<compile_context>
chip_gen: v5e
topology: v5e:2x2
jax: 0.10.0
libtpu: 0.0.40
codegen_flags: <defaults>
</compile_context>

<pallas_src>
import jax
import jax.numpy as jnp
from jax.experimental import pallas as pl
from jax.experimental.pallas import tpu as pltpu


# ---------------------------------------------------------------------------
# Static layout constants
# ---------------------------------------------------------------------------
ROW_W = 32                     # spatial grid width (flat row index r = y*32 + x)
H1_ROWS = 960                  # conv1 rows kept in VMEM (28*32 + 2*32)
C2_ROWS = 896                  # 28*32 conv2 output rows
M1_ROWS = C2_ROWS - ROW_W      # 864 rows after vertical pair max
REAL_TAPS = 18                 # conv1 input taps: 3 ky x 6 horizontal offsets
N_TAPS = 32                    # taps padded to a 16-multiple lane count
IMG_FLAT = 1032                # padded flat image length (needs >= 1029)
PPACK_ROWS = 104               # 98 packed pooled rows (2 px / row), 8-padded
FC_K = PPACK_ROWS * 128        # 13312 fc1 input features (12544 real + pad)
FC_TK = FC_K // 2              # 6656 -> 2 pipelined K steps


# ---------------------------------------------------------------------------
# Pallas kernels
# ---------------------------------------------------------------------------
def _fused_conv_kernel(x_ref, w1_ref, b1_ref, w2_ref, b2_ref, se_ref, so_ref,
                       o_ref, h1_ref):
    """conv1 + ReLU + conv2 + ReLU + 2x2 max-pool, fully fused per image.

    x_ref : (1, 960, 32) bf16   row i = flat image row, lane = conv1 tap
    w1_ref: (32, 128)    bf16   conv1 weights replicated at 4 kx shifts
    b1_ref: (1, 128)     f32    conv1 bias tiled x4
    w2_ref: (3, 128, 128) bf16  per-ky conv2 weight; out lanes 0:64 -> row r,
                                lanes 64:128 -> row r+1 (horizontal neighbour)
    b2_ref: (1, 128)     f32    conv2 bias tiled x2
    se/so : (104, 864)   bf16   0/1 gather of even / odd pooled pixels
    o_ref : (1, 104, 128) bf16  pooled activations, 2 pooled pixels per row
    h1_ref: (960, 128)   bf16   VMEM scratch: kx-widened conv1 activation
    """
    # conv1 + ReLU, kx-widened: h1[i, kx*32 + c] = relu(conv1)[flat i+kx, c]
    h1 = jnp.dot(x_ref[0], w1_ref[...], preferred_element_type=jnp.float32)
    h1_ref[...] = jnp.maximum(h1 + b1_ref[...], 0.0).astype(h1_ref.dtype)

    # conv2 + bias + ReLU: 3 accumulated matmuls over ky, aligned row slices,
    # accumulator initialized by the first matmul (no zero-fill).
    acc = jnp.dot(h1_ref[0:C2_ROWS, :], w2_ref[0],
                  preferred_element_type=jnp.float32)
    acc = acc + jnp.dot(h1_ref[ROW_W:ROW_W + C2_ROWS, :], w2_ref[1],
                        preferred_element_type=jnp.float32)
    acc = acc + jnp.dot(h1_ref[2 * ROW_W:2 * ROW_W + C2_ROWS, :], w2_ref[2],
                        preferred_element_type=jnp.float32)
    y = jnp.maximum(acc + b2_ref[...], 0.0)                     # (896, 128) f32

    # 2x2 max-pool: vertical pair max (rows r, r+32), horizontal pair max via
    # a 64-lane rotate (lane halves hold the r / r+1 conv2 outputs), then two
    # half-height 0/1 selection matmuls gather the valid pooled pixels.
    # Note: rows with x>=28 / bottom padding hold wrap-around garbage; se/so
    # never select those rows, and the r+1 lane half is only used at x<=26.
    m1 = jnp.maximum(y[0:M1_ROWS, :], y[ROW_W:ROW_W + M1_ROWS, :])
    m2 = jnp.maximum(m1, pltpu.roll(m1, 64, axis=1)).astype(jnp.bfloat16)
    pe = jnp.dot(se_ref[...], m2, preferred_element_type=jnp.float32)
    po = jnp.dot(so_ref[...], m2, preferred_element_type=jnp.float32)
    lane = jax.lax.broadcasted_iota(jnp.int32, pe.shape, 1)
    # lanes 0:64 <- even pooled pixel channels, 64:128 <- odd pooled pixel.
    o_ref[0] = jnp.where(lane < 64, pe, po).astype(o_ref.dtype)


def _fc_fused_kernel(x_ref, w1_ref, b1_ref, w2_ref, b2_ref, o_ref, acc_ref):
    """fc1 (K-tiled, accumulated) + ReLU + fc2 + masked log_softmax."""
    k = pl.program_id(0)

    @pl.when(k == 0)
    def _():
        acc_ref[...] = jnp.zeros_like(acc_ref)

    acc_ref[...] += jnp.dot(x_ref[...], w1_ref[...],
                            preferred_element_type=jnp.float32)

    @pl.when(k == pl.num_programs(0) - 1)
    def _():
        h = jnp.maximum(acc_ref[...] + b1_ref[...], 0.0)        # (MP, 128) f32
        logits = jnp.dot(h.astype(jnp.bfloat16), w2_ref[...],
                         preferred_element_type=jnp.float32) + b2_ref[...]
        lane = jax.lax.broadcasted_iota(jnp.int32, logits.shape, 1)
        logits = jnp.where(lane < 10, logits, -1e30)            # mask pad classes
        m = jnp.max(logits, axis=-1, keepdims=True)
        s = logits - m
        lse = jnp.log(jnp.sum(jnp.exp(s), axis=-1, keepdims=True))
        o_ref[...] = (s - lse).astype(o_ref.dtype)


# ---------------------------------------------------------------------------
# Pallas wrappers
# ---------------------------------------------------------------------------
def fused_conv_pallas(xw, w1, b1, w2, b2, se, so):
    B = xw.shape[0]
    return pl.pallas_call(
        _fused_conv_kernel,
        out_shape=jax.ShapeDtypeStruct((B, PPACK_ROWS, 128), jnp.bfloat16),
        grid=(B,),
        in_specs=[
            pl.BlockSpec((1, H1_ROWS, N_TAPS), lambda b: (b, 0, 0)),
            pl.BlockSpec((N_TAPS, 128), lambda b: (0, 0)),
            pl.BlockSpec((1, 128), lambda b: (0, 0)),
            pl.BlockSpec((3, 128, 128), lambda b: (0, 0, 0)),
            pl.BlockSpec((1, 128), lambda b: (0, 0)),
            pl.BlockSpec((PPACK_ROWS, M1_ROWS), lambda b: (0, 0)),
            pl.BlockSpec((PPACK_ROWS, M1_ROWS), lambda b: (0, 0)),
        ],
        out_specs=pl.BlockSpec((1, PPACK_ROWS, 128), lambda b: (b, 0, 0)),
        scratch_shapes=[pltpu.VMEM((H1_ROWS, 128), jnp.bfloat16)],
        compiler_params=pltpu.CompilerParams(dimension_semantics=("parallel",)),
    )(xw, w1, b1, w2, b2, se, so)


def fc_fused_pallas(xf, w1p, b1, w2p, b2):
    MP, K = xf.shape
    nk = K // FC_TK
    return pl.pallas_call(
        _fc_fused_kernel,
        out_shape=jax.ShapeDtypeStruct((MP, 128), jnp.float32),
        grid=(nk,),
        in_specs=[
            pl.BlockSpec((MP, FC_TK), lambda k: (0, k)),
            pl.BlockSpec((FC_TK, 128), lambda k: (k, 0)),
            pl.BlockSpec((1, 128), lambda k: (0, 0)),
            pl.BlockSpec((128, 128), lambda k: (0, 0)),
            pl.BlockSpec((1, 128), lambda k: (0, 0)),
        ],
        out_specs=pl.BlockSpec((MP, 128), lambda k: (0, 0)),
        scratch_shapes=[pltpu.VMEM((MP, 128), jnp.float32)],
        compiler_params=pltpu.CompilerParams(dimension_semantics=("arbitrary",)),
    )(xf, w1p, b1, w2p, b2)


# ---------------------------------------------------------------------------
# One-time parameter repacking (PyTorch layout -> kernel layout)
# ---------------------------------------------------------------------------
def prepare_params(p):
    bf16, f32 = jnp.bfloat16, jnp.float32

    # conv1 (32,1,3,3) -> (32,128): W1[ky*6 + kx1 + kx, kx*32 + cout]
    # = conv1_w[cout, 0, ky, kx1]; output lane block kx gives conv1 shifted
    # horizontally by kx (kx = 0..3), so conv2 / pool need no unaligned reads.
    w1 = p["conv1_w"].astype(f32)
    W1 = jnp.zeros((N_TAPS, 128), f32)
    for kx in range(4):
        for ky in range(3):
            for kx1 in range(3):
                W1 = W1.at[ky * 6 + kx1 + kx,
                           kx * 32:(kx + 1) * 32].set(w1[:, 0, ky, kx1])
    b1 = jnp.tile(p["conv1_b"].astype(f32), 4).reshape(1, 128)

    # conv2 (64,32,3,3) -> (3,128,128): K lane = kx*32 + cin; output lanes
    # 0:64 -> conv2(row r), lanes 64:128 -> conv2(row r+1) (uses kx shifts 1..3).
    w2 = p["conv2_w"].astype(f32)
    W2 = jnp.zeros((3, 128, 128), f32)
    for ky in range(3):
        for kx in range(3):
            blk = w2[:, :, ky, kx].T                       # (32 cin, 64 cout)
            W2 = W2.at[ky, kx * 32:(kx + 1) * 32, 0:64].set(blk)
            W2 = W2.at[ky, (kx + 1) * 32:(kx + 2) * 32, 64:128].set(blk)
    b2 = jnp.tile(p["conv2_b"].astype(f32), 2).reshape(1, 128)

    # Pool gather matrices: pooled pixel i = p*14+q lives at m2 row 64p + 2q.
    t = jnp.arange(PPACK_ROWS)
    j = jnp.arange(M1_ROWS)[None, :]

    def sel(pix):
        row = 64 * (pix // 14) + 2 * (pix % 14)
        return ((j == row[:, None]) & (pix < 196)[:, None]).astype(bf16)

    se = sel(2 * t)          # even pooled pixel of packed row t
    so = sel(2 * t + 1)      # odd pooled pixel of packed row t

    # fc1 (128, 12544), PyTorch (c,p,q) flatten -> (13312, 128) matching the
    # packed pooled layout: k = t*128 + half*64 + c, pixel = 2t + half.
    fw1 = p["fc1_w"].reshape(128, 64, 14, 14)              # (n, c, p, q)
    fw1 = jnp.transpose(fw1, (2, 3, 1, 0))                 # (p, q, c, n)
    fw1 = fw1.reshape(98, 2, 64, 128)
    fw1 = jnp.pad(fw1, ((0, PPACK_ROWS - 98), (0, 0), (0, 0), (0, 0)))
    fw1 = fw1.reshape(FC_K, 128).astype(bf16)

    # fc2 (10, 128) -> (128, 128) pre-transposed, N padded to 128 lanes.
    fw2 = jnp.pad(p["fc2_w"].T, ((0, 0), (0, 118))).astype(bf16)

    return {
        "conv_w1": W1.astype(bf16), "conv_b1": b1,
        "conv_w2": W2.astype(bf16), "conv_b2": b2,
        "pool_se": se, "pool_so": so,
        "fc1_w": fw1, "fc1_b": p["fc1_b"].reshape(1, 128).astype(f32),
        "fc2_w": fw2,
        "fc2_b": jnp.pad(p["fc2_b"], (0, 118)).reshape(1, 128).astype(f32),
    }


# ---------------------------------------------------------------------------
# Forward pass
# ---------------------------------------------------------------------------
def mnist_base_net_forward(x, prep):
    """x: (B, 1, 32, 32) f32 NCHW -> (B, 10) f32 log-probabilities."""
    B = x.shape[0]

    # Flatten the single-channel image (row r = y*32 + x) and build the 18
    # conv1 taps (3 ky x 6 horizontal offsets) as lanes; pad lanes to 32.
    img = jnp.pad(x.reshape(B, ROW_W * ROW_W),
                  ((0, 0), (0, IMG_FLAT - ROW_W * ROW_W)))
    taps = [img[:, ky * ROW_W + h: ky * ROW_W + h + H1_ROWS]
            for ky in range(3) for h in range(6)]
    xw = jnp.stack(taps, axis=-1)                            # (B, 960, 18)
    xw = jnp.pad(xw, ((0, 0), (0, 0), (0, N_TAPS - REAL_TAPS)))
    xw = xw.astype(jnp.bfloat16)

    # TODO(synk): dropout1 is identity (inference semantics).
    pooled = fused_conv_pallas(xw, prep["conv_w1"], prep["conv_b1"],
                               prep["conv_w2"], prep["conv_b2"],
                               prep["pool_se"], prep["pool_so"])  # (B,104,128)

    xf = pooled.reshape(B, FC_K)                             # contiguous reshape
    mp = max(8, ((B + 7) // 8) * 8)                          # pad M to >= 8 rows
    xf = jnp.pad(xf, ((0, mp - B), (0, 0)))

    # TODO(synk): dropout2 is identity (inference semantics).
    logp = fc_fused_pallas(xf, prep["fc1_w"], prep["fc1_b"],
                           prep["fc2_w"], prep["fc2_b"])     # (mp, 128)
    return logp[:B, :10]


# ---------------------------------------------------------------------------
# PyTorch-layout params + pure-JAX f32 reference (for validation)
# ---------------------------------------------------------------------------
def init_params(key):
    ks = jax.random.split(key, 8)
    s = 0.05
    return {
        "conv1_w": jax.random.normal(ks[0], (32, 1, 3, 3), jnp.float32) * s,
        "conv1_b": jax.random.normal(ks[1], (32,), jnp.float32) * s,
        "conv2_w": jax.random.normal(ks[2], (64, 32, 3, 3), jnp.float32) * s,
        "conv2_b": jax.random.normal(ks[3], (64,), jnp.float32) * s,
        "fc1_w": jax.random.normal(ks[4], (128, 12544), jnp.float32) * s,
        "fc1_b": jax.random.normal(ks[5], (128,), jnp.float32) * s,
        "fc2_w": jax.random.normal(ks[6], (10, 128), jnp.float32) * s,
        "fc2_b": jax.random.normal(ks[7], (10,), jnp.float32) * s,
    }


def reference_forward(x, p):
    hi = jax.lax.Precision.HIGHEST
    y = jax.lax.conv_general_dilated(x, p["conv1_w"], (1, 1), "VALID",
                                     dimension_numbers=("NCHW", "OIHW", "NCHW"),
                                     precision=hi)
    y = jax.nn.relu(y + p["conv1_b"][None, :, None, None])
    y = jax.lax.conv_general_dilated(y, p["conv2_w"], (1, 1), "VALID",
                                     dimension_numbers=("NCHW", "OIHW", "NCHW"),
                                     precision=hi)
    y = jax.nn.relu(y + p["conv2_b"][None, :, None, None])
    y = jax.lax.reduce_window(y, -jnp.inf, jax.lax.max,
                              (1, 1, 2, 2), (1, 1, 2, 2), "VALID")
    y = y.reshape(y.shape[0], -1)
    y = jax.nn.relu(jnp.dot(y, p["fc1_w"].T, precision=hi) + p["fc1_b"])
    y = jnp.dot(y, p["fc2_w"].T, precision=hi) + p["fc2_b"]
    return jax.nn.log_softmax(y, axis=-1)


# ---------------------------------------------------------------------------
if __name__ == "__main__":
    key = jax.random.PRNGKey(0)
    k_params, k_x = jax.random.split(key)
    params = init_params(k_params)
    prep = prepare_params(params)

    # fc1's 12544-feature input forces a 32x32 single-channel image.
    x = jax.random.normal(k_x, (2, 1, 32, 32), jnp.float32)

    fwd = jax.jit(mnist_base_net_forward)
    out = jax.block_until_ready(fwd(x, prep))

    assert out.shape == (2, 10)
    # log_softmax rows sum (in prob space) to ~1
    assert bool(jnp.all(jnp.abs(jnp.sum(jnp.exp(out), axis=1) - 1.0) < 1e-3))
    # matches the f32 reference up to bf16 rounding
    ref = reference_forward(x, params)
    max_err = float(jnp.max(jnp.abs(out - ref)))
    assert max_err < 5e-2, f"mismatch vs reference: {max_err}"

    print("KERNEL_OK")
</pallas_src>

<mosaic_0001>
module attributes {stable_mosaic.version = 11 : i64} {
  func.func @_fused_conv_kernel(%arg0: i32, %arg1: memref<1x960x32xbf16, #tpu.memory_space<vmem>>, %arg2: memref<32x128xbf16, #tpu.memory_space<vmem>>, %arg3: memref<1x128xf32, #tpu.memory_space<vmem>>, %arg4: memref<3x128x128xbf16, #tpu.memory_space<vmem>>, %arg5: memref<1x128xf32, #tpu.memory_space<vmem>>, %arg6: memref<104x864xbf16, #tpu.memory_space<vmem>>, %arg7: memref<104x864xbf16, #tpu.memory_space<vmem>>, %arg8: memref<1x104x128xbf16, #tpu.memory_space<vmem>>, %arg9: memref<960x128xbf16, #tpu.memory_space<vmem>>) attributes {dimension_semantics = [#tpu.dimension_semantics<parallel>], iteration_bounds = array<i64: 2>, scalar_prefetch = 0 : i64, scratch_operands = 1 : i64, tpu.core_type = #tpu.core_type<tc>, window_params = [{transform_indices = @transform_0, window_bounds = array<i64: 1, 960, 32>}, {pipeline_mode = #tpu.pipeline_mode<synchronous>, transform_indices = @transform_1, window_bounds = array<i64: 32, 128>}, {pipeline_mode = #tpu.pipeline_mode<synchronous>, transform_indices = @transform_2, window_bounds = array<i64: 1, 128>}, {pipeline_mode = #tpu.pipeline_mode<synchronous>, transform_indices = @transform_3, window_bounds = array<i64: 3, 128, 128>}, {pipeline_mode = #tpu.pipeline_mode<synchronous>, transform_indices = @transform_4, window_bounds = array<i64: 1, 128>}, {pipeline_mode = #tpu.pipeline_mode<synchronous>, transform_indices = @transform_5, window_bounds = array<i64: 104, 864>}, {pipeline_mode = #tpu.pipeline_mode<synchronous>, transform_indices = @transform_6, window_bounds = array<i64: 104, 864>}, {transform_indices = @transform_7, window_bounds = array<i64: 1, 104, 128>}]} {
    %c0 = arith.constant 0 : index
    %c0_0 = arith.constant 0 : index
    %c0_1 = arith.constant 0 : index
    %0 = vector.load %arg1[%c0, %c0_0, %c0_1] : memref<1x960x32xbf16, #tpu.memory_space<vmem>>, vector<1x960x32xbf16>
    %1 = vector.shape_cast %0 : vector<1x960x32xbf16> to vector<960x32xbf16>
    %c0_2 = arith.constant 0 : index
    %c0_3 = arith.constant 0 : index
    %2 = vector.load %arg2[%c0_2, %c0_3] : memref<32x128xbf16, #tpu.memory_space<vmem>>, vector<32x128xbf16>
    %cst = arith.constant dense<0.000000e+00> : vector<960x128xf32>
    %3 = tpu.matmul %1, %2, %cst {dimension_numbers = #tpu.dot_dimension_numbers<[1], [0], [0], [1], [0, 0, 1, 1], [], []>} : vector<960x32xbf16>, vector<32x128xbf16>, vector<960x128xf32> -> vector<960x128xf32>
    %c0_4 = arith.constant 0 : index
    %c0_5 = arith.constant 0 : index
    %4 = vector.load %arg3[%c0_4, %c0_5] : memref<1x128xf32, #tpu.memory_space<vmem>>, vector<1x128xf32>
    %5 = vector.broadcast %4 : vector<1x128xf32> to vector<960x128xf32>
    %6 = arith.addf %3, %5 : vector<960x128xf32>
    %cst_6 = arith.constant 0.000000e+00 : f32
    %7 = vector.broadcast %cst_6 : f32 to vector<960x128xf32>
    %8 = arith.maximumf %6, %7 : vector<960x128xf32>
    %9 = arith.truncf %8 : vector<960x128xf32> to vector<960x128xbf16>
    %c0_7 = arith.constant 0 : index
    %c0_8 = arith.constant 0 : index
    %10 = vector.load %arg9[%c0_7, %c0_8] : memref<960x128xbf16, #tpu.memory_space<vmem>>, vector<960x128xbf16>
    tpu.vector_store %arg9[%c0_7, %c0_8], %9 {strides = array<i32>} : memref<960x128xbf16, #tpu.memory_space<vmem>>, vector<960x128xbf16>,
    %c0_9 = arith.constant 0 : index
    %c0_10 = arith.constant 0 : index
    %11 = vector.load %arg9[%c0_9, %c0_10] : memref<960x128xbf16, #tpu.memory_space<vmem>>, vector<896x128xbf16>
    %c0_11 = arith.constant 0 : index
    %c0_12 = arith.constant 0 : index
    %c0_13 = arith.constant 0 : index
    %12 = vector.load %arg4[%c0_11, %c0_12, %c0_13] : memref<3x128x128xbf16, #tpu.memory_space<vmem>>, vector<1x128x128xbf16>
    %13 = vector.shape_cast %12 : vector<1x128x128xbf16> to vector<128x128xbf16>
    %cst_14 = arith.constant dense<0.000000e+00> : vector<896x128xf32>
    %14 = tpu.matmul %11, %13, %cst_14 {dimension_numbers = #tpu.dot_dimension_numbers<[1], [0], [0], [1], [0, 0, 1, 1], [], []>} : vector<896x128xbf16>, vector<128x128xbf16>, vector<896x128xf32> -> vector<896x128xf32>
    %c32 = arith.constant 32 : index
    %c0_15 = arith.constant 0 : index
    %15 = vector.load %arg9[%c32, %c0_15] : memref<960x128xbf16, #tpu.memory_space<vmem>>, vector<896x128xbf16>
    %c1 = arith.constant 1 : index
    %c0_16 = arith.constant 0 : index
    %c0_17 = arith.constant 0 : index
    %16 = vector.load %arg4[%c1, %c0_16, %c0_17] : memref<3x128x128xbf16, #tpu.memory_space<vmem>>, vector<1x128x128xbf16>
    %17 = vector.shape_cast %16 : vector<1x128x128xbf16> to vector<128x128xbf16>
    %cst_18 = arith.constant dense<0.000000e+00> : vector<896x128xf32>
    %18 = tpu.matmul %15, %17, %cst_18 {dimension_numbers = #tpu.dot_dimension_numbers<[1], [0], [0], [1], [0, 0, 1, 1], [], []>} : vector<896x128xbf16>, vector<128x128xbf16>, vector<896x128xf32> -> vector<896x128xf32>
    %19 = arith.addf %14, %18 : vector<896x128xf32>
    %c64 = arith.constant 64 : index
    %c0_19 = arith.constant 0 : index
    %20 = vector.load %arg9[%c64, %c0_19] : memref<960x128xbf16, #tpu.memory_space<vmem>>, vector<896x128xbf16>
    %c2 = arith.constant 2 : index
    %c0_20 = arith.constant 0 : index
    %c0_21 = arith.constant 0 : index
    %21 = vector.load %arg4[%c2, %c0_20, %c0_21] : memref<3x128x128xbf16, #tpu.memory_space<vmem>>, vector<1x128x128xbf16>
    %22 = vector.shape_cast %21 : vector<1x128x128xbf16> to vector<128x128xbf16>
    %cst_22 = arith.constant dense<0.000000e+00> : vector<896x128xf32>
    %23 = tpu.matmul %20, %22, %cst_22 {dimension_numbers = #tpu.dot_dimension_numbers<[1], [0], [0], [1], [0, 0, 1, 1], [], []>} : vector<896x128xbf16>, vector<128x128xbf16>, vector<896x128xf32> -> vector<896x128xf32>
    %24 = arith.addf %19, %23 : vector<896x128xf32>
    %c0_23 = arith.constant 0 : index
    %c0_24 = arith.constant 0 : index
    %25 = vector.load %arg5[%c0_23, %c0_24] : memref<1x128xf32, #tpu.memory_space<vmem>>, vector<1x128xf32>
    %26 = vector.broadcast %25 : vector<1x128xf32> to vector<896x128xf32>
    %27 = arith.addf %24, %26 : vector<896x128xf32>
    %cst_25 = arith.constant 0.000000e+00 : f32
    %28 = vector.broadcast %cst_25 : f32 to vector<896x128xf32>
    %29 = arith.maximumf %27, %28 : vector<896x128xf32>
    %30 = vector.extract_strided_slice %29 {offsets = [0, 0], sizes = [864, 128], strides = [1, 1]} : vector<896x128xf32> to vector<864x128xf32>
    %31 = vector.extract_strided_slice %29 {offsets = [32, 0], sizes = [864, 128], strides = [1, 1]} : vector<896x128xf32> to vector<864x128xf32>
    %32 = arith.maximumf %30, %31 : vector<864x128xf32>
    %c64_i32 = arith.constant 64 : i32
    %33 = tpu.dynamic_rotate %32 by %c64_i32 dim 1 : vector<864x128xf32>, i32 -> vector<864x128xf32>
    %34 = arith.maximumf %32, %33 : vector<864x128xf32>
    %35 = arith.truncf %34 : vector<864x128xf32> to vector<864x128xbf16>
    %c0_26 = arith.constant 0 : index
    %c0_27 = arith.constant 0 : index
    %36 = vector.load %arg6[%c0_26, %c0_27] : memref<104x864xbf16, #tpu.memory_space<vmem>>, vector<104x864xbf16>
    %cst_28 = arith.constant dense<0.000000e+00> : vector<104x128xf32>
    %37 = tpu.matmul %36, %35, %cst_28 {dimension_numbers = #tpu.dot_dimension_numbers<[1], [0], [0], [1], [0, 0, 1, 1], [], []>} : vector<104x864xbf16>, vector<864x128xbf16>, vector<104x128xf32> -> vector<104x128xf32>
    %c0_29 = arith.constant 0 : index
    %c0_30 = arith.constant 0 : index
    %38 = vector.load %arg7[%c0_29, %c0_30] : memref<104x864xbf16, #tpu.memory_space<vmem>>, vector<104x864xbf16>
    %cst_31 = arith.constant dense<0.000000e+00> : vector<104x128xf32>
    %39 = tpu.matmul %38, %35, %cst_31 {dimension_numbers = #tpu.dot_dimension_numbers<[1], [0], [0], [1], [0, 0, 1, 1], [], []>} : vector<104x864xbf16>, vector<864x128xbf16>, vector<104x128xf32> -> vector<104x128xf32>
    %40 = tpu.iota {dimensions = array<i32: 1>} : vector<104x128xi32>
    %c64_i32_32 = arith.constant 64 : i32
    %41 = vector.broadcast %c64_i32_32 : i32 to vector<104x128xi32>
    %42 = arith.cmpi slt, %40, %41 : vector<104x128xi32>
    %43 = arith.select %42, %37, %39 : vector<104x128xi1>, vector<104x128xf32>
    %44 = arith.truncf %43 : vector<104x128xf32> to vector<104x128xbf16>
    %c0_33 = arith.constant 0 : index
    %c0_34 = arith.constant 0 : index
    %c0_35 = arith.constant 0 : index
    %45 = vector.load %arg8[%c0_33, %c0_34, %c0_35] : memref<1x104x128xbf16, #tpu.memory_space<vmem>>, vector<1x104x128xbf16>
    %46 = vector.shape_cast %45 : vector<1x104x128xbf16> to vector<104x128xbf16>
    %47 = vector.shape_cast %44 : vector<104x128xbf16> to vector<1x104x128xbf16>
    tpu.vector_store %arg8[%c0_33, %c0_34, %c0_35], %47 {strides = array<i32>} : memref<1x104x128xbf16, #tpu.memory_space<vmem>>, vector<1x104x128xbf16>,
    return
  }
  func.func @transform_0(%arg0: i32) -> (i32, i32, i32) {
    %c0_i32 = arith.constant 0 : i32
    %c0_i32_0 = arith.constant 0 : i32
    %c0_i32_1 = arith.constant 0 : i32
    return %arg0, %c0_i32, %c0_i32_0 : i32, i32, i32
  }
  func.func @transform_1(%arg0: i32) -> (i32, i32) {
    %c0_i32 = arith.constant 0 : i32
    %c0_i32_0 = arith.constant 0 : i32
    %c0_i32_1 = arith.constant 0 : i32
    return %c0_i32, %c0_i32_0 : i32, i32
  }
  func.func @transform_2(%arg0: i32) -> (i32, i32) {
    %c0_i32 = arith.constant 0 : i32
    %c0_i32_0 = arith.constant 0 : i32
    %c0_i32_1 = arith.constant 0 : i32
    return %c0_i32, %c0_i32_0 : i32, i32
  }
  func.func @transform_3(%arg0: i32) -> (i32, i32, i32) {
    %c0_i32 = arith.constant 0 : i32
    %c0_i32_0 = arith.constant 0 : i32
    %c0_i32_1 = arith.constant 0 : i32
    %c0_i32_2 = arith.constant 0 : i32
    return %c0_i32, %c0_i32_0, %c0_i32_1 : i32, i32, i32
  }
  func.func @transform_4(%arg0: i32) -> (i32, i32) {
    %c0_i32 = arith.constant 0 : i32
    %c0_i32_0 = arith.constant 0 : i32
    %c0_i32_1 = arith.constant 0 : i32
    return %c0_i32, %c0_i32_0 : i32, i32
  }
  func.func @transform_5(%arg0: i32) -> (i32, i32) {
    %c0_i32 = arith.constant 0 : i32
    %c0_i32_0 = arith.constant 0 : i32
    %c0_i32_1 = arith.constant 0 : i32
    return %c0_i32, %c0_i32_0 : i32, i32
  }
  func.func @transform_6(%arg0: i32) -> (i32, i32) {
    %c0_i32 = arith.constant 0 : i32
    %c0_i32_0 = arith.constant 0 : i32
    %c0_i32_1 = arith.constant 0 : i32
    return %c0_i32, %c0_i32_0 : i32, i32
  }
  func.func @transform_7(%arg0: i32) -> (i32, i32, i32) {
    %c0_i32 = arith.constant 0 : i32
    %c0_i32_0 = arith.constant 0 : i32
    %c0_i32_1 = arith.constant 0 : i32
    return %arg0, %c0_i32, %c0_i32_0 : i32, i32, i32
  }
}

module attributes {stable_mosaic.version = 11 : i64} {
  func.func @_fc_fused_kernel(%arg0: i32, %arg1: memref<8x6656xbf16, #tpu.memory_space<vmem>>, %arg2: memref<6656x128xbf16, #tpu.memory_space<vmem>>, %arg3: memref<1x128xf32, #tpu.memory_space<vmem>>, %arg4: memref<128x128xbf16, #tpu.memory_space<vmem>>, %arg5: memref<1x128xf32, #tpu.memory_space<vmem>>, %arg6: memref<8x128xf32, #tpu.memory_space<vmem>>, %arg7: memref<8x128xf32, #tpu.memory_space<vmem>>) attributes {dimension_semantics = [#tpu.dimension_semantics<arbitrary>], iteration_bounds = array<i64: 2>, scalar_prefetch = 0 : i64, scratch_operands = 1 : i64, tpu.core_type = #tpu.core_type<tc>, window_params = [{transform_indices = @transform_0, window_bounds = array<i64: 8, 6656>}, {transform_indices = @transform_1, window_bounds = array<i64: 6656, 128>}, {pipeline_mode = #tpu.pipeline_mode<synchronous>, transform_indices = @transform_2, window_bounds = array<i64: 1, 128>}, {pipeline_mode = #tpu.pipeline_mode<synchronous>, transform_indices = @transform_3, window_bounds = array<i64: 128, 128>}, {pipeline_mode = #tpu.pipeline_mode<synchronous>, transform_indices = @transform_4, window_bounds = array<i64: 1, 128>}, {pipeline_mode = #tpu.pipeline_mode<synchronous>, transform_indices = @transform_5, window_bounds = array<i64: 8, 128>}]} {
    %c0_i32 = arith.constant 0 : i32
    %0 = arith.cmpi eq, %arg0, %c0_i32 : i32
    %1 = arith.extui %0 : i1 to i32
    %c0_i32_0 = arith.constant 0 : i32
    %2 = arith.cmpi ne, %1, %c0_i32_0 : i32
    scf.if %2 {
      %cst_9 = arith.constant 0.000000e+00 : f32
      %12 = vector.broadcast %cst_9 : f32 to vector<8x128xf32>
      %c0_10 = arith.constant 0 : index
      %c0_11 = arith.constant 0 : index
      %13 = vector.load %arg7[%c0_10, %c0_11] : memref<8x128xf32, #tpu.memory_space<vmem>>, vector<8x128xf32>
      tpu.vector_store %arg7[%c0_10, %c0_11], %12 {strides = array<i32>} : memref<8x128xf32, #tpu.memory_space<vmem>>, vector<8x128xf32>,
    } else {
    }
    %c0 = arith.constant 0 : index
    %c0_1 = arith.constant 0 : index
    %3 = vector.load %arg7[%c0, %c0_1] : memref<8x128xf32, #tpu.memory_space<vmem>>, vector<8x128xf32>
    %c0_2 = arith.constant 0 : index
    %c0_3 = arith.constant 0 : index
    %4 = vector.load %arg1[%c0_2, %c0_3] : memref<8x6656xbf16, #tpu.memory_space<vmem>>, vector<8x6656xbf16>
    %c0_4 = arith.constant 0 : index
    %c0_5 = arith.constant 0 : index
    %5 = vector.load %arg2[%c0_4, %c0_5] : memref<6656x128xbf16, #tpu.memory_space<vmem>>, vector<6656x128xbf16>
    %cst = arith.constant dense<0.000000e+00> : vector<8x128xf32>
    %6 = tpu.matmul %4, %5, %cst {dimension_numbers = #tpu.dot_dimension_numbers<[1], [0], [0], [1], [0, 0, 1, 1], [], []>} : vector<8x6656xbf16>, vector<6656x128xbf16>, vector<8x128xf32> -> vector<8x128xf32>
    %7 = arith.addf %3, %6 : vector<8x128xf32>
    %c0_6 = arith.constant 0 : index
    %c0_7 = arith.constant 0 : index
    %8 = vector.load %arg7[%c0_6, %c0_7] : memref<8x128xf32, #tpu.memory_space<vmem>>, vector<8x128xf32>
    tpu.vector_store %arg7[%c0_6, %c0_7], %7 {strides = array<i32>} : memref<8x128xf32, #tpu.memory_space<vmem>>, vector<8x128xf32>,
    %c1_i32 = arith.constant 1 : i32
    %9 = arith.cmpi eq, %arg0, %c1_i32 : i32
    %10 = arith.extui %9 : i1 to i32
    %c0_i32_8 = arith.constant 0 : i32
    %11 = arith.cmpi ne, %10, %c0_i32_8 : i32
    scf.if %11 {
      %c0_9 = arith.constant 0 : index
      %c0_10 = arith.constant 0 : index
      %12 = vector.load %arg7[%c0_9, %c0_10] : memref<8x128xf32, #tpu.memory_space<vmem>>, vector<8x128xf32>
      %c0_11 = arith.constant 0 : index
      %c0_12 = arith.constant 0 : index
      %13 = vector.load %arg3[%c0_11, %c0_12] : memref<1x128xf32, #tpu.memory_space<vmem>>, vector<1x128xf32>
      %14 = vector.broadcast %13 : vector<1x128xf32> to vector<8x128xf32>
      %15 = arith.addf %12, %14 : vector<8x128xf32>
      %cst_13 = arith.constant 0.000000e+00 : f32
      %16 = vector.broadcast %cst_13 : f32 to vector<8x128xf32>
      %17 = arith.maximumf %15, %16 : vector<8x128xf32>
      %18 = arith.truncf %17 : vector<8x128xf32> to vector<8x128xbf16>
      %c0_14 = arith.constant 0 : index
      %c0_15 = arith.constant 0 : index
      %19 = vector.load %arg4[%c0_14, %c0_15] : memref<128x128xbf16, #tpu.memory_space<vmem>>, vector<128x128xbf16>
      %cst_16 = arith.constant dense<0.000000e+00> : vector<8x128xf32>
      %20 = tpu.matmul %18, %19, %cst_16 {dimension_numbers = #tpu.dot_dimension_numbers<[1], [0], [0], [1], [0, 0, 1, 1], [], []>} : vector<8x128xbf16>, vector<128x128xbf16>, vector<8x128xf32> -> vector<8x128xf32>
      %c0_17 = arith.constant 0 : index
      %c0_18 = arith.constant 0 : index
      %21 = vector.load %arg5[%c0_17, %c0_18] : memref<1x128xf32, #tpu.memory_space<vmem>>, vector<1x128xf32>
      %22 = vector.broadcast %21 : vector<1x128xf32> to vector<8x128xf32>
      %23 = arith.addf %20, %22 : vector<8x128xf32>
      %24 = tpu.iota {dimensions = array<i32: 1>} : vector<8x128xi32>
      %c10_i32 = arith.constant 10 : i32
      %25 = vector.broadcast %c10_i32 : i32 to vector<8x128xi32>
      %26 = arith.cmpi slt, %24, %25 : vector<8x128xi32>
      %cst_19 = arith.constant -1.000000e+30 : f32
      %27 = vector.broadcast %cst_19 : f32 to vector<8x128xf32>
      %28 = arith.select %26, %23, %27 : vector<8x128xi1>, vector<8x128xf32>
      %cst_20 = arith.constant dense<0xFF800000> : vector<8xf32>
      %29 = vector.multi_reduction <maximumf>, %28, %cst_20 [1] : vector<8x128xf32> to vector<8xf32>
      %30 = vector.shape_cast %29 : vector<8xf32> to vector<8x1xf32>
      %31 = vector.broadcast %30 : vector<8x1xf32> to vector<8x128xf32>
      %32 = arith.subf %28, %31 : vector<8x128xf32>
      %33 = math.exp %32 : vector<8x128xf32>
      %cst_21 = arith.constant dense<0.000000e+00> : vector<8xf32>
      %34 = vector.multi_reduction <add>, %33, %cst_21 [1] : vector<8x128xf32> to vector<8xf32>
      %35 = vector.shape_cast %34 : vector<8xf32> to vector<8x1xf32>
      %36 = math.log %35 : vector<8x1xf32>
      %37 = vector.broadcast %36 : vector<8x1xf32> to vector<8x128xf32>
      %38 = arith.subf %32, %37 : vector<8x128xf32>
      %c0_22 = arith.constant 0 : index
      %c0_23 = arith.constant 0 : index
      %39 = vector.load %arg6[%c0_22, %c0_23] : memref<8x128xf32, #tpu.memory_space<vmem>>, vector<8x128xf32>
      tpu.vector_store %arg6[%c0_22, %c0_23], %38 {strides = array<i32>} : memref<8x128xf32, #tpu.memory_space<vmem>>, vector<8x128xf32>,
    } else {
    }
    return
  }
  func.func @transform_0(%arg0: i32) -> (i32, i32) {
    %c0_i32 = arith.constant 0 : i32
    %c0_i32_0 = arith.constant 0 : i32
    return %c0_i32, %arg0 : i32, i32
  }
  func.func @transform_1(%arg0: i32) -> (i32, i32) {
    %c0_i32 = arith.constant 0 : i32
    %c0_i32_0 = arith.constant 0 : i32
    return %arg0, %c0_i32 : i32, i32
  }
  func.func @transform_2(%arg0: i32) -> (i32, i32) {
    %c0_i32 = arith.constant 0 : i32
    %c0_i32_0 = arith.constant 0 : i32
    %c0_i32_1 = arith.constant 0 : i32
    return %c0_i32, %c0_i32_0 : i32, i32
  }
  func.func @transform_3(%arg0: i32) -> (i32, i32) {
    %c0_i32 = arith.constant 0 : i32
    %c0_i32_0 = arith.constant 0 : i32
    %c0_i32_1 = arith.constant 0 : i32
    return %c0_i32, %c0_i32_0 : i32, i32
  }
  func.func @transform_4(%arg0: i32) -> (i32, i32) {
    %c0_i32 = arith.constant 0 : i32
    %c0_i32_0 = arith.constant 0 : i32
    %c0_i32_1 = arith.constant 0 : i32
    return %c0_i32, %c0_i32_0 : i32, i32
  }
  func.func @transform_5(%arg0: i32) -> (i32, i32) {
    %c0_i32 = arith.constant 0 : i32
    %c0_i32_0 = arith.constant 0 : i32
    %c0_i32_1 = arith.constant 0 : i32
    return %c0_i32, %c0_i32_0 : i32, i32
  }
}

</mosaic_0001>

<bundles_post_ra>
// kernel: mnist_base_net_forward.3
= control target key start
LH: loop header
LB: loop body
LE: loop exit
PB: predicated region body
PF: predicated region fallthrough
CT: control target
= control target key end

     0   :  { %10 = vsyncpa [#allocation4], 0  ;;  %s7729_s0 = inlined_call_operand.vmem [shape: bf16[8,13312], index: 0, kind: input, shape index: {}]   ;;  %s7730_s1 = inlined_call_operand.hbm [shape: bf16[13312,128], index: 1, kind: input, shape index: {}]   ;;  %s7731_s2 = inlined_call_operand.hbm [shape: f32[1,128], index: 2, kind: input, shape index: {}]   ;;  %s7732_s3 = inlined_call_operand.hbm [shape: bf16[128,128], index: 3, kind: input, shape index: {}]   ;;  %s7733_s4 = inlined_call_operand.hbm [shape: f32[1,128], index: 4, kind: input, shape index: {}]   ;;  %s7734_s5 = inlined_call_operand.vmem [shape: f32[8,128], index: 5, kind: output, shape index: {}]  }
   0x1   :  { %12 = vsyncpa [#allocation4 + $0x1], 0 }
   0x2   :  { %13 = vsyncpa [#allocation6], 0 }
   0x3   :  { %14 = vsyncpa [#allocation9], 0  ;;  %s7127_s18 = smov 0   ;;  %s7129_s19 = smov 0  }
   0x4   :  { %s7131_s20 = smov 0   ;;  %s7133_s21 = smov 0  }
   0x5 LB: > { %s7146_s22 = sadd.s32 4294967295, %s7089_s21   ;;  %p66_p0 = scmp.ne.s32.totalorder %s7081_s19, %s7077_s18  ;;  %s7089_s21 = sphi %s7133_s21, %s7743_s21   ;;  %s7085_s20 = sphi %s7131_s20, %s7742_s20   ;;  %s7081_s19 = sphi %s7129_s19, %s7741_s19   ;;  %s7077_s18 = sphi %s7127_s18, %s7740_s18  }
   0x6   : > { %p67_p1 = scmp.eq.s32.totalorder %s7146_s22, 0  ;;  %p4710_p2 = scmp.ge.s32.totalorder %s7089_s21, 1 }
   0x7   : > { %p161_p3 = scmp.lt.s32.totalorder %s7089_s21, 3  ;;  %p4711_p4 = scmp.ne.s32.totalorder %s7146_s22, 0 }
   0x8   : > { %p7155_p5 = por %p67_p1, %p66_p0  ;;  %s173_s26 = sshll.u32 %s7731_s2, 4  ;;  %s174_s26 = int_to_ptr.hbm [resolvable:$true] %s173_s26 }
   0x9   : > { %p7162_p6 = pnand %p4710_p2, %p161_p3  ;;  %s7091_s28 = smov [#allocation5]  }
   0xa   : > { %s175_s29 = sshll.u32 %s7091_s28, 4  ;;  %s184_s7 = sshll.u32 %s7732_s3, 4  ;;  %s176_s29 = int_to_ptr.vmem [resolvable:$true] %s175_s29  ;;  %s185_s7 = int_to_ptr.hbm [resolvable:$true] %s184_s7 }
   0xb   : > { %p6862_p7 = pneg %p7162_p6  ;;  %s7092_s9 = smov [#allocation7]  }
   0xc   : > { %s186_s10 = sshll.u32 %s7092_s9, 4  ;;  %s7093_s11 = smov 64   ;;  %s187_s10 = int_to_ptr.vmem [resolvable:$true] %s186_s10 }
   0xd   : > { %p7173_p8 = pnand %p6862_p7, %p67_p1  ;;  %s7094_s12 = smov 4  }
   0xe   : > { %s199_s15 = sshll.u32 %s7733_s4, 4  ;;  %s7095_s16 = smov [#allocation8]   ;;  %s200_s15 = int_to_ptr.hbm [resolvable:$true] %s199_s15 }
   0xf   : > { %6865 = dma.hbm_to_vmem [thread:$0]  (!%p7173_p8), %s174_s26, 16, %s176_s29, [#allocation6]  }
  0x10   : > { %6868 = dma.hbm_to_vmem [thread:$0]  (!%p7173_p8), %s185_s7, 1024, %s187_s10, [#allocation6], %s7093_s11, %s7093_s11, %s7094_s12  }
  0x11   : > { %s201_s17 = sshll.u32 %s7095_s16, 4  ;;  %s7190_s18 = sadd.s32 1, %s7089_s21   ;;  %s202_s17 = int_to_ptr.vmem [resolvable:$true] %s201_s17 }
  0x12   : > { %6871 = dma.hbm_to_vmem [thread:$0]  (!%p7173_p8), %s200_s15, 16, %s202_s17, [#allocation9]  }
  0x13   : > { %s50_s24 = ssub.s32 %s7089_s21, %s7190_s18  ;;  %s53_s25 = sadd.s32 1, %s7085_s20 }
  0x14   : > { %p51_p9 = scmp.eq.s32.totalorder %s50_s24, 0  ;;  %p60_p10 = scmp.ne.s32.totalorder %s7085_s20, %s7081_s19 }
  0x15   : > { %p61_p11 = scmp.eq.s32.totalorder %s7089_s21, 0  ;;  %p6879_p12 = scmp.lt.s32.totalorder %s7089_s21, 2 }
  0x16   : > { %s7200_s26 = scalar_select %p51_p9, %s7085_s20, %s53_s25  }
  0x17   : > { %p62_p13 = por %p61_p11, %p60_p10  ;;  %s221_s28 = sand.u32 1, %s7085_s20  }
  0x18   : > { %s6846_s29 = smul.u32 3328, %s221_s28  ;;  %s222_s15 = scalar_lea.sflag [#allocation4], %s221_s28 }
  0x19   : > { %s6421_s30 = smul.u32 3328, %s7089_s21  ;;  %p7204_p0 = pnand %p6879_p12, %p62_p13 }
  0x1a   : > { %s225_s10 = scalar_lea.vmem [#allocation3], %s6846_s29  ;;  %s7024_s25 = scalar_lea.hbm %s7730_s1, 6656 }
  0x1b   : > { %s230_s9 = scalar_lea.hbm %s7730_s1, %s6421_s30  ;;  %s233_s13 = sshll.u32 %s225_s10, 4  ;;  %s234_s13 = int_to_ptr.vmem [resolvable:$true] %s233_s13 }
  0x1c   : > { %s231_s14 = sshll.u32 %s230_s9, 4  ;;  %p7021_p3 = pneg %p7204_p0  ;;  %s232_s14 = int_to_ptr.hbm [resolvable:$true] %s231_s14 }
  0x1d   : > { %s7017_s16 = sshra.s32 %s232_s14, 4  ;;  %s7018_s16 = int_to_ptr.hbm [resolvable:$true] %s7017_s16 }
  0x1e   : > { %s7019_s17 = scalar_lea.hbm %s7018_s16, 3328  ;;  %p7025_p9 = scmp.lt.s32.totalorder %s7018_s16, %s7730_s1 }
  0x1f   : > { %p7020_p2 = scmp.ne.s32.totalorder %s7018_s16, %s7019_s17  ;;  %p7026_p10 = scmp.lt.s32.totalorder %s7024_s25, %s7019_s17 }
  0x21   : > { %p7022_p7 = pnand %p7021_p3, %p7020_p2  ;;  %p7027_p11 = por %p7026_p10, %p7025_p9 }
  0x23   : > { %p7023_p8 = pneg %p7022_p7 }
  0x25   : > { %p7028_p12 = pnand %p7027_p11, %p7023_p8 }
  0x27   : > { %7031 = shalt.err (!%p7028_p12)
}
  0x28   : > { %6875 = dma.hbm_to_vmem [thread:$0]  (!%p7204_p0), %s232_s14, 53248, %s234_s13, %s222_s15, %s7093_s11, %s7093_s11, %s7094_s12  }
  0x29   : > { %245 = sbr.rel (%p7162_p6) target bundleno = 1035 (0x40b), region = 40  ;;  %s247_s28 = sand.u32 (!%p7162_p6), 1, %s7081_s19  }
  0x2a   : > { %s6847_s29 = smul.u32 (!%p7162_p6), 3328, %s247_s28  ;;  %s248_s8 = scalar_lea.sflag (!%p7162_p6), [#allocation4], %s247_s28 }
  0x2c   : > { %s7227_s9 = scalar_lea.vmem (!%p7162_p6), [#allocation3], %s6847_s29 }
  0x2e   : > { %7064 = dma.done.wait (%p7155_p5), %s248_s8, 53248  }
  0x2f   : > { %7066 = vsyncadd (%p7155_p5), %s248_s8, 4294914048 }
  0x30   : > { %7068 = dma.done.wait (%p67_p1), [#allocation6], 1040  }
  0x31   : > { %7070 = vsyncadd (%p67_p1), [#allocation6], 4294966256 }
  0x32   : > { %7072 = dma.done.wait (%p67_p1), [#allocation9], 16  }
  0x33   : > { %7074 = vsyncadd (%p67_p1), [#allocation9], 4294967280  ;;  %s294_s27 = smul.u32 52, %s7146_s22 }
  0x35   : > { %p295_p6 = scmp.lt.s32.totalorder %s294_s27, 103  ;;  %304 = sbr.rel (%p4711_p4) target bundleno = 60 (0x3c), region = 60 }
  0x37   : > { %s7745_s27 = smov (!%p295_p6, %s294_s27), 103 }
  0x38   : > { %s4720_s11 = sshll.u32 %s7745_s27, 2 }
  0x39   : > { %s7245_s6 = scalar_lea.vmem %s7729_s0, %s4720_s11 }
  0x3a   : > { %v7096_v0 = vmov 0.0  }
  0x3b   : > { %305 = vst [vmem:[#allocation2] sm:$0xff] %v7096_v0 }
  0x3c PF: > { %v6429_v1 = vld [vmem:[%s7227_s9 + $0x38] sm:$0xff]  ;;  %v6428_v5 = vld [vmem:[%s7227_s9 + $0x30] sm:$0xff]  ;;  %v6427_v9 = vld [vmem:[%s7227_s9 + $0x28] sm:$0xff]  ;;  %p6386_p1 = scmp.ne.s32.totalorder %s7146_s22, 1 }
  0x3d   : > { %v6437_v2 = vld [vmem:[%s7227_s9 + $0x78] sm:$0xff]  ;;  %3843 = vmatpush.bf16.msra.mxu0 %v6429_v1  ;;  %v6436_v6 = vld [vmem:[%s7227_s9 + $0x70] sm:$0xff]  ;;  %v6435_v10 = vld [vmem:[%s7227_s9 + $0x68] sm:$0xff] }
  0x3e   : > { %v6445_v3 = vld [vmem:[%s7227_s9 + $0xb8] sm:$0xff]  ;;  %3856 = vmatpush.bf16.msra.mxu1 %v6437_v2  ;;  %v6444_v7 = vld [vmem:[%s7227_s9 + $0xb0] sm:$0xff]  ;;  %v6443_v11 = vld [vmem:[%s7227_s9 + $0xa8] sm:$0xff] }
  0x3f   : > { %v6453_v4 = vld [vmem:[%s7227_s9 + $0xf8] sm:$0xff]  ;;  %3869 = vmatpush.bf16.msra.mxu2 %v6445_v3  ;;  %v6452_v8 = vld [vmem:[%s7227_s9 + $0xf0] sm:$0xff]  ;;  %v6451_v12 = vld [vmem:[%s7227_s9 + $0xe8] sm:$0xff] }
  0x40   : > { %3882 = vmatpush.bf16.msra.mxu3 %v6453_v4  ;;  %v6426_v13 = vld [vmem:[%s7227_s9 + $0x20] sm:$0xff]  ;;  %v6425_v17 = vld [vmem:[%s7227_s9 + $0x18] sm:$0xff]  ;;  %v6424_v21 = vld [vmem:[%s7227_s9 + $0x10] sm:$0xff] }
  0x41   : > { %3844 = vmatpush.bf16.msra.mxu0 %v6428_v5  ;;  %v6434_v14 = vld [vmem:[%s7227_s9 + $0x60] sm:$0xff]  ;;  %v6433_v18 = vld [vmem:[%s7227_s9 + $0x58] sm:$0xff]  ;;  %v6432_v22 = vld [vmem:[%s7227_s9 + $0x50] sm:$0xff] }
  0x42   : > { %3857 = vmatpush.bf16.msra.mxu1 %v6436_v6  ;;  %v6442_v15 = vld [vmem:[%s7227_s9 + $0xa0] sm:$0xff]  ;;  %v6441_v19 = vld [vmem:[%s7227_s9 + $0x98] sm:$0xff]  ;;  %v6440_v23 = vld [vmem:[%s7227_s9 + $0x90] sm:$0xff] }
  0x43   : > { %3870 = vmatpush.bf16.msra.mxu2 %v6444_v7  ;;  %v6450_v16 = vld [vmem:[%s7227_s9 + $0xe0] sm:$0xff]  ;;  %v6449_v20 = vld [vmem:[%s7227_s9 + $0xd8] sm:$0xff]  ;;  %v6448_v24 = vld [vmem:[%s7227_s9 + $0xd0] sm:$0xff] }
  0x44   : > { %3883 = vmatpush.bf16.msra.mxu3 %v6452_v8  ;;  %v6423_v25 = vld [vmem:[%s7227_s9 + $0x8] sm:$0xff]  ;;  %v308_v29 = vld [vmem:[%s7245_s6 + $0x8] sm:$0xff]  ;;  %v307_v30 = vld [vmem:[%s7245_s6] sm:$0xff] }
  0x45   : > { %3845 = vmatpush.bf16.msra.mxu0 %v6427_v9  ;;  %v6431_v26 = vld [vmem:[%s7227_s9 + $0x48] sm:$0xff]  ;;  %v6422_v31 = vld [vmem:[%s7227_s9] sm:$0xff]  ;;  %v1193_v33 = vunpack.c.l.b16 %v308_v29  ;;  %v1191_v34 = vunpack.c.l.b16 %v307_v30  ;;  %v1194_v37 = vunpack.c.h.b16 %v308_v29  ;;  %v1192_v38 = vunpack.c.h.b16 %v307_v30  ;;  %v6461_v39 = vld [vmem:[%s7227_s9 + $0x138] sm:$0xff] }
  0x46   : > { %3858 = vmatpush.bf16.msra.mxu1 %v6435_v10  ;;  %v6439_v27 = vld [vmem:[%s7227_s9 + $0x88] sm:$0xff]  ;;  %v6430_v32 = vld [vmem:[%s7227_s9 + $0x40] sm:$0xff]  ;;  %v6469_v40 = vld [vmem:[%s7227_s9 + $0x178] sm:$0xff] }
  0x47   : > { %3871 = vmatpush.bf16.msra.mxu2 %v6443_v11  ;;  %v6447_v28 = vld [vmem:[%s7227_s9 + $0xc8] sm:$0xff]  ;;  %v6438_v35 = vld [vmem:[%s7227_s9 + $0x80] sm:$0xff]  ;;  %v6477_v41 = vld [vmem:[%s7227_s9 + $0x1b8] sm:$0xff]  ;;  %v1245_v43 = vpack.c.b16 %v1193_v33, %v1193_v33  ;;  %v1243_v44 = vpack.c.b16 %v1191_v34, %v1191_v34  ;;  %v1246_v45 = vpack.c.b16 %v1194_v37, %v1194_v37  ;;  %v1244_v46 = vpack.c.b16 %v1192_v38, %v1192_v38 }
  0x48   : > { %3884 = vmatpush.bf16.msra.mxu3 %v6451_v12  ;;  %v6446_v36 = vld [vmem:[%s7227_s9 + $0xc0] sm:$0xff]  ;;  %v6485_v42 = vld [vmem:[%s7227_s9 + $0x1f8] sm:$0xff]  ;;  %v6460_v47 = vld [vmem:[%s7227_s9 + $0x130] sm:$0xff] }
  0x49   : > { %3846 = vmatpush.bf16.msra.mxu0 %v6426_v13  ;;  %v6468_v48 = vld [vmem:[%s7227_s9 + $0x170] sm:$0xff]  ;;  %v6459_v51 = vld [vmem:[%s7227_s9 + $0x128] sm:$0xff]  ;;  %v6458_v55 = vld [vmem:[%s7227_s9 + $0x120] sm:$0xff] }
  0x4a   : > { %3859 = vmatpush.bf16.msra.mxu1 %v6434_v14  ;;  %v6476_v49 = vld [vmem:[%s7227_s9 + $0x1b0] sm:$0xff]  ;;  %v6467_v52 = vld [vmem:[%s7227_s9 + $0x168] sm:$0xff]  ;;  %v6466_v56 = vld [vmem:[%s7227_s9 + $0x160] sm:$0xff] }
  0x4b   : > { %3872 = vmatpush.bf16.msra.mxu2 %v6442_v15  ;;  %v6484_v50 = vld [vmem:[%s7227_s9 + $0x1f0] sm:$0xff]  ;;  %v6475_v53 = vld [vmem:[%s7227_s9 + $0x1a8] sm:$0xff]  ;;  %v6474_v57 = vld [vmem:[%s7227_s9 + $0x1a0] sm:$0xff] }
  0x4c   : > { %3885 = vmatpush.bf16.msra.mxu3 %v6450_v16  ;;  %v6483_v54 = vld [vmem:[%s7227_s9 + $0x1e8] sm:$0xff]  ;;  %v6482_v58 = vld [vmem:[%s7227_s9 + $0x1e0] sm:$0xff]  ;;  %v6457_v59 = vld [vmem:[%s7227_s9 + $0x118] sm:$0xff] }
  0x4d   : > { %3847 = vmatpush.bf16.msra.mxu0 %v6425_v17  ;;  %v6465_v60 = vld [vmem:[%s7227_s9 + $0x158] sm:$0xff]  ;;  %v6456_v63 = vld [vmem:[%s7227_s9 + $0x110] sm:$0xff]  ;;  %v6455_v3 = vld [vmem:[%s7227_s9 + $0x108] sm:$0xff] }
  0x4e   : > { %3860 = vmatpush.bf16.msra.mxu1 %v6433_v18  ;;  %v6473_v61 = vld [vmem:[%s7227_s9 + $0x198] sm:$0xff]  ;;  %v6464_v0 = vld [vmem:[%s7227_s9 + $0x150] sm:$0xff]  ;;  %v6463_v4 = vld [vmem:[%s7227_s9 + $0x148] sm:$0xff] }
  0x4f   : > { %3873 = vmatpush.bf16.msra.mxu2 %v6441_v19  ;;  %v6481_v62 = vld [vmem:[%s7227_s9 + $0x1d8] sm:$0xff]  ;;  %v6472_v1 = vld [vmem:[%s7227_s9 + $0x190] sm:$0xff]  ;;  %v6471_v5 = vld [vmem:[%s7227_s9 + $0x188] sm:$0xff] }
  0x50   : > { %3886 = vmatpush.bf16.msra.mxu3 %v6449_v20  ;;  %v6480_v2 = vld [vmem:[%s7227_s9 + $0x1d0] sm:$0xff]  ;;  %v6479_v6 = vld [vmem:[%s7227_s9 + $0x1c8] sm:$0xff]  ;;  %v6454_v9 = vld [vmem:[%s7227_s9 + $0x100] sm:$0xff] }
  0x51   : > { %3848 = vmatpush.bf16.msra.mxu0 %v6424_v21  ;;  %v310_v7 = vld [vmem:[%s7245_s6 + $0x18] sm:$0xff]  ;;  %v309_v8 = vld [vmem:[%s7245_s6 + $0x10] sm:$0xff]  ;;  %v6462_v10 = vld [vmem:[%s7227_s9 + $0x140] sm:$0xff] }
  0x52   : > { %3861 = vmatpush.bf16.msra.mxu1 %v6432_v22  ;;  %v1197_v11 = vunpack.c.l.b16 %v310_v7  ;;  %v1195_v12 = vunpack.c.l.b16 %v309_v8  ;;  %v6470_v13 = vld [vmem:[%s7227_s9 + $0x180] sm:$0xff]  ;;  %v1198_v15 = vunpack.c.h.b16 %v310_v7  ;;  %v1196_v16 = vunpack.c.h.b16 %v309_v8  ;;  %v6493_v17 = vld [vmem:[%s7227_s9 + $0x238] sm:$0xff]  ;;  %v6491_v29 = vld [vmem:[%s7227_s9 + $0x228] sm:$0xff] }
  0x53   : > { %3874 = vmatpush.bf16.msra.mxu2 %v6440_v23  ;;  %v6478_v14 = vld [vmem:[%s7227_s9 + $0x1c0] sm:$0xff]  ;;  %v6501_v18 = vld [vmem:[%s7227_s9 + $0x278] sm:$0xff]  ;;  %v6499_v30 = vld [vmem:[%s7227_s9 + $0x268] sm:$0xff] }
  0x54   : > { %3887 = vmatpush.bf16.msra.mxu3 %v6448_v24  ;;  %v6509_v19 = vld [vmem:[%s7227_s9 + $0x2b8] sm:$0xff]  ;;  %v1249_v21 = vpack.c.b16 %v1197_v11, %v1197_v11  ;;  %v1247_v22 = vpack.c.b16 %v1195_v12, %v1195_v12  ;;  %v1250_v23 = vpack.c.b16 %v1198_v15, %v1198_v15  ;;  %v1248_v24 = vpack.c.b16 %v1196_v16, %v1196_v16  ;;  %v6490_v33 = vld [vmem:[%s7227_s9 + $0x220] sm:$0xff]  ;;  %v6523_v7 = vld [vmem:[%s7227_s9 + $0x328] sm:$0xff] }
  0x55   : > { %3849 = vmatpush.bf16.msra.mxu0 %v6423_v25  ;;  %v6517_v20 = vld [vmem:[%s7227_s9 + $0x2f8] sm:$0xff]  ;;  %v6492_v25 = vld [vmem:[%s7227_s9 + $0x230] sm:$0xff]  ;;  %v6498_v34 = vld [vmem:[%s7227_s9 + $0x260] sm:$0xff] }
  0x56   : > { %3862 = vmatpush.bf16.msra.mxu1 %v6431_v26  ;;  %v6500_v26 = vld [vmem:[%s7227_s9 + $0x270] sm:$0xff]  ;;  %v6489_v37 = vld [vmem:[%s7227_s9 + $0x218] sm:$0xff]  ;;  %v6531_v8 = vld [vmem:[%s7227_s9 + $0x368] sm:$0xff] }
  0x57   : > { %3875 = vmatpush.bf16.msra.mxu2 %v6439_v27  ;;  %v6508_v27 = vld [vmem:[%s7227_s9 + $0x2b0] sm:$0xff]  ;;  %v6497_v38 = vld [vmem:[%s7227_s9 + $0x258] sm:$0xff]  ;;  %v6522_v11 = vld [vmem:[%s7227_s9 + $0x320] sm:$0xff] }
  0x58   : > { %3888 = vmatpush.bf16.msra.mxu3 %v6447_v28  ;;  %v6516_v28 = vld [vmem:[%s7227_s9 + $0x2f0] sm:$0xff]  ;;  %v6530_v12 = vld [vmem:[%s7227_s9 + $0x360] sm:$0xff]  ;;  %v6521_v15 = vld [vmem:[%s7227_s9 + $0x318] sm:$0xff] }
  0x59   : > { %3850 = vmatpush.bf16.msra.mxu0 %v6422_v31  ;;  %v6507_v31 = vld [vmem:[%s7227_s9 + $0x2a8] sm:$0xff]  ;;  %v6529_v16 = vld [vmem:[%s7227_s9 + $0x358] sm:$0xff] }
  0x5a   : > { %3863 = vmatpush.bf16.msra.mxu1 %v6430_v32  ;;  %v6515_v32 = vld [vmem:[%s7227_s9 + $0x2e8] sm:$0xff] }
  0x5b   : > { %3876 = vmatpush.bf16.msra.mxu2 %v6438_v35  ;;  %v6506_v35 = vld [vmem:[%s7227_s9 + $0x2a0] sm:$0xff] }
  0x5c   : > { %3889 = vmatpush.bf16.msra.mxu3 %v6446_v36  ;;  %3851 = vmatmul.bf16.vlgmr.msra.gmra.mxu0 %v1243_v44  ;;  %v6514_v36 = vld [vmem:[%s7227_s9 + $0x2e0] sm:$0xff]  ;;  %v6512_v44 = vld [vmem:[%s7227_s9 + $0x2d0] sm:$0xff] }
  0x5d   : > { %3895 = vmatpush.bf16.msrb.mxu0 %v6461_v39  ;;  %3864 = vmatmul.bf16.vlgmr.msra.gmra.mxu1 %v1244_v46  ;;  %v6505_v39 = vld [vmem:[%s7227_s9 + $0x298] sm:$0xff]  ;;  %v6495_v46 = vld [vmem:[%s7227_s9 + $0x248] sm:$0xff] }
  0x5e   : > { %3908 = vmatpush.bf16.msrb.mxu1 %v6469_v40  ;;  %3877 = vmatmul.bf16.vlgmr.msra.gmra.mxu2 %v1245_v43  ;;  %v6513_v40 = vld [vmem:[%s7227_s9 + $0x2d8] sm:$0xff]  ;;  %v6504_v43 = vld [vmem:[%s7227_s9 + $0x290] sm:$0xff] }
  0x5f   : > { %3921 = vmatpush.bf16.msrb.mxu2 %v6477_v41  ;;  %3890 = vmatmul.bf16.vlgmr.msra.gmra.mxu3 %v1246_v45  ;;  %v6488_v41 = vld [vmem:[%s7227_s9 + $0x210] sm:$0xff]  ;;  %v6487_v45 = vld [vmem:[%s7227_s9 + $0x208] sm:$0xff] }
  0x60   : > { %3934 = vmatpush.bf16.msrb.mxu3 %v6485_v42  ;;  %v6496_v42 = vld [vmem:[%s7227_s9 + $0x250] sm:$0xff] }
  0x61   : > { %3896 = vmatpush.bf16.msrb.mxu0 %v6460_v47  ;;  %v6503_v47 = vld [vmem:[%s7227_s9 + $0x288] sm:$0xff] }
  0x62   : > { %3909 = vmatpush.bf16.msrb.mxu1 %v6468_v48  ;;  %v6511_v48 = vld [vmem:[%s7227_s9 + $0x2c8] sm:$0xff] }
  0x63   : > { %3922 = vmatpush.bf16.msrb.mxu2 %v6476_v49  ;;  %v311_v49 = vld [vmem:[%s7245_s6 + $0x20] sm:$0xff] }
  0x64   : > { %3935 = vmatpush.bf16.msrb.mxu3 %v6484_v50  ;;  %v312_v50 = vld [vmem:[%s7245_s6 + $0x28] sm:$0xff] }
  0x65   : > { %3897 = vmatpush.bf16.msrb.mxu0 %v6459_v51  ;;  %v6486_v51 = vld [vmem:[%s7227_s9 + $0x200] sm:$0xff] }
  0x66   : > { %3910 = vmatpush.bf16.msrb.mxu1 %v6467_v52  ;;  %v6494_v52 = vld [vmem:[%s7227_s9 + $0x240] sm:$0xff] }
  0x67   : > { %3923 = vmatpush.bf16.msrb.mxu2 %v6475_v53  ;;  %v1199_v53 = vunpack.c.l.b16 %v311_v49 }
  0x68   : > { %3936 = vmatpush.bf16.msrb.mxu3 %v6483_v54  ;;  %v1201_v54 = vunpack.c.l.b16 %v312_v50 }
  0x69   : > { %3898 = vmatpush.bf16.msrb.mxu0 %v6458_v55  ;;  %v6502_v55 = vld [vmem:[%s7227_s9 + $0x280] sm:$0xff] }
  0x6a   : > { %3911 = vmatpush.bf16.msrb.mxu1 %v6466_v56  ;;  %v6510_v56 = vld [vmem:[%s7227_s9 + $0x2c0] sm:$0xff] }
  0x6b   : > { %3924 = vmatpush.bf16.msrb.mxu2 %v6474_v57  ;;  %v1200_v57 = vunpack.c.h.b16 %v311_v49  ;;  %v6555_v49 = vld [vmem:[%s7227_s9 + $0x428] sm:$0xff] }
  0x6c   : > { %3937 = vmatpush.bf16.msrb.mxu3 %v6482_v58  ;;  %v1202_v58 = vunpack.c.h.b16 %v312_v50  ;;  %v6563_v50 = vld [vmem:[%s7227_s9 + $0x468] sm:$0xff] }
  0x6d   : > { %3899 = vmatpush.bf16.msrb.mxu0 %v6457_v59  ;;  %v6525_v59 = vld [vmem:[%s7227_s9 + $0x338] sm:$0xff] }
  0x6e   : > { %3912 = vmatpush.bf16.msrb.mxu1 %v6465_v60  ;;  %v6533_v60 = vld [vmem:[%s7227_s9 + $0x378] sm:$0xff] }
  0x6f   : > { %3925 = vmatpush.bf16.msrb.mxu2 %v6473_v61  ;;  %v6541_v61 = vld [vmem:[%s7227_s9 + $0x3b8] sm:$0xff] }
  0x70   : > { %3938 = vmatpush.bf16.msrb.mxu3 %v6481_v62  ;;  %v6549_v62 = vld [vmem:[%s7227_s9 + $0x3f8] sm:$0xff] }
  0x71   : > { %3900 = vmatpush.bf16.msrb.mxu0 %v6456_v63  ;;  %v1251_v63 = vpack.c.b16 %v1199_v53, %v1199_v53  ;;  %v6554_v53 = vld [vmem:[%s7227_s9 + $0x420] sm:$0xff] }
  0x72   : > { %3913 = vmatpush.bf16.msrb.mxu1 %v6464_v0  ;;  %v1253_v0 = vpack.c.b16 %v1201_v54, %v1201_v54  ;;  %v6562_v54 = vld [vmem:[%s7227_s9 + $0x460] sm:$0xff] }
  0x73   : > { %3926 = vmatpush.bf16.msrb.mxu2 %v6472_v1  ;;  %v1252_v1 = vpack.c.b16 %v1200_v57, %v1200_v57  ;;  %v6553_v57 = vld [vmem:[%s7227_s9 + $0x418] sm:$0xff] }
  0x74   : > { %3939 = vmatpush.bf16.msrb.mxu3 %v6480_v2  ;;  %v1254_v2 = vpack.c.b16 %v1202_v58, %v1202_v58  ;;  %v6561_v58 = vld [vmem:[%s7227_s9 + $0x458] sm:$0xff] }
  0x75   : > { %3901 = vmatpush.bf16.msrb.mxu0 %v6455_v3  ;;  %v6524_v3 = vld [vmem:[%s7227_s9 + $0x330] sm:$0xff] }
  0x76   : > { %3914 = vmatpush.bf16.msrb.mxu1 %v6463_v4  ;;  %v6532_v4 = vld [vmem:[%s7227_s9 + $0x370] sm:$0xff] }
  0x77   : > { %3927 = vmatpush.bf16.msrb.mxu2 %v6471_v5  ;;  %v6540_v5 = vld [vmem:[%s7227_s9 + $0x3b0] sm:$0xff] }
  0x78   : > { %3940 = vmatpush.bf16.msrb.mxu3 %v6479_v6  ;;  %v6548_v6 = vld [vmem:[%s7227_s9 + $0x3f0] sm:$0xff] }
  0x79   : > { %3902 = vmatpush.bf16.msrb.mxu0 %v6454_v9  ;;  %v6539_v9 = vld [vmem:[%s7227_s9 + $0x3a8] sm:$0xff] }
  0x7a   : > { %3915 = vmatpush.bf16.msrb.mxu1 %v6462_v10  ;;  %v6547_v10 = vld [vmem:[%s7227_s9 + $0x3e8] sm:$0xff] }
  0x7b   : > { %3928 = vmatpush.bf16.msrb.mxu2 %v6470_v13  ;;  %v6538_v13 = vld [vmem:[%s7227_s9 + $0x3a0] sm:$0xff] }
  0x7c   : > { %3941 = vmatpush.bf16.msrb.mxu3 %v6478_v14  ;;  %3903 = vmatmul.bf16.vlgmr.msrb.gmra.mxu0 %v1247_v22  ;;  %v6546_v14 = vld [vmem:[%s7227_s9 + $0x3e0] sm:$0xff]  ;;  %v6544_v22 = vld [vmem:[%s7227_s9 + $0x3d0] sm:$0xff] }
  0x7d   : > { %3947 = vmatpush.bf16.msra.mxu0 %v6493_v17  ;;  %3916 = vmatmul.bf16.vlgmr.msrb.gmra.mxu1 %v1248_v24  ;;  %v6537_v17 = vld [vmem:[%s7227_s9 + $0x398] sm:$0xff]  ;;  %v6527_v24 = vld [vmem:[%s7227_s9 + $0x348] sm:$0xff] }
  0x7e   : > { %3960 = vmatpush.bf16.msra.mxu1 %v6501_v18  ;;  %3929 = vmatmul.bf16.vlgmr.msrb.gmra.mxu2 %v1249_v21  ;;  %v6545_v18 = vld [vmem:[%s7227_s9 + $0x3d8] sm:$0xff]  ;;  %v6536_v21 = vld [vmem:[%s7227_s9 + $0x390] sm:$0xff] }
  0x7f   : > { %3973 = vmatpush.bf16.msra.mxu2 %v6509_v19  ;;  %3942 = vmatmul.bf16.vlgmr.msrb.gmra.mxu3 %v1250_v23  ;;  %v6520_v19 = vld [vmem:[%s7227_s9 + $0x310] sm:$0xff]  ;;  %v6519_v23 = vld [vmem:[%s7227_s9 + $0x308] sm:$0xff] }
  0x80   : > { %3986 = vmatpush.bf16.msra.mxu3 %v6517_v20  ;;  %v6528_v20 = vld [vmem:[%s7227_s9 + $0x350] sm:$0xff] }
  0x81   : > { %3948 = vmatpush.bf16.msra.mxu0 %v6492_v25  ;;  %v6535_v25 = vld [vmem:[%s7227_s9 + $0x388] sm:$0xff] }
  0x82   : > { %3961 = vmatpush.bf16.msra.mxu1 %v6500_v26  ;;  %v6543_v26 = vld [vmem:[%s7227_s9 + $0x3c8] sm:$0xff] }
  0x83   : > { %3974 = vmatpush.bf16.msra.mxu2 %v6508_v27  ;;  %v313_v27 = vld [vmem:[%s7245_s6 + $0x30] sm:$0xff] }
  0x84   : > { %3987 = vmatpush.bf16.msra.mxu3 %v6516_v28  ;;  %v314_v28 = vld [vmem:[%s7245_s6 + $0x38] sm:$0xff] }
  0x85   : > { %3949 = vmatpush.bf16.msra.mxu0 %v6491_v29  ;;  %v6518_v29 = vld [vmem:[%s7227_s9 + $0x300] sm:$0xff] }
  0x86   : > { %3962 = vmatpush.bf16.msra.mxu1 %v6499_v30  ;;  %v6526_v30 = vld [vmem:[%s7227_s9 + $0x340] sm:$0xff] }
  0x87   : > { %3975 = vmatpush.bf16.msra.mxu2 %v6507_v31  ;;  %v1203_v31 = vunpack.c.l.b16 %v313_v27 }
  0x88   : > { %3988 = vmatpush.bf16.msra.mxu3 %v6515_v32  ;;  %v1205_v32 = vunpack.c.l.b16 %v314_v28 }
  0x89   : > { %3950 = vmatpush.bf16.msra.mxu0 %v6490_v33  ;;  %v6534_v33 = vld [vmem:[%s7227_s9 + $0x380] sm:$0xff] }
  0x8a   : > { %3963 = vmatpush.bf16.msra.mxu1 %v6498_v34  ;;  %v6542_v34 = vld [vmem:[%s7227_s9 + $0x3c0] sm:$0xff] }
  0x8b   : > { %3976 = vmatpush.bf16.msra.mxu2 %v6506_v35  ;;  %v1204_v35 = vunpack.c.h.b16 %v313_v27  ;;  %v6587_v27 = vld [vmem:[%s7227_s9 + $0x528] sm:$0xff] }
  0x8c   : > { %3989 = vmatpush.bf16.msra.mxu3 %v6514_v36  ;;  %v1206_v36 = vunpack.c.h.b16 %v314_v28  ;;  %v6595_v28 = vld [vmem:[%s7227_s9 + $0x568] sm:$0xff] }
  0x8d   : > { %3951 = vmatpush.bf16.msra.mxu0 %v6489_v37  ;;  %v6557_v37 = vld [vmem:[%s7227_s9 + $0x438] sm:$0xff] }
  0x8e   : > { %3964 = vmatpush.bf16.msra.mxu1 %v6497_v38  ;;  %v6565_v38 = vld [vmem:[%s7227_s9 + $0x478] sm:$0xff] }
  0x8f   : > { %3977 = vmatpush.bf16.msra.mxu2 %v6505_v39  ;;  %v6573_v39 = vld [vmem:[%s7227_s9 + $0x4b8] sm:$0xff] }
  0x90   : > { %3990 = vmatpush.bf16.msra.mxu3 %v6513_v40  ;;  %v6581_v40 = vld [vmem:[%s7227_s9 + $0x4f8] sm:$0xff] }
  0x91   : > { %3952 = vmatpush.bf16.msra.mxu0 %v6488_v41  ;;  %v1255_v41 = vpack.c.b16 %v1203_v31, %v1203_v31 }
  0x92   : > { %3965 = vmatpush.bf16.msra.mxu1 %v6496_v42  ;;  %v1257_v42 = vpack.c.b16 %v1205_v32, %v1205_v32  ;;  %v6586_v32 = vld [vmem:[%s7227_s9 + $0x520] sm:$0xff] }
  0x93   : > { %3978 = vmatpush.bf16.msra.mxu2 %v6504_v43  ;;  %v1256_v43 = vpack.c.b16 %v1204_v35, %v1204_v35  ;;  %v6602_v35 = vld [vmem:[%s7227_s9 + $0x5a0] sm:$0xff] }
  0x94   : > { %3991 = vmatpush.bf16.msra.mxu3 %v6512_v44  ;;  %v1258_v44 = vpack.c.b16 %v1206_v36, %v1206_v36  ;;  %v6610_v36 = vld [vmem:[%s7227_s9 + $0x5e0] sm:$0xff] }
  0x95   : > { %3953 = vmatpush.bf16.msra.mxu0 %v6487_v45  ;;  %v6556_v45 = vld [vmem:[%s7227_s9 + $0x430] sm:$0xff] }
  0x96   : > { %3966 = vmatpush.bf16.msra.mxu1 %v6495_v46  ;;  %v6564_v46 = vld [vmem:[%s7227_s9 + $0x470] sm:$0xff] }
  0x97   : > { %3979 = vmatpush.bf16.msra.mxu2 %v6503_v47  ;;  %v6572_v47 = vld [vmem:[%s7227_s9 + $0x4b0] sm:$0xff] }
  0x98   : > { %3992 = vmatpush.bf16.msra.mxu3 %v6511_v48  ;;  %v6580_v48 = vld [vmem:[%s7227_s9 + $0x4f0] sm:$0xff] }
  0x99   : > { %3954 = vmatpush.bf16.msra.mxu0 %v6486_v51  ;;  %v6571_v51 = vld [vmem:[%s7227_s9 + $0x4a8] sm:$0xff] }
  0x9a   : > { %3967 = vmatpush.bf16.msra.mxu1 %v6494_v52  ;;  %v6579_v52 = vld [vmem:[%s7227_s9 + $0x4e8] sm:$0xff] }
  0x9b   : > { %3980 = vmatpush.bf16.msra.mxu2 %v6502_v55  ;;  %v6570_v55 = vld [vmem:[%s7227_s9 + $0x4a0] sm:$0xff] }
  0x9c   : > { %3993 = vmatpush.bf16.msra.mxu3 %v6510_v56  ;;  %3955 = vmatmul.bf16.vlgmr.msra.gmra.mxu0 %v1251_v63  ;;  %v6578_v56 = vld [vmem:[%s7227_s9 + $0x4e0] sm:$0xff]  ;;  %v6568_v63 = vld [vmem:[%s7227_s9 + $0x490] sm:$0xff] }
  0x9d   : > { %3999 = vmatpush.bf16.msrb.mxu0 %v6525_v59  ;;  %3968 = vmatmul.bf16.vlgmr.msra.gmra.mxu1 %v1252_v1  ;;  %v6569_v59 = vld [vmem:[%s7227_s9 + $0x498] sm:$0xff]  ;;  %v6551_v1 = vld [vmem:[%s7227_s9 + $0x408] sm:$0xff] }
  0x9e   : > { %4012 = vmatpush.bf16.msrb.mxu1 %v6533_v60  ;;  %3981 = vmatmul.bf16.vlgmr.msra.gmra.mxu2 %v1253_v0  ;;  %v6577_v60 = vld [vmem:[%s7227_s9 + $0x4d8] sm:$0xff]  ;;  %v6576_v0 = vld [vmem:[%s7227_s9 + $0x4d0] sm:$0xff] }
  0x9f   : > { %4025 = vmatpush.bf16.msrb.mxu2 %v6541_v61  ;;  %3994 = vmatmul.bf16.vlgmr.msra.gmra.mxu3 %v1254_v2  ;;  %v6552_v61 = vld [vmem:[%s7227_s9 + $0x410] sm:$0xff]  ;;  %v6559_v2 = vld [vmem:[%s7227_s9 + $0x448] sm:$0xff] }
  0xa0   : > { %4038 = vmatpush.bf16.msrb.mxu3 %v6549_v62  ;;  %v6560_v62 = vld [vmem:[%s7227_s9 + $0x450] sm:$0xff] }
  0xa1   : > { %4000 = vmatpush.bf16.msrb.mxu0 %v6524_v3  ;;  %v6567_v3 = vld [vmem:[%s7227_s9 + $0x488] sm:$0xff] }
  0xa2   : > { %4013 = vmatpush.bf16.msrb.mxu1 %v6532_v4  ;;  %v6575_v4 = vld [vmem:[%s7227_s9 + $0x4c8] sm:$0xff] }
  0xa3   : > { %4026 = vmatpush.bf16.msrb.mxu2 %v6540_v5  ;;  %v315_v5 = vld [vmem:[%s7245_s6 + $0x40] sm:$0xff] }
  0xa4   : > { %4039 = vmatpush.bf16.msrb.mxu3 %v6548_v6  ;;  %v316_v6 = vld [vmem:[%s7245_s6 + $0x48] sm:$0xff] }
  0xa5   : > { %4001 = vmatpush.bf16.msrb.mxu0 %v6523_v7  ;;  %v6550_v7 = vld [vmem:[%s7227_s9 + $0x400] sm:$0xff] }
  0xa6   : > { %4014 = vmatpush.bf16.msrb.mxu1 %v6531_v8  ;;  %v6558_v8 = vld [vmem:[%s7227_s9 + $0x440] sm:$0xff] }
  0xa7   : > { %4027 = vmatpush.bf16.msrb.mxu2 %v6539_v9  ;;  %v1207_v9 = vunpack.c.l.b16 %v315_v5 }
  0xa8   : > { %4040 = vmatpush.bf16.msrb.mxu3 %v6547_v10  ;;  %v1209_v10 = vunpack.c.l.b16 %v316_v6 }
  0xa9   : > { %4002 = vmatpush.bf16.msrb.mxu0 %v6522_v11  ;;  %v6566_v11 = vld [vmem:[%s7227_s9 + $0x480] sm:$0xff] }
  0xaa   : > { %4015 = vmatpush.bf16.msrb.mxu1 %v6530_v12  ;;  %v6574_v12 = vld [vmem:[%s7227_s9 + $0x4c0] sm:$0xff] }
  0xab   : > { %4028 = vmatpush.bf16.msrb.mxu2 %v6538_v13  ;;  %v1208_v13 = vunpack.c.h.b16 %v315_v5  ;;  %v6629_v5 = vld [vmem:[%s7227_s9 + $0x678] sm:$0xff] }
  0xac   : > { %4041 = vmatpush.bf16.msrb.mxu3 %v6546_v14  ;;  %v1210_v14 = vunpack.c.h.b16 %v316_v6  ;;  %v6637_v6 = vld [vmem:[%s7227_s9 + $0x6b8] sm:$0xff] }
  0xad   : > { %4003 = vmatpush.bf16.msrb.mxu0 %v6521_v15  ;;  %v6589_v15 = vld [vmem:[%s7227_s9 + $0x538] sm:$0xff] }
  0xae   : > { %4016 = vmatpush.bf16.msrb.mxu1 %v6529_v16  ;;  %v6597_v16 = vld [vmem:[%s7227_s9 + $0x578] sm:$0xff] }
  0xaf   : > { %4029 = vmatpush.bf16.msrb.mxu2 %v6537_v17  ;;  %v6605_v17 = vld [vmem:[%s7227_s9 + $0x5b8] sm:$0xff] }
  0xb0   : > { %4042 = vmatpush.bf16.msrb.mxu3 %v6545_v18  ;;  %v6613_v18 = vld [vmem:[%s7227_s9 + $0x5f8] sm:$0xff] }
  0xb1   : > { %4004 = vmatpush.bf16.msrb.mxu0 %v6520_v19  ;;  %v1259_v19 = vpack.c.b16 %v1207_v9, %v1207_v9 }
  0xb2   : > { %4017 = vmatpush.bf16.msrb.mxu1 %v6528_v20  ;;  %v1261_v20 = vpack.c.b16 %v1209_v10, %v1209_v10 }
  0xb3   : > { %4030 = vmatpush.bf16.msrb.mxu2 %v6536_v21  ;;  %v1260_v21 = vpack.c.b16 %v1208_v13, %v1208_v13  ;;  %v6628_v13 = vld [vmem:[%s7227_s9 + $0x670] sm:$0xff] }
  0xb4   : > { %4043 = vmatpush.bf16.msrb.mxu3 %v6544_v22  ;;  %v1262_v22 = vpack.c.b16 %v1210_v14, %v1210_v14  ;;  %v6636_v14 = vld [vmem:[%s7227_s9 + $0x6b0] sm:$0xff] }
  0xb5   : > { %4005 = vmatpush.bf16.msrb.mxu0 %v6519_v23  ;;  %v6588_v23 = vld [vmem:[%s7227_s9 + $0x530] sm:$0xff] }
  0xb6   : > { %4018 = vmatpush.bf16.msrb.mxu1 %v6527_v24  ;;  %v6596_v24 = vld [vmem:[%s7227_s9 + $0x570] sm:$0xff] }
  0xb7   : > { %4031 = vmatpush.bf16.msrb.mxu2 %v6535_v25  ;;  %v6604_v25 = vld [vmem:[%s7227_s9 + $0x5b0] sm:$0xff] }
  0xb8   : > { %4044 = vmatpush.bf16.msrb.mxu3 %v6543_v26  ;;  %v6612_v26 = vld [vmem:[%s7227_s9 + $0x5f0] sm:$0xff] }
  0xb9   : > { %4006 = vmatpush.bf16.msrb.mxu0 %v6518_v29  ;;  %v6603_v29 = vld [vmem:[%s7227_s9 + $0x5a8] sm:$0xff] }
  0xba   : > { %4019 = vmatpush.bf16.msrb.mxu1 %v6526_v30  ;;  %v6611_v30 = vld [vmem:[%s7227_s9 + $0x5e8] sm:$0xff] }
  0xbb   : > { %4032 = vmatpush.bf16.msrb.mxu2 %v6534_v33  ;;  %v6594_v33 = vld [vmem:[%s7227_s9 + $0x560] sm:$0xff] }
  0xbc   : > { %4045 = vmatpush.bf16.msrb.mxu3 %v6542_v34  ;;  %4007 = vmatmul.bf16.vlgmr.msrb.gmra.mxu0 %v1255_v41  ;;  %v6609_v41 = vld [vmem:[%s7227_s9 + $0x5d8] sm:$0xff] }
  0xbd   : > { %4051 = vmatpush.bf16.msra.mxu0 %v6557_v37  ;;  %4020 = vmatmul.bf16.vlgmr.msrb.gmra.mxu1 %v1256_v43 }
  0xbe   : > { %4064 = vmatpush.bf16.msra.mxu1 %v6565_v38  ;;  %4033 = vmatmul.bf16.vlgmr.msrb.gmra.mxu2 %v1257_v42  ;;  %v6585_v38 = vld [vmem:[%s7227_s9 + $0x518] sm:$0xff] }
  0xbf   : > { %4077 = vmatpush.bf16.msra.mxu2 %v6573_v39  ;;  %4046 = vmatmul.bf16.vlgmr.msrb.gmra.mxu3 %v1258_v44  ;;  %v6593_v39 = vld [vmem:[%s7227_s9 + $0x558] sm:$0xff] }
  0xc0   : > { %4090 = vmatpush.bf16.msra.mxu3 %v6581_v40  ;;  %v6601_v40 = vld [vmem:[%s7227_s9 + $0x598] sm:$0xff] }
  0xc1   : > { %4052 = vmatpush.bf16.msra.mxu0 %v6556_v45 }
  0xc2   : > { %4065 = vmatpush.bf16.msra.mxu1 %v6564_v46  ;;  %v6584_v46 = vld [vmem:[%s7227_s9 + $0x510] sm:$0xff] }
  0xc3   : > { %4078 = vmatpush.bf16.msra.mxu2 %v6572_v47  ;;  %v6592_v47 = vld [vmem:[%s7227_s9 + $0x550] sm:$0xff] }
  0xc4   : > { %4091 = vmatpush.bf16.msra.mxu3 %v6580_v48 }
  0xc5   : > { %4053 = vmatpush.bf16.msra.mxu0 %v6555_v49 }
  0xc6   : > { %4066 = vmatpush.bf16.msra.mxu1 %v6563_v50  ;;  %v6600_v50 = vld [vmem:[%s7227_s9 + $0x590] sm:$0xff] }
  0xc7   : > { %4079 = vmatpush.bf16.msra.mxu2 %v6571_v51  ;;  %v6608_v51 = vld [vmem:[%s7227_s9 + $0x5d0] sm:$0xff] }
  0xc8   : > { %4092 = vmatpush.bf16.msra.mxu3 %v6579_v52  ;;  %v6583_v52 = vld [vmem:[%s7227_s9 + $0x508] sm:$0xff] }
  0xc9   : > { %4054 = vmatpush.bf16.msra.mxu0 %v6554_v53  ;;  %v6591_v53 = vld [vmem:[%s7227_s9 + $0x548] sm:$0xff] }
  0xca   : > { %4067 = vmatpush.bf16.msra.mxu1 %v6562_v54  ;;  %v6599_v54 = vld [vmem:[%s7227_s9 + $0x588] sm:$0xff] }
  0xcb   : > { %4080 = vmatpush.bf16.msra.mxu2 %v6570_v55  ;;  %v6607_v55 = vld [vmem:[%s7227_s9 + $0x5c8] sm:$0xff] }
  0xcc   : > { %4093 = vmatpush.bf16.msra.mxu3 %v6578_v56  ;;  %v317_v56 = vld [vmem:[%s7245_s6 + $0x50] sm:$0xff] }
  0xcd   : > { %4055 = vmatpush.bf16.msra.mxu0 %v6553_v57  ;;  %v318_v57 = vld [vmem:[%s7245_s6 + $0x58] sm:$0xff] }
  0xce   : > { %4068 = vmatpush.bf16.msra.mxu1 %v6561_v58 }
  0xcf   : > { %4081 = vmatpush.bf16.msra.mxu2 %v6569_v59 }
  0xd0   : > { %4094 = vmatpush.bf16.msra.mxu3 %v6577_v60  ;;  %v6582_v60 = vld [vmem:[%s7227_s9 + $0x500] sm:$0xff] }
  0xd1   : > { %4056 = vmatpush.bf16.msra.mxu0 %v6552_v61  ;;  %v6590_v61 = vld [vmem:[%s7227_s9 + $0x540] sm:$0xff] }
  0xd2   : > { %4069 = vmatpush.bf16.msra.mxu1 %v6560_v62  ;;  %v1211_v62 = vunpack.c.l.b16 %v317_v56 }
  0xd3   : > { %4082 = vmatpush.bf16.msra.mxu2 %v6568_v63  ;;  %v1213_v63 = vunpack.c.l.b16 %v318_v57 }
  0xd4   : > { %4095 = vmatpush.bf16.msra.mxu3 %v6576_v0  ;;  %v6598_v0 = vld [vmem:[%s7227_s9 + $0x580] sm:$0xff] }
  0xd5   : > { %4057 = vmatpush.bf16.msra.mxu0 %v6551_v1  ;;  %v6606_v1 = vld [vmem:[%s7227_s9 + $0x5c0] sm:$0xff]  ;;  %v1265_v9 = vpack.c.b16 %v1213_v63, %v1213_v63 }
  0xd6   : > { %4070 = vmatpush.bf16.msra.mxu1 %v6559_v2  ;;  %v1212_v2 = vunpack.c.h.b16 %v317_v56 }
  0xd7   : > { %4083 = vmatpush.bf16.msra.mxu2 %v6567_v3  ;;  %v1214_v3 = vunpack.c.h.b16 %v318_v57 }
  0xd8   : > { %4096 = vmatpush.bf16.msra.mxu3 %v6575_v4  ;;  %v6621_v4 = vld [vmem:[%s7227_s9 + $0x638] sm:$0xff]  ;;  %v1264_v10 = vpack.c.b16 %v1212_v2, %v1212_v2  ;;  %v6652_v2 = vld [vmem:[%s7227_s9 + $0x730] sm:$0xff] }
  0xd9   : > { %4058 = vmatpush.bf16.msra.mxu0 %v6550_v7  ;;  %v3852_v31 = vpop.f32.mrf.mxu0  ;;  %v6645_v7 = vld [vmem:[%s7227_s9 + $0x6f8] sm:$0xff] }
  0xda   : > { %4071 = vmatpush.bf16.msra.mxu1 %v6558_v8  ;;  %v3865_v34 = vpop.f32.mrf.mxu1  ;;  %v1263_v8 = vpack.c.b16 %v1211_v62, %v1211_v62 }
  0xdb   : > { %4084 = vmatpush.bf16.msra.mxu2 %v6566_v11  ;;  %v3866_v37 = vadd.f32 %v3865_v34, %v3852_v31  ;;  %v1266_v11 = vpack.c.b16 %v1214_v3, %v1214_v3  ;;  %v6641_v31 = vld [vmem:[%s7227_s9 + $0x6d8] sm:$0xff]  ;;  %v6660_v3 = vld [vmem:[%s7227_s9 + $0x770] sm:$0xff] }
  0xdc   : > { %4097 = vmatpush.bf16.msra.mxu3 %v6574_v12  ;;  %4059 = vmatmul.bf16.vlgmr.msra.gmra.mxu0 %v1259_v19  ;;  %v6620_v12 = vld [vmem:[%s7227_s9 + $0x630] sm:$0xff]  ;;  %v6643_v19 = vld [vmem:[%s7227_s9 + $0x6e8] sm:$0xff] }
  0xdd   : > { %4103 = vmatpush.bf16.msrb.mxu0 %v6589_v15  ;;  %4072 = vmatmul.bf16.vlgmr.msra.gmra.mxu1 %v1260_v21  ;;  %v6644_v15 = vld [vmem:[%s7227_s9 + $0x6f0] sm:$0xff]  ;;  %v6618_v21 = vld [vmem:[%s7227_s9 + $0x620] sm:$0xff] }
  0xde   : > { %4116 = vmatpush.bf16.msrb.mxu1 %v6597_v16  ;;  %4085 = vmatmul.bf16.vlgmr.msra.gmra.mxu2 %v1261_v20  ;;  %v6619_v16 = vld [vmem:[%s7227_s9 + $0x628] sm:$0xff] }
  0xdf   : > { %4129 = vmatpush.bf16.msrb.mxu2 %v6605_v17  ;;  %4098 = vmatmul.bf16.vlgmr.msra.gmra.mxu3 %v1262_v22  ;;  %v6627_v17 = vld [vmem:[%s7227_s9 + $0x668] sm:$0xff]  ;;  %v6626_v22 = vld [vmem:[%s7227_s9 + $0x660] sm:$0xff] }
  0xe0   : > { %4142 = vmatpush.bf16.msrb.mxu3 %v6613_v18  ;;  %v6635_v18 = vld [vmem:[%s7227_s9 + $0x6a8] sm:$0xff] }
  0xe1   : > { %4104 = vmatpush.bf16.msrb.mxu0 %v6588_v23  ;;  %v3878_v42 = vpop.f32.mrf.mxu2  ;;  %v3854_v45 = vpop.f32.mrf.mxu0 }
  0xe2   : > { %4117 = vmatpush.bf16.msrb.mxu1 %v6596_v24  ;;  %v3879_v43 = vadd.f32 %v3878_v42, %v3866_v37  ;;  %v3891_v44 = vpop.f32.mrf.mxu3  ;;  %v3867_v49 = vpop.f32.mrf.mxu1  ;;  %v6624_v37 = vld [vmem:[%s7227_s9 + $0x650] sm:$0xff]  ;;  %v6615_v42 = vld [vmem:[%s7227_s9 + $0x608] sm:$0xff] }
  0xe3   : > { %4130 = vmatpush.bf16.msrb.mxu2 %v6604_v25  ;;  %v6634_v25 = vld [vmem:[%s7227_s9 + $0x6a0] sm:$0xff]  ;;  %v6639_v45 = vld [vmem:[%s7227_s9 + $0x6c8] sm:$0xff] }
  0xe4   : > { %4143 = vmatpush.bf16.msrb.mxu3 %v6612_v26  ;;  %v7441_v48 = vadd.f32 %v3891_v44, %v3879_v43  ;;  %v6642_v26 = vld [vmem:[%s7227_s9 + $0x6e0] sm:$0xff]  ;;  %v6623_v43 = vld [vmem:[%s7227_s9 + $0x648] sm:$0xff] }
  0xe5   : > { %4105 = vmatpush.bf16.msrb.mxu0 %v6587_v27  ;;  %v6631_v44 = vld [vmem:[%s7227_s9 + $0x688] sm:$0xff] }
  0xe6   : > { %4118 = vmatpush.bf16.msrb.mxu1 %v6595_v28  ;;  %v6617_v28 = vld [vmem:[%s7227_s9 + $0x618] sm:$0xff] }
  0xe7   : > { %4131 = vmatpush.bf16.msrb.mxu2 %v6603_v29  ;;  %v6625_v29 = vld [vmem:[%s7227_s9 + $0x658] sm:$0xff] }
  0xe8   : > { %4144 = vmatpush.bf16.msrb.mxu3 %v6611_v30  ;;  %v6633_v30 = vld [vmem:[%s7227_s9 + $0x698] sm:$0xff] }
  0xe9   : > { %4106 = vmatpush.bf16.msrb.mxu0 %v6586_v32  ;;  %v3880_v58 = vpop.f32.mrf.mxu2 }
  0xea   : > { %4119 = vmatpush.bf16.msrb.mxu1 %v6594_v33  ;;  %v3893_v59 = vpop.f32.mrf.mxu3  ;;  %v6653_v58 = vld [vmem:[%s7227_s9 + $0x738] sm:$0xff] }
  0xeb   : > { %4132 = vmatpush.bf16.msrb.mxu2 %v6602_v35  ;;  %v6661_v59 = vld [vmem:[%s7227_s9 + $0x778] sm:$0xff] }
  0xec   : > { %4145 = vmatpush.bf16.msrb.mxu3 %v6610_v36  ;;  %v6616_v36 = vld [vmem:[%s7227_s9 + $0x610] sm:$0xff] }
  0xed   : > { %4107 = vmatpush.bf16.msrb.mxu0 %v6585_v38 }
  0xee   : > { %4120 = vmatpush.bf16.msrb.mxu1 %v6593_v39 }
  0xef   : > { %4133 = vmatpush.bf16.msrb.mxu2 %v6601_v40  ;;  %v6632_v40 = vld [vmem:[%s7227_s9 + $0x690] sm:$0xff] }
  0xf0   : > { %4146 = vmatpush.bf16.msrb.mxu3 %v6609_v41  ;;  %v6640_v41 = vld [vmem:[%s7227_s9 + $0x6d0] sm:$0xff] }
  0xf1   : > { %4108 = vmatpush.bf16.msrb.mxu0 %v6584_v46  ;;  %v319_v46 = vld [vmem:[%s7245_s6 + $0x60] sm:$0xff] }
  0xf2   : > { %4121 = vmatpush.bf16.msrb.mxu1 %v6592_v47  ;;  %v320_v47 = vld [vmem:[%s7245_s6 + $0x68] sm:$0xff]  ;;  %v1216_v56 = vunpack.c.h.b16 %v319_v46 }
  0xf3   : > { %4134 = vmatpush.bf16.msrb.mxu2 %v6600_v50  ;;  %v6614_v50 = vld [vmem:[%s7227_s9 + $0x600] sm:$0xff]  ;;  %v1218_v57 = vunpack.c.h.b16 %v320_v47 }
  0xf4   : > { %4147 = vmatpush.bf16.msrb.mxu3 %v6608_v51  ;;  %v6622_v51 = vld [vmem:[%s7227_s9 + $0x640] sm:$0xff] }
  0xf5   : > { %4109 = vmatpush.bf16.msrb.mxu0 %v6583_v52  ;;  %v1215_v52 = vunpack.c.l.b16 %v319_v46 }
  0xf6   : > { %4122 = vmatpush.bf16.msrb.mxu1 %v6591_v53  ;;  %v1217_v53 = vunpack.c.l.b16 %v320_v47 }
  0xf7   : > { %4135 = vmatpush.bf16.msrb.mxu2 %v6599_v54  ;;  %v6630_v54 = vld [vmem:[%s7227_s9 + $0x680] sm:$0xff]  ;;  %v1267_v62 = vpack.c.b16 %v1215_v52, %v1215_v52 }
  0xf8   : > { %4148 = vmatpush.bf16.msrb.mxu3 %v6607_v55  ;;  %v6638_v55 = vld [vmem:[%s7227_s9 + $0x6c0] sm:$0xff]  ;;  %v1269_v63 = vpack.c.b16 %v1217_v53, %v1217_v53 }
  0xf9   : > { %4110 = vmatpush.bf16.msrb.mxu0 %v6582_v60  ;;  %v3904_v20 = vpop.f32.mrf.mxu0  ;;  %v6669_v60 = vld [vmem:[%s7227_s9 + $0x7b8] sm:$0xff] }
  0xfa   : > { %4123 = vmatpush.bf16.msrb.mxu1 %v6590_v61  ;;  %v3905_v23 = vadd.f32 %v3904_v20, %v7441_v48  ;;  %v3917_v24 = vpop.f32.mrf.mxu1  ;;  %v6677_v61 = vld [vmem:[%s7227_s9 + $0x7f8] sm:$0xff] }
  0xfb   : > { %4136 = vmatpush.bf16.msrb.mxu2 %v6598_v0  ;;  %v1268_v0 = vpack.c.b16 %v1216_v56, %v1216_v56  ;;  %v6665_v20 = vld [vmem:[%s7227_s9 + $0x798] sm:$0xff]  ;;  %v6684_v56 = vld [vmem:[%s7227_s9 + $0x830] sm:$0xff] }
  0xfc   : > { %4149 = vmatpush.bf16.msrb.mxu3 %v6606_v1  ;;  %4111 = vmatmul.bf16.vlgmr.msrb.gmra.mxu0 %v1263_v8  ;;  %v3918_v27 = vadd.f32 %v3917_v24, %v3905_v23  ;;  %v1270_v1 = vpack.c.b16 %v1218_v57, %v1218_v57  ;;  %v6667_v8 = vld [vmem:[%s7227_s9 + $0x7a8] sm:$0xff]  ;;  %v6692_v57 = vld [vmem:[%s7227_s9 + $0x870] sm:$0xff] }
  0xfd   : > { %4155 = vmatpush.bf16.msra.mxu0 %v6621_v4  ;;  %4124 = vmatmul.bf16.vlgmr.msrb.gmra.mxu1 %v1264_v10  ;;  %v6668_v4 = vld [vmem:[%s7227_s9 + $0x7b0] sm:$0xff] }
  0xfe   : > { %4168 = vmatpush.bf16.msra.mxu1 %v6629_v5  ;;  %4137 = vmatmul.bf16.vlgmr.msrb.gmra.mxu2 %v1265_v9  ;;  %v6676_v5 = vld [vmem:[%s7227_s9 + $0x7f0] sm:$0xff]  ;;  %v6675_v9 = vld [vmem:[%s7227_s9 + $0x7e8] sm:$0xff] }
  0xff   : > { %4181 = vmatpush.bf16.msra.mxu2 %v6637_v6  ;;  %4150 = vmatmul.bf16.vlgmr.msrb.gmra.mxu3 %v1266_v11  ;;  %v6651_v6 = vld [vmem:[%s7227_s9 + $0x728] sm:$0xff] }
 0x100   : > { %4194 = vmatpush.bf16.msra.mxu3 %v6645_v7  ;;  %v6659_v7 = vld [vmem:[%s7227_s9 + $0x768] sm:$0xff] }
 0x101   : > { %4156 = vmatpush.bf16.msra.mxu0 %v6620_v12  ;;  %v3930_v32 = vpop.f32.mrf.mxu2  ;;  %v3906_v35 = vpop.f32.mrf.mxu0  ;;  %v6650_v12 = vld [vmem:[%s7227_s9 + $0x720] sm:$0xff] }
 0x102   : > { %4169 = vmatpush.bf16.msra.mxu1 %v6628_v13  ;;  %v3931_v33 = vadd.f32 %v3930_v32, %v3918_v27  ;;  %v3943_v34 = vpop.f32.mrf.mxu3  ;;  %v3919_v39 = vpop.f32.mrf.mxu1  ;;  %v6658_v13 = vld [vmem:[%s7227_s9 + $0x760] sm:$0xff]  ;;  %v6648_v27 = vld [vmem:[%s7227_s9 + $0x710] sm:$0xff]  ;;  %v6647_v32 = vld [vmem:[%s7227_s9 + $0x708] sm:$0xff] }
 0x103   : > { %4182 = vmatpush.bf16.msra.mxu2 %v6636_v14  ;;  %v6671_v35 = vld [vmem:[%s7227_s9 + $0x7c8] sm:$0xff] }
 0x104   : > { %4195 = vmatpush.bf16.msra.mxu3 %v6644_v15  ;;  %v7478_v38 = vadd.f32 %v3943_v34, %v3931_v33  ;;  %v6666_v15 = vld [vmem:[%s7227_s9 + $0x7a0] sm:$0xff]  ;;  %v6655_v33 = vld [vmem:[%s7227_s9 + $0x748] sm:$0xff] }
 0x105   : > { %4157 = vmatpush.bf16.msra.mxu0 %v6619_v16  ;;  %v6674_v16 = vld [vmem:[%s7227_s9 + $0x7e0] sm:$0xff]  ;;  %v6663_v34 = vld [vmem:[%s7227_s9 + $0x788] sm:$0xff] }
 0x106   : > { %4170 = vmatpush.bf16.msra.mxu1 %v6627_v17 }
 0x107   : > { %4183 = vmatpush.bf16.msra.mxu2 %v6635_v18  ;;  %v6649_v18 = vld [vmem:[%s7227_s9 + $0x718] sm:$0xff] }
 0x108   : > { %4196 = vmatpush.bf16.msra.mxu3 %v6643_v19  ;;  %v6657_v19 = vld [vmem:[%s7227_s9 + $0x758] sm:$0xff] }
 0x109   : > { %4158 = vmatpush.bf16.msra.mxu0 %v6618_v21  ;;  %v3932_v48 = vpop.f32.mrf.mxu2  ;;  %v6673_v21 = vld [vmem:[%s7227_s9 + $0x7d8] sm:$0xff] }
 0x10a   : > { %4171 = vmatpush.bf16.msra.mxu1 %v6626_v22  ;;  %v3945_v49 = vpop.f32.mrf.mxu3  ;;  %v6685_v48 = vld [vmem:[%s7227_s9 + $0x838] sm:$0xff] }
 0x10b   : > { %4184 = vmatpush.bf16.msra.mxu2 %v6634_v25  ;;  %v6693_v49 = vld [vmem:[%s7227_s9 + $0x878] sm:$0xff] }
 0x10c   : > { %4197 = vmatpush.bf16.msra.mxu3 %v6642_v26 }
 0x10d   : > { %4159 = vmatpush.bf16.msra.mxu0 %v6617_v28  ;;  %v6656_v28 = vld [vmem:[%s7227_s9 + $0x750] sm:$0xff] }
 0x10e   : > { %4172 = vmatpush.bf16.msra.mxu1 %v6625_v29 }
 0x10f   : > { %4185 = vmatpush.bf16.msra.mxu2 %v6633_v30  ;;  %v6664_v30 = vld [vmem:[%s7227_s9 + $0x790] sm:$0xff] }
 0x110   : > { %4198 = vmatpush.bf16.msra.mxu3 %v6641_v31  ;;  %v6672_v31 = vld [vmem:[%s7227_s9 + $0x7d0] sm:$0xff] }
 0x111   : > { %4160 = vmatpush.bf16.msra.mxu0 %v6616_v36  ;;  %v321_v36 = vld [vmem:[%s7245_s6 + $0x70] sm:$0xff] }
 0x112   : > { %4173 = vmatpush.bf16.msra.mxu1 %v6624_v37  ;;  %v322_v37 = vld [vmem:[%s7245_s6 + $0x78] sm:$0xff]  ;;  %v1220_v46 = vunpack.c.h.b16 %v321_v36 }
 0x113   : > { %4186 = vmatpush.bf16.msra.mxu2 %v6632_v40  ;;  %v6646_v40 = vld [vmem:[%s7227_s9 + $0x700] sm:$0xff]  ;;  %v1222_v47 = vunpack.c.h.b16 %v322_v37 }
 0x114   : > { %4199 = vmatpush.bf16.msra.mxu3 %v6640_v41  ;;  %v6654_v41 = vld [vmem:[%s7227_s9 + $0x740] sm:$0xff] }
 0x115   : > { %4161 = vmatpush.bf16.msra.mxu0 %v6615_v42  ;;  %v1219_v42 = vunpack.c.l.b16 %v321_v36 }
 0x116   : > { %4174 = vmatpush.bf16.msra.mxu1 %v6623_v43  ;;  %v1221_v43 = vunpack.c.l.b16 %v322_v37 }
 0x117   : > { %4187 = vmatpush.bf16.msra.mxu2 %v6631_v44  ;;  %v6662_v44 = vld [vmem:[%s7227_s9 + $0x780] sm:$0xff]  ;;  %v1271_v52 = vpack.c.b16 %v1219_v42, %v1219_v42 }
 0x118   : > { %4200 = vmatpush.bf16.msra.mxu3 %v6639_v45  ;;  %v6670_v45 = vld [vmem:[%s7227_s9 + $0x7c0] sm:$0xff]  ;;  %v1273_v53 = vpack.c.b16 %v1221_v43, %v1221_v43 }
 0x119   : > { %4162 = vmatpush.bf16.msra.mxu0 %v6614_v50  ;;  %v3956_v10 = vpop.f32.mrf.mxu0  ;;  %v6701_v50 = vld [vmem:[%s7227_s9 + $0x8b8] sm:$0xff] }
 0x11a   : > { %4175 = vmatpush.bf16.msra.mxu1 %v6622_v51  ;;  %v3957_v11 = vadd.f32 %v3956_v10, %v7478_v38  ;;  %v3969_v14 = vpop.f32.mrf.mxu1  ;;  %v6709_v51 = vld [vmem:[%s7227_s9 + $0x8f8] sm:$0xff] }
 0x11b   : > { %4188 = vmatpush.bf16.msra.mxu2 %v6630_v54  ;;  %v1272_v54 = vpack.c.b16 %v1220_v46, %v1220_v46  ;;  %v6697_v10 = vld [vmem:[%s7227_s9 + $0x898] sm:$0xff]  ;;  %v6716_v46 = vld [vmem:[%s7227_s9 + $0x930] sm:$0xff] }
 0x11c   : > { %4201 = vmatpush.bf16.msra.mxu3 %v6638_v55  ;;  %4163 = vmatmul.bf16.vlgmr.msra.gmra.mxu0 %v1267_v62  ;;  %v3970_v17 = vadd.f32 %v3969_v14, %v3957_v11  ;;  %v1274_v55 = vpack.c.b16 %v1222_v47, %v1222_v47  ;;  %v6699_v62 = vld [vmem:[%s7227_s9 + $0x8a8] sm:$0xff]  ;;  %v6705_v11 = vld [vmem:[%s7227_s9 + $0x8d8] sm:$0xff]  ;;  %v6724_v47 = vld [vmem:[%s7227_s9 + $0x970] sm:$0xff] }
 0x11d   : > { %4207 = vmatpush.bf16.msrb.mxu0 %v6653_v58  ;;  %4176 = vmatmul.bf16.vlgmr.msra.gmra.mxu1 %v1268_v0  ;;  %v6700_v58 = vld [vmem:[%s7227_s9 + $0x8b0] sm:$0xff] }
 0x11e   : > { %4220 = vmatpush.bf16.msrb.mxu1 %v6661_v59  ;;  %4189 = vmatmul.bf16.vlgmr.msra.gmra.mxu2 %v1269_v63  ;;  %v6708_v59 = vld [vmem:[%s7227_s9 + $0x8f0] sm:$0xff]  ;;  %v6707_v63 = vld [vmem:[%s7227_s9 + $0x8e8] sm:$0xff] }
 0x11f   : > { %4233 = vmatpush.bf16.msrb.mxu2 %v6669_v60  ;;  %4202 = vmatmul.bf16.vlgmr.msra.gmra.mxu3 %v1270_v1  ;;  %v6683_v60 = vld [vmem:[%s7227_s9 + $0x828] sm:$0xff] }
 0x120   : > { %4246 = vmatpush.bf16.msrb.mxu3 %v6677_v61  ;;  %v6691_v61 = vld [vmem:[%s7227_s9 + $0x868] sm:$0xff] }
 0x121   : > { %4208 = vmatpush.bf16.msrb.mxu0 %v6652_v2  ;;  %v3982_v22 = vpop.f32.mrf.mxu2  ;;  %v3958_v25 = vpop.f32.mrf.mxu0  ;;  %v6682_v2 = vld [vmem:[%s7227_s9 + $0x820] sm:$0xff] }
 0x122   : > { %4221 = vmatpush.bf16.msrb.mxu1 %v6660_v3  ;;  %v3983_v23 = vadd.f32 %v3982_v22, %v3970_v17  ;;  %v3995_v24 = vpop.f32.mrf.mxu3  ;;  %v3971_v29 = vpop.f32.mrf.mxu1  ;;  %v6690_v3 = vld [vmem:[%s7227_s9 + $0x860] sm:$0xff]  ;;  %v6680_v17 = vld [vmem:[%s7227_s9 + $0x810] sm:$0xff]  ;;  %v6679_v22 = vld [vmem:[%s7227_s9 + $0x808] sm:$0xff] }
 0x123   : > { %4234 = vmatpush.bf16.msrb.mxu2 %v6668_v4  ;;  %v6703_v25 = vld [vmem:[%s7227_s9 + $0x8c8] sm:$0xff] }
 0x124   : > { %4247 = vmatpush.bf16.msrb.mxu3 %v6676_v5  ;;  %v7513_v26 = vadd.f32 %v3995_v24, %v3983_v23  ;;  %v6698_v5 = vld [vmem:[%s7227_s9 + $0x8a0] sm:$0xff]  ;;  %v6687_v23 = vld [vmem:[%s7227_s9 + $0x848] sm:$0xff] }
 0x125   : > { %4209 = vmatpush.bf16.msrb.mxu0 %v6651_v6  ;;  %v6706_v6 = vld [vmem:[%s7227_s9 + $0x8e0] sm:$0xff]  ;;  %v6695_v24 = vld [vmem:[%s7227_s9 + $0x888] sm:$0xff] }
 0x126   : > { %4222 = vmatpush.bf16.msrb.mxu1 %v6659_v7 }
 0x127   : > { %4235 = vmatpush.bf16.msrb.mxu2 %v6667_v8  ;;  %v6681_v8 = vld [vmem:[%s7227_s9 + $0x818] sm:$0xff] }
 0x128   : > { %4248 = vmatpush.bf16.msrb.mxu3 %v6675_v9  ;;  %v6689_v9 = vld [vmem:[%s7227_s9 + $0x858] sm:$0xff] }
 0x129   : > { %4210 = vmatpush.bf16.msrb.mxu0 %v6650_v12  ;;  %v3984_v38 = vpop.f32.mrf.mxu2 }
 0x12a   : > { %4223 = vmatpush.bf16.msrb.mxu1 %v6658_v13  ;;  %v3997_v39 = vpop.f32.mrf.mxu3  ;;  %v6717_v38 = vld [vmem:[%s7227_s9 + $0x938] sm:$0xff] }
 0x12b   : > { %4236 = vmatpush.bf16.msrb.mxu2 %v6666_v15  ;;  %v6725_v39 = vld [vmem:[%s7227_s9 + $0x978] sm:$0xff] }
 0x12c   : > { %4249 = vmatpush.bf16.msrb.mxu3 %v6674_v16 }
 0x12d   : > { %4211 = vmatpush.bf16.msrb.mxu0 %v6649_v18  ;;  %v6688_v18 = vld [vmem:[%s7227_s9 + $0x850] sm:$0xff] }
 0x12e   : > { %4224 = vmatpush.bf16.msrb.mxu1 %v6657_v19 }
 0x12f   : > { %4237 = vmatpush.bf16.msrb.mxu2 %v6665_v20  ;;  %v6696_v20 = vld [vmem:[%s7227_s9 + $0x890] sm:$0xff] }
 0x130   : > { %4250 = vmatpush.bf16.msrb.mxu3 %v6673_v21  ;;  %v6704_v21 = vld [vmem:[%s7227_s9 + $0x8d0] sm:$0xff] }
 0x131   : > { %4212 = vmatpush.bf16.msrb.mxu0 %v6648_v27  ;;  %v324_v27 = vld [vmem:[%s7245_s6 + $0x88] sm:$0xff] }
 0x132   : > { %4225 = vmatpush.bf16.msrb.mxu1 %v6656_v28  ;;  %v1226_v37 = vunpack.c.h.b16 %v324_v27 }
 0x133   : > { %4238 = vmatpush.bf16.msrb.mxu2 %v6664_v30  ;;  %v6678_v30 = vld [vmem:[%s7227_s9 + $0x800] sm:$0xff] }
 0x134   : > { %4251 = vmatpush.bf16.msrb.mxu3 %v6672_v31  ;;  %v6686_v31 = vld [vmem:[%s7227_s9 + $0x840] sm:$0xff] }
 0x135   : > { %4213 = vmatpush.bf16.msrb.mxu0 %v6647_v32 }
 0x136   : > { %4226 = vmatpush.bf16.msrb.mxu1 %v6655_v33  ;;  %v1225_v33 = vunpack.c.l.b16 %v324_v27 }
 0x137   : > { %4239 = vmatpush.bf16.msrb.mxu2 %v6663_v34  ;;  %v6694_v34 = vld [vmem:[%s7227_s9 + $0x880] sm:$0xff] }
 0x138   : > { %4252 = vmatpush.bf16.msrb.mxu3 %v6671_v35  ;;  %v6702_v35 = vld [vmem:[%s7227_s9 + $0x8c0] sm:$0xff]  ;;  %v1277_v43 = vpack.c.b16 %v1225_v33, %v1225_v33 }
 0x139   : > { %4214 = vmatpush.bf16.msrb.mxu0 %v6646_v40  ;;  %v4008_v0 = vpop.f32.mrf.mxu0  ;;  %v6733_v40 = vld [vmem:[%s7227_s9 + $0x9b8] sm:$0xff] }
 0x13a   : > { %4227 = vmatpush.bf16.msrb.mxu1 %v6654_v41  ;;  %v4009_v1 = vadd.f32 %v4008_v0, %v7513_v26  ;;  %v4021_v4 = vpop.f32.mrf.mxu1  ;;  %v323_v26 = vld [vmem:[%s7245_s6 + $0x80] sm:$0xff] }
 0x13b   : > { %4240 = vmatpush.bf16.msrb.mxu2 %v6662_v44  ;;  %v1223_v32 = vunpack.c.l.b16 %v323_v26  ;;  %v1224_v36 = vunpack.c.h.b16 %v323_v26  ;;  %v6741_v41 = vld [vmem:[%s7227_s9 + $0x9f8] sm:$0xff] }
 0x13c   : > { %4253 = vmatpush.bf16.msrb.mxu3 %v6670_v45  ;;  %4215 = vmatmul.bf16.vlgmr.msrb.gmra.mxu0 %v1271_v52  ;;  %v4022_v7 = vadd.f32 %v4021_v4, %v4009_v1  ;;  %v1278_v45 = vpack.c.b16 %v1226_v37, %v1226_v37  ;;  %v6731_v52 = vld [vmem:[%s7227_s9 + $0x9a8] sm:$0xff]  ;;  %v6729_v0 = vld [vmem:[%s7227_s9 + $0x998] sm:$0xff]  ;;  %v6756_v37 = vld [vmem:[%s7227_s9 + $0xa70] sm:$0xff] }
 0x13d   : > { %4259 = vmatpush.bf16.msra.mxu0 %v6685_v48  ;;  %4228 = vmatmul.bf16.vlgmr.msrb.gmra.mxu1 %v1272_v54  ;;  %v1275_v42 = vpack.c.b16 %v1223_v32, %v1223_v32  ;;  %v1276_v44 = vpack.c.b16 %v1224_v36, %v1224_v36  ;;  %v6732_v48 = vld [vmem:[%s7227_s9 + $0x9b0] sm:$0xff]  ;;  %v6737_v1 = vld [vmem:[%s7227_s9 + $0x9d8] sm:$0xff] }
 0x13e   : > { %4272 = vmatpush.bf16.msra.mxu1 %v6693_v49  ;;  %4241 = vmatmul.bf16.vlgmr.msrb.gmra.mxu2 %v1273_v53  ;;  %v6740_v49 = vld [vmem:[%s7227_s9 + $0x9f0] sm:$0xff]  ;;  %v6739_v53 = vld [vmem:[%s7227_s9 + $0x9e8] sm:$0xff] }
 0x13f   : > { %4285 = vmatpush.bf16.msra.mxu2 %v6701_v50  ;;  %4254 = vmatmul.bf16.vlgmr.msrb.gmra.mxu3 %v1274_v55  ;;  %v6715_v50 = vld [vmem:[%s7227_s9 + $0x928] sm:$0xff]  ;;  %v6748_v36 = vld [vmem:[%s7227_s9 + $0xa30] sm:$0xff] }
 0x140   : > { %4298 = vmatpush.bf16.msra.mxu3 %v6709_v51  ;;  %v6723_v51 = vld [vmem:[%s7227_s9 + $0x968] sm:$0xff] }
 0x141   : > { %4260 = vmatpush.bf16.msra.mxu0 %v6684_v56  ;;  %v4034_v12 = vpop.f32.mrf.mxu2  ;;  %v4010_v15 = vpop.f32.mrf.mxu0  ;;  %v6714_v56 = vld [vmem:[%s7227_s9 + $0x920] sm:$0xff] }
 0x142   : > { %4273 = vmatpush.bf16.msra.mxu1 %v6692_v57  ;;  %v4035_v13 = vadd.f32 %v4034_v12, %v4022_v7  ;;  %v4047_v14 = vpop.f32.mrf.mxu3  ;;  %v4023_v19 = vpop.f32.mrf.mxu1  ;;  %v6722_v57 = vld [vmem:[%s7227_s9 + $0x960] sm:$0xff]  ;;  %v6712_v7 = vld [vmem:[%s7227_s9 + $0x910] sm:$0xff]  ;;  %v6711_v12 = vld [vmem:[%s7227_s9 + $0x908] sm:$0xff] }
 0x143   : > { %4286 = vmatpush.bf16.msra.mxu2 %v6700_v58  ;;  %v6735_v15 = vld [vmem:[%s7227_s9 + $0x9c8] sm:$0xff] }
 0x144   : > { %4299 = vmatpush.bf16.msra.mxu3 %v6708_v59  ;;  %v7550_v16 = vadd.f32 %v4047_v14, %v4035_v13  ;;  %v6730_v59 = vld [vmem:[%s7227_s9 + $0x9a0] sm:$0xff]  ;;  %v6719_v13 = vld [vmem:[%s7227_s9 + $0x948] sm:$0xff] }
 0x145   : > { %4261 = vmatpush.bf16.msra.mxu0 %v6683_v60  ;;  %v6738_v60 = vld [vmem:[%s7227_s9 + $0x9e0] sm:$0xff]  ;;  %v6727_v14 = vld [vmem:[%s7227_s9 + $0x988] sm:$0xff] }
 0x146   : > { %4274 = vmatpush.bf16.msra.mxu1 %v6691_v61 }
 0x147   : > { %4287 = vmatpush.bf16.msra.mxu2 %v6699_v62  ;;  %v6713_v62 = vld [vmem:[%s7227_s9 + $0x918] sm:$0xff] }
 0x148   : > { %4300 = vmatpush.bf16.msra.mxu3 %v6707_v63  ;;  %v6721_v63 = vld [vmem:[%s7227_s9 + $0x958] sm:$0xff] }
 0x149   : > { %4262 = vmatpush.bf16.msra.mxu0 %v6682_v2  ;;  %v4036_v28 = vpop.f32.mrf.mxu2 }
 0x14a   : > { %4275 = vmatpush.bf16.msra.mxu1 %v6690_v3  ;;  %v4049_v29 = vpop.f32.mrf.mxu3  ;;  %v6749_v28 = vld [vmem:[%s7227_s9 + $0xa38] sm:$0xff] }
 0x14b   : > { %4288 = vmatpush.bf16.msra.mxu2 %v6698_v5  ;;  %v6757_v29 = vld [vmem:[%s7227_s9 + $0xa78] sm:$0xff] }
 0x14c   : > { %4301 = vmatpush.bf16.msra.mxu3 %v6706_v6 }
 0x14d   : > { %4263 = vmatpush.bf16.msra.mxu0 %v6681_v8  ;;  %v6720_v8 = vld [vmem:[%s7227_s9 + $0x950] sm:$0xff] }
 0x14e   : > { %4276 = vmatpush.bf16.msra.mxu1 %v6689_v9 }
 0x14f   : > { %4289 = vmatpush.bf16.msra.mxu2 %v6697_v10  ;;  %v6728_v10 = vld [vmem:[%s7227_s9 + $0x990] sm:$0xff] }
 0x150   : > { %4302 = vmatpush.bf16.msra.mxu3 %v6705_v11  ;;  %v6736_v11 = vld [vmem:[%s7227_s9 + $0x9d0] sm:$0xff] }
 0x151   : > { %4264 = vmatpush.bf16.msra.mxu0 %v6680_v17  ;;  %v326_v17 = vld [vmem:[%s7245_s6 + $0x98] sm:$0xff] }
 0x152   : > { %4277 = vmatpush.bf16.msra.mxu1 %v6688_v18  ;;  %v1230_v27 = vunpack.c.h.b16 %v326_v17 }
 0x153   : > { %4290 = vmatpush.bf16.msra.mxu2 %v6696_v20  ;;  %v6710_v20 = vld [vmem:[%s7227_s9 + $0x900] sm:$0xff] }
 0x154   : > { %4303 = vmatpush.bf16.msra.mxu3 %v6704_v21  ;;  %v6718_v21 = vld [vmem:[%s7227_s9 + $0x940] sm:$0xff] }
 0x155   : > { %4265 = vmatpush.bf16.msra.mxu0 %v6679_v22 }
 0x156   : > { %4278 = vmatpush.bf16.msra.mxu1 %v6687_v23  ;;  %v1229_v23 = vunpack.c.l.b16 %v326_v17 }
 0x157   : > { %4291 = vmatpush.bf16.msra.mxu2 %v6695_v24  ;;  %v6726_v24 = vld [vmem:[%s7227_s9 + $0x980] sm:$0xff] }
 0x158   : > { %4304 = vmatpush.bf16.msra.mxu3 %v6703_v25  ;;  %v6734_v25 = vld [vmem:[%s7227_s9 + $0x9c0] sm:$0xff]  ;;  %v1281_v33 = vpack.c.b16 %v1229_v23, %v1229_v23 }
 0x159   : > { %4266 = vmatpush.bf16.msra.mxu0 %v6678_v30  ;;  %v4060_v54 = vpop.f32.mrf.mxu0  ;;  %v6765_v30 = vld [vmem:[%s7227_s9 + $0xab8] sm:$0xff] }
 0x15a   : > { %4279 = vmatpush.bf16.msra.mxu1 %v6686_v31  ;;  %v4061_v55 = vadd.f32 %v4060_v54, %v7550_v16  ;;  %v4073_v58 = vpop.f32.mrf.mxu1  ;;  %v325_v16 = vld [vmem:[%s7245_s6 + $0x90] sm:$0xff]  ;;  %v6773_v31 = vld [vmem:[%s7227_s9 + $0xaf8] sm:$0xff] }
 0x15b   : > { %4292 = vmatpush.bf16.msra.mxu2 %v6694_v34  ;;  %v1227_v22 = vunpack.c.l.b16 %v325_v16  ;;  %v1228_v26 = vunpack.c.h.b16 %v325_v16  ;;  %v6761_v54 = vld [vmem:[%s7227_s9 + $0xa98] sm:$0xff] }
 0x15c   : > { %4305 = vmatpush.bf16.msra.mxu3 %v6702_v35  ;;  %4267 = vmatmul.bf16.vlgmr.msra.gmra.mxu0 %v1275_v42  ;;  %v4074_v61 = vadd.f32 %v4073_v58, %v4061_v55  ;;  %v1282_v35 = vpack.c.b16 %v1230_v27, %v1230_v27  ;;  %v6763_v42 = vld [vmem:[%s7227_s9 + $0xaa8] sm:$0xff]  ;;  %v6769_v55 = vld [vmem:[%s7227_s9 + $0xad8] sm:$0xff]  ;;  %v6788_v27 = vld [vmem:[%s7227_s9 + $0xb70] sm:$0xff] }
 0x15d   : > { %4311 = vmatpush.bf16.msrb.mxu0 %v6717_v38  ;;  %4280 = vmatmul.bf16.vlgmr.msra.gmra.mxu1 %v1276_v44  ;;  %v1279_v32 = vpack.c.b16 %v1227_v22, %v1227_v22  ;;  %v1280_v34 = vpack.c.b16 %v1228_v26, %v1228_v26  ;;  %v6764_v38 = vld [vmem:[%s7227_s9 + $0xab0] sm:$0xff] }
 0x15e   : > { %4324 = vmatpush.bf16.msrb.mxu1 %v6725_v39  ;;  %4293 = vmatmul.bf16.vlgmr.msra.gmra.mxu2 %v1277_v43  ;;  %v6772_v39 = vld [vmem:[%s7227_s9 + $0xaf0] sm:$0xff]  ;;  %v6771_v43 = vld [vmem:[%s7227_s9 + $0xae8] sm:$0xff] }
 0x15f   : > { %4337 = vmatpush.bf16.msrb.mxu2 %v6733_v40  ;;  %4306 = vmatmul.bf16.vlgmr.msra.gmra.mxu3 %v1278_v45  ;;  %v6747_v40 = vld [vmem:[%s7227_s9 + $0xa28] sm:$0xff]  ;;  %v6780_v26 = vld [vmem:[%s7227_s9 + $0xb30] sm:$0xff] }
 0x160   : > { %4350 = vmatpush.bf16.msrb.mxu3 %v6741_v41  ;;  %v6755_v41 = vld [vmem:[%s7227_s9 + $0xa68] sm:$0xff] }
 0x161   : > { %4312 = vmatpush.bf16.msrb.mxu0 %v6716_v46  ;;  %v4086_v2 = vpop.f32.mrf.mxu2  ;;  %v4062_v5 = vpop.f32.mrf.mxu0  ;;  %v6746_v46 = vld [vmem:[%s7227_s9 + $0xa20] sm:$0xff] }
 0x162   : > { %4325 = vmatpush.bf16.msrb.mxu1 %v6724_v47  ;;  %v4087_v3 = vadd.f32 %v4086_v2, %v4074_v61  ;;  %v4099_v4 = vpop.f32.mrf.mxu3  ;;  %v4075_v9 = vpop.f32.mrf.mxu1  ;;  %v6754_v47 = vld [vmem:[%s7227_s9 + $0xa60] sm:$0xff]  ;;  %v6744_v61 = vld [vmem:[%s7227_s9 + $0xa10] sm:$0xff]  ;;  %v6743_v2 = vld [vmem:[%s7227_s9 + $0xa08] sm:$0xff] }
 0x163   : > { %4338 = vmatpush.bf16.msrb.mxu2 %v6732_v48  ;;  %v6767_v5 = vld [vmem:[%s7227_s9 + $0xac8] sm:$0xff] }
 0x164   : > { %4351 = vmatpush.bf16.msrb.mxu3 %v6740_v49  ;;  %v7587_v6 = vadd.f32 %v4099_v4, %v4087_v3  ;;  %v6762_v49 = vld [vmem:[%s7227_s9 + $0xaa0] sm:$0xff]  ;;  %v6751_v3 = vld [vmem:[%s7227_s9 + $0xa48] sm:$0xff] }
 0x165   : > { %4313 = vmatpush.bf16.msrb.mxu0 %v6715_v50  ;;  %v6770_v50 = vld [vmem:[%s7227_s9 + $0xae0] sm:$0xff]  ;;  %v6759_v4 = vld [vmem:[%s7227_s9 + $0xa88] sm:$0xff] }
 0x166   : > { %4326 = vmatpush.bf16.msrb.mxu1 %v6723_v51 }
 0x167   : > { %4339 = vmatpush.bf16.msrb.mxu2 %v6731_v52  ;;  %v6745_v52 = vld [vmem:[%s7227_s9 + $0xa18] sm:$0xff] }
 0x168   : > { %4352 = vmatpush.bf16.msrb.mxu3 %v6739_v53  ;;  %v6753_v53 = vld [vmem:[%s7227_s9 + $0xa58] sm:$0xff] }
 0x169   : > { %4314 = vmatpush.bf16.msrb.mxu0 %v6714_v56  ;;  %v4088_v18 = vpop.f32.mrf.mxu2 }
 0x16a   : > { %4327 = vmatpush.bf16.msrb.mxu1 %v6722_v57  ;;  %v4101_v19 = vpop.f32.mrf.mxu3  ;;  %v6781_v18 = vld [vmem:[%s7227_s9 + $0xb38] sm:$0xff] }
 0x16b   : > { %4340 = vmatpush.bf16.msrb.mxu2 %v6730_v59  ;;  %v6789_v19 = vld [vmem:[%s7227_s9 + $0xb78] sm:$0xff] }
 0x16c   : > { %4353 = vmatpush.bf16.msrb.mxu3 %v6738_v60 }
 0x16d   : > { %4315 = vmatpush.bf16.msrb.mxu0 %v6713_v62  ;;  %v6752_v62 = vld [vmem:[%s7227_s9 + $0xa50] sm:$0xff] }
 0x16e   : > { %4328 = vmatpush.bf16.msrb.mxu1 %v6721_v63 }
 0x16f   : > { %4341 = vmatpush.bf16.msrb.mxu2 %v6729_v0  ;;  %v6760_v0 = vld [vmem:[%s7227_s9 + $0xa90] sm:$0xff] }
 0x170   : > { %4354 = vmatpush.bf16.msrb.mxu3 %v6737_v1  ;;  %v6768_v1 = vld [vmem:[%s7227_s9 + $0xad0] sm:$0xff] }
 0x171   : > { %4316 = vmatpush.bf16.msrb.mxu0 %v6712_v7  ;;  %v328_v7 = vld [vmem:[%s7245_s6 + $0xa8] sm:$0xff] }
 0x172   : > { %4329 = vmatpush.bf16.msrb.mxu1 %v6720_v8  ;;  %v1234_v17 = vunpack.c.h.b16 %v328_v7 }
 0x173   : > { %4342 = vmatpush.bf16.msrb.mxu2 %v6728_v10  ;;  %v6742_v10 = vld [vmem:[%s7227_s9 + $0xa00] sm:$0xff] }
 0x174   : > { %4355 = vmatpush.bf16.msrb.mxu3 %v6736_v11  ;;  %v6750_v11 = vld [vmem:[%s7227_s9 + $0xa40] sm:$0xff] }
 0x175   : > { %4317 = vmatpush.bf16.msrb.mxu0 %v6711_v12 }
 0x176   : > { %4330 = vmatpush.bf16.msrb.mxu1 %v6719_v13  ;;  %v1233_v13 = vunpack.c.l.b16 %v328_v7 }
 0x177   : > { %4343 = vmatpush.bf16.msrb.mxu2 %v6727_v14  ;;  %v6758_v14 = vld [vmem:[%s7227_s9 + $0xa80] sm:$0xff] }
 0x178   : > { %4356 = vmatpush.bf16.msrb.mxu3 %v6735_v15  ;;  %v6766_v15 = vld [vmem:[%s7227_s9 + $0xac0] sm:$0xff]  ;;  %v1285_v23 = vpack.c.b16 %v1233_v13, %v1233_v13 }
 0x179   : > { %4318 = vmatpush.bf16.msrb.mxu0 %v6710_v20  ;;  %v4112_v44 = vpop.f32.mrf.mxu0  ;;  %v6797_v20 = vld [vmem:[%s7227_s9 + $0xbb8] sm:$0xff] }
 0x17a   : > { %4331 = vmatpush.bf16.msrb.mxu1 %v6718_v21  ;;  %v4113_v45 = vadd.f32 %v4112_v44, %v7587_v6  ;;  %v4125_v48 = vpop.f32.mrf.mxu1  ;;  %v327_v6 = vld [vmem:[%s7245_s6 + $0xa0] sm:$0xff] }
 0x17b   : > { %4344 = vmatpush.bf16.msrb.mxu2 %v6726_v24  ;;  %v1231_v12 = vunpack.c.l.b16 %v327_v6  ;;  %v1232_v16 = vunpack.c.h.b16 %v327_v6  ;;  %v6805_v21 = vld [vmem:[%s7227_s9 + $0xbf8] sm:$0xff] }
 0x17c   : > { %4357 = vmatpush.bf16.msrb.mxu3 %v6734_v25  ;;  %4319 = vmatmul.bf16.vlgmr.msrb.gmra.mxu0 %v1279_v32  ;;  %v4126_v51 = vadd.f32 %v4125_v48, %v4113_v45  ;;  %v1286_v25 = vpack.c.b16 %v1234_v17, %v1234_v17  ;;  %v6795_v32 = vld [vmem:[%s7227_s9 + $0xba8] sm:$0xff]  ;;  %v6793_v44 = vld [vmem:[%s7227_s9 + $0xb98] sm:$0xff]  ;;  %v6820_v17 = vld [vmem:[%s7227_s9 + $0xc70] sm:$0xff] }
 0x17d   : > { %4363 = vmatpush.bf16.msra.mxu0 %v6749_v28  ;;  %4332 = vmatmul.bf16.vlgmr.msrb.gmra.mxu1 %v1280_v34  ;;  %v1283_v22 = vpack.c.b16 %v1231_v12, %v1231_v12  ;;  %v1284_v24 = vpack.c.b16 %v1232_v16, %v1232_v16  ;;  %v6796_v28 = vld [vmem:[%s7227_s9 + $0xbb0] sm:$0xff]  ;;  %v6801_v45 = vld [vmem:[%s7227_s9 + $0xbd8] sm:$0xff] }
 0x17e   : > { %4376 = vmatpush.bf16.msra.mxu1 %v6757_v29  ;;  %4345 = vmatmul.bf16.vlgmr.msrb.gmra.mxu2 %v1281_v33  ;;  %v6804_v29 = vld [vmem:[%s7227_s9 + $0xbf0] sm:$0xff]  ;;  %v6803_v33 = vld [vmem:[%s7227_s9 + $0xbe8] sm:$0xff] }
 0x17f   : > { %4389 = vmatpush.bf16.msra.mxu2 %v6765_v30  ;;  %4358 = vmatmul.bf16.vlgmr.msrb.gmra.mxu3 %v1282_v35  ;;  %v6779_v30 = vld [vmem:[%s7227_s9 + $0xb28] sm:$0xff]  ;;  %v6812_v16 = vld [vmem:[%s7227_s9 + $0xc30] sm:$0xff] }
 0x180   : > { %4402 = vmatpush.bf16.msra.mxu3 %v6773_v31  ;;  %v6787_v31 = vld [vmem:[%s7227_s9 + $0xb68] sm:$0xff] }
 0x181   : > { %4364 = vmatpush.bf16.msra.mxu0 %v6748_v36  ;;  %v4138_v56 = vpop.f32.mrf.mxu2  ;;  %v4114_v59 = vpop.f32.mrf.mxu0  ;;  %v6778_v36 = vld [vmem:[%s7227_s9 + $0xb20] sm:$0xff] }
 0x182   : > { %4377 = vmatpush.bf16.msra.mxu1 %v6756_v37  ;;  %v4139_v57 = vadd.f32 %v4138_v56, %v4126_v51  ;;  %v4151_v58 = vpop.f32.mrf.mxu3  ;;  %v4127_v63 = vpop.f32.mrf.mxu1  ;;  %v6786_v37 = vld [vmem:[%s7227_s9 + $0xb60] sm:$0xff]  ;;  %v6776_v51 = vld [vmem:[%s7227_s9 + $0xb10] sm:$0xff]  ;;  %v6775_v56 = vld [vmem:[%s7227_s9 + $0xb08] sm:$0xff] }
 0x183   : > { %4390 = vmatpush.bf16.msra.mxu2 %v6764_v38  ;;  %v6799_v59 = vld [vmem:[%s7227_s9 + $0xbc8] sm:$0xff] }
 0x184   : > { %4403 = vmatpush.bf16.msra.mxu3 %v6772_v39  ;;  %v7624_v60 = vadd.f32 %v4151_v58, %v4139_v57  ;;  %v6794_v39 = vld [vmem:[%s7227_s9 + $0xba0] sm:$0xff]  ;;  %v6783_v57 = vld [vmem:[%s7227_s9 + $0xb48] sm:$0xff] }
 0x185   : > { %4365 = vmatpush.bf16.msra.mxu0 %v6747_v40  ;;  %v6802_v40 = vld [vmem:[%s7227_s9 + $0xbe0] sm:$0xff]  ;;  %v6791_v58 = vld [vmem:[%s7227_s9 + $0xb88] sm:$0xff] }
 0x186   : > { %4378 = vmatpush.bf16.msra.mxu1 %v6755_v41 }
 0x187   : > { %4391 = vmatpush.bf16.msra.mxu2 %v6763_v42  ;;  %v6777_v42 = vld [vmem:[%s7227_s9 + $0xb18] sm:$0xff] }
 0x188   : > { %4404 = vmatpush.bf16.msra.mxu3 %v6771_v43  ;;  %v6785_v43 = vld [vmem:[%s7227_s9 + $0xb58] sm:$0xff] }
 0x189   : > { %4366 = vmatpush.bf16.msra.mxu0 %v6746_v46  ;;  %v4140_v8 = vpop.f32.mrf.mxu2 }
 0x18a   : > { %4379 = vmatpush.bf16.msra.mxu1 %v6754_v47  ;;  %v4153_v9 = vpop.f32.mrf.mxu3  ;;  %v6813_v8 = vld [vmem:[%s7227_s9 + $0xc38] sm:$0xff] }
 0x18b   : > { %4392 = vmatpush.bf16.msra.mxu2 %v6762_v49  ;;  %v6821_v9 = vld [vmem:[%s7227_s9 + $0xc78] sm:$0xff] }
 0x18c   : > { %4405 = vmatpush.bf16.msra.mxu3 %v6770_v50 }
 0x18d   : > { %4367 = vmatpush.bf16.msra.mxu0 %v6745_v52  ;;  %v6784_v52 = vld [vmem:[%s7227_s9 + $0xb50] sm:$0xff] }
 0x18e   : > { %4380 = vmatpush.bf16.msra.mxu1 %v6753_v53 }
 0x18f   : > { %4393 = vmatpush.bf16.msra.mxu2 %v6761_v54  ;;  %v6792_v54 = vld [vmem:[%s7227_s9 + $0xb90] sm:$0xff] }
 0x190   : > { %4406 = vmatpush.bf16.msra.mxu3 %v6769_v55  ;;  %v6800_v55 = vld [vmem:[%s7227_s9 + $0xbd0] sm:$0xff] }
 0x191   : > { %4368 = vmatpush.bf16.msra.mxu0 %v6744_v61  ;;  %v330_v61 = vld [vmem:[%s7245_s6 + $0xb8] sm:$0xff] }
 0x192   : > { %4381 = vmatpush.bf16.msra.mxu1 %v6752_v62  ;;  %v1238_v7 = vunpack.c.h.b16 %v330_v61 }
 0x193   : > { %4394 = vmatpush.bf16.msra.mxu2 %v6760_v0  ;;  %v6774_v0 = vld [vmem:[%s7227_s9 + $0xb00] sm:$0xff] }
 0x194   : > { %4407 = vmatpush.bf16.msra.mxu3 %v6768_v1  ;;  %v6782_v1 = vld [vmem:[%s7227_s9 + $0xb40] sm:$0xff] }
 0x195   : > { %4369 = vmatpush.bf16.msra.mxu0 %v6743_v2 }
 0x196   : > { %4382 = vmatpush.bf16.msra.mxu1 %v6751_v3  ;;  %v1237_v3 = vunpack.c.l.b16 %v330_v61  ;;  %v6830_v61 = vld [vmem:[%s7227_s9 + $0xcc0] sm:$0xff] }
 0x197   : > { %4395 = vmatpush.bf16.msra.mxu2 %v6759_v4  ;;  %v6790_v4 = vld [vmem:[%s7227_s9 + $0xb80] sm:$0xff] }
 0x198   : > { %4408 = vmatpush.bf16.msra.mxu3 %v6767_v5  ;;  %v6798_v5 = vld [vmem:[%s7227_s9 + $0xbc0] sm:$0xff]  ;;  %v1289_v13 = vpack.c.b16 %v1237_v3, %v1237_v3 }
 0x199   : > { %4370 = vmatpush.bf16.msra.mxu0 %v6742_v10  ;;  %v4164_v34 = vpop.f32.mrf.mxu0  ;;  %v6829_v10 = vld [vmem:[%s7227_s9 + $0xcb8] sm:$0xff] }
 0x19a   : > { %4383 = vmatpush.bf16.msra.mxu1 %v6750_v11  ;;  %v4165_v35 = vadd.f32 %v4164_v34, %v7624_v60  ;;  %v4177_v38 = vpop.f32.mrf.mxu1  ;;  %v329_v60 = vld [vmem:[%s7245_s6 + $0xb0] sm:$0xff]  ;;  %v6837_v11 = vld [vmem:[%s7227_s9 + $0xcf8] sm:$0xff] }
 0x19b   : > { %4396 = vmatpush.bf16.msra.mxu2 %v6758_v14  ;;  %v1235_v2 = vunpack.c.l.b16 %v329_v60  ;;  %v1236_v6 = vunpack.c.h.b16 %v329_v60  ;;  %v6825_v34 = vld [vmem:[%s7227_s9 + $0xc98] sm:$0xff]  ;;  %v6822_v60 = vld [vmem:[%s7227_s9 + $0xc80] sm:$0xff] }
 0x19c   : > { %4409 = vmatpush.bf16.msra.mxu3 %v6766_v15  ;;  %4371 = vmatmul.bf16.vlgmr.msra.gmra.mxu0 %v1283_v22  ;;  %v4178_v41 = vadd.f32 %v4177_v38, %v4165_v35  ;;  %v1290_v15 = vpack.c.b16 %v1238_v7, %v1238_v7  ;;  %v6827_v22 = vld [vmem:[%s7227_s9 + $0xca8] sm:$0xff]  ;;  %v6833_v35 = vld [vmem:[%s7227_s9 + $0xcd8] sm:$0xff] }
 0x19d   : > { %4415 = vmatpush.bf16.msrb.mxu0 %v6781_v18  ;;  %4384 = vmatmul.bf16.vlgmr.msra.gmra.mxu1 %v1284_v24  ;;  %v1287_v12 = vpack.c.b16 %v1235_v2, %v1235_v2  ;;  %v1288_v14 = vpack.c.b16 %v1236_v6, %v1236_v6  ;;  %v6828_v18 = vld [vmem:[%s7227_s9 + $0xcb0] sm:$0xff] }
 0x19e   : > { %4428 = vmatpush.bf16.msrb.mxu1 %v6789_v19  ;;  %4397 = vmatmul.bf16.vlgmr.msra.gmra.mxu2 %v1285_v23  ;;  %v6836_v19 = vld [vmem:[%s7227_s9 + $0xcf0] sm:$0xff]  ;;  %v6835_v23 = vld [vmem:[%s7227_s9 + $0xce8] sm:$0xff] }
 0x19f   : > { %4441 = vmatpush.bf16.msrb.mxu2 %v6797_v20  ;;  %4410 = vmatmul.bf16.vlgmr.msra.gmra.mxu3 %v1286_v25  ;;  %v6811_v20 = vld [vmem:[%s7227_s9 + $0xc28] sm:$0xff] }
 0x1a0   : > { %4454 = vmatpush.bf16.msrb.mxu3 %v6805_v21  ;;  %v6819_v21 = vld [vmem:[%s7227_s9 + $0xc68] sm:$0xff] }
 0x1a1   : > { %4416 = vmatpush.bf16.msrb.mxu0 %v6780_v26  ;;  %v4190_v46 = vpop.f32.mrf.mxu2  ;;  %v4166_v49 = vpop.f32.mrf.mxu0  ;;  %v6810_v26 = vld [vmem:[%s7227_s9 + $0xc20] sm:$0xff] }
 0x1a2   : > { %4429 = vmatpush.bf16.msrb.mxu1 %v6788_v27  ;;  %v4191_v47 = vadd.f32 %v4190_v46, %v4178_v41  ;;  %v4203_v48 = vpop.f32.mrf.mxu3  ;;  %v4179_v53 = vpop.f32.mrf.mxu1  ;;  %v6818_v27 = vld [vmem:[%s7227_s9 + $0xc60] sm:$0xff]  ;;  %v6808_v41 = vld [vmem:[%s7227_s9 + $0xc10] sm:$0xff]  ;;  %v6807_v46 = vld [vmem:[%s7227_s9 + $0xc08] sm:$0xff] }
 0x1a3   : > { %4442 = vmatpush.bf16.msrb.mxu2 %v6796_v28  ;;  %v6823_v49 = vld [vmem:[%s7227_s9 + $0xc88] sm:$0xff] }
 0x1a4   : > { %4455 = vmatpush.bf16.msrb.mxu3 %v6804_v29  ;;  %v7661_v50 = vadd.f32 %v4203_v48, %v4191_v47  ;;  %v6826_v29 = vld [vmem:[%s7227_s9 + $0xca0] sm:$0xff]  ;;  %v6815_v47 = vld [vmem:[%s7227_s9 + $0xc48] sm:$0xff]  ;;  %v331_v48 = vld [vmem:[%s7245_s6 + $0xc0] sm:$0xff] }
 0x1a5   : > { %4417 = vmatpush.bf16.msrb.mxu0 %v6779_v30  ;;  %v6834_v30 = vld [vmem:[%s7227_s9 + $0xce0] sm:$0xff] }
 0x1a6   : > { %4430 = vmatpush.bf16.msrb.mxu1 %v6787_v31 }
 0x1a7   : > { %4443 = vmatpush.bf16.msrb.mxu2 %v6795_v32  ;;  %v6809_v32 = vld [vmem:[%s7227_s9 + $0xc18] sm:$0xff] }
 0x1a8   : > { %4456 = vmatpush.bf16.msrb.mxu3 %v6803_v33  ;;  %v6817_v33 = vld [vmem:[%s7227_s9 + $0xc58] sm:$0xff] }
 0x1a9   : > { %4418 = vmatpush.bf16.msrb.mxu0 %v6778_v36  ;;  %v4192_v62 = vpop.f32.mrf.mxu2 }
 0x1aa   : > { %4431 = vmatpush.bf16.msrb.mxu1 %v6786_v37  ;;  %v4205_v63 = vpop.f32.mrf.mxu3 }
 0x1ab   : > { %4444 = vmatpush.bf16.msrb.mxu2 %v6794_v39 }
 0x1ac   : > { %4457 = vmatpush.bf16.msrb.mxu3 %v6802_v40 }
 0x1ad   : > { %4419 = vmatpush.bf16.msrb.mxu0 %v6777_v42  ;;  %v6816_v42 = vld [vmem:[%s7227_s9 + $0xc50] sm:$0xff] }
 0x1ae   : > { %4432 = vmatpush.bf16.msrb.mxu1 %v6785_v43 }
 0x1af   : > { %4445 = vmatpush.bf16.msrb.mxu2 %v6793_v44  ;;  %v6824_v44 = vld [vmem:[%s7227_s9 + $0xc90] sm:$0xff] }
 0x1b0   : > { %4458 = vmatpush.bf16.msrb.mxu3 %v6801_v45  ;;  %v6832_v45 = vld [vmem:[%s7227_s9 + $0xcd0] sm:$0xff] }
 0x1b1   : > { %4420 = vmatpush.bf16.msrb.mxu0 %v6776_v51  ;;  %v332_v51 = vld [vmem:[%s7245_s6 + $0xc8] sm:$0xff] }
 0x1b2   : > { %4433 = vmatpush.bf16.msrb.mxu1 %v6784_v52 }
 0x1b3   : > { %4446 = vmatpush.bf16.msrb.mxu2 %v6792_v54  ;;  %v1239_v54 = vunpack.c.l.b16 %v331_v48 }
 0x1b4   : > { %4459 = vmatpush.bf16.msrb.mxu3 %v6800_v55  ;;  %v1240_v55 = vunpack.c.h.b16 %v331_v48 }
 0x1b5   : > { %4421 = vmatpush.bf16.msrb.mxu0 %v6775_v56  ;;  %v6806_v56 = vld [vmem:[%s7227_s9 + $0xc00] sm:$0xff]  ;;  %v1291_v62 = vpack.c.b16 %v1239_v54, %v1239_v54 }
 0x1b6   : > { %4434 = vmatpush.bf16.msrb.mxu1 %v6783_v57  ;;  %v6814_v57 = vld [vmem:[%s7227_s9 + $0xc40] sm:$0xff]  ;;  %v1292_v63 = vpack.c.b16 %v1240_v55, %v1240_v55 }
 0x1b7   : > { %4447 = vmatpush.bf16.msrb.mxu2 %v6791_v58  ;;  %v1241_v58 = vunpack.c.l.b16 %v332_v51 }
 0x1b8   : > { %4460 = vmatpush.bf16.msrb.mxu3 %v6799_v59  ;;  %v1242_v59 = vunpack.c.h.b16 %v332_v51 }
 0x1b9   : > { %4422 = vmatpush.bf16.msrb.mxu0 %v6774_v0  ;;  %v4216_v24 = vpop.f32.mrf.mxu0  ;;  %v1293_v0 = vpack.c.b16 %v1241_v58, %v1241_v58 }
 0x1ba   : > { %4435 = vmatpush.bf16.msrb.mxu1 %v6782_v1  ;;  %v4217_v25 = vadd.f32 %v4216_v24, %v7661_v50  ;;  %v4229_v28 = vpop.f32.mrf.mxu1  ;;  %v6831_v50 = vld [vmem:[%s7227_s9 + $0xcc8] sm:$0xff]  ;;  %v1294_v1 = vpack.c.b16 %v1242_v59, %v1242_v59  ;;  %v306_v59 = vld [vmem:[#allocation2] sm:$0xff] }
 0x1bb   : > { %4448 = vmatpush.bf16.msrb.mxu2 %v6790_v4 }
 0x1bc   : > { %4461 = vmatpush.bf16.msrb.mxu3 %v6798_v5  ;;  %4423 = vmatmul.bf16.vlgmr.msrb.gmra.mxu0 %v1287_v12  ;;  %v4230_v31 = vadd.f32 %v4229_v28, %v4217_v25 }
 0x1bd   : > { %4467 = vmatpush.bf16.msra.mxu0 %v6813_v8  ;;  %4436 = vmatmul.bf16.vlgmr.msrb.gmra.mxu1 %v1288_v14 }
 0x1be   : > { %4480 = vmatpush.bf16.msra.mxu1 %v6821_v9  ;;  %4449 = vmatmul.bf16.vlgmr.msrb.gmra.mxu2 %v1289_v13 }
 0x1bf   : > { %4493 = vmatpush.bf16.msra.mxu2 %v6829_v10  ;;  %4462 = vmatmul.bf16.vlgmr.msrb.gmra.mxu3 %v1290_v15 }
 0x1c0   : > { %4506 = vmatpush.bf16.msra.mxu3 %v6837_v11 }
 0x1c1   : > { %4468 = vmatpush.bf16.msra.mxu0 %v6812_v16  ;;  %v4242_v36 = vpop.f32.mrf.mxu2  ;;  %v4218_v39 = vpop.f32.mrf.mxu0 }
 0x1c2   : > { %4481 = vmatpush.bf16.msra.mxu1 %v6820_v17  ;;  %v4243_v37 = vadd.f32 %v4242_v36, %v4230_v31  ;;  %v4255_v38 = vpop.f32.mrf.mxu3  ;;  %v4231_v43 = vpop.f32.mrf.mxu1 }
 0x1c3   : > { %4494 = vmatpush.bf16.msra.mxu2 %v6828_v18 }
 0x1c4   : > { %4507 = vmatpush.bf16.msra.mxu3 %v6836_v19  ;;  %v4256_v40 = vadd.f32 %v4255_v38, %v4243_v37 }
 0x1c5   : > { %4469 = vmatpush.bf16.msra.mxu0 %v6811_v20 }
 0x1c6   : > { %4482 = vmatpush.bf16.msra.mxu1 %v6819_v21 }
 0x1c7   : > { %4495 = vmatpush.bf16.msra.mxu2 %v6827_v22 }
 0x1c8   : > { %4508 = vmatpush.bf16.msra.mxu3 %v6835_v23 }
 0x1c9   : > { %4470 = vmatpush.bf16.msra.mxu0 %v6810_v26  ;;  %v4244_v52 = vpop.f32.mrf.mxu2 }
 0x1ca   : > { %4483 = vmatpush.bf16.msra.mxu1 %v6818_v27  ;;  %v4257_v53 = vpop.f32.mrf.mxu3 }
 0x1cb   : > { %4496 = vmatpush.bf16.msra.mxu2 %v6826_v29 }
 0x1cc   : > { %4509 = vmatpush.bf16.msra.mxu3 %v6834_v30 }
 0x1cd   : > { %4471 = vmatpush.bf16.msra.mxu0 %v6809_v32 }
 0x1ce   : > { %4484 = vmatpush.bf16.msra.mxu1 %v6817_v33 }
 0x1cf   : > { %4497 = vmatpush.bf16.msra.mxu2 %v6825_v34 }
 0x1d0   : > { %4510 = vmatpush.bf16.msra.mxu3 %v6833_v35 }
 0x1d1   : > { %4472 = vmatpush.bf16.msra.mxu0 %v6808_v41 }
 0x1d2   : > { %4485 = vmatpush.bf16.msra.mxu1 %v6816_v42 }
 0x1d3   : > { %4498 = vmatpush.bf16.msra.mxu2 %v6824_v44 }
 0x1d4   : > { %4511 = vmatpush.bf16.msra.mxu3 %v6832_v45 }
 0x1d5   : > { %4473 = vmatpush.bf16.msra.mxu0 %v6807_v46 }
 0x1d6   : > { %4486 = vmatpush.bf16.msra.mxu1 %v6815_v47 }
 0x1d7   : > { %4499 = vmatpush.bf16.msra.mxu2 %v6823_v49 }
 0x1d8   : > { %4512 = vmatpush.bf16.msra.mxu3 %v6831_v50 }
 0x1d9   : > { %4474 = vmatpush.bf16.msra.mxu0 %v6806_v56  ;;  %v4268_v2 = vpop.f32.mrf.mxu0 }
 0x1da   : > { %4487 = vmatpush.bf16.msra.mxu1 %v6814_v57  ;;  %v4269_v3 = vadd.f32 %v4268_v2, %v4256_v40  ;;  %v4281_v4 = vpop.f32.mrf.mxu1 }
 0x1db   : > { %4500 = vmatpush.bf16.msra.mxu2 %v6822_v60 }
 0x1dc   : > { %4513 = vmatpush.bf16.msra.mxu3 %v6830_v61  ;;  %4475 = vmatmul.bf16.vlgmr.msra.gmra.mxu0 %v1291_v62  ;;  %v4282_v5 = vadd.f32 %v4281_v4, %v4269_v3 }
 0x1dd   : > { %4488 = vmatmul.bf16.vlgmr.msra.gmra.mxu1 %v1292_v63 }
 0x1de   : > { %4501 = vmatmul.bf16.vlgmr.msra.gmra.mxu2 %v1293_v0 }
 0x1df   : > { %4514 = vmatmul.bf16.vlgmr.msra.gmra.mxu3 %v1294_v1 }
 0x1e1   : > { %v4294_v6 = vpop.f32.mrf.mxu2  ;;  %v4270_v9 = vpop.f32.mrf.mxu0 }
 0x1e2   : > { %v4295_v7 = vadd.f32 %v4294_v6, %v4282_v5  ;;  %v4307_v8 = vpop.f32.mrf.mxu3  ;;  %v4283_v11 = vpop.f32.mrf.mxu1 }
 0x1e4   : > { %v4308_v10 = vadd.f32 %v4307_v8, %v4295_v7 }
 0x1e9   : > { %v4296_v12 = vpop.f32.mrf.mxu2 }
 0x1ea   : > { %v4309_v13 = vpop.f32.mrf.mxu3 }
 0x1f9   : > { %v4320_v14 = vpop.f32.mrf.mxu0 }
 0x1fa   : > { %v4321_v15 = vadd.f32 %v4320_v14, %v4308_v10  ;;  %v4333_v16 = vpop.f32.mrf.mxu1 }
 0x1fc   : > { %v4334_v17 = vadd.f32 %v4333_v16, %v4321_v15 }
 0x201   : > { %v4346_v18 = vpop.f32.mrf.mxu2  ;;  %v4322_v21 = vpop.f32.mrf.mxu0 }
 0x202   : > { %v4347_v19 = vadd.f32 %v4346_v18, %v4334_v17  ;;  %v4359_v20 = vpop.f32.mrf.mxu3  ;;  %v4335_v23 = vpop.f32.mrf.mxu1 }
 0x204   : > { %v4360_v22 = vadd.f32 %v4359_v20, %v4347_v19 }
 0x209   : > { %v4348_v24 = vpop.f32.mrf.mxu2 }
 0x20a   : > { %v4361_v25 = vpop.f32.mrf.mxu3 }
 0x219   : > { %v4372_v26 = vpop.f32.mrf.mxu0 }
 0x21a   : > { %v4385_v27 = vpop.f32.mrf.mxu1  ;;  %v4373_v37 = vadd.f32 %v4372_v26, %v4360_v22 }
 0x21c   : > { %v4386_v41 = vadd.f32 %v4385_v27, %v4373_v37 }
 0x221   : > { %v4398_v28 = vpop.f32.mrf.mxu2  ;;  %v4374_v30 = vpop.f32.mrf.mxu0 }
 0x222   : > { %v4411_v29 = vpop.f32.mrf.mxu3  ;;  %v4387_v31 = vpop.f32.mrf.mxu1  ;;  %v4399_v42 = vadd.f32 %v4398_v28, %v4386_v41 }
 0x224   : > { %v4412_v45 = vadd.f32 %v4411_v29, %v4399_v42 }
 0x229   : > { %v4400_v32 = vpop.f32.mrf.mxu2 }
 0x22a   : > { %v4413_v33 = vpop.f32.mrf.mxu3 }
 0x239   : > { %v4424_v34 = vpop.f32.mrf.mxu0 }
 0x23a   : > { %v4437_v35 = vpop.f32.mrf.mxu1  ;;  %v4425_v46 = vadd.f32 %v4424_v34, %v4412_v45 }
 0x23c   : > { %v4438_v47 = vadd.f32 %v4437_v35, %v4425_v46 }
 0x241   : > { %v4450_v36 = vpop.f32.mrf.mxu2  ;;  %v4426_v39 = vpop.f32.mrf.mxu0 }
 0x242   : > { %v4463_v38 = vpop.f32.mrf.mxu3  ;;  %v4439_v40 = vpop.f32.mrf.mxu1  ;;  %v4451_v48 = vadd.f32 %v4450_v36, %v4438_v47 }
 0x244   : > { %v4464_v49 = vadd.f32 %v4463_v38, %v4451_v48 }
 0x249   : > { %v4452_v43 = vpop.f32.mrf.mxu2 }
 0x24a   : > { %v4465_v44 = vpop.f32.mrf.mxu3 }
 0x259   : > { %v4476_v50 = vpop.f32.mrf.mxu0 }
 0x25a   : > { %v4489_v51 = vpop.f32.mrf.mxu1  ;;  %v4477_v52 = vadd.f32 %v4476_v50, %v4464_v49 }
 0x25c   : > { %v4490_v53 = vadd.f32 %v4489_v51, %v4477_v52 }
 0x261   : > { %v4502_v54 = vpop.f32.mrf.mxu2  ;;  %v4478_v57 = vpop.f32.mrf.mxu0 }
 0x262   : > { %v4515_v55 = vpop.f32.mrf.mxu3  ;;  %v4503_v56 = vadd.f32 %v4502_v54, %v4490_v53  ;;  %v4491_v58 = vpop.f32.mrf.mxu1 }
 0x264   : > { %v4516_v60 = vadd.f32 %v4515_v55, %v4503_v56 }
 0x266   : > { %v4519_v61 = vadd.f32 %v4516_v60, %v306_v59  ;;  %4524 = sbr.rel (%p6386_p1) target bundleno = 1035 (0x40b), region = 64 }
 0x268   : > { %4520 = vst [vmem:[#allocation2] sm:$0xff] %v4519_v61 }
 0x269   : > { %v4504_v62 = vpop.f32.mrf.mxu2 }
 0x26a   : > { %v4517_v63 = vpop.f32.mrf.mxu3 }
 0x26b   : > { %v6845_v0 = vld [vmem:[#allocation7 + $0x38] sm:$0xff]  ;;  %v6844_v1 = vld [vmem:[#allocation7 + $0x30] sm:$0xff]  ;;  %v6843_v2 = vld [vmem:[#allocation7 + $0x28] sm:$0xff]  ;;  %v4614_v13 = vlaneseq }
 0x26c   : > { %4601 = vmatpush.bf16.msra.mxu0 %v6845_v0  ;;  %v6842_v3 = vld [vmem:[#allocation7 + $0x20] sm:$0xff]  ;;  %v6841_v4 = vld [vmem:[#allocation7 + $0x18] sm:$0xff]  ;;  %v6840_v6 = vld [vmem:[#allocation7 + $0x10] sm:$0xff] }
 0x26d   : > { %v6921_v5 = vld [vmem:[#allocation5] ss:$0 sm:$0xff]  ;;  %v6839_v9 = vld [vmem:[#allocation7 + $0x8] sm:$0xff]  ;;  %v6838_v11 = vld [vmem:[#allocation7] sm:$0xff]  ;;  %v4615_v14 = vand.u32 127, %v4614_v13 }
 0x26e   : > { %v6922_v15 = vld [vmem:[#allocation8] ss:$0 sm:$0xff] }
 0x26f   : > { %v4525_v7 = vld [vmem:[#allocation2] sm:$0xff]  ;;  %vm4616_vm0 = vcmp.lt.s32.totalorder %v4615_v14, 10 }
 0x270   : > { %4602 = vmatpush.bf16.msra.mxu0 %v6844_v1  ;;  %v4530_v8 = vadd.f32 %v6921_v5, %v4525_v7 }
 0x272   : > { %v4531_v10 = vmax.f32 %v4530_v8, 0.0 }
 0x274   : > { %4603 = vmatpush.bf16.msra.mxu0 %v6843_v2  ;;  %v4532_v12 = vpack.c.bf16 %v4531_v10, %v4531_v10 }
 0x278   : > { %4604 = vmatpush.bf16.msra.mxu0 %v6842_v3 }
 0x27c   : > { %4605 = vmatpush.bf16.msra.mxu0 %v6841_v4 }
 0x280   : > { %4606 = vmatpush.bf16.msra.mxu0 %v6840_v6 }
 0x284   : > { %4607 = vmatpush.bf16.msra.mxu0 %v6839_v9 }
 0x288   : > { %4608 = vmatpush.bf16.msra.mxu0 %v6838_v11 }
 0x28b   : > { %4609 = vmatmul.bf16.vlgmr.msra.gmra.mxu0 %v4532_v12 }
 0x308   : > { %v4610_v16 = vpop.f32.mrf.mxu0 }
 0x309   : > { %v4611_v17 = vadd.f32 %v6922_v15, %v4610_v16 }
 0x30b   : > { %v4617_v18 = vsel %vm4616_vm0, %v4611_v17, -1e+30 }
 0x30c   : > { %4618 = vmax.xlane.f32.xlu0 %v4617_v18 }
 0x310   : > { %v4612_v19 = vpop.f32.mrf.mxu0 }
 0x37f   : > { %v4619_v20 = vpop.xlane.xlu0 %4618 }
 0x380   : > { %v4620_v21 = vsub.f32 %v4617_v18, %v4619_v20 }
 0x382   : > { %v4621_v22 = vmul.f32 1.442695, %v4620_v21 }
 0x384   : > { %6923 = vpow2.f32 %v4621_v22 }
 0x38a   : > { %v6924_v23 = vpop.eup %6923 }
 0x38b   : > { %4623 = vadd.xlane.f32.xlu0 %v6924_v23 }
 0x3fe   : > { %v4624_v24 = vpop.xlane.xlu0 %4623 }
 0x3ff   : > { %6925 = vlog2.f32 %v4624_v24 }
 0x405   : > { %v6926_v25 = vpop.eup %6925 }
 0x406   : > { %v4626_v26 = vmul.f32 0.6931472, %v6926_v25 }
 0x408   : > { %v4627_v27 = vsub.f32 %v4620_v21, %v4626_v26 }
 0x40a   : > { %4628 = vst [vmem:[%s7734_s5] sm:$0xff] %v4627_v27 }
 0x40b PF: > { %s7739_s13 = smov %s7190_s18  ;;  %p17_p4 = scmp.ge.s32.totalorder %s7190_s18, 4  }
 0x40c   : > { %s7740_s18 = smov %s7081_s19  ;;  %s7741_s19 = smov %s7085_s20 }
 0x40d   : > { %s7742_s20 = smov %s7200_s26  ;;  %s7743_s21 = smov %s7739_s13 }
 0x40e   :  { %19 = sbr.rel (!%p17_p4) target bundleno = 5 (0x5), region = 99 }
 0x413   :  { %4640 = vsyncpa [#allocation4], 1 }
 0x414   :  { %4642 = vsyncpa [#allocation4 + $0x1], 1 }
 0x415   :  { %4643 = vsyncpa [#allocation6], 1 }
 0x416   :  { %4644 = vsyncpa [#allocation9], 1 }

// kernel: mnist_base_net_forward.2
= control target key start
LH: loop header
LB: loop body
LE: loop exit
PB: predicated region body
PF: predicated region fallthrough
CT: control target
= control target key end

     0   :  { %12 = vsyncpa [#allocation4], 0  ;;  %s10299_s0 = inlined_call_operand.vmem [shape: bf16[2,960,32], index: 0, kind: input, shape index: {}]   ;;  %s10300_s1 = inlined_call_operand.hbm [shape: bf16[32,128], index: 1, kind: input, shape index: {}]   ;;  %s10301_s2 = inlined_call_operand.hbm [shape: f32[1,128], index: 2, kind: input, shape index: {}]   ;;  %s10302_s3 = inlined_call_operand.hbm [shape: bf16[3,128,128], index: 3, kind: input, shape index: {}]   ;;  %s10303_s4 = inlined_call_operand.hbm [shape: f32[1,128], index: 4, kind: input, shape index: {}]   ;;  %s10304_s5 = inlined_call_operand.hbm [shape: bf16[104,864], index: 5, kind: input, shape index: {}]   ;;  %s10305_s6 = inlined_call_operand.hbm [shape: bf16[104,864], index: 6, kind: input, shape index: {}]   ;;  %s10306_s7 = inlined_call_operand.vmem [shape: bf16[2,104,128], index: 7, kind: output, shape index: {}]  }
   0x1   :  { %13 = vsyncpa [#allocation6], 0 }
   0x2   :  { %14 = vsyncpa [#allocation9], 0 }
   0x3   :  { %15 = vsyncpa [#allocation12], 0  ;;  %s8371_s24 = smov 0  }
   0x4 LB: > { %s230_s27 = sshll.u32 %s10301_s2, 4  ;;  %s8380_s28 = sadd.s32 4294967295, %s8318_s24   ;;  %s8318_s24 = sphi %s8371_s24, %s21_s24   ;;  %s231_s27 = int_to_ptr.hbm [resolvable:$true] %s230_s27 }
   0x5   : > { %p5841_p0 = scmp.ge.s32.totalorder %s8318_s24, 1  ;;  %p204_p1 = scmp.lt.s32.totalorder %s8318_s24, 3 }
   0x6   : > { %p7809_p2 = scmp.eq.s32.totalorder %s8380_s28, 0  ;;  %s8320_s30 = smov [#allocation5]  }
   0x7   : > { %p8385_p3 = pnand %p5841_p0, %p204_p1  ;;  %s232_s8 = sshll.u32 %s8320_s30, 4  ;;  %s233_s8 = int_to_ptr.vmem [resolvable:$true] %s232_s8 }
   0x8   : > { %s256_s11 = sshll.u32 %s10303_s4, 4  ;;  %s215_s14 = sshll.u32 %s10300_s1, 4  ;;  %s257_s11 = int_to_ptr.hbm [resolvable:$true] %s256_s11  ;;  %s216_s14 = int_to_ptr.hbm [resolvable:$true] %s215_s14 }
   0x9   : > { %p7790_p4 = pneg %p8385_p3  ;;  %s8321_s16 = smov [#allocation8]  }
   0xa   : > { %s258_s17 = sshll.u32 %s8321_s16, 4  ;;  %s8322_s18 = smov [#allocation3]   ;;  %s259_s17 = int_to_ptr.vmem [resolvable:$true] %s258_s17 }
   0xb   : > { %p8399_p5 = pnand %p7809_p2, %p7790_p4  ;;  %s217_s19 = sshll.u32 %s8322_s18, 4  ;;  %s218_s19 = int_to_ptr.vmem [resolvable:$true] %s217_s19 }
   0xc   : > { %s8323_s20 = smov 64   ;;  %s8324_s21 = smov 4  }
   0xd   : > { %7796 = dma.hbm_to_vmem [thread:$0]  (!%p8399_p5), %s231_s27, 16, %s233_s8, [#allocation6]  }
   0xe   : > { %7802 = dma.hbm_to_vmem [thread:$0]  (!%p8399_p5), %s257_s11, 16, %s259_s17, [#allocation9]  }
   0xf   : > { %7793 = dma.hbm_to_vmem [thread:$0]  (!%p8399_p5), %s216_s14, 256, %s218_s19, [#allocation4], %s8323_s20, %s8323_s20, %s8324_s21  }
  0x10   : > { %s241_s25 = sshll.u32 %s10302_s3, 4  ;;  %s8325_s26 = smov [#allocation7]   ;;  %s242_s25 = int_to_ptr.hbm [resolvable:$true] %s241_s25 }
  0x11   : > { %s243_s30 = sshll.u32 %s8325_s26, 4  ;;  %s267_s9 = sshll.u32 %s10304_s5, 4  ;;  %s244_s30 = int_to_ptr.vmem [resolvable:$true] %s243_s30  ;;  %s268_s9 = int_to_ptr.hbm [resolvable:$true] %s267_s9 }
  0x12   : > { %7799 = dma.hbm_to_vmem [thread:$0]  (!%p8399_p5), %s242_s25, 3072, %s244_s30, [#allocation6], %s8323_s20, %s8323_s20, %s8324_s21  }
  0x13   : > { %s8326_s10 = smov [#allocation10]   ;;  %s8327_s12 = smov 448  }
  0x14   : > { %s269_s11 = sshll.u32 %s8326_s10, 4  ;;  %s8328_s13 = smov 28   ;;  %s270_s11 = int_to_ptr.vmem [resolvable:$true] %s269_s11 }
  0x15   : > { %7805 = dma.hbm_to_vmem [thread:$0]  (!%p8399_p5), %s268_s9, 5824, %s270_s11, [#allocation9], %s8327_s12, %s8327_s12, %s8328_s13  }
  0x16   : > { %s281_s17 = sshll.u32 %s10305_s6, 4  ;;  %s8329_s18 = smov [#allocation11]   ;;  %s282_s17 = int_to_ptr.hbm [resolvable:$true] %s281_s17 }
  0x17   : > { %s283_s19 = sshll.u32 %s8329_s18, 4  ;;  %307 = sbr.rel (%p8385_p3) target bundleno = 2700 (0xa8c), region = 48  ;;  %s284_s19 = int_to_ptr.vmem [resolvable:$true] %s283_s19 }
  0x18   : > { %7808 = dma.hbm_to_vmem [thread:$0]  (!%p8399_p5), %s282_s17, 5824, %s284_s19, [#allocation12], %s8327_s12, %s8327_s12, %s8328_s13  }
  0x1c   : > { %8301 = dma.done.wait (%p7809_p2), [#allocation4], 256  }
  0x1d   : > { %8303 = vsyncadd (%p7809_p2), [#allocation4], 4294967040 }
  0x1e   : > { %8305 = dma.done.wait (%p7809_p2), [#allocation6], 3088  }
  0x1f   : > { %8307 = vsyncadd (%p7809_p2), [#allocation6], 4294964208 }
  0x20   : > { %8309 = dma.done.wait (%p7809_p2), [#allocation9], 5840  }
  0x21   : > { %8311 = vsyncadd (%p7809_p2), [#allocation9], 4294961456 }
  0x22   : > { %8313 = dma.done.wait (%p7809_p2), [#allocation12], 5824  }
  0x23   : > { %8315 = vsyncadd (%p7809_p2), [#allocation12], 4294961472  ;;  %p365_p6 = scmp.lt.s32.totalorder %s8380_s28, 1  ;;  %v7131_v0 = vld [vmem:[#allocation3 + $0x8] sm:$0xff]  ;;  %v7130_v1 = vld [vmem:[#allocation3] sm:$0xff]  ;;  %vm816_vm0 = vcmask 261120  }
  0x24   : > { %1003 = vmatpush.bf16.msra.mxu0 %v7131_v0  ;;  %v7195_v8 = vld [vmem:[#allocation7 + $0x38] sm:$0xff]  ;;  %v7194_v9 = vld [vmem:[#allocation7 + $0x30] sm:$0xff]  ;;  %v8465_v11 = vld [vmem:[#allocation7 + $0x28] sm:$0xff]  ;;  %s8330_s22 = smov 64   ;;  %vm4751_vm1 = vcmask 785408  }
  0x25   : > { %s10638_s28 = smov (!%p365_p6, %s8380_s28), 1  ;;  %2548 = vmatpush.bf16.msra.mxu2 %v7195_v8  ;;  %v8469_v12 = vld [vmem:[#allocation7 + $0x20] sm:$0xff]  ;;  %v8472_v13 = vld [vmem:[#allocation7 + $0x18] sm:$0xff]  ;;  %v8475_v14 = vld [vmem:[#allocation7 + $0x10] sm:$0xff] }
  0x26   : > { %s7764_s29 = smul.u32 480, %s10638_s28  ;;  %v8479_v16 = vld [vmem:[#allocation7 + $0x8] sm:$0xff]  ;;  %v8483_v17 = vld [vmem:[#allocation7] sm:$0xff]  ;;  %v7205_v18 = vld [vmem:[#allocation7 + $0x78] sm:$0xff] }
  0x27   : > { %2199 = vmatpush.bf16.msra.mxu1 %v7205_v18  ;;  %7748 = vmatpush.bf16.msra.mxu3 %v7205_v18  ;;  %v7204_v19 = vld [vmem:[#allocation7 + $0x70] sm:$0xff]  ;;  %v7203_v21 = vld [vmem:[#allocation7 + $0x68] sm:$0xff]  ;;  %v8487_v23 = vld [vmem:[#allocation5] ss:$0 sm:$0xff]  ;;  %s7765_s23 = smul.u32 52, %s10638_s28 }
  0x28   : > { %s8450_s21 = scalar_lea.vmem %s10299_s0, %s7764_s29  ;;  %1004 = vmatpush.bf16.msra.mxu0 %v7130_v1  ;;  %v7202_v24 = vld [vmem:[#allocation7 + $0x60] sm:$0xff]  ;;  %v7201_v26 = vld [vmem:[#allocation7 + $0x58] sm:$0xff]  ;;  %v7200_v31 = vld [vmem:[#allocation7 + $0x50] sm:$0xff] }
  0x29   : > { %v7070_v2 = vld [vmem:[%s8450_s21] sm:$0xff]  ;;  %v7071_v3 = vld [vmem:[%s8450_s21 + $0x8] sm:$0xff]  ;;  %v7072_v4 = vld [vmem:[%s8450_s21 + $0x10] sm:$0xff]  ;;  %2549 = vmatpush.bf16.msra.mxu2 %v7194_v9  ;;  %s10241_s30 = scalar_lea.vmem %s10306_s7, %s7765_s23 }
  0x2a   : > { %v7073_v5 = vld [vmem:[%s8450_s21 + $0x18] sm:$0xff]  ;;  %v7074_v6 = vld [vmem:[%s8450_s21 + $0x20] sm:$0xff]  ;;  %v7075_v7 = vld [vmem:[%s8450_s21 + $0x28] sm:$0xff] }
  0x2b   : > { %6106 = vmatmul.msk.bf16.vlgmr.msra.gmra.mxu0 %vm816_vm0, %v7070_v2  ;;  %v7076_v10 = vld [vmem:[%s8450_s21 + $0x30] sm:$0xff]  ;;  %v7077_v15 = vld [vmem:[%s8450_s21 + $0x38] sm:$0xff]  ;;  %2200 = vmatpush.bf16.msra.mxu1 %v7204_v19  ;;  %v7078_v20 = vld [vmem:[%s8450_s21 + $0x40] sm:$0xff] }
  0x2c   : > { %7749 = vmatpush.bf16.msra.mxu3 %v7204_v19  ;;  %v7079_v33 = vld [vmem:[%s8450_s21 + $0x48] sm:$0xff]  ;;  %v7199_v34 = vld [vmem:[#allocation7 + $0x48] sm:$0xff]  ;;  %v7198_v36 = vld [vmem:[#allocation7 + $0x40] sm:$0xff] }
  0x2d   : > { %2550 = vmatpush.bf16.msra.mxu2 %v8465_v11  ;;  %v7080_v44 = vld [vmem:[%s8450_s21 + $0x50] sm:$0xff]  ;;  %v7081_v53 = vld [vmem:[%s8450_s21 + $0x58] sm:$0xff]  ;;  %v7082_v62 = vld [vmem:[%s8450_s21 + $0x60] sm:$0xff] }
  0x2f   : > { %2201 = vmatpush.bf16.msra.mxu1 %v7203_v21 }
  0x30   : > { %7750 = vmatpush.bf16.msra.mxu3 %v7203_v21 }
  0x31   : > { %2551 = vmatpush.bf16.msra.mxu2 %v8469_v12 }
  0x33   : > { %2202 = vmatpush.bf16.msra.mxu1 %v7202_v24 }
  0x34   : > { %7751 = vmatpush.bf16.msra.mxu3 %v7202_v24 }
  0x35   : > { %2552 = vmatpush.bf16.msra.mxu2 %v8472_v13 }
  0x37   : > { %2203 = vmatpush.bf16.msra.mxu1 %v7201_v26 }
  0x38   : > { %7752 = vmatpush.bf16.msra.mxu3 %v7201_v26  ;;  %v7085_v26 = vld [vmem:[%s8450_s21 + $0x78] sm:$0xff] }
  0x39   : > { %2553 = vmatpush.bf16.msra.mxu2 %v8475_v14 }
  0x3b   : > { %6107 = vmatmul.msk.bf16.gmra.mxu0 %vm816_vm0, %v7071_v3  ;;  %2204 = vmatpush.bf16.msra.mxu1 %v7200_v31 }
  0x3c   : > { %7753 = vmatpush.bf16.msra.mxu3 %v7200_v31 }
  0x3d   : > { %2554 = vmatpush.bf16.msra.mxu2 %v8479_v16 }
  0x3f   : > { %2205 = vmatpush.bf16.msra.mxu1 %v7199_v34 }
  0x40   : > { %7754 = vmatpush.bf16.msra.mxu3 %v7199_v34 }
  0x41   : > { %2555 = vmatpush.bf16.msra.mxu2 %v8483_v17 }
  0x43   : > { %2206 = vmatpush.bf16.msra.mxu1 %v7198_v36 }
  0x44   : > { %7755 = vmatpush.bf16.msra.mxu3 %v7198_v36 }
  0x48   : > { %7756 = vmatpush.bf16.msrb.mxu3 %v7195_v8 }
  0x4b   : > { %6108 = vmatmul.msk.bf16.gmra.mxu0 %vm816_vm0, %v7072_v4 }
  0x4c   : > { %7757 = vmatpush.bf16.msrb.mxu3 %v7194_v9 }
  0x50   : > { %7758 = vmatpush.bf16.msrb.mxu3 %v8465_v11 }
  0x54   : > { %7759 = vmatpush.bf16.msrb.mxu3 %v8469_v12 }
  0x58   : > { %7760 = vmatpush.bf16.msrb.mxu3 %v8472_v13 }
  0x5b   : > { %6109 = vmatmul.msk.bf16.gmra.mxu0 %vm816_vm0, %v7073_v5 }
  0x5c   : > { %7761 = vmatpush.bf16.msrb.mxu3 %v8475_v14 }
  0x60   : > { %7762 = vmatpush.bf16.msrb.mxu3 %v8479_v16  ;;  %v7084_v16 = vld [vmem:[%s8450_s21 + $0x70] sm:$0xff] }
  0x64   : > { %7763 = vmatpush.bf16.msrb.mxu3 %v8483_v17 }
  0x6b   : > { %6110 = vmatmul.msk.bf16.gmra.mxu0 %vm816_vm0, %v7074_v6 }
  0x7b   : > { %6111 = vmatmul.msk.bf16.gmra.mxu0 %vm816_vm0, %v7075_v7  ;;  %v7083_v7 = vld [vmem:[%s8450_s21 + $0x68] sm:$0xff] }
  0x8b   : > { %6112 = vmatmul.msk.bf16.gmra.mxu0 %vm816_vm0, %v7076_v10 }
  0x9b   : > { %6113 = vmatmul.msk.bf16.gmra.mxu0 %vm816_vm0, %v7077_v15 }
  0xa8   : > { %v1006_v22 = vpop.f32.mrf.mxu0 }
  0xa9   : > { %v1007_v25 = vadd.f32 %v8487_v23, %v1006_v22 }
  0xab   : > { %6114 = vmatmul.msk.bf16.gmra.mxu0 %vm816_vm0, %v7078_v20  ;;  %v1306_v29 = vmax.f32 %v1007_v25, 0.0 }
  0xb0   : > { %v1008_v27 = vpop.f32.mrf.mxu0 }
  0xb1   : > { %v1009_v28 = vadd.f32 %v8487_v23, %v1008_v27 }
  0xb3   : > { %v1307_v30 = vmax.f32 %v1009_v28, 0.0 }
  0xb5   : > { %v7357_v32 = vpack.c.bf16 %v1307_v30, %v1306_v29 }
  0xb7   : > { %7358 = vst [vmem:[#allocation2 + $0xb0] sm:$0xff] %v7357_v32  }
  0xb8   : > { %v1011_v35 = vpop.f32.mrf.mxu0 }
  0xb9   : > { %v1012_v38 = vadd.f32 %v8487_v23, %v1011_v35  ;;  %v7086_v35 = vld [vmem:[%s8450_s21 + $0x80] sm:$0xff] }
  0xbb   : > { %6115 = vmatmul.msk.bf16.gmra.mxu0 %vm816_vm0, %v7079_v33  ;;  %v1308_v41 = vmax.f32 %v1012_v38, 0.0 }
  0xbe   : > { %v7132_v37 = vld [vmem:[#allocation2 + $0xb0] sm:$0xff] }
  0xbf   : > { %2556 = vmatmul.bf16.vlgmr.msra.gmra.mxu2 %v7132_v37 }
  0xc0   : > { %v1013_v39 = vpop.f32.mrf.mxu0 }
  0xc1   : > { %v1014_v40 = vadd.f32 %v8487_v23, %v1013_v39 }
  0xc3   : > { %v1309_v42 = vmax.f32 %v1014_v40, 0.0 }
  0xc5   : > { %v7362_v43 = vpack.c.bf16 %v1309_v42, %v1308_v41 }
  0xc7   : > { %7684 = vst [vmem:[#allocation2 + $0x1b0] sm:$0xff] %v7362_v43  }
  0xc8   : > { %v1016_v45 = vpop.f32.mrf.mxu0 }
  0xc9   : > { %v1017_v47 = vadd.f32 %v8487_v23, %v1016_v45 }
  0xcb   : > { %6116 = vmatmul.msk.bf16.gmra.mxu0 %vm816_vm0, %v7080_v44  ;;  %v1310_v50 = vmax.f32 %v1017_v47, 0.0  ;;  %v7087_v44 = vld [vmem:[%s8450_s21 + $0x88] sm:$0xff] }
  0xce   : > { %v7133_v46 = vld [vmem:[#allocation2 + $0x1b0] sm:$0xff] }
  0xcf   : > { %2561 = vmatmul.bf16.gmra.mxu2 %v7133_v46 }
  0xd0   : > { %v1018_v48 = vpop.f32.mrf.mxu0 }
  0xd1   : > { %v1019_v49 = vadd.f32 %v8487_v23, %v1018_v48 }
  0xd3   : > { %v1311_v51 = vmax.f32 %v1019_v49, 0.0 }
  0xd5   : > { %v7367_v52 = vpack.c.bf16 %v1311_v51, %v1310_v50 }
  0xd7   : > { %7685 = vst [vmem:[#allocation2 + $0xd8] sm:$0xff] %v7367_v52  }
  0xd8   : > { %v1021_v54 = vpop.f32.mrf.mxu0 }
  0xd9   : > { %v1022_v56 = vadd.f32 %v8487_v23, %v1021_v54  ;;  %v7088_v54 = vld [vmem:[%s8450_s21 + $0x90] sm:$0xff] }
  0xdb   : > { %6117 = vmatmul.msk.bf16.gmra.mxu0 %vm816_vm0, %v7081_v53  ;;  %v1312_v59 = vmax.f32 %v1022_v56, 0.0 }
  0xde   : > { %v7134_v55 = vld [vmem:[#allocation2 + $0xd8] sm:$0xff] }
  0xdf   : > { %2207 = vmatmul.bf16.vlgmr.msra.gmra.mxu1 %v7134_v55  ;;  %2566 = vmatmul.bf16.gmra.mxu2 %v7134_v55 }
  0xe0   : > { %v1023_v57 = vpop.f32.mrf.mxu0 }
  0xe1   : > { %v1024_v58 = vadd.f32 %v8487_v23, %v1023_v57 }
  0xe3   : > { %v1313_v60 = vmax.f32 %v1024_v58, 0.0 }
  0xe5   : > { %v7372_v61 = vpack.c.bf16 %v1313_v60, %v1312_v59 }
  0xe7   : > { %7686 = vst [vmem:[#allocation2 + $0x18] sm:$0xff] %v7372_v61  }
  0xe8   : > { %v1026_v63 = vpop.f32.mrf.mxu0 }
  0xe9   : > { %v1027_v1 = vadd.f32 %v8487_v23, %v1026_v63 }
  0xeb   : > { %6118 = vmatmul.msk.bf16.gmra.mxu0 %vm816_vm0, %v7082_v62  ;;  %v1314_v4 = vmax.f32 %v1027_v1, 0.0  ;;  %v7089_v1 = vld [vmem:[%s8450_s21 + $0x98] sm:$0xff] }
  0xee   : > { %v7135_v0 = vld [vmem:[#allocation2 + $0x18] sm:$0xff] }
  0xef   : > { %2212 = vmatmul.bf16.gmra.mxu1 %v7135_v0  ;;  %2571 = vmatmul.bf16.gmra.mxu2 %v7135_v0 }
  0xf0   : > { %v1028_v2 = vpop.f32.mrf.mxu0 }
  0xf1   : > { %v1029_v3 = vadd.f32 %v8487_v23, %v1028_v2 }
  0xf3   : > { %v1315_v5 = vmax.f32 %v1029_v3, 0.0 }
  0xf5   : > { %v7377_v6 = vpack.c.bf16 %v1315_v5, %v1314_v4 }
  0xf7   : > { %7687 = vst [vmem:[#allocation2 + $0x50] sm:$0xff] %v7377_v6  }
  0xf8   : > { %v1031_v8 = vpop.f32.mrf.mxu0 }
  0xf9   : > { %v1032_v10 = vadd.f32 %v8487_v23, %v1031_v8 }
  0xfb   : > { %6119 = vmatmul.msk.bf16.gmra.mxu0 %vm816_vm0, %v7083_v7  ;;  %v1316_v13 = vmax.f32 %v1032_v10, 0.0 }
  0xfe   : > { %v7136_v9 = vld [vmem:[#allocation2 + $0x50] sm:$0xff] }
  0xff   : > { %2217 = vmatmul.bf16.gmra.mxu1 %v7136_v9  ;;  %2576 = vmatmul.bf16.gmra.mxu2 %v7136_v9 }
 0x100   : > { %v1033_v11 = vpop.f32.mrf.mxu0 }
 0x101   : > { %v1034_v12 = vadd.f32 %v8487_v23, %v1033_v11 }
 0x103   : > { %v1317_v14 = vmax.f32 %v1034_v12, 0.0 }
 0x105   : > { %v7382_v15 = vpack.c.bf16 %v1317_v14, %v1316_v13 }
 0x107   : > { %7688 = vst [vmem:[#allocation2 + $0x168] sm:$0xff] %v7382_v15  }
 0x108   : > { %v1036_v17 = vpop.f32.mrf.mxu0 }
 0x109   : > { %v1037_v19 = vadd.f32 %v8487_v23, %v1036_v17 }
 0x10b   : > { %6120 = vmatmul.msk.bf16.gmra.mxu0 %vm816_vm0, %v7084_v16  ;;  %v1318_v22 = vmax.f32 %v1037_v19, 0.0  ;;  %v7090_v16 = vld [vmem:[%s8450_s21 + $0xa0] sm:$0xff] }
 0x10e   : > { %v7137_v18 = vld [vmem:[#allocation2 + $0x168] sm:$0xff] }
 0x10f   : > { %2222 = vmatmul.bf16.gmra.mxu1 %v7137_v18  ;;  %2581 = vmatmul.bf16.gmra.mxu2 %v7137_v18 }
 0x110   : > { %v1038_v20 = vpop.f32.mrf.mxu0 }
 0x111   : > { %v1039_v21 = vadd.f32 %v8487_v23, %v1038_v20 }
 0x113   : > { %v1319_v24 = vmax.f32 %v1039_v21, 0.0 }
 0x115   : > { %v7387_v25 = vpack.c.bf16 %v1319_v24, %v1318_v22 }
 0x117   : > { %7689 = vst [vmem:[#allocation2 + $0x130] sm:$0xff] %v7387_v25  }
 0x118   : > { %v1041_v27 = vpop.f32.mrf.mxu0 }
 0x119   : > { %v1042_v29 = vadd.f32 %v8487_v23, %v1041_v27 }
 0x11b   : > { %6121 = vmatmul.msk.bf16.gmra.mxu0 %vm816_vm0, %v7085_v26  ;;  %v1320_v32 = vmax.f32 %v1042_v29, 0.0 }
 0x11e   : > { %v7138_v28 = vld [vmem:[#allocation2 + $0x130] sm:$0xff] }
 0x11f   : > { %2227 = vmatmul.bf16.gmra.mxu1 %v7138_v28  ;;  %2586 = vmatmul.bf16.gmra.mxu2 %v7138_v28 }
 0x120   : > { %v1043_v30 = vpop.f32.mrf.mxu0 }
 0x121   : > { %v1044_v31 = vadd.f32 %v8487_v23, %v1043_v30 }
 0x123   : > { %v1321_v33 = vmax.f32 %v1044_v31, 0.0 }
 0x125   : > { %v7392_v34 = vpack.c.bf16 %v1321_v33, %v1320_v32  ;;  %v7091_v32 = vld [vmem:[%s8450_s21 + $0xa8] sm:$0xff] }
 0x127   : > { %7690 = vst [vmem:[#allocation2 + $0x48] sm:$0xff] %v7392_v34  }
 0x128   : > { %v1046_v36 = vpop.f32.mrf.mxu0 }
 0x129   : > { %v1047_v38 = vadd.f32 %v8487_v23, %v1046_v36 }
 0x12b   : > { %6122 = vmatmul.msk.bf16.gmra.mxu0 %vm816_vm0, %v7086_v35  ;;  %v1322_v41 = vmax.f32 %v1047_v38, 0.0 }
 0x12e   : > { %v7139_v37 = vld [vmem:[#allocation2 + $0x48] sm:$0xff] }
 0x12f   : > { %2232 = vmatmul.bf16.gmra.mxu1 %v7139_v37  ;;  %2591 = vmatmul.bf16.gmra.mxu2 %v7139_v37 }
 0x130   : > { %v1048_v39 = vpop.f32.mrf.mxu0 }
 0x131   : > { %v1049_v40 = vadd.f32 %v8487_v23, %v1048_v39 }
 0x133   : > { %v1323_v42 = vmax.f32 %v1049_v40, 0.0 }
 0x135   : > { %v7397_v43 = vpack.c.bf16 %v1323_v42, %v1322_v41 }
 0x137   : > { %7691 = vst [vmem:[#allocation2 + $0x180] sm:$0xff] %v7397_v43  }
 0x138   : > { %v1051_v45 = vpop.f32.mrf.mxu0 }
 0x139   : > { %v1052_v47 = vadd.f32 %v8487_v23, %v1051_v45 }
 0x13b   : > { %6123 = vmatmul.msk.bf16.gmra.mxu0 %vm816_vm0, %v7087_v44  ;;  %v1324_v50 = vmax.f32 %v1052_v47, 0.0  ;;  %v7092_v47 = vld [vmem:[%s8450_s21 + $0xb0] sm:$0xff] }
 0x13e   : > { %v7140_v46 = vld [vmem:[#allocation2 + $0x180] sm:$0xff] }
 0x13f   : > { %2237 = vmatmul.bf16.gmra.mxu1 %v7140_v46  ;;  %2596 = vmatmul.bf16.gmra.mxu2 %v7140_v46 }
 0x140   : > { %v1053_v48 = vpop.f32.mrf.mxu0 }
 0x141   : > { %v1054_v49 = vadd.f32 %v8487_v23, %v1053_v48 }
 0x142   : > { %v2557_v52 = vpop.f32.mrf.mxu2 }
 0x143   : > { %v1325_v51 = vmax.f32 %v1054_v49, 0.0 }
 0x145   : > { %v7402_v53 = vpack.c.bf16 %v1325_v51, %v1324_v50 }
 0x147   : > { %7692 = vst [vmem:[#allocation2 + $0x110] sm:$0xff] %v7402_v53  }
 0x148   : > { %v1056_v55 = vpop.f32.mrf.mxu0 }
 0x149   : > { %v1057_v58 = vadd.f32 %v8487_v23, %v1056_v55 }
 0x14a   : > { %v2559_v56 = vpop.f32.mrf.mxu2 }
 0x14b   : > { %6124 = vmatmul.msk.bf16.gmra.mxu0 %vm816_vm0, %v7088_v54  ;;  %v1326_v61 = vmax.f32 %v1057_v58, 0.0 }
 0x14e   : > { %v7141_v57 = vld [vmem:[#allocation2 + $0x110] sm:$0xff] }
 0x14f   : > { %2242 = vmatmul.bf16.gmra.mxu1 %v7141_v57  ;;  %2601 = vmatmul.bf16.gmra.mxu2 %v7141_v57 }
 0x150   : > { %v1058_v59 = vpop.f32.mrf.mxu0 }
 0x151   : > { %v1059_v60 = vadd.f32 %v8487_v23, %v1058_v59 }
 0x152   : > { %v2562_v63 = vpop.f32.mrf.mxu2 }
 0x153   : > { %v1327_v62 = vmax.f32 %v1059_v60, 0.0 }
 0x155   : > { %v7407_v0 = vpack.c.bf16 %v1327_v62, %v1326_v61  ;;  %v7093_v62 = vld [vmem:[%s8450_s21 + $0xb8] sm:$0xff] }
 0x157   : > { %7693 = vst [vmem:[#allocation2 + $0x118] sm:$0xff] %v7407_v0  }
 0x158   : > { %v1061_v2 = vpop.f32.mrf.mxu0 }
 0x159   : > { %v1062_v7 = vadd.f32 %v8487_v23, %v1061_v2 }
 0x15a   : > { %v2564_v3 = vpop.f32.mrf.mxu2 }
 0x15b   : > { %6125 = vmatmul.msk.bf16.gmra.mxu0 %vm816_vm0, %v7089_v1  ;;  %v1328_v10 = vmax.f32 %v1062_v7, 0.0 }
 0x15c   : > { %v2208_v4 = vpop.f32.mrf.mxu1 }
 0x15d   : > { %v8540_v5 = vadd.f32 %v2557_v52, %v2208_v4 }
 0x15e   : > { %v7142_v6 = vld [vmem:[#allocation2 + $0x118] sm:$0xff] }
 0x15f   : > { %2247 = vmatmul.bf16.gmra.mxu1 %v7142_v6  ;;  %2606 = vmatmul.bf16.gmra.mxu2 %v7142_v6 }
 0x160   : > { %v1063_v8 = vpop.f32.mrf.mxu0 }
 0x161   : > { %v1064_v9 = vadd.f32 %v8487_v23, %v1063_v8 }
 0x162   : > { %v2567_v12 = vpop.f32.mrf.mxu2 }
 0x163   : > { %v1329_v11 = vmax.f32 %v1064_v9, 0.0 }
 0x164   : > { %v2210_v14 = vpop.f32.mrf.mxu1 }
 0x165   : > { %v7412_v13 = vpack.c.bf16 %v1329_v11, %v1328_v10  ;;  %v8544_v15 = vadd.f32 %v2559_v56, %v2210_v14  ;;  %v7094_v14 = vld [vmem:[%s8450_s21 + $0xc0] sm:$0xff] }
 0x167   : > { %7694 = vst [vmem:[#allocation2 + $0x98] sm:$0xff] %v7412_v13  }
 0x168   : > { %v1066_v17 = vpop.f32.mrf.mxu0 }
 0x169   : > { %v1067_v22 = vadd.f32 %v8487_v23, %v1066_v17 }
 0x16a   : > { %v2569_v18 = vpop.f32.mrf.mxu2 }
 0x16b   : > { %6126 = vmatmul.msk.bf16.gmra.mxu0 %vm816_vm0, %v7090_v16  ;;  %v1330_v26 = vmax.f32 %v1067_v22, 0.0 }
 0x16c   : > { %v2213_v19 = vpop.f32.mrf.mxu1 }
 0x16d   : > { %v8548_v20 = vadd.f32 %v2562_v63, %v2213_v19 }
 0x16e   : > { %v7143_v21 = vld [vmem:[#allocation2 + $0x98] sm:$0xff] }
 0x16f   : > { %2252 = vmatmul.bf16.gmra.mxu1 %v7143_v21  ;;  %2611 = vmatmul.bf16.gmra.mxu2 %v7143_v21 }
 0x170   : > { %v1068_v24 = vpop.f32.mrf.mxu0 }
 0x171   : > { %v1069_v25 = vadd.f32 %v8487_v23, %v1068_v24 }
 0x172   : > { %v2572_v28 = vpop.f32.mrf.mxu2 }
 0x173   : > { %v1331_v27 = vmax.f32 %v1069_v25, 0.0 }
 0x174   : > { %v2215_v30 = vpop.f32.mrf.mxu1 }
 0x175   : > { %v7417_v29 = vpack.c.bf16 %v1331_v27, %v1330_v26  ;;  %v8552_v31 = vadd.f32 %v2564_v3, %v2215_v30 }
 0x177   : > { %7695 = vst [vmem:[#allocation2 + $0x120] sm:$0xff] %v7417_v29  }
 0x178   : > { %v1071_v33 = vpop.f32.mrf.mxu0 }
 0x179   : > { %v1072_v38 = vadd.f32 %v8487_v23, %v1071_v33  ;;  %v7095_v33 = vld [vmem:[%s8450_s21 + $0xc8] sm:$0xff] }
 0x17a   : > { %v2574_v34 = vpop.f32.mrf.mxu2 }
 0x17b   : > { %6127 = vmatmul.msk.bf16.gmra.mxu0 %vm816_vm0, %v7091_v32  ;;  %v1332_v41 = vmax.f32 %v1072_v38, 0.0 }
 0x17c   : > { %v2218_v35 = vpop.f32.mrf.mxu1 }
 0x17d   : > { %v8556_v36 = vadd.f32 %v2567_v12, %v2218_v35 }
 0x17e   : > { %v7144_v37 = vld [vmem:[#allocation2 + $0x120] sm:$0xff] }
 0x17f   : > { %2257 = vmatmul.bf16.gmra.mxu1 %v7144_v37  ;;  %2616 = vmatmul.bf16.gmra.mxu2 %v7144_v37 }
 0x180   : > { %v1073_v39 = vpop.f32.mrf.mxu0 }
 0x181   : > { %v1074_v40 = vadd.f32 %v8487_v23, %v1073_v39 }
 0x182   : > { %v2577_v43 = vpop.f32.mrf.mxu2 }
 0x183   : > { %v1333_v42 = vmax.f32 %v1074_v40, 0.0 }
 0x184   : > { %v2220_v45 = vpop.f32.mrf.mxu1 }
 0x185   : > { %v7422_v44 = vpack.c.bf16 %v1333_v42, %v1332_v41  ;;  %v8560_v46 = vadd.f32 %v2569_v18, %v2220_v45 }
 0x187   : > { %7696 = vst [vmem:[#allocation2 + $0x150] sm:$0xff] %v7422_v44  }
 0x188   : > { %v1076_v48 = vpop.f32.mrf.mxu0 }
 0x189   : > { %v1077_v53 = vadd.f32 %v8487_v23, %v1076_v48 }
 0x18a   : > { %v2579_v49 = vpop.f32.mrf.mxu2 }
 0x18b   : > { %6128 = vmatmul.msk.bf16.gmra.mxu0 %vm816_vm0, %v7092_v47  ;;  %v1334_v56 = vmax.f32 %v1077_v53, 0.0 }
 0x18c   : > { %v2223_v50 = vpop.f32.mrf.mxu1 }
 0x18d   : > { %v8564_v51 = vadd.f32 %v2572_v28, %v2223_v50  ;;  %v7096_v50 = vld [vmem:[%s8450_s21 + $0xd0] sm:$0xff] }
 0x18e   : > { %v7145_v52 = vld [vmem:[#allocation2 + $0x150] sm:$0xff] }
 0x18f   : > { %2262 = vmatmul.bf16.gmra.mxu1 %v7145_v52  ;;  %2621 = vmatmul.bf16.gmra.mxu2 %v7145_v52 }
 0x190   : > { %v1078_v54 = vpop.f32.mrf.mxu0 }
 0x191   : > { %v1079_v55 = vadd.f32 %v8487_v23, %v1078_v54 }
 0x192   : > { %v2582_v58 = vpop.f32.mrf.mxu2 }
 0x193   : > { %v1335_v57 = vmax.f32 %v1079_v55, 0.0 }
 0x194   : > { %v2225_v60 = vpop.f32.mrf.mxu1 }
 0x195   : > { %v7427_v59 = vpack.c.bf16 %v1335_v57, %v1334_v56  ;;  %v8568_v61 = vadd.f32 %v2574_v34, %v2225_v60 }
 0x197   : > { %7697 = vst [vmem:[#allocation2 + $0x108] sm:$0xff] %v7427_v59  }
 0x198   : > { %v1081_v63 = vpop.f32.mrf.mxu0 }
 0x199   : > { %v1082_v4 = vadd.f32 %v8487_v23, %v1081_v63 }
 0x19a   : > { %v2584_v0 = vpop.f32.mrf.mxu2 }
 0x19b   : > { %6129 = vmatmul.msk.bf16.gmra.mxu0 %vm816_vm0, %v7093_v62  ;;  %v1336_v8 = vmax.f32 %v1082_v4, 0.0  ;;  %v7097_v4 = vld [vmem:[%s8450_s21 + $0xd8] sm:$0xff] }
 0x19c   : > { %v2228_v1 = vpop.f32.mrf.mxu1 }
 0x19d   : > { %v8572_v2 = vadd.f32 %v2577_v43, %v2228_v1 }
 0x19e   : > { %v7146_v3 = vld [vmem:[#allocation2 + $0x108] sm:$0xff] }
 0x19f   : > { %2267 = vmatmul.bf16.gmra.mxu1 %v7146_v3  ;;  %2626 = vmatmul.bf16.gmra.mxu2 %v7146_v3 }
 0x1a0   : > { %v1083_v6 = vpop.f32.mrf.mxu0 }
 0x1a1   : > { %v1084_v7 = vadd.f32 %v8487_v23, %v1083_v6 }
 0x1a2   : > { %v2587_v10 = vpop.f32.mrf.mxu2 }
 0x1a3   : > { %v1337_v9 = vmax.f32 %v1084_v7, 0.0 }
 0x1a4   : > { %v2230_v12 = vpop.f32.mrf.mxu1 }
 0x1a5   : > { %v7432_v11 = vpack.c.bf16 %v1337_v9, %v1336_v8  ;;  %v8576_v13 = vadd.f32 %v2579_v49, %v2230_v12 }
 0x1a7   : > { %7698 = vst [vmem:[#allocation2 + $0x60] sm:$0xff] %v7432_v11  }
 0x1a8   : > { %v1086_v16 = vpop.f32.mrf.mxu0 }
 0x1a9   : > { %v1087_v22 = vadd.f32 %v8487_v23, %v1086_v16 }
 0x1aa   : > { %v2589_v17 = vpop.f32.mrf.mxu2 }
 0x1ab   : > { %6130 = vmatmul.msk.bf16.gmra.mxu0 %vm816_vm0, %v7094_v14  ;;  %v1338_v26 = vmax.f32 %v1087_v22, 0.0 }
 0x1ac   : > { %v2233_v18 = vpop.f32.mrf.mxu1 }
 0x1ad   : > { %v8580_v19 = vadd.f32 %v2582_v58, %v2233_v18 }
 0x1ae   : > { %v7147_v21 = vld [vmem:[#allocation2 + $0x60] sm:$0xff] }
 0x1af   : > { %2272 = vmatmul.bf16.gmra.mxu1 %v7147_v21  ;;  %2631 = vmatmul.bf16.gmra.mxu2 %v7147_v21 }
 0x1b0   : > { %v1088_v24 = vpop.f32.mrf.mxu0 }
 0x1b1   : > { %v1089_v25 = vadd.f32 %v8487_v23, %v1088_v24 }
 0x1b2   : > { %v2592_v28 = vpop.f32.mrf.mxu2 }
 0x1b3   : > { %v1339_v27 = vmax.f32 %v1089_v25, 0.0  ;;  %v7098_v25 = vld [vmem:[%s8450_s21 + $0xe0] sm:$0xff] }
 0x1b4   : > { %v2235_v30 = vpop.f32.mrf.mxu1 }
 0x1b5   : > { %v7437_v29 = vpack.c.bf16 %v1339_v27, %v1338_v26  ;;  %v8584_v32 = vadd.f32 %v2584_v0, %v2235_v30 }
 0x1b7   : > { %7699 = vst [vmem:[#allocation2 + $0xe0] sm:$0xff] %v7437_v29  }
 0x1b8   : > { %v1091_v34 = vpop.f32.mrf.mxu0 }
 0x1b9   : > { %v1092_v40 = vadd.f32 %v8487_v23, %v1091_v34 }
 0x1ba   : > { %v2594_v35 = vpop.f32.mrf.mxu2 }
 0x1bb   : > { %6131 = vmatmul.msk.bf16.gmra.mxu0 %vm816_vm0, %v7095_v33  ;;  %v1340_v43 = vmax.f32 %v1092_v40, 0.0 }
 0x1bc   : > { %v2238_v37 = vpop.f32.mrf.mxu1 }
 0x1bd   : > { %v8588_v38 = vadd.f32 %v2587_v10, %v2238_v37 }
 0x1be   : > { %v7148_v39 = vld [vmem:[#allocation2 + $0xe0] sm:$0xff] }
 0x1bf   : > { %2277 = vmatmul.bf16.gmra.mxu1 %v7148_v39  ;;  %2636 = vmatmul.bf16.gmra.mxu2 %v7148_v39 }
 0x1c0   : > { %v1093_v41 = vpop.f32.mrf.mxu0 }
 0x1c1   : > { %v1094_v42 = vadd.f32 %v8487_v23, %v1093_v41 }
 0x1c2   : > { %v2597_v45 = vpop.f32.mrf.mxu2 }
 0x1c3   : > { %v1341_v44 = vmax.f32 %v1094_v42, 0.0 }
 0x1c4   : > { %v2240_v48 = vpop.f32.mrf.mxu1 }
 0x1c5   : > { %v7442_v47 = vpack.c.bf16 %v1341_v44, %v1340_v43  ;;  %v8592_v49 = vadd.f32 %v2589_v17, %v2240_v48  ;;  %v7099_v44 = vld [vmem:[%s8450_s21 + $0xe8] sm:$0xff] }
 0x1c7   : > { %7700 = vst [vmem:[#allocation2 + $0x188] sm:$0xff] %v7442_v47  }
 0x1c8   : > { %v1096_v52 = vpop.f32.mrf.mxu0 }
 0x1c9   : > { %v1097_v57 = vadd.f32 %v8487_v23, %v1096_v52 }
 0x1ca   : > { %v2599_v53 = vpop.f32.mrf.mxu2 }
 0x1cb   : > { %6132 = vmatmul.msk.bf16.gmra.mxu0 %vm816_vm0, %v7096_v50  ;;  %v1342_v60 = vmax.f32 %v1097_v57, 0.0 }
 0x1cc   : > { %v2243_v54 = vpop.f32.mrf.mxu1 }
 0x1cd   : > { %v8596_v55 = vadd.f32 %v2592_v28, %v2243_v54 }
 0x1ce   : > { %v7149_v56 = vld [vmem:[#allocation2 + $0x188] sm:$0xff] }
 0x1cf   : > { %2282 = vmatmul.bf16.gmra.mxu1 %v7149_v56  ;;  %2641 = vmatmul.bf16.gmra.mxu2 %v7149_v56 }
 0x1d0   : > { %v1098_v58 = vpop.f32.mrf.mxu0 }
 0x1d1   : > { %v1099_v59 = vadd.f32 %v8487_v23, %v1098_v58 }
 0x1d2   : > { %v2602_v63 = vpop.f32.mrf.mxu2 }
 0x1d3   : > { %v1343_v62 = vmax.f32 %v1099_v59, 0.0 }
 0x1d4   : > { %v2245_v1 = vpop.f32.mrf.mxu1 }
 0x1d5   : > { %v7447_v0 = vpack.c.bf16 %v1343_v62, %v1342_v60  ;;  %v8600_v3 = vadd.f32 %v2594_v35, %v2245_v1 }
 0x1d7   : > { %7701 = vst [vmem:[#allocation2 + $0x138] sm:$0xff] %v7447_v0   ;;  %v7100_v0 = vld [vmem:[%s8450_s21 + $0xf0] sm:$0xff] }
 0x1d8   : > { %v1101_v6 = vpop.f32.mrf.mxu0 }
 0x1d9   : > { %v1102_v11 = vadd.f32 %v8487_v23, %v1101_v6 }
 0x1da   : > { %v2604_v7 = vpop.f32.mrf.mxu2 }
 0x1db   : > { %6133 = vmatmul.msk.bf16.gmra.mxu0 %vm816_vm0, %v7097_v4  ;;  %v1344_v16 = vmax.f32 %v1102_v11, 0.0 }
 0x1dc   : > { %v2248_v8 = vpop.f32.mrf.mxu1 }
 0x1dd   : > { %v8604_v9 = vadd.f32 %v2597_v45, %v2248_v8 }
 0x1de   : > { %v7150_v10 = vld [vmem:[#allocation2 + $0x138] sm:$0xff] }
 0x1df   : > { %2287 = vmatmul.bf16.gmra.mxu1 %v7150_v10  ;;  %2646 = vmatmul.bf16.gmra.mxu2 %v7150_v10 }
 0x1e0   : > { %v1103_v12 = vpop.f32.mrf.mxu0 }
 0x1e1   : > { %v1104_v14 = vadd.f32 %v8487_v23, %v1103_v12 }
 0x1e2   : > { %v2607_v18 = vpop.f32.mrf.mxu2 }
 0x1e3   : > { %v1345_v17 = vmax.f32 %v1104_v14, 0.0 }
 0x1e4   : > { %v2250_v22 = vpop.f32.mrf.mxu1 }
 0x1e5   : > { %v7452_v21 = vpack.c.bf16 %v1345_v17, %v1344_v16  ;;  %v8608_v24 = vadd.f32 %v2599_v53, %v2250_v22 }
 0x1e7   : > { %7702 = vst [vmem:[#allocation2 + $0x140] sm:$0xff] %v7452_v21  }
 0x1e8   : > { %v1106_v26 = vpop.f32.mrf.mxu0 }
 0x1e9   : > { %v1107_v33 = vadd.f32 %v8487_v23, %v1106_v26 }
 0x1ea   : > { %v2609_v27 = vpop.f32.mrf.mxu2 }
 0x1eb   : > { %6134 = vmatmul.msk.bf16.gmra.mxu0 %vm816_vm0, %v7098_v25  ;;  %v1346_v37 = vmax.f32 %v1107_v33, 0.0  ;;  %v7101_v25 = vld [vmem:[%s8450_s21 + $0xf8] sm:$0xff] }
 0x1ec   : > { %v2253_v28 = vpop.f32.mrf.mxu1 }
 0x1ed   : > { %v8612_v29 = vadd.f32 %v2602_v63, %v2253_v28 }
 0x1ee   : > { %v7151_v30 = vld [vmem:[#allocation2 + $0x140] sm:$0xff] }
 0x1ef   : > { %2292 = vmatmul.bf16.gmra.mxu1 %v7151_v30  ;;  %2651 = vmatmul.bf16.gmra.mxu2 %v7151_v30 }
 0x1f0   : > { %v1108_v34 = vpop.f32.mrf.mxu0 }
 0x1f1   : > { %v1109_v35 = vadd.f32 %v8487_v23, %v1108_v34 }
 0x1f2   : > { %v2612_v40 = vpop.f32.mrf.mxu2 }
 0x1f3   : > { %v1347_v39 = vmax.f32 %v1109_v35, 0.0 }
 0x1f4   : > { %v2255_v42 = vpop.f32.mrf.mxu1 }
 0x1f5   : > { %v7457_v41 = vpack.c.bf16 %v1347_v39, %v1346_v37  ;;  %v8616_v43 = vadd.f32 %v2604_v7, %v2255_v42 }
 0x1f7   : > { %7703 = vst [vmem:[#allocation2 + $0x80] sm:$0xff] %v7457_v41  }
 0x1f8   : > { %v1111_v45 = vpop.f32.mrf.mxu0 }
 0x1f9   : > { %v1112_v53 = vadd.f32 %v8487_v23, %v1111_v45 }
 0x1fa   : > { %v2614_v47 = vpop.f32.mrf.mxu2 }
 0x1fb   : > { %6135 = vmatmul.msk.bf16.gmra.mxu0 %vm816_vm0, %v7099_v44  ;;  %v1348_v57 = vmax.f32 %v1112_v53, 0.0 }
 0x1fc   : > { %v2258_v48 = vpop.f32.mrf.mxu1 }
 0x1fd   : > { %v8620_v50 = vadd.f32 %v2607_v18, %v2258_v48 }
 0x1fe   : > { %v7152_v52 = vld [vmem:[#allocation2 + $0x80] sm:$0xff] }
 0x1ff   : > { %2297 = vmatmul.bf16.gmra.mxu1 %v7152_v52  ;;  %2656 = vmatmul.bf16.gmra.mxu2 %v7152_v52 }
 0x200   : > { %v1113_v54 = vpop.f32.mrf.mxu0 }
 0x201   : > { %v1114_v56 = vadd.f32 %v8487_v23, %v1113_v54 }
 0x202   : > { %v2617_v59 = vpop.f32.mrf.mxu2 }
 0x203   : > { %v1349_v58 = vmax.f32 %v1114_v56, 0.0 }
 0x204   : > { %v2260_v62 = vpop.f32.mrf.mxu1 }
 0x205   : > { %v7462_v60 = vpack.c.bf16 %v1349_v58, %v1348_v57  ;;  %v8624_v63 = vadd.f32 %v2609_v27, %v2260_v62 }
 0x207   : > { %7704 = vst [vmem:[#allocation2 + $0x1a8] sm:$0xff] %v7462_v60  }
 0x208   : > { %v1116_v1 = vpop.f32.mrf.mxu0 }
 0x209   : > { %v1117_v10 = vadd.f32 %v8487_v23, %v1116_v1 }
 0x20a   : > { %v2619_v4 = vpop.f32.mrf.mxu2 }
 0x20b   : > { %6136 = vmatmul.msk.bf16.gmra.mxu0 %vm816_vm0, %v7100_v0  ;;  %v1350_v14 = vmax.f32 %v1117_v10, 0.0 }
 0x20c   : > { %v2263_v6 = vpop.f32.mrf.mxu1 }
 0x20d   : > { %v8628_v7 = vadd.f32 %v2612_v40, %v2263_v6 }
 0x20e   : > { %v7153_v8 = vld [vmem:[#allocation2 + $0x1a8] sm:$0xff] }
 0x20f   : > { %2302 = vmatmul.bf16.gmra.mxu1 %v7153_v8  ;;  %2661 = vmatmul.bf16.gmra.mxu2 %v7153_v8  ;;  %v7103_v8 = vld [vmem:[%s8450_s21 + $0x108] sm:$0xff] }
 0x210   : > { %v1118_v11 = vpop.f32.mrf.mxu0 }
 0x211   : > { %v1119_v12 = vadd.f32 %v8487_v23, %v1118_v11 }
 0x212   : > { %v2622_v17 = vpop.f32.mrf.mxu2 }
 0x213   : > { %v1351_v16 = vmax.f32 %v1119_v12, 0.0 }
 0x214   : > { %v2265_v21 = vpop.f32.mrf.mxu1 }
 0x215   : > { %v7467_v18 = vpack.c.bf16 %v1351_v16, %v1350_v14  ;;  %v8632_v22 = vadd.f32 %v2614_v47, %v2265_v21  ;;  %v7102_v47 = vld [vmem:[%s8450_s21 + $0x100] sm:$0xff] }
 0x217   : > { %7705 = vst [vmem:[#allocation2 + $0x1b8] sm:$0xff] %v7467_v18  }
 0x218   : > { %v1121_v26 = vpop.f32.mrf.mxu0 }
 0x219   : > { %v1122_v34 = vadd.f32 %v8487_v23, %v1121_v26 }
 0x21a   : > { %v2624_v27 = vpop.f32.mrf.mxu2 }
 0x21b   : > { %6137 = vmatmul.msk.bf16.gmra.mxu0 %vm816_vm0, %v7101_v25  ;;  %v1352_v39 = vmax.f32 %v1122_v34, 0.0 }
 0x21c   : > { %v2268_v28 = vpop.f32.mrf.mxu1 }
 0x21d   : > { %v8636_v30 = vadd.f32 %v2617_v59, %v2268_v28 }
 0x21e   : > { %v7154_v33 = vld [vmem:[#allocation2 + $0x1b8] sm:$0xff] }
 0x21f   : > { %2307 = vmatmul.bf16.gmra.mxu1 %v7154_v33  ;;  %2666 = vmatmul.bf16.gmra.mxu2 %v7154_v33 }
 0x220   : > { %v1123_v35 = vpop.f32.mrf.mxu0 }
 0x221   : > { %v1124_v37 = vadd.f32 %v8487_v23, %v1123_v35  ;;  %v7104_v35 = vld [vmem:[%s8450_s21 + $0x110] sm:$0xff] }
 0x222   : > { %v2627_v41 = vpop.f32.mrf.mxu2 }
 0x223   : > { %v1353_v40 = vmax.f32 %v1124_v37, 0.0 }
 0x224   : > { %v2270_v44 = vpop.f32.mrf.mxu1 }
 0x225   : > { %v7472_v42 = vpack.c.bf16 %v1353_v40, %v1352_v39  ;;  %v8640_v45 = vadd.f32 %v2619_v4, %v2270_v44 }
 0x227   : > { %7706 = vst [vmem:[#allocation2 + $0x28] sm:$0xff] %v7472_v42  }
 0x228   : > { %v1126_v48 = vpop.f32.mrf.mxu0 }
 0x229   : > { %v1127_v57 = vadd.f32 %v8487_v23, %v1126_v48 }
 0x22a   : > { %v2629_v52 = vpop.f32.mrf.mxu2 }
 0x22b   : > { %6138 = vmatmul.msk.bf16.gmra.mxu0 %vm816_vm0, %v7102_v47  ;;  %v1354_v60 = vmax.f32 %v1127_v57, 0.0 }
 0x22c   : > { %v2273_v53 = vpop.f32.mrf.mxu1 }
 0x22d   : > { %v8644_v54 = vadd.f32 %v2622_v17, %v2273_v53 }
 0x22e   : > { %v7155_v56 = vld [vmem:[#allocation2 + $0x28] sm:$0xff] }
 0x22f   : > { %2312 = vmatmul.bf16.gmra.mxu1 %v7155_v56  ;;  %2671 = vmatmul.bf16.gmra.mxu2 %v7155_v56 }
 0x230   : > { %v1128_v58 = vpop.f32.mrf.mxu0 }
 0x231   : > { %v1129_v59 = vadd.f32 %v8487_v23, %v1128_v58 }
 0x232   : > { %v2632_v0 = vpop.f32.mrf.mxu2 }
 0x233   : > { %v1355_v62 = vmax.f32 %v1129_v59, 0.0 }
 0x234   : > { %v2275_v4 = vpop.f32.mrf.mxu1 }
 0x235   : > { %v7477_v1 = vpack.c.bf16 %v1355_v62, %v1354_v60  ;;  %v8648_v6 = vadd.f32 %v2624_v27, %v2275_v4  ;;  %v7105_v60 = vld [vmem:[%s8450_s21 + $0x118] sm:$0xff] }
 0x237   : > { %7707 = vst [vmem:[#allocation2 + $0xf0] sm:$0xff] %v7477_v1  }
 0x238   : > { %v1131_v10 = vpop.f32.mrf.mxu0 }
 0x239   : > { %v1132_v17 = vadd.f32 %v8487_v23, %v1131_v10 }
 0x23a   : > { %v2634_v11 = vpop.f32.mrf.mxu2 }
 0x23b   : > { %6139 = vmatmul.msk.bf16.gmra.mxu0 %vm816_vm0, %v7103_v8  ;;  %v1356_v25 = vmax.f32 %v1132_v17, 0.0 }
 0x23c   : > { %v2278_v12 = vpop.f32.mrf.mxu1 }
 0x23d   : > { %v8652_v14 = vadd.f32 %v2627_v41, %v2278_v12 }
 0x23e   : > { %v7156_v16 = vld [vmem:[#allocation2 + $0xf0] sm:$0xff] }
 0x23f   : > { %2317 = vmatmul.bf16.gmra.mxu1 %v7156_v16  ;;  %2676 = vmatmul.bf16.gmra.mxu2 %v7156_v16 }
 0x240   : > { %v1133_v18 = vpop.f32.mrf.mxu0 }
 0x241   : > { %v1134_v21 = vadd.f32 %v8487_v23, %v1133_v18 }
 0x242   : > { %v2637_v27 = vpop.f32.mrf.mxu2 }
 0x243   : > { %v1357_v26 = vmax.f32 %v1134_v21, 0.0 }
 0x244   : > { %v2280_v33 = vpop.f32.mrf.mxu1 }
 0x245   : > { %v7482_v28 = vpack.c.bf16 %v1357_v26, %v1356_v25  ;;  %v8656_v34 = vadd.f32 %v2629_v52, %v2280_v33 }
 0x247   : > { %7708 = vst [vmem:[#allocation2 + $0x158] sm:$0xff] %v7482_v28   ;;  %v7106_v28 = vld [vmem:[%s8450_s21 + $0x120] sm:$0xff] }
 0x248   : > { %v1136_v37 = vpop.f32.mrf.mxu0 }
 0x249   : > { %v1137_v44 = vadd.f32 %v8487_v23, %v1136_v37 }
 0x24a   : > { %v2639_v39 = vpop.f32.mrf.mxu2 }
 0x24b   : > { %6140 = vmatmul.msk.bf16.gmra.mxu0 %vm816_vm0, %v7104_v35  ;;  %v1358_v52 = vmax.f32 %v1137_v44, 0.0 }
 0x24c   : > { %v2283_v40 = vpop.f32.mrf.mxu1 }
 0x24d   : > { %v8660_v41 = vadd.f32 %v2632_v0, %v2283_v40 }
 0x24e   : > { %v7157_v42 = vld [vmem:[#allocation2 + $0x158] sm:$0xff] }
 0x24f   : > { %2322 = vmatmul.bf16.gmra.mxu1 %v7157_v42  ;;  %2681 = vmatmul.bf16.gmra.mxu2 %v7157_v42 }
 0x250   : > { %v1138_v47 = vpop.f32.mrf.mxu0 }
 0x251   : > { %v1139_v48 = vadd.f32 %v8487_v23, %v1138_v47 }
 0x252   : > { %v2642_v56 = vpop.f32.mrf.mxu2 }
 0x253   : > { %v1359_v53 = vmax.f32 %v1139_v48, 0.0 }
 0x254   : > { %v2285_v58 = vpop.f32.mrf.mxu1 }
 0x255   : > { %v7487_v57 = vpack.c.bf16 %v1359_v53, %v1358_v52  ;;  %v8664_v59 = vadd.f32 %v2634_v11, %v2285_v58 }
 0x257   : > { %7709 = vst [vmem:[#allocation2 + $0x128] sm:$0xff] %v7487_v57  }
 0x258   : > { %v1141_v62 = vpop.f32.mrf.mxu0 }
 0x259   : > { %v1142_v10 = vadd.f32 %v8487_v23, %v1141_v62 }
 0x25a   : > { %v2644_v0 = vpop.f32.mrf.mxu2 }
 0x25b   : > { %6141 = vmatmul.msk.bf16.gmra.mxu0 %vm816_vm0, %v7105_v60  ;;  %v1360_v11 = vmax.f32 %v1142_v10, 0.0  ;;  %v7107_v60 = vld [vmem:[%s8450_s21 + $0x128] sm:$0xff] }
 0x25c   : > { %v2288_v1 = vpop.f32.mrf.mxu1 }
 0x25d   : > { %v8668_v4 = vadd.f32 %v2637_v27, %v2288_v1 }
 0x25e   : > { %v7158_v8 = vld [vmem:[#allocation2 + $0x128] sm:$0xff] }
 0x25f   : > { %2327 = vmatmul.bf16.gmra.mxu1 %v7158_v8  ;;  %2686 = vmatmul.bf16.gmra.mxu2 %v7158_v8 }
 0x260   : > { %v1143_v12 = vpop.f32.mrf.mxu0 }
 0x261   : > { %v1144_v16 = vadd.f32 %v8487_v23, %v1143_v12  ;;  %v8686_v12 = vld [vmem:[#allocation5] ss:$0 sm:$0xff] }
 0x262   : > { %v2647_v18 = vpop.f32.mrf.mxu2 }
 0x263   : > { %v1361_v17 = vmax.f32 %v1144_v16, 0.0 }
 0x264   : > { %v2290_v25 = vpop.f32.mrf.mxu1 }
 0x265   : > { %v7492_v21 = vpack.c.bf16 %v1361_v17, %v1360_v11  ;;  %v8672_v26 = vadd.f32 %v2639_v39, %v2290_v25 }
 0x267   : > { %7710 = vst [vmem:[#allocation2 + $0x1d8] sm:$0xff] %v7492_v21  }
 0x268   : > { %v1146_v33 = vpop.f32.mrf.mxu0 }
 0x269   : > { %v1147_v42 = vadd.f32 %v8487_v23, %v1146_v33 }
 0x26a   : > { %v2649_v27 = vpop.f32.mrf.mxu2 }
 0x26b   : > { %6142 = vmatmul.msk.bf16.gmra.mxu0 %vm816_vm0, %v7106_v28  ;;  %v1362_v39 = vmax.f32 %v1147_v42, 0.0 }
 0x26c   : > { %v2293_v35 = vpop.f32.mrf.mxu1 }
 0x26d   : > { %v8676_v37 = vadd.f32 %v2642_v56, %v2293_v35 }
 0x26e   : > { %v7159_v40 = vld [vmem:[#allocation2 + $0x1d8] sm:$0xff] }
 0x26f   : > { %2332 = vmatmul.bf16.gmra.mxu1 %v7159_v40  ;;  %2691 = vmatmul.bf16.gmra.mxu2 %v7159_v40 }
 0x270   : > { %v1148_v44 = vpop.f32.mrf.mxu0 }
 0x271   : > { %v1149_v47 = vadd.f32 %v8487_v23, %v1148_v44 }
 0x272   : > { %v2652_v52 = vpop.f32.mrf.mxu2 }
 0x273   : > { %v1363_v48 = vmax.f32 %v1149_v47, 0.0 }
 0x274   : > { %v2295_v57 = vpop.f32.mrf.mxu1 }
 0x275   : > { %v7497_v53 = vpack.c.bf16 %v1363_v48, %v1362_v39  ;;  %v8680_v58 = vadd.f32 %v2644_v0, %v2295_v57 }
 0x277   : > { %7711 = vst [vmem:[#allocation2 + $0x8] sm:$0xff] %v7497_v53  }
 0x278   : > { %v1151_v62 = vpop.f32.mrf.mxu0 }
 0x279   : > { %v1152_v23 = vadd.f32 %v8686_v12, %v1151_v62 }
 0x27a   : > { %v2654_v56 = vpop.f32.mrf.mxu2 }
 0x27b   : > { %6143 = vmatmul.msk.bf16.gmra.mxu0 %vm816_vm0, %v7107_v60  ;;  %v1364_v11 = vmax.f32 %v1152_v23, 0.0  ;;  %v7109_v23 = vld [vmem:[%s8450_s21 + $0x138] sm:$0xff] }
 0x27c   : > { %v2298_v1 = vpop.f32.mrf.mxu1 }
 0x27d   : > { %v8684_v8 = vadd.f32 %v2647_v18, %v2298_v1  ;;  %v7108_v18 = vld [vmem:[%s8450_s21 + $0x130] sm:$0xff] }
 0x27e   : > { %v7160_v10 = vld [vmem:[#allocation2 + $0x8] sm:$0xff] }
 0x27f   : > { %2337 = vmatmul.bf16.gmra.mxu1 %v7160_v10  ;;  %2696 = vmatmul.bf16.gmra.mxu2 %v7160_v10 }
 0x280   : > { %v1153_v16 = vpop.f32.mrf.mxu0 }
 0x281   : > { %v1154_v0 = vadd.f32 %v8686_v12, %v1153_v16 }
 0x282   : > { %v2657_v21 = vpop.f32.mrf.mxu2 }
 0x283   : > { %v1365_v17 = vmax.f32 %v1154_v0, 0.0 }
 0x284   : > { %v2300_v28 = vpop.f32.mrf.mxu1 }
 0x285   : > { %v7502_v25 = vpack.c.bf16 %v1365_v17, %v1364_v11  ;;  %v8690_v33 = vadd.f32 %v2649_v27, %v2300_v28 }
 0x287   : > { %7712 = vst [vmem:[#allocation2 + $0x170] sm:$0xff] %v7502_v25  }
 0x288   : > { %v1156_v35 = vpop.f32.mrf.mxu0 }
 0x289   : > { %v1157_v39 = vadd.f32 %v8686_v12, %v1156_v35 }
 0x28a   : > { %v2659_v40 = vpop.f32.mrf.mxu2 }
 0x28b   : > { %6144 = vmatmul.msk.bf16.gmra.mxu0 %vm816_vm0, %v7108_v18  ;;  %v1366_v27 = vmax.f32 %v1157_v39, 0.0 }
 0x28c   : > { %v2303_v42 = vpop.f32.mrf.mxu1 }
 0x28d   : > { %v8694_v44 = vadd.f32 %v2652_v52, %v2303_v42 }
 0x28e   : > { %v7161_v47 = vld [vmem:[#allocation2 + $0x170] sm:$0xff] }
 0x28f   : > { %2342 = vmatmul.bf16.gmra.mxu1 %v7161_v47  ;;  %2701 = vmatmul.bf16.gmra.mxu2 %v7161_v47 }
 0x290   : > { %v1158_v48 = vpop.f32.mrf.mxu0 }
 0x291   : > { %v1159_v53 = vadd.f32 %v8686_v12, %v1158_v48 }
 0x292   : > { %v2662_v60 = vpop.f32.mrf.mxu2 }
 0x293   : > { %v1367_v57 = vmax.f32 %v1159_v53, 0.0  ;;  %v7110_v53 = vld [vmem:[%s8450_s21 + $0x140] sm:$0xff] }
 0x294   : > { %v2305_v1 = vpop.f32.mrf.mxu1 }
 0x295   : > { %v7507_v62 = vpack.c.bf16 %v1367_v57, %v1366_v27  ;;  %v8698_v10 = vadd.f32 %v2654_v56, %v2305_v1 }
 0x297   : > { %7713 = vst [vmem:[#allocation2 + $0xc0] sm:$0xff] %v7507_v62  }
 0x298   : > { %v1161_v16 = vpop.f32.mrf.mxu0 }
 0x299   : > { %v1162_v25 = vadd.f32 %v8686_v12, %v1161_v16 }
 0x29a   : > { %v2664_v52 = vpop.f32.mrf.mxu2 }
 0x29b   : > { %6145 = vmatmul.msk.bf16.gmra.mxu0 %vm816_vm0, %v7109_v23  ;;  %v1368_v56 = vmax.f32 %v1162_v25, 0.0 }
 0x29c   : > { %v2308_v0 = vpop.f32.mrf.mxu1 }
 0x29d   : > { %v8702_v11 = vadd.f32 %v2657_v21, %v2308_v0 }
 0x29e   : > { %v7162_v17 = vld [vmem:[#allocation2 + $0xc0] sm:$0xff] }
 0x29f   : > { %2347 = vmatmul.bf16.gmra.mxu1 %v7162_v17  ;;  %2706 = vmatmul.bf16.gmra.mxu2 %v7162_v17 }
 0x2a0   : > { %v1163_v28 = vpop.f32.mrf.mxu0 }
 0x2a1   : > { %v1164_v18 = vadd.f32 %v8686_v12, %v1163_v28 }
 0x2a2   : > { %v2667_v42 = vpop.f32.mrf.mxu2 }
 0x2a3   : > { %v1369_v35 = vmax.f32 %v1164_v18, 0.0 }
 0x2a4   : > { %v2310_v39 = vpop.f32.mrf.mxu1 }
 0x2a5   : > { %v7512_v47 = vpack.c.bf16 %v1369_v35, %v1368_v56  ;;  %v8706_v48 = vadd.f32 %v2659_v40, %v2310_v39  ;;  %v7111_v35 = vld [vmem:[%s8450_s21 + $0x148] sm:$0xff] }
 0x2a7   : > { %7714 = vst [vmem:[#allocation2 + $0xa0] sm:$0xff] %v7512_v47  }
 0x2a8   : > { %v1166_v27 = vpop.f32.mrf.mxu0 }
 0x2a9   : > { %v1167_v23 = vadd.f32 %v8686_v12, %v1166_v27 }
 0x2aa   : > { %v2669_v21 = vpop.f32.mrf.mxu2 }
 0x2ab   : > { %6146 = vmatmul.msk.bf16.gmra.mxu0 %vm816_vm0, %v7110_v53  ;;  %v1370_v40 = vmax.f32 %v1167_v23, 0.0 }
 0x2ac   : > { %v2313_v57 = vpop.f32.mrf.mxu1 }
 0x2ad   : > { %v8710_v62 = vadd.f32 %v2662_v60, %v2313_v57 }
 0x2ae   : > { %v7163_v1 = vld [vmem:[#allocation2 + $0xa0] sm:$0xff] }
 0x2af   : > { %2352 = vmatmul.bf16.gmra.mxu1 %v7163_v1  ;;  %2711 = vmatmul.bf16.gmra.mxu2 %v7163_v1 }
 0x2b0   : > { %v1168_v16 = vpop.f32.mrf.mxu0 }
 0x2b1   : > { %v1169_v0 = vadd.f32 %v8686_v12, %v1168_v16 }
 0x2b2   : > { %v2672_v25 = vpop.f32.mrf.mxu2 }
 0x2b3   : > { %v1371_v17 = vmax.f32 %v1169_v0, 0.0 }
 0x2b4   : > { %v2315_v18 = vpop.f32.mrf.mxu1 }
 0x2b5   : > { %v7517_v28 = vpack.c.bf16 %v1371_v17, %v1370_v40  ;;  %v8714_v56 = vadd.f32 %v2664_v52, %v2315_v18  ;;  %v7112_v18 = vld [vmem:[%s8450_s21 + $0x150] sm:$0xff] }
 0x2b7   : > { %10373 = vst [vmem:[#allocation17_spill] sm:$0xff] %v8714_v56 }
 0x2b8   : > { %7715 = vst [vmem:[#allocation2 + $0x148] sm:$0xff] %v7517_v28   ;;  %v1171_v47 = vpop.f32.mrf.mxu0 }
 0x2b9   : > { %v1172_v57 = vadd.f32 %v8686_v12, %v1171_v47 }
 0x2ba   : > { %v2674_v60 = vpop.f32.mrf.mxu2 }
 0x2bb   : > { %6147 = vmatmul.msk.bf16.gmra.mxu0 %vm816_vm0, %v7111_v35  ;;  %v1372_v52 = vmax.f32 %v1172_v57, 0.0 }
 0x2bc   : > { %v2318_v39 = vpop.f32.mrf.mxu1 }
 0x2bd   : > { %v8718_v53 = vadd.f32 %v2667_v42, %v2318_v39 }
 0x2bf   : > { %10374 = vst [vmem:[#allocation18_spill] sm:$0xff] %v8718_v53  ;;  %v7164_v27 = vld [vmem:[#allocation2 + $0x148] sm:$0xff] }
 0x2c0   : > { %v1173_v1 = vpop.f32.mrf.mxu0  ;;  %2357 = vmatmul.bf16.gmra.mxu1 %v7164_v27  ;;  %2716 = vmatmul.bf16.gmra.mxu2 %v7164_v27 }
 0x2c1   : > { %v1174_v23 = vadd.f32 %v8686_v12, %v1173_v1 }
 0x2c2   : > { %v2677_v0 = vpop.f32.mrf.mxu2 }
 0x2c3   : > { %v1373_v16 = vmax.f32 %v1174_v23, 0.0 }
 0x2c4   : > { %v2320_v17 = vpop.f32.mrf.mxu1 }
 0x2c5   : > { %v7522_v40 = vpack.c.bf16 %v1373_v16, %v1372_v52  ;;  %v8722_v28 = vadd.f32 %v2669_v21, %v2320_v17 }
 0x2c7   : > { %10375 = vst [vmem:[#allocation19_spill] sm:$0xff] %v8722_v28 }
 0x2c8   : > { %7716 = vst [vmem:[#allocation2 + $0x1d0] sm:$0xff] %v7522_v40   ;;  %v1176_v35 = vpop.f32.mrf.mxu0 }
 0x2c9   : > { %v1177_v1 = vadd.f32 %v8686_v12, %v1176_v35 }
 0x2ca   : > { %v2679_v42 = vpop.f32.mrf.mxu2 }
 0x2cb   : > { %6148 = vmatmul.msk.bf16.gmra.mxu0 %vm816_vm0, %v7112_v18  ;;  %v1374_v21 = vmax.f32 %v1177_v1, 0.0  ;;  %v7113_v18 = vld [vmem:[%s8450_s21 + $0x158] sm:$0xff] }
 0x2cc   : > { %v2323_v47 = vpop.f32.mrf.mxu1 }
 0x2cd   : > { %v8726_v39 = vadd.f32 %v2672_v25, %v2323_v47 }
 0x2cf   : > { %10376 = vst [vmem:[#allocation20_spill] sm:$0xff] %v8726_v39  ;;  %v7165_v27 = vld [vmem:[#allocation2 + $0x1d0] sm:$0xff] }
 0x2d0   : > { %v1178_v57 = vpop.f32.mrf.mxu0  ;;  %2362 = vmatmul.bf16.gmra.mxu1 %v7165_v27  ;;  %2721 = vmatmul.bf16.gmra.mxu2 %v7165_v27 }
 0x2d1   : > { %v1179_v23 = vadd.f32 %v8686_v12, %v1178_v57 }
 0x2d2   : > { %v2682_v16 = vpop.f32.mrf.mxu2 }
 0x2d3   : > { %v1375_v52 = vmax.f32 %v1179_v23, 0.0 }
 0x2d4   : > { %v2325_v17 = vpop.f32.mrf.mxu1 }
 0x2d5   : > { %v7527_v40 = vpack.c.bf16 %v1375_v52, %v1374_v21  ;;  %v8730_v28 = vadd.f32 %v2674_v60, %v2325_v17 }
 0x2d7   : > { %10377 = vst [vmem:[#allocation21_spill] sm:$0xff] %v8730_v28 }
 0x2d8   : > { %7717 = vst [vmem:[#allocation2 + $0x100] sm:$0xff] %v7527_v40   ;;  %v1181_v53 = vpop.f32.mrf.mxu0 }
 0x2d9   : > { %v1182_v57 = vadd.f32 %v8686_v12, %v1181_v53 }
 0x2da   : > { %v2684_v25 = vpop.f32.mrf.mxu2 }
 0x2db   : > { %6149 = vmatmul.msk.bf16.gmra.mxu0 %vm816_vm0, %v7113_v18  ;;  %v1376_v60 = vmax.f32 %v1182_v57, 0.0  ;;  %v7114_v18 = vld [vmem:[%s8450_s21 + $0x160] sm:$0xff] }
 0x2dc   : > { %v2328_v35 = vpop.f32.mrf.mxu1 }
 0x2dd   : > { %v8734_v47 = vadd.f32 %v2677_v0, %v2328_v35 }
 0x2df   : > { %10378 = vst [vmem:[#allocation22_spill] sm:$0xff] %v8734_v47  ;;  %v7166_v27 = vld [vmem:[#allocation2 + $0x100] sm:$0xff] }
 0x2e0   : > { %v1183_v1 = vpop.f32.mrf.mxu0  ;;  %2367 = vmatmul.bf16.gmra.mxu1 %v7166_v27  ;;  %2726 = vmatmul.bf16.gmra.mxu2 %v7166_v27 }
 0x2e1   : > { %v1184_v23 = vadd.f32 %v8686_v12, %v1183_v1 }
 0x2e2   : > { %v2687_v52 = vpop.f32.mrf.mxu2 }
 0x2e3   : > { %v1377_v21 = vmax.f32 %v1184_v23, 0.0 }
 0x2e4   : > { %v2330_v17 = vpop.f32.mrf.mxu1 }
 0x2e5   : > { %v7532_v40 = vpack.c.bf16 %v1377_v21, %v1376_v60  ;;  %v8738_v28 = vadd.f32 %v2679_v42, %v2330_v17 }
 0x2e7   : > { %10379 = vst [vmem:[#allocation23_spill] sm:$0xff] %v8738_v28 }
 0x2e8   : > { %7718 = vst [vmem:[#allocation2 + $0xf8] sm:$0xff] %v7532_v40   ;;  %v1186_v39 = vpop.f32.mrf.mxu0 }
 0x2e9   : > { %v1187_v1 = vadd.f32 %v8686_v12, %v1186_v39 }
 0x2ea   : > { %v2689_v0 = vpop.f32.mrf.mxu2 }
 0x2eb   : > { %6150 = vmatmul.msk.bf16.gmra.mxu0 %vm816_vm0, %v7114_v18  ;;  %v1378_v42 = vmax.f32 %v1187_v1, 0.0  ;;  %v7115_v18 = vld [vmem:[%s8450_s21 + $0x168] sm:$0xff] }
 0x2ec   : > { %v2333_v53 = vpop.f32.mrf.mxu1 }
 0x2ed   : > { %v8742_v35 = vadd.f32 %v2682_v16, %v2333_v53 }
 0x2ef   : > { %10380 = vst [vmem:[#allocation24_spill] sm:$0xff] %v8742_v35  ;;  %v7167_v27 = vld [vmem:[#allocation2 + $0xf8] sm:$0xff] }
 0x2f0   : > { %v1188_v57 = vpop.f32.mrf.mxu0  ;;  %2372 = vmatmul.bf16.gmra.mxu1 %v7167_v27  ;;  %2731 = vmatmul.bf16.gmra.mxu2 %v7167_v27 }
 0x2f1   : > { %v1189_v23 = vadd.f32 %v8686_v12, %v1188_v57 }
 0x2f2   : > { %v2692_v21 = vpop.f32.mrf.mxu2 }
 0x2f3   : > { %v1379_v60 = vmax.f32 %v1189_v23, 0.0 }
 0x2f4   : > { %v2335_v17 = vpop.f32.mrf.mxu1 }
 0x2f5   : > { %v7537_v40 = vpack.c.bf16 %v1379_v60, %v1378_v42  ;;  %v8746_v28 = vadd.f32 %v2684_v25, %v2335_v17 }
 0x2f7   : > { %10381 = vst [vmem:[#allocation25_spill] sm:$0xff] %v8746_v28 }
 0x2f8   : > { %7719 = vst [vmem:[#allocation2 + $0x40] sm:$0xff] %v7537_v40   ;;  %v1191_v47 = vpop.f32.mrf.mxu0 }
 0x2f9   : > { %v1192_v57 = vadd.f32 %v8686_v12, %v1191_v47 }
 0x2fa   : > { %v2694_v16 = vpop.f32.mrf.mxu2 }
 0x2fb   : > { %6151 = vmatmul.msk.bf16.gmra.mxu0 %vm816_vm0, %v7115_v18  ;;  %v1380_v25 = vmax.f32 %v1192_v57, 0.0  ;;  %v7116_v18 = vld [vmem:[%s8450_s21 + $0x170] sm:$0xff] }
 0x2fc   : > { %v2338_v39 = vpop.f32.mrf.mxu1 }
 0x2fd   : > { %v8750_v53 = vadd.f32 %v2687_v52, %v2338_v39 }
 0x2ff   : > { %10382 = vst [vmem:[#allocation26_spill] sm:$0xff] %v8750_v53  ;;  %v7168_v27 = vld [vmem:[#allocation2 + $0x40] sm:$0xff] }
 0x300   : > { %v1193_v1 = vpop.f32.mrf.mxu0  ;;  %2377 = vmatmul.bf16.gmra.mxu1 %v7168_v27  ;;  %2736 = vmatmul.bf16.gmra.mxu2 %v7168_v27 }
 0x301   : > { %v1194_v23 = vadd.f32 %v8686_v12, %v1193_v1 }
 0x302   : > { %v2697_v60 = vpop.f32.mrf.mxu2 }
 0x303   : > { %v1381_v42 = vmax.f32 %v1194_v23, 0.0 }
 0x304   : > { %v2340_v17 = vpop.f32.mrf.mxu1 }
 0x305   : > { %v7542_v40 = vpack.c.bf16 %v1381_v42, %v1380_v25  ;;  %v8754_v28 = vadd.f32 %v2689_v0, %v2340_v17 }
 0x307   : > { %10383 = vst [vmem:[#allocation27_spill] sm:$0xff] %v8754_v28 }
 0x308   : > { %7720 = vst [vmem:[#allocation2 + $0xa8] sm:$0xff] %v7542_v40   ;;  %v1196_v35 = vpop.f32.mrf.mxu0 }
 0x309   : > { %v1197_v1 = vadd.f32 %v8686_v12, %v1196_v35 }
 0x30a   : > { %v2699_v52 = vpop.f32.mrf.mxu2 }
 0x30b   : > { %6152 = vmatmul.msk.bf16.gmra.mxu0 %vm816_vm0, %v7116_v18  ;;  %v1382_v0 = vmax.f32 %v1197_v1, 0.0  ;;  %v7117_v18 = vld [vmem:[%s8450_s21 + $0x178] sm:$0xff] }
 0x30c   : > { %v2343_v47 = vpop.f32.mrf.mxu1 }
 0x30d   : > { %v8758_v39 = vadd.f32 %v2692_v21, %v2343_v47 }
 0x30f   : > { %10384 = vst [vmem:[#allocation28_spill] sm:$0xff] %v8758_v39  ;;  %v7169_v27 = vld [vmem:[#allocation2 + $0xa8] sm:$0xff] }
 0x310   : > { %v1198_v57 = vpop.f32.mrf.mxu0  ;;  %2382 = vmatmul.bf16.gmra.mxu1 %v7169_v27  ;;  %2741 = vmatmul.bf16.gmra.mxu2 %v7169_v27 }
 0x311   : > { %v1199_v23 = vadd.f32 %v8686_v12, %v1198_v57 }
 0x312   : > { %v2702_v42 = vpop.f32.mrf.mxu2 }
 0x313   : > { %v1383_v25 = vmax.f32 %v1199_v23, 0.0 }
 0x314   : > { %v2345_v17 = vpop.f32.mrf.mxu1 }
 0x315   : > { %v7547_v40 = vpack.c.bf16 %v1383_v25, %v1382_v0  ;;  %v8762_v28 = vadd.f32 %v2694_v16, %v2345_v17 }
 0x317   : > { %10385 = vst [vmem:[#allocation29_spill] sm:$0xff] %v8762_v28 }
 0x318   : > { %7721 = vst [vmem:[#allocation2 + $0x190] sm:$0xff] %v7547_v40   ;;  %v1201_v53 = vpop.f32.mrf.mxu0 }
 0x319   : > { %v1202_v57 = vadd.f32 %v8686_v12, %v1201_v53 }
 0x31a   : > { %v2704_v21 = vpop.f32.mrf.mxu2 }
 0x31b   : > { %6153 = vmatmul.msk.bf16.gmra.mxu0 %vm816_vm0, %v7117_v18  ;;  %v1384_v16 = vmax.f32 %v1202_v57, 0.0  ;;  %v7118_v18 = vld [vmem:[%s8450_s21 + $0x180] sm:$0xff] }
 0x31c   : > { %v2348_v35 = vpop.f32.mrf.mxu1 }
 0x31d   : > { %v8766_v47 = vadd.f32 %v2697_v60, %v2348_v35 }
 0x31f   : > { %10386 = vst [vmem:[#allocation30_spill] sm:$0xff] %v8766_v47  ;;  %v7170_v27 = vld [vmem:[#allocation2 + $0x190] sm:$0xff] }
 0x320   : > { %v1203_v1 = vpop.f32.mrf.mxu0  ;;  %2387 = vmatmul.bf16.gmra.mxu1 %v7170_v27  ;;  %2746 = vmatmul.bf16.gmra.mxu2 %v7170_v27 }
 0x321   : > { %v1204_v23 = vadd.f32 %v8686_v12, %v1203_v1 }
 0x322   : > { %v2707_v25 = vpop.f32.mrf.mxu2 }
 0x323   : > { %v1385_v0 = vmax.f32 %v1204_v23, 0.0 }
 0x324   : > { %v2350_v17 = vpop.f32.mrf.mxu1 }
 0x325   : > { %v7552_v40 = vpack.c.bf16 %v1385_v0, %v1384_v16  ;;  %v8770_v28 = vadd.f32 %v2699_v52, %v2350_v17 }
 0x327   : > { %10387 = vst [vmem:[#allocation31_spill] sm:$0xff] %v8770_v28 }
 0x328   : > { %7722 = vst [vmem:[#allocation2 + $0x1a0] sm:$0xff] %v7552_v40   ;;  %v1206_v39 = vpop.f32.mrf.mxu0 }
 0x329   : > { %v1207_v1 = vadd.f32 %v8686_v12, %v1206_v39 }
 0x32a   : > { %v2709_v60 = vpop.f32.mrf.mxu2 }
 0x32b   : > { %6154 = vmatmul.msk.bf16.gmra.mxu0 %vm816_vm0, %v7118_v18  ;;  %v1386_v52 = vmax.f32 %v1207_v1, 0.0  ;;  %v7119_v18 = vld [vmem:[%s8450_s21 + $0x188] sm:$0xff] }
 0x32c   : > { %v2353_v53 = vpop.f32.mrf.mxu1 }
 0x32d   : > { %v8774_v35 = vadd.f32 %v2702_v42, %v2353_v53 }
 0x32f   : > { %10388 = vst [vmem:[#allocation32_spill] sm:$0xff] %v8774_v35  ;;  %v7171_v27 = vld [vmem:[#allocation2 + $0x1a0] sm:$0xff] }
 0x330   : > { %v1208_v57 = vpop.f32.mrf.mxu0  ;;  %2392 = vmatmul.bf16.gmra.mxu1 %v7171_v27  ;;  %2751 = vmatmul.bf16.gmra.mxu2 %v7171_v27 }
 0x331   : > { %v1209_v23 = vadd.f32 %v8686_v12, %v1208_v57 }
 0x332   : > { %v2712_v0 = vpop.f32.mrf.mxu2 }
 0x333   : > { %v1387_v16 = vmax.f32 %v1209_v23, 0.0 }
 0x334   : > { %v2355_v17 = vpop.f32.mrf.mxu1 }
 0x335   : > { %v7557_v40 = vpack.c.bf16 %v1387_v16, %v1386_v52  ;;  %v8778_v28 = vadd.f32 %v2704_v21, %v2355_v17 }
 0x337   : > { %10389 = vst [vmem:[#allocation33_spill] sm:$0xff] %v8778_v28 }
 0x338   : > { %7723 = vst [vmem:[#allocation2 + $0xb8] sm:$0xff] %v7557_v40   ;;  %v1211_v47 = vpop.f32.mrf.mxu0 }
 0x339   : > { %v1212_v57 = vadd.f32 %v8686_v12, %v1211_v47 }
 0x33a   : > { %v2714_v42 = vpop.f32.mrf.mxu2 }
 0x33b   : > { %6155 = vmatmul.msk.bf16.gmra.mxu0 %vm816_vm0, %v7119_v18  ;;  %v1388_v21 = vmax.f32 %v1212_v57, 0.0  ;;  %v7120_v18 = vld [vmem:[%s8450_s21 + $0x190] sm:$0xff] }
 0x33d   : > { %v2358_v39 = vpop.f32.mrf.mxu1 }
 0x33e   : > { %v8782_v53 = vadd.f32 %v2707_v25, %v2358_v39 }
 0x33f   : > { %v7172_v27 = vld [vmem:[#allocation2 + $0xb8] sm:$0xff] }
 0x340   : > { %10390 = vst [vmem:[#allocation34_spill] sm:$0xff] %v8782_v53  ;;  %v1213_v1 = vpop.f32.mrf.mxu0  ;;  %2397 = vmatmul.bf16.gmra.mxu1 %v7172_v27  ;;  %2756 = vmatmul.bf16.gmra.mxu2 %v7172_v27 }
 0x341   : > { %v1214_v23 = vadd.f32 %v8686_v12, %v1213_v1 }
 0x343   : > { %v1389_v52 = vmax.f32 %v1214_v23, 0.0  ;;  %v2717_v16 = vpop.f32.mrf.mxu2 }
 0x345   : > { %v7562_v40 = vpack.c.bf16 %v1389_v52, %v1388_v21  ;;  %v2360_v17 = vpop.f32.mrf.mxu1 }
 0x346   : > { %v8786_v28 = vadd.f32 %v2709_v60, %v2360_v17 }
 0x347   : > { %7724 = vst [vmem:[#allocation2] sm:$0xff] %v7562_v40  }
 0x348   : > { %10391 = vst [vmem:[#allocation35_spill] sm:$0xff] %v8786_v28  ;;  %v1216_v35 = vpop.f32.mrf.mxu0 }
 0x349   : > { %v1217_v1 = vadd.f32 %v8686_v12, %v1216_v35 }
 0x34b   : > { %6156 = vmatmul.msk.bf16.gmra.mxu0 %vm816_vm0, %v7120_v18  ;;  %v2719_v25 = vpop.f32.mrf.mxu2  ;;  %v1390_v60 = vmax.f32 %v1217_v1, 0.0  ;;  %v7121_v18 = vld [vmem:[%s8450_s21 + $0x198] sm:$0xff] }
 0x34d   : > { %v2363_v47 = vpop.f32.mrf.mxu1 }
 0x34e   : > { %v8790_v39 = vadd.f32 %v2712_v0, %v2363_v47  ;;  %v7173_v27 = vld [vmem:[#allocation2] sm:$0xff] }
 0x350   : > { %10392 = vst [vmem:[#allocation36_spill] sm:$0xff] %v8790_v39  ;;  %v1218_v57 = vpop.f32.mrf.mxu0  ;;  %2402 = vmatmul.bf16.gmra.mxu1 %v7173_v27  ;;  %2761 = vmatmul.bf16.gmra.mxu2 %v7173_v27 }
 0x351   : > { %v1219_v23 = vadd.f32 %v8686_v12, %v1218_v57 }
 0x353   : > { %v1391_v21 = vmax.f32 %v1219_v23, 0.0  ;;  %v2722_v52 = vpop.f32.mrf.mxu2 }
 0x355   : > { %v7567_v40 = vpack.c.bf16 %v1391_v21, %v1390_v60  ;;  %v2365_v17 = vpop.f32.mrf.mxu1 }
 0x356   : > { %v8794_v28 = vadd.f32 %v2714_v42, %v2365_v17 }
 0x357   : > { %7725 = vst [vmem:[#allocation2 + $0x38] sm:$0xff] %v7567_v40  }
 0x358   : > { %10393 = vst [vmem:[#allocation37_spill] sm:$0xff] %v8794_v28  ;;  %v1221_v53 = vpop.f32.mrf.mxu0 }
 0x359   : > { %v1222_v57 = vadd.f32 %v8686_v12, %v1221_v53 }
 0x35b   : > { %6157 = vmatmul.msk.bf16.gmra.mxu0 %vm816_vm0, %v7121_v18  ;;  %v2724_v0 = vpop.f32.mrf.mxu2  ;;  %v1392_v42 = vmax.f32 %v1222_v57, 0.0  ;;  %v7122_v18 = vld [vmem:[%s8450_s21 + $0x1a0] sm:$0xff] }
 0x35d   : > { %v2368_v35 = vpop.f32.mrf.mxu1 }
 0x35e   : > { %v8798_v47 = vadd.f32 %v2717_v16, %v2368_v35  ;;  %v7174_v27 = vld [vmem:[#allocation2 + $0x38] sm:$0xff] }
 0x360   : > { %10394 = vst [vmem:[#allocation38_spill] sm:$0xff] %v8798_v47  ;;  %v1223_v1 = vpop.f32.mrf.mxu0  ;;  %2407 = vmatmul.bf16.gmra.mxu1 %v7174_v27  ;;  %2766 = vmatmul.bf16.gmra.mxu2 %v7174_v27 }
 0x361   : > { %v1224_v23 = vadd.f32 %v8686_v12, %v1223_v1 }
 0x363   : > { %v1393_v60 = vmax.f32 %v1224_v23, 0.0  ;;  %v2727_v21 = vpop.f32.mrf.mxu2 }
 0x365   : > { %v7572_v40 = vpack.c.bf16 %v1393_v60, %v1392_v42  ;;  %v2370_v17 = vpop.f32.mrf.mxu1 }
 0x366   : > { %v8802_v28 = vadd.f32 %v2719_v25, %v2370_v17 }
 0x367   : > { %7726 = vst [vmem:[#allocation2 + $0x20] sm:$0xff] %v7572_v40  }
 0x368   : > { %10395 = vst [vmem:[#allocation39_spill] sm:$0xff] %v8802_v28  ;;  %v1226_v39 = vpop.f32.mrf.mxu0 }
 0x369   : > { %v1227_v1 = vadd.f32 %v8686_v12, %v1226_v39 }
 0x36b   : > { %6158 = vmatmul.msk.bf16.gmra.mxu0 %vm816_vm0, %v7122_v18  ;;  %v2729_v16 = vpop.f32.mrf.mxu2  ;;  %v1394_v25 = vmax.f32 %v1227_v1, 0.0  ;;  %v7123_v18 = vld [vmem:[%s8450_s21 + $0x1a8] sm:$0xff] }
 0x36d   : > { %v2373_v53 = vpop.f32.mrf.mxu1 }
 0x36e   : > { %v8806_v35 = vadd.f32 %v2722_v52, %v2373_v53  ;;  %v7175_v27 = vld [vmem:[#allocation2 + $0x20] sm:$0xff] }
 0x370   : > { %10396 = vst [vmem:[#allocation40_spill] sm:$0xff] %v8806_v35  ;;  %v1228_v57 = vpop.f32.mrf.mxu0  ;;  %2412 = vmatmul.bf16.gmra.mxu1 %v7175_v27  ;;  %2771 = vmatmul.bf16.gmra.mxu2 %v7175_v27 }
 0x371   : > { %v1229_v23 = vadd.f32 %v8686_v12, %v1228_v57 }
 0x373   : > { %v1395_v42 = vmax.f32 %v1229_v23, 0.0  ;;  %v2732_v60 = vpop.f32.mrf.mxu2 }
 0x375   : > { %v7577_v40 = vpack.c.bf16 %v1395_v42, %v1394_v25  ;;  %v2375_v17 = vpop.f32.mrf.mxu1 }
 0x376   : > { %v8810_v28 = vadd.f32 %v2724_v0, %v2375_v17 }
 0x377   : > { %7727 = vst [vmem:[#allocation2 + $0x10] sm:$0xff] %v7577_v40  }
 0x378   : > { %10397 = vst [vmem:[#allocation41_spill] sm:$0xff] %v8810_v28  ;;  %v1231_v47 = vpop.f32.mrf.mxu0 }
 0x379   : > { %v1232_v57 = vadd.f32 %v8686_v12, %v1231_v47 }
 0x37b   : > { %6159 = vmatmul.msk.bf16.gmra.mxu0 %vm816_vm0, %v7123_v18  ;;  %v2734_v52 = vpop.f32.mrf.mxu2  ;;  %v1396_v0 = vmax.f32 %v1232_v57, 0.0  ;;  %v7124_v18 = vld [vmem:[%s8450_s21 + $0x1b0] sm:$0xff] }
 0x37d   : > { %v2378_v39 = vpop.f32.mrf.mxu1 }
 0x37e   : > { %v8814_v53 = vadd.f32 %v2727_v21, %v2378_v39  ;;  %v7176_v27 = vld [vmem:[#allocation2 + $0x10] sm:$0xff] }
 0x380   : > { %10398 = vst [vmem:[#allocation42_spill] sm:$0xff] %v8814_v53  ;;  %v1233_v1 = vpop.f32.mrf.mxu0  ;;  %2417 = vmatmul.bf16.gmra.mxu1 %v7176_v27  ;;  %2776 = vmatmul.bf16.gmra.mxu2 %v7176_v27 }
 0x381   : > { %v1234_v23 = vadd.f32 %v8686_v12, %v1233_v1 }
 0x383   : > { %v1397_v25 = vmax.f32 %v1234_v23, 0.0  ;;  %v2737_v42 = vpop.f32.mrf.mxu2 }
 0x385   : > { %v7582_v40 = vpack.c.bf16 %v1397_v25, %v1396_v0  ;;  %v2380_v17 = vpop.f32.mrf.mxu1 }
 0x386   : > { %v8818_v28 = vadd.f32 %v2729_v16, %v2380_v17 }
 0x387   : > { %7728 = vst [vmem:[#allocation2 + $0x58] sm:$0xff] %v7582_v40  }
 0x388   : > { %10399 = vst [vmem:[#allocation43_spill] sm:$0xff] %v8818_v28  ;;  %v1236_v35 = vpop.f32.mrf.mxu0 }
 0x389   : > { %v1237_v1 = vadd.f32 %v8686_v12, %v1236_v35 }
 0x38b   : > { %6160 = vmatmul.msk.bf16.gmra.mxu0 %vm816_vm0, %v7124_v18  ;;  %v2739_v21 = vpop.f32.mrf.mxu2  ;;  %v1398_v16 = vmax.f32 %v1237_v1, 0.0  ;;  %v7125_v18 = vld [vmem:[%s8450_s21 + $0x1b8] sm:$0xff] }
 0x38d   : > { %v2383_v47 = vpop.f32.mrf.mxu1 }
 0x38e   : > { %v8822_v39 = vadd.f32 %v2732_v60, %v2383_v47  ;;  %v7177_v27 = vld [vmem:[#allocation2 + $0x58] sm:$0xff] }
 0x390   : > { %10400 = vst [vmem:[#allocation44_spill] sm:$0xff] %v8822_v39  ;;  %v1238_v57 = vpop.f32.mrf.mxu0  ;;  %2422 = vmatmul.bf16.gmra.mxu1 %v7177_v27  ;;  %2781 = vmatmul.bf16.gmra.mxu2 %v7177_v27 }
 0x391   : > { %v1239_v23 = vadd.f32 %v8686_v12, %v1238_v57 }
 0x393   : > { %v1399_v0 = vmax.f32 %v1239_v23, 0.0  ;;  %v2742_v25 = vpop.f32.mrf.mxu2 }
 0x395   : > { %v7587_v40 = vpack.c.bf16 %v1399_v0, %v1398_v16  ;;  %v2385_v17 = vpop.f32.mrf.mxu1 }
 0x396   : > { %v8826_v28 = vadd.f32 %v2734_v52, %v2385_v17 }
 0x397   : > { %7729 = vst [vmem:[#allocation2 + $0x88] sm:$0xff] %v7587_v40  }
 0x398   : > { %10401 = vst [vmem:[#allocation45_spill] sm:$0xff] %v8826_v28  ;;  %v1241_v53 = vpop.f32.mrf.mxu0 }
 0x399   : > { %v1242_v57 = vadd.f32 %v8686_v12, %v1241_v53 }
 0x39b   : > { %6161 = vmatmul.msk.bf16.gmra.mxu0 %vm816_vm0, %v7125_v18  ;;  %v2744_v60 = vpop.f32.mrf.mxu2  ;;  %v1400_v52 = vmax.f32 %v1242_v57, 0.0  ;;  %v7126_v18 = vld [vmem:[%s8450_s21 + $0x1c0] sm:$0xff] }
 0x39d   : > { %v2388_v35 = vpop.f32.mrf.mxu1 }
 0x39e   : > { %v8830_v47 = vadd.f32 %v2737_v42, %v2388_v35  ;;  %v7178_v27 = vld [vmem:[#allocation2 + $0x88] sm:$0xff] }
 0x3a0   : > { %10402 = vst [vmem:[#allocation46_spill] sm:$0xff] %v8830_v47  ;;  %v1243_v1 = vpop.f32.mrf.mxu0  ;;  %2427 = vmatmul.bf16.gmra.mxu1 %v7178_v27  ;;  %2786 = vmatmul.bf16.gmra.mxu2 %v7178_v27 }
 0x3a1   : > { %v1244_v23 = vadd.f32 %v8686_v12, %v1243_v1 }
 0x3a3   : > { %v1401_v16 = vmax.f32 %v1244_v23, 0.0  ;;  %v2747_v0 = vpop.f32.mrf.mxu2 }
 0x3a5   : > { %v7592_v40 = vpack.c.bf16 %v1401_v16, %v1400_v52  ;;  %v2390_v17 = vpop.f32.mrf.mxu1 }
 0x3a6   : > { %v8834_v28 = vadd.f32 %v2739_v21, %v2390_v17 }
 0x3a7   : > { %7730 = vst [vmem:[#allocation2 + $0xd0] sm:$0xff] %v7592_v40  }
 0x3a8   : > { %10403 = vst [vmem:[#allocation47_spill] sm:$0xff] %v8834_v28  ;;  %v1246_v39 = vpop.f32.mrf.mxu0 }
 0x3a9   : > { %v1247_v1 = vadd.f32 %v8686_v12, %v1246_v39 }
 0x3ab   : > { %6162 = vmatmul.msk.bf16.gmra.mxu0 %vm816_vm0, %v7126_v18  ;;  %v2749_v42 = vpop.f32.mrf.mxu2  ;;  %v1402_v21 = vmax.f32 %v1247_v1, 0.0  ;;  %v7127_v18 = vld [vmem:[%s8450_s21 + $0x1c8] sm:$0xff] }
 0x3ad   : > { %v2393_v53 = vpop.f32.mrf.mxu1 }
 0x3ae   : > { %v8838_v35 = vadd.f32 %v2742_v25, %v2393_v53  ;;  %v7179_v27 = vld [vmem:[#allocation2 + $0xd0] sm:$0xff] }
 0x3b0   : > { %10404 = vst [vmem:[#allocation48_spill] sm:$0xff] %v8838_v35  ;;  %v1248_v57 = vpop.f32.mrf.mxu0  ;;  %2432 = vmatmul.bf16.gmra.mxu1 %v7179_v27  ;;  %2791 = vmatmul.bf16.gmra.mxu2 %v7179_v27 }
 0x3b1   : > { %v1249_v23 = vadd.f32 %v8686_v12, %v1248_v57 }
 0x3b3   : > { %v1403_v52 = vmax.f32 %v1249_v23, 0.0  ;;  %v2752_v16 = vpop.f32.mrf.mxu2 }
 0x3b5   : > { %v7597_v40 = vpack.c.bf16 %v1403_v52, %v1402_v21  ;;  %v2395_v17 = vpop.f32.mrf.mxu1 }
 0x3b6   : > { %v8842_v28 = vadd.f32 %v2744_v60, %v2395_v17 }
 0x3b7   : > { %7731 = vst [vmem:[#allocation2 + $0x68] sm:$0xff] %v7597_v40  }
 0x3b8   : > { %10405 = vst [vmem:[#allocation49_spill] sm:$0xff] %v8842_v28  ;;  %v1251_v47 = vpop.f32.mrf.mxu0 }
 0x3b9   : > { %v1252_v27 = vadd.f32 %v8686_v12, %v1251_v47 }
 0x3bb   : > { %6163 = vmatmul.msk.bf16.gmra.mxu0 %vm816_vm0, %v7127_v18  ;;  %v2754_v25 = vpop.f32.mrf.mxu2  ;;  %v1404_v23 = vmax.f32 %v1252_v27, 0.0 }
 0x3bd   : > { %v2398_v53 = vpop.f32.mrf.mxu1 }
 0x3be   : > { %v8846_v39 = vadd.f32 %v2747_v0, %v2398_v53  ;;  %v7180_v35 = vld [vmem:[#allocation2 + $0x68] sm:$0xff] }
 0x3c0   : > { %10406 = vst [vmem:[#allocation50_spill] sm:$0xff] %v8846_v39  ;;  %v1253_v57 = vpop.f32.mrf.mxu0  ;;  %2437 = vmatmul.bf16.gmra.mxu1 %v7180_v35  ;;  %2796 = vmatmul.bf16.gmra.mxu2 %v7180_v35 }
 0x3c1   : > { %v1254_v1 = vadd.f32 %v8686_v12, %v1253_v57 }
 0x3c3   : > { %v1405_v60 = vmax.f32 %v1254_v1, 0.0  ;;  %v2757_v21 = vpop.f32.mrf.mxu2 }
 0x3c5   : > { %v7602_v52 = vpack.c.bf16 %v1405_v60, %v1404_v23  ;;  %v2400_v40 = vpop.f32.mrf.mxu1 }
 0x3c6   : > { %v8850_v17 = vadd.f32 %v2749_v42, %v2400_v40 }
 0x3c7   : > { %7732 = vst [vmem:[#allocation2 + $0xc8] sm:$0xff] %v7602_v52  }
 0x3c8   : > { %10407 = vst [vmem:[#allocation51_spill] sm:$0xff] %v8850_v17  ;;  %v1256_v18 = vpop.f32.mrf.mxu0 }
 0x3c9   : > { %v1257_v47 = vadd.f32 %v8686_v12, %v1256_v18 }
 0x3cb   : > { %v2759_v28 = vpop.f32.mrf.mxu2  ;;  %v1406_v27 = vmax.f32 %v1257_v47, 0.0 }
 0x3cd   : > { %v2403_v0 = vpop.f32.mrf.mxu1 }
 0x3ce   : > { %v8852_v53 = vadd.f32 %v2752_v16, %v2403_v0  ;;  %v7181_v39 = vld [vmem:[#allocation2 + $0xc8] sm:$0xff] }
 0x3d0   : > { %10408 = vst [vmem:[#allocation52_spill] sm:$0xff] %v8852_v53  ;;  %v1258_v56 = vpop.f32.mrf.mxu0  ;;  %2442 = vmatmul.bf16.gmra.mxu1 %v7181_v39  ;;  %2801 = vmatmul.bf16.gmra.mxu2 %v7181_v39 }
 0x3d1   : > { %v1259_v35 = vadd.f32 %v8686_v12, %v1258_v56 }
 0x3d3   : > { %v1407_v57 = vmax.f32 %v1259_v35, 0.0  ;;  %v2762_v1 = vpop.f32.mrf.mxu2 }
 0x3d5   : > { %v7607_v23 = vpack.c.bf16 %v1407_v57, %v1406_v27  ;;  %v2405_v42 = vpop.f32.mrf.mxu1 }
 0x3d6   : > { %v8856_v60 = vadd.f32 %v2754_v25, %v2405_v42 }
 0x3d7   : > { %7733 = vst [vmem:[#allocation2 + $0x198] sm:$0xff] %v7607_v23  }
 0x3d8   : > { %10409 = vst [vmem:[#allocation53_spill] sm:$0xff] %v8856_v60  ;;  %v1261_v52 = vpop.f32.mrf.mxu0 }
 0x3d9   : > { %v1262_v18 = vadd.f32 %v8686_v12, %v1261_v52 }
 0x3db   : > { %v2764_v40 = vpop.f32.mrf.mxu2  ;;  %v1408_v39 = vmax.f32 %v1262_v18, 0.0 }
 0x3dd   : > { %v2408_v16 = vpop.f32.mrf.mxu1 }
 0x3de   : > { %v8858_v0 = vadd.f32 %v2757_v21, %v2408_v16  ;;  %v7182_v53 = vld [vmem:[#allocation2 + $0x198] sm:$0xff] }
 0x3e0   : > { %10410 = vst [vmem:[#allocation54_spill] sm:$0xff] %v8858_v0  ;;  %v1263_v17 = vpop.f32.mrf.mxu0  ;;  %2447 = vmatmul.bf16.gmra.mxu1 %v7182_v53  ;;  %2806 = vmatmul.bf16.gmra.mxu2 %v7182_v53 }
 0x3e1   : > { %v1264_v56 = vadd.f32 %v8686_v12, %v1263_v17 }
 0x3e3   : > { %v1409_v47 = vmax.f32 %v1264_v56, 0.0  ;;  %v2767_v35 = vpop.f32.mrf.mxu2 }
 0x3e5   : > { %v7612_v27 = vpack.c.bf16 %v1409_v47, %v1408_v39  ;;  %v2410_v25 = vpop.f32.mrf.mxu1 }
 0x3e6   : > { %v8862_v57 = vadd.f32 %v2759_v28, %v2410_v25 }
 0x3e7   : > { %7734 = vst [vmem:[#allocation2 + $0xe8] sm:$0xff] %v7612_v27  }
 0x3e8   : > { %10411 = vst [vmem:[#allocation55_spill] sm:$0xff] %v8862_v57  ;;  %v1266_v23 = vpop.f32.mrf.mxu0 }
 0x3e9   : > { %v1267_v0 = vadd.f32 %v8686_v12, %v1266_v23 }
 0x3eb   : > { %v8864_v42 = vpop.f32.mrf.mxu2  ;;  %v1410_v18 = vmax.f32 %v1267_v0, 0.0 }
 0x3ec   : > { %10412 = vst [vmem:[#allocation56_spill] sm:$0xff] %v8864_v42 }
 0x3ed   : > { %v2413_v21 = vpop.f32.mrf.mxu1 }
 0x3ee   : > { %v8866_v16 = vadd.f32 %v2762_v1, %v2413_v21  ;;  %v7183_v52 = vld [vmem:[#allocation2 + $0xe8] sm:$0xff] }
 0x3f0   : > { %10413 = vst [vmem:[#allocation57_spill] sm:$0xff] %v8866_v16  ;;  %v1268_v53 = vpop.f32.mrf.mxu0  ;;  %2452 = vmatmul.bf16.gmra.mxu1 %v7183_v52  ;;  %2811 = vmatmul.bf16.gmra.mxu2 %v7183_v52 }
 0x3f1   : > { %v1269_v17 = vadd.f32 %v8686_v12, %v1268_v53 }
 0x3f3   : > { %v1411_v56 = vmax.f32 %v1269_v17, 0.0  ;;  %v8870_v39 = vpop.f32.mrf.mxu2 }
 0x3f4   : > { %10414 = vst [vmem:[#allocation58_spill] sm:$0xff] %v8870_v39 }
 0x3f5   : > { %v7617_v28 = vpack.c.bf16 %v1411_v56, %v1410_v18  ;;  %v2415_v47 = vpop.f32.mrf.mxu1 }
 0x3f6   : > { %v8872_v27 = vadd.f32 %v2764_v40, %v2415_v47 }
 0x3f7   : > { %7735 = vst [vmem:[#allocation2 + $0x178] sm:$0xff] %v7617_v28  }
 0x3f8   : > { %10415 = vst [vmem:[#allocation59_spill] sm:$0xff] %v8872_v27  ;;  %v1271_v25 = vpop.f32.mrf.mxu0  ;;  %v7240_v27 = vld [vmem:[#allocation2 + $0x190] sm:$0xff] }
 0x3f9   : > { %v1272_v52 = vadd.f32 %v8686_v12, %v1271_v25 }
 0x3fb   : > { %v8874_v1 = vpop.f32.mrf.mxu2  ;;  %v1412_v53 = vmax.f32 %v1272_v52, 0.0 }
 0x3fc   : > { %10416 = vst [vmem:[#allocation60_spill] sm:$0xff] %v8874_v1 }
 0x3fd   : > { %v2418_v21 = vpop.f32.mrf.mxu1 }
 0x3fe   : > { %v8876_v42 = vadd.f32 %v2767_v35, %v2418_v21  ;;  %v7184_v23 = vld [vmem:[#allocation2 + $0x178] sm:$0xff] }
 0x400   : > { %10417 = vst [vmem:[#allocation61_spill] sm:$0xff] %v8876_v42  ;;  %v1273_v16 = vpop.f32.mrf.mxu0  ;;  %2457 = vmatmul.bf16.gmra.mxu1 %v7184_v23  ;;  %2816 = vmatmul.bf16.gmra.mxu2 %v7184_v23 }
 0x401   : > { %v1274_v0 = vadd.f32 %v8686_v12, %v1273_v16 }
 0x403   : > { %v1413_v17 = vmax.f32 %v1274_v0, 0.0  ;;  %v8880_v40 = vpop.f32.mrf.mxu2 }
 0x404   : > { %10418 = vst [vmem:[#allocation62_spill] sm:$0xff] %v8880_v40 }
 0x405   : > { %v7622_v18 = vpack.c.bf16 %v1413_v17, %v1412_v53  ;;  %v8882_v56 = vpop.f32.mrf.mxu1 }
 0x406   : > { %10419 = vst [vmem:[#allocation63_spill] sm:$0xff] %v8882_v56 }
 0x407   : > { %7736 = vst [vmem:[#allocation2 + $0x70] sm:$0xff] %v7622_v18  }
 0x408   : > { %v1276_v28 = vpop.f32.mrf.mxu0 }
 0x409   : > { %v1277_v21 = vadd.f32 %v8686_v12, %v1276_v28 }
 0x40b   : > { %v8887_v25 = vpop.f32.mrf.mxu2  ;;  %v1414_v23 = vmax.f32 %v1277_v21, 0.0 }
 0x40c   : > { %10421 = vst [vmem:[#allocation65_spill] sm:$0xff] %v8887_v25 }
 0x40d   : > { %v8884_v47 = vpop.f32.mrf.mxu1 }
 0x40e   : > { %10420 = vst [vmem:[#allocation64_spill] sm:$0xff] %v8884_v47  ;;  %v7185_v35 = vld [vmem:[#allocation2 + $0x70] sm:$0xff] }
 0x410   : > { %v1278_v1 = vpop.f32.mrf.mxu0  ;;  %2462 = vmatmul.bf16.gmra.mxu1 %v7185_v35  ;;  %2821 = vmatmul.bf16.gmra.mxu2 %v7185_v35 }
 0x411   : > { %v1279_v16 = vadd.f32 %v8686_v12, %v1278_v1 }
 0x413   : > { %v1415_v52 = vmax.f32 %v1279_v16, 0.0  ;;  %v8892_v18 = vpop.f32.mrf.mxu2 }
 0x414   : > { %10423 = vst [vmem:[#allocation67_spill] sm:$0xff] %v8892_v18 }
 0x415   : > { %v7627_v0 = vpack.c.bf16 %v1415_v52, %v1414_v23  ;;  %v8890_v53 = vpop.f32.mrf.mxu1 }
 0x416   : > { %10422 = vst [vmem:[#allocation66_spill] sm:$0xff] %v8890_v53 }
 0x417   : > { %7737 = vst [vmem:[#allocation2 + $0x1c8] sm:$0xff] %v7627_v0  }
 0x418   : > { %v1281_v17 = vpop.f32.mrf.mxu0 }
 0x419   : > { %v1282_v28 = vadd.f32 %v8686_v12, %v1281_v17 }
 0x41b   : > { %v1416_v47 = vmax.f32 %v1282_v28, 0.0  ;;  %v8898_v1 = vpop.f32.mrf.mxu2 }
 0x41c   : > { %10425 = vst [vmem:[#allocation69_spill] sm:$0xff] %v8898_v1 }
 0x41d   : > { %v8894_v40 = vpop.f32.mrf.mxu1 }
 0x41e   : > { %10424 = vst [vmem:[#allocation68_spill] sm:$0xff] %v8894_v40  ;;  %v7186_v39 = vld [vmem:[#allocation2 + $0x1c8] sm:$0xff] }
 0x420   : > { %v1283_v25 = vpop.f32.mrf.mxu0  ;;  %2467 = vmatmul.bf16.gmra.mxu1 %v7186_v39 }
 0x421   : > { %v1284_v35 = vadd.f32 %v8686_v12, %v1283_v25 }
 0x423   : > { %v1417_v21 = vmax.f32 %v1284_v35, 0.0  ;;  %v8902_v0 = vpop.f32.mrf.mxu2 }
 0x424   : > { %10427 = vst [vmem:[#allocation71_spill] sm:$0xff] %v8902_v0 }
 0x425   : > { %v7632_v16 = vpack.c.bf16 %v1417_v21, %v1416_v47  ;;  %v8900_v23 = vpop.f32.mrf.mxu1 }
 0x426   : > { %10426 = vst [vmem:[#allocation70_spill] sm:$0xff] %v8900_v23 }
 0x427   : > { %7738 = vst [vmem:[#allocation2 + $0x90] sm:$0xff] %v7632_v16  }
 0x428   : > { %v1286_v52 = vpop.f32.mrf.mxu0 }
 0x429   : > { %v1287_v17 = vadd.f32 %v8686_v12, %v1286_v52 }
 0x42b   : > { %v1418_v28 = vmax.f32 %v1287_v17, 0.0  ;;  %v8910_v47 = vpop.f32.mrf.mxu2 }
 0x42c   : > { %10430 = vst [vmem:[#allocation74_spill] sm:$0xff] %v8910_v47 }
 0x42d   : > { %v8904_v53 = vpop.f32.mrf.mxu1 }
 0x42e   : > { %10428 = vst [vmem:[#allocation72_spill] sm:$0xff] %v8904_v53  ;;  %v7187_v40 = vld [vmem:[#allocation2 + $0x90] sm:$0xff] }
 0x42f   : > { %v7269_v53 = vld [vmem:[#allocation7 + $0xb8] sm:$0xff] }
 0x430   : > { %v1288_v18 = vpop.f32.mrf.mxu0  ;;  %2472 = vmatmul.bf16.gmra.mxu1 %v7187_v40 }
 0x431   : > { %v1289_v25 = vadd.f32 %v8686_v12, %v1288_v18 }
 0x433   : > { %v1419_v56 = vmax.f32 %v1289_v25, 0.0  ;;  %v8915_v42 = vpop.f32.mrf.mxu2  ;;  %v7268_v25 = vld [vmem:[#allocation7 + $0xb0] sm:$0xff] }
 0x434   : > { %10432 = vst [vmem:[#allocation76_spill] sm:$0xff] %v8915_v42  ;;  %v7265_v42 = vld [vmem:[#allocation7 + $0x98] sm:$0xff] }
 0x435   : > { %v7637_v1 = vpack.c.bf16 %v1419_v56, %v1418_v28  ;;  %v8908_v35 = vpop.f32.mrf.mxu1 }
 0x436   : > { %10429 = vst [vmem:[#allocation73_spill] sm:$0xff] %v8908_v35 }
 0x437   : > { %7739 = vst [vmem:[#allocation2 + $0x160] sm:$0xff] %v7637_v1   ;;  %v7267_v1 = vld [vmem:[#allocation7 + $0xa8] sm:$0xff] }
 0x438   : > { %v1291_v21 = vpop.f32.mrf.mxu0 }
 0x439   : > { %v1292_v0 = vadd.f32 %v8686_v12, %v1291_v21  ;;  %v7266_v21 = vld [vmem:[#allocation7 + $0xa0] sm:$0xff] }
 0x43b   : > { %v1420_v56 = vmax.f32 %v1292_v0, 0.0 }
 0x43d   : > { %v8912_v16 = vpop.f32.mrf.mxu1 }
 0x43e   : > { %10431 = vst [vmem:[#allocation75_spill] sm:$0xff] %v8912_v16  ;;  %v7196_v23 = vld [vmem:[#allocation2 + $0x160] sm:$0xff]  ;;  %v8920_v16 = vpop.f32.mrf.mxu2 }
 0x43f   : > { %2477 = vmatmul.bf16.vlgmr.msra.gmra.mxu3 %v7196_v23  ;;  %10434 = vst [vmem:[#allocation78_spill] sm:$0xff] %v8920_v16 }
 0x440   : > { %v1293_v52 = vpop.f32.mrf.mxu0  ;;  %3350 = vmatpush.bf16.msra.mxu3 %v7269_v53 }
 0x441   : > { %v1294_v18 = vadd.f32 %v8686_v12, %v1293_v52  ;;  %v7264_v12 = vld [vmem:[#allocation7 + $0x90] sm:$0xff]  ;;  %v7263_v52 = vld [vmem:[#allocation7 + $0x88] sm:$0xff] }
 0x443   : > { %v1421_v17 = vmax.f32 %v1294_v18, 0.0  ;;  %v7262_v18 = vld [vmem:[#allocation7 + $0x80] sm:$0xff] }
 0x444   : > { %3351 = vmatpush.bf16.msra.mxu3 %v7268_v25 }
 0x445   : > { %v7642_v28 = vpack.c.bf16 %v1421_v17, %v1420_v56  ;;  %v8918_v47 = vpop.f32.mrf.mxu1 }
 0x446   : > { %10433 = vst [vmem:[#allocation77_spill] sm:$0xff] %v8918_v47  ;;  %v8924_v53 = vpop.f32.mrf.mxu2 }
 0x447   : > { %7740 = vst [vmem:[#allocation2 + $0x30] sm:$0xff] %v7642_v28  }
 0x448   : > { %3352 = vmatpush.bf16.msra.mxu3 %v7267_v1  ;;  %10436 = vst [vmem:[#allocation80_spill] sm:$0xff] %v8924_v53  ;;  %v7206_v53 = vld [vmem:[#allocation2 + $0x50] sm:$0xff] }
 0x44c   : > { %3353 = vmatpush.bf16.msra.mxu3 %v7266_v21 }
 0x44d   : > { %v8922_v35 = vpop.f32.mrf.mxu1 }
 0x44e   : > { %10435 = vst [vmem:[#allocation79_spill] sm:$0xff] %v8922_v35  ;;  %v7197_v23 = vld [vmem:[#allocation2 + $0x30] sm:$0xff]  ;;  %v8930_v17 = vpop.f32.mrf.mxu2 }
 0x44f   : > { %2482 = vmatmul.bf16.gmra.mxu3 %v7197_v23  ;;  %10439 = vst [vmem:[#allocation83_spill] sm:$0xff] %v8930_v17  ;;  %v7209_v17 = vld [vmem:[#allocation2 + $0x48] sm:$0xff] }
 0x450   : > { %3354 = vmatpush.bf16.msra.mxu3 %v7265_v42 }
 0x454   : > { %3355 = vmatpush.bf16.msra.mxu3 %v7264_v12 }
 0x455   : > { %v8926_v0 = vpop.f32.mrf.mxu1 }
 0x456   : > { %10437 = vst [vmem:[#allocation81_spill] sm:$0xff] %v8926_v0  ;;  %v8934_v28 = vpop.f32.mrf.mxu2  ;;  %v7214_v0 = vld [vmem:[#allocation2 + $0x120] sm:$0xff] }
 0x457   : > { %10441 = vst [vmem:[#allocation85_spill] sm:$0xff] %v8934_v28  ;;  %v7210_v28 = vld [vmem:[#allocation2 + $0x180] sm:$0xff] }
 0x458   : > { %3356 = vmatpush.bf16.msra.mxu3 %v7263_v52 }
 0x45c   : > { %3357 = vmatpush.bf16.msra.mxu3 %v7262_v18  ;;  %v7207_v18 = vld [vmem:[#allocation2 + $0x168] sm:$0xff] }
 0x45d   : > { %v8928_v56 = vpop.f32.mrf.mxu1 }
 0x45e   : > { %10438 = vst [vmem:[#allocation82_spill] sm:$0xff] %v8928_v56  ;;  %v8938_v1 = vpop.f32.mrf.mxu2  ;;  %v7212_v56 = vld [vmem:[#allocation2 + $0x118] sm:$0xff] }
 0x45f   : > { %2826 = vmatmul.bf16.vlgmr.msrb.gmra.mxu3 %v7186_v39  ;;  %10443 = vst [vmem:[#allocation87_spill] sm:$0xff] %v8938_v1  ;;  %v7208_v39 = vld [vmem:[#allocation2 + $0x130] sm:$0xff] }
 0x465   : > { %v8932_v25 = vpop.f32.mrf.mxu1 }
 0x466   : > { %10440 = vst [vmem:[#allocation84_spill] sm:$0xff] %v8932_v25  ;;  %v2807_v23 = vpop.f32.mrf.mxu2  ;;  %v7211_v25 = vld [vmem:[#allocation2 + $0x110] sm:$0xff] }
 0x46d   : > { %v8936_v42 = vpop.f32.mrf.mxu1 }
 0x46e   : > { %10442 = vst [vmem:[#allocation86_spill] sm:$0xff] %v8936_v42 }
 0x46f   : > { %2831 = vmatmul.bf16.gmra.mxu3 %v7187_v40 }
 0x475   : > { %v8940_v21 = vpop.f32.mrf.mxu1 }
 0x476   : > { %10444 = vst [vmem:[#allocation88_spill] sm:$0xff] %v8940_v21 }
 0x47d   : > { %v2458_v12 = vpop.f32.mrf.mxu1 }
 0x47e   : > { %v8942_v52 = vadd.f32 %v2807_v23, %v2458_v12 }
 0x47f   : > { %3358 = vmatmul.bf16.vlgmr.msra.gmra.mxu3 %v7206_v53 }
 0x480   : > { %10445 = vst [vmem:[#allocation89_spill] sm:$0xff] %v8942_v52 }
 0x48f   : > { %3363 = vmatmul.bf16.gmra.mxu3 %v7207_v18  ;;  %v7213_v18 = vld [vmem:[#allocation2 + $0x98] sm:$0xff] }
 0x49f   : > { %3368 = vmatmul.bf16.gmra.mxu3 %v7208_v39 }
 0x4af   : > { %3373 = vmatmul.bf16.gmra.mxu3 %v7209_v17 }
 0x4bf   : > { %3378 = vmatmul.bf16.gmra.mxu3 %v7210_v28 }
 0x4c2   : > { %v2478_v42 = vpop.f32.mrf.mxu3 }
 0x4ca   : > { %v2480_v40 = vpop.f32.mrf.mxu3 }
 0x4cf   : > { %3383 = vmatmul.bf16.gmra.mxu3 %v7211_v25 }
 0x4d2   : > { %v2483_v1 = vpop.f32.mrf.mxu3 }
 0x4da   : > { %v2485_v21 = vpop.f32.mrf.mxu3 }
 0x4df   : > { %3388 = vmatmul.bf16.gmra.mxu3 %v7212_v56 }
 0x4e2   : > { %v2827_v23 = vpop.f32.mrf.mxu3 }
 0x4e3   : > { %v8944_v12 = vadd.f32 %v2827_v23, %v2478_v42  ;;  %v7215_v23 = vld [vmem:[#allocation2 + $0x150] sm:$0xff] }
 0x4e5   : > { %10446 = vst [vmem:[#allocation90_spill] sm:$0xff] %v8944_v12 }
 0x4ea   : > { %v2829_v53 = vpop.f32.mrf.mxu3 }
 0x4eb   : > { %v8946_v52 = vadd.f32 %v2829_v53, %v2480_v40 }
 0x4ed   : > { %10447 = vst [vmem:[#allocation91_spill] sm:$0xff] %v8946_v52 }
 0x4ef   : > { %3393 = vmatmul.bf16.gmra.mxu3 %v7213_v18 }
 0x4f2   : > { %v2832_v39 = vpop.f32.mrf.mxu3 }
 0x4f3   : > { %v8948_v17 = vadd.f32 %v2832_v39, %v2483_v1  ;;  %v7216_v39 = vld [vmem:[#allocation2 + $0x108] sm:$0xff] }
 0x4f5   : > { %10448 = vst [vmem:[#allocation92_spill] sm:$0xff] %v8948_v17  ;;  %v8956_v17 = vld [vmem:[#allocation8] ss:$0 sm:$0xff] }
 0x4fa   : > { %v2834_v28 = vpop.f32.mrf.mxu3 }
 0x4fb   : > { %v8950_v16 = vadd.f32 %v2834_v28, %v2485_v21 }
 0x4fd   : > { %10449 = vst [vmem:[#allocation93_spill] sm:$0xff] %v8950_v16 }
 0x4ff   : > { %3398 = vmatmul.bf16.gmra.mxu3 %v7214_v0 }
 0x502   : > { %v3359_v25 = vpop.f32.mrf.mxu3 }
 0x503   : > { %v3639_v35 = vadd.f32 %v3359_v25, %v8540_v5 }
 0x505   : > { %v3755_v0 = vadd.f32 %v8956_v17, %v3639_v35 }
 0x50a   : > { %v3361_v56 = vpop.f32.mrf.mxu3 }
 0x50b   : > { %v3640_v42 = vadd.f32 %v3361_v56, %v8544_v15  ;;  %v3867_v15 = vmax.f32 %v3755_v0, 0.0 }
 0x50f   : > { %3403 = vmatmul.bf16.gmra.mxu3 %v7215_v23 }
 0x512   : > { %v3364_v40 = vpop.f32.mrf.mxu3 }
 0x513   : > { %v3641_v53 = vadd.f32 %v3364_v40, %v8548_v20  ;;  %v3756_v20 = vadd.f32 %v8956_v17, %v3640_v42 }
 0x51a   : > { %v3366_v18 = vpop.f32.mrf.mxu3 }
 0x51b   : > { %v3642_v1 = vadd.f32 %v3366_v18, %v8552_v31  ;;  %v7217_v18 = vld [vmem:[#allocation2 + $0x60] sm:$0xff] }
 0x51f   : > { %3408 = vmatmul.bf16.gmra.mxu3 %v7216_v39  ;;  %v3868_v39 = vmax.f32 %v3756_v20, 0.0 }
 0x522   : > { %v3369_v21 = vpop.f32.mrf.mxu3 }
 0x523   : > { %v3643_v5 = vadd.f32 %v3369_v21, %v8556_v36  ;;  %v3757_v21 = vadd.f32 %v8956_v17, %v3641_v53 }
 0x525   : > { %v3759_v28 = vadd.f32 %v8956_v17, %v3643_v5 }
 0x527   : > { %v3871_v25 = vmax.f32 %v3759_v28, 0.0  ;;  %v3869_v28 = vmax.f32 %v3757_v21, 0.0 }
 0x529   : > { %v8961_v56 = vmax.f32 %v3867_v15, %v3871_v25 }
 0x52a   : > { %v3371_v23 = vpop.f32.mrf.mxu3 }
 0x52b   : > { %v3644_v31 = vadd.f32 %v3371_v23, %v8560_v46  ;;  %v3758_v23 = vadd.f32 %v8956_v17, %v3642_v1 }
 0x52d   : > { %v3760_v40 = vadd.f32 %v8956_v17, %v3644_v31 }
 0x52f   : > { %v3872_v16 = vmax.f32 %v3760_v40, 0.0  ;;  %3413 = vmatmul.bf16.gmra.mxu3 %v7217_v18  ;;  %v7218_v40 = vld [vmem:[#allocation2 + $0xe0] sm:$0xff]  ;;  %v3870_v18 = vmax.f32 %v3758_v23, 0.0 }
 0x531   : > { %v8966_v35 = vmax.f32 %v3868_v39, %v3872_v16 }
 0x532   : > { %v3374_v36 = vpop.f32.mrf.mxu3 }
 0x533   : > { %v3645_v0 = vadd.f32 %v3374_v36, %v8564_v51 }
 0x535   : > { %v3761_v5 = vadd.f32 %v8956_v17, %v3645_v0 }
 0x537   : > { %v3873_v15 = vmax.f32 %v3761_v5, 0.0 }
 0x539   : > { %v8971_v42 = vmax.f32 %v3869_v28, %v3873_v15 }
 0x53a   : > { %v3376_v46 = vpop.f32.mrf.mxu3 }
 0x53b   : > { %v3646_v20 = vadd.f32 %v3376_v46, %v8568_v61  ;;  %v7219_v46 = vld [vmem:[#allocation2 + $0x188] sm:$0xff] }
 0x53d   : > { %v3762_v31 = vadd.f32 %v8956_v17, %v3646_v20 }
 0x53f   : > { %v3874_v39 = vmax.f32 %v3762_v31, 0.0  ;;  %3418 = vmatmul.bf16.gmra.mxu3 %v7218_v40 }
 0x541   : > { %v8976_v53 = vmax.f32 %v3870_v18, %v3874_v39 }
 0x542   : > { %v3379_v51 = vpop.f32.mrf.mxu3 }
 0x543   : > { %v3647_v36 = vadd.f32 %v3379_v51, %v8572_v2 }
 0x545   : > { %v3763_v21 = vadd.f32 %v8956_v17, %v3647_v36 }
 0x547   : > { %v3875_v0 = vmax.f32 %v3763_v21, 0.0  ;;  %v7220_v21 = vld [vmem:[#allocation2 + $0x138] sm:$0xff] }
 0x549   : > { %v8980_v5 = vmax.f32 %v3871_v25, %v3875_v0 }
 0x54a   : > { %v3381_v28 = vpop.f32.mrf.mxu3 }
 0x54b   : > { %v3648_v1 = vadd.f32 %v3381_v28, %v8576_v13 }
 0x54d   : > { %v3764_v61 = vadd.f32 %v8956_v17, %v3648_v1 }
 0x54f   : > { %v3876_v20 = vmax.f32 %v3764_v61, 0.0  ;;  %3423 = vmatmul.bf16.gmra.mxu3 %v7219_v46 }
 0x551   : > { %v8984_v23 = vmax.f32 %v3872_v16, %v3876_v20 }
 0x552   : > { %v3384_v31 = vpop.f32.mrf.mxu3 }
 0x553   : > { %v3649_v40 = vadd.f32 %v3384_v31, %v8580_v19 }
 0x555   : > { %v3765_v2 = vadd.f32 %v8956_v17, %v3649_v40 }
 0x557   : > { %v3877_v18 = vmax.f32 %v3765_v2, 0.0  ;;  %v7221_v2 = vld [vmem:[#allocation2 + $0x140] sm:$0xff] }
 0x559   : > { %v8988_v51 = vmax.f32 %v3873_v15, %v3877_v18 }
 0x55a   : > { %v3386_v25 = vpop.f32.mrf.mxu3 }
 0x55b   : > { %v3650_v36 = vadd.f32 %v3386_v25, %v8584_v32 }
 0x55d   : > { %v3766_v13 = vadd.f32 %v8956_v17, %v3650_v36 }
 0x55f   : > { %v3878_v28 = vmax.f32 %v3766_v13, 0.0  ;;  %3428 = vmatmul.bf16.gmra.mxu3 %v7220_v21 }
 0x561   : > { %v8992_v1 = vmax.f32 %v3874_v39, %v3878_v28 }
 0x562   : > { %v3389_v16 = vpop.f32.mrf.mxu3 }
 0x563   : > { %v3651_v61 = vadd.f32 %v3389_v16, %v8588_v38 }
 0x565   : > { %v3767_v19 = vadd.f32 %v8956_v17, %v3651_v61 }
 0x567   : > { %v3879_v46 = vmax.f32 %v3767_v19, 0.0  ;;  %v7222_v19 = vld [vmem:[#allocation2 + $0x80] sm:$0xff] }
 0x569   : > { %v8996_v31 = vmax.f32 %v3875_v0, %v3879_v46 }
 0x56a   : > { %v3391_v15 = vpop.f32.mrf.mxu3 }
 0x56b   : > { %v3652_v40 = vadd.f32 %v3391_v15, %v8592_v49 }
 0x56d   : > { %v3768_v32 = vadd.f32 %v8956_v17, %v3652_v40 }
 0x56f   : > { %v3880_v25 = vmax.f32 %v3768_v32, 0.0  ;;  %3433 = vmatmul.bf16.gmra.mxu3 %v7221_v2 }
 0x571   : > { %v9000_v36 = vmax.f32 %v3876_v20, %v3880_v25 }
 0x572   : > { %v3394_v39 = vpop.f32.mrf.mxu3 }
 0x573   : > { %v3653_v13 = vadd.f32 %v3394_v39, %v8596_v55 }
 0x575   : > { %v3769_v38 = vadd.f32 %v8956_v17, %v3653_v13 }
 0x577   : > { %v3881_v21 = vmax.f32 %v3769_v38, 0.0  ;;  %v7223_v38 = vld [vmem:[#allocation2 + $0x1a8] sm:$0xff] }
 0x579   : > { %v9004_v16 = vmax.f32 %v3877_v18, %v3881_v21 }
 0x57a   : > { %v3396_v0 = vpop.f32.mrf.mxu3 }
 0x57b   : > { %v3654_v61 = vadd.f32 %v3396_v0, %v8600_v3 }
 0x57d   : > { %v3770_v49 = vadd.f32 %v8956_v17, %v3654_v61 }
 0x57f   : > { %v3882_v15 = vmax.f32 %v3770_v49, 0.0  ;;  %3438 = vmatmul.bf16.gmra.mxu3 %v7222_v19 }
 0x581   : > { %v9008_v40 = vmax.f32 %v3878_v28, %v3882_v15 }
 0x582   : > { %v3399_v20 = vpop.f32.mrf.mxu3 }
 0x583   : > { %v3655_v32 = vadd.f32 %v3399_v20, %v8604_v9 }
 0x585   : > { %v3771_v55 = vadd.f32 %v8956_v17, %v3655_v32 }
 0x587   : > { %v3883_v2 = vmax.f32 %v3771_v55, 0.0  ;;  %v7224_v55 = vld [vmem:[#allocation2 + $0x1b8] sm:$0xff] }
 0x589   : > { %v9012_v39 = vmax.f32 %v3879_v46, %v3883_v2 }
 0x58a   : > { %v3401_v18 = vpop.f32.mrf.mxu3 }
 0x58b   : > { %v3656_v13 = vadd.f32 %v3401_v18, %v8608_v24 }
 0x58d   : > { %v3772_v3 = vadd.f32 %v8956_v17, %v3656_v13 }
 0x58f   : > { %v3884_v0 = vmax.f32 %v3772_v3, 0.0  ;;  %3443 = vmatmul.bf16.gmra.mxu3 %v7223_v38 }
 0x591   : > { %v9016_v61 = vmax.f32 %v3880_v25, %v3884_v0 }
 0x592   : > { %v3404_v28 = vpop.f32.mrf.mxu3 }
 0x593   : > { %v3657_v49 = vadd.f32 %v3404_v28, %v8612_v29  ;;  %v7860_v9 = vpack.i.bf16 %v9016_v61, %v9012_v39 }
 0x595   : > { %v3773_v19 = vadd.f32 %v8956_v17, %v3657_v49  ;;  %7861 = vrot.lane.b32.xlu2 %v7860_v9, %s8330_s22 }
 0x597   : > { %v3885_v46 = vmax.f32 %v3773_v19, 0.0 }
 0x599   : > { %v9023_v24 = vmax.f32 %v3881_v21, %v3885_v46 }
 0x59a   : > { %v3406_v20 = vpop.f32.mrf.mxu3 }
 0x59b   : > { %v3658_v32 = vadd.f32 %v3406_v20, %v8616_v43 }
 0x59d   : > { %v3774_v25 = vadd.f32 %v8956_v17, %v3658_v32 }
 0x59f   : > { %v3886_v18 = vmax.f32 %v3774_v25, 0.0  ;;  %3448 = vmatmul.bf16.gmra.mxu3 %v7224_v55 }
 0x5a1   : > { %v9027_v29 = vmax.f32 %v3882_v15, %v3886_v18  ;;  %v7225_v15 = vld [vmem:[#allocation2 + $0x28] sm:$0xff] }
 0x5a2   : > { %v3409_v13 = vpop.f32.mrf.mxu3 }
 0x5a3   : > { %v3659_v3 = vadd.f32 %v3409_v13, %v8620_v50  ;;  %v7850_v38 = vpack.i.bf16 %v9027_v29, %v9023_v24 }
 0x5a5   : > { %v3775_v28 = vadd.f32 %v8956_v17, %v3659_v3  ;;  %7851 = vrot.lane.b32.xlu1 %v7850_v38, %s8330_s22 }
 0x5a7   : > { %v3887_v21 = vmax.f32 %v3775_v28, 0.0  ;;  %v7226_v28 = vld [vmem:[#allocation2 + $0xf0] sm:$0xff] }
 0x5a9   : > { %v9034_v49 = vmax.f32 %v3883_v2, %v3887_v21 }
 0x5aa   : > { %v3411_v43 = vpop.f32.mrf.mxu3 }
 0x5ab   : > { %v3660_v9 = vadd.f32 %v3411_v43, %v8624_v63 }
 0x5ad   : > { %v3776_v19 = vadd.f32 %v8956_v17, %v3660_v9 }
 0x5af   : > { %v3888_v20 = vmax.f32 %v3776_v19, 0.0  ;;  %3453 = vmatmul.bf16.gmra.mxu3 %v7225_v15 }
 0x5b1   : > { %v9038_v32 = vmax.f32 %v3884_v0, %v3888_v20 }
 0x5b2   : > { %v3414_v50 = vpop.f32.mrf.mxu3 }
 0x5b3   : > { %v3661_v25 = vadd.f32 %v3414_v50, %v8628_v7 }
 0x5b5   : > { %v3777_v55 = vadd.f32 %v8956_v17, %v3661_v25 }
 0x5b7   : > { %v3889_v13 = vmax.f32 %v3777_v55, 0.0  ;;  %v7227_v55 = vld [vmem:[#allocation2 + $0x158] sm:$0xff] }
 0x5b9   : > { %v9042_v3 = vmax.f32 %v3885_v46, %v3889_v13 }
 0x5ba   : > { %v3416_v2 = vpop.f32.mrf.mxu3 }
 0x5bb   : > { %v3662_v38 = vadd.f32 %v3416_v2, %v8632_v22 }
 0x5bd   : > { %v3778_v63 = vadd.f32 %v8956_v17, %v3662_v38 }
 0x5bf   : > { %v3890_v43 = vmax.f32 %v3778_v63, 0.0  ;;  %3458 = vmatmul.bf16.gmra.mxu3 %v7226_v28 }
 0x5c1   : > { %v9046_v9 = vmax.f32 %v3886_v18, %v3890_v43 }
 0x5c2   : > { %v3419_v0 = vpop.f32.mrf.mxu3 }
 0x5c3   : > { %v3663_v19 = vadd.f32 %v3419_v0, %v8636_v30 }
 0x5c5   : > { %v3779_v7 = vadd.f32 %v8956_v17, %v3663_v19 }
 0x5c7   : > { %v3891_v15 = vmax.f32 %v3779_v7, 0.0  ;;  %v7228_v7 = vld [vmem:[#allocation2 + $0x128] sm:$0xff] }
 0x5c9   : > { %v9050_v50 = vmax.f32 %v3887_v21, %v3891_v15 }
 0x5ca   : > { %v3421_v46 = vpop.f32.mrf.mxu3 }
 0x5cb   : > { %v3664_v25 = vadd.f32 %v3421_v46, %v8640_v45 }
 0x5cd   : > { %v3780_v22 = vadd.f32 %v8956_v17, %v3664_v25 }
 0x5cf   : > { %v3892_v2 = vmax.f32 %v3780_v22, 0.0  ;;  %3463 = vmatmul.bf16.gmra.mxu3 %v7227_v55 }
 0x5d1   : > { %v9054_v38 = vmax.f32 %v3888_v20, %v3892_v2 }
 0x5d2   : > { %v3424_v18 = vpop.f32.mrf.mxu3 }
 0x5d3   : > { %v3665_v63 = vadd.f32 %v3424_v18, %v8644_v54 }
 0x5d5   : > { %v3781_v30 = vadd.f32 %v8956_v17, %v3665_v63 }
 0x5d7   : > { %v3893_v28 = vmax.f32 %v3781_v30, 0.0  ;;  %v7229_v30 = vld [vmem:[#allocation2 + $0x1d8] sm:$0xff] }
 0x5d9   : > { %v9058_v0 = vmax.f32 %v3889_v13, %v3893_v28 }
 0x5da   : > { %v3426_v21 = vpop.f32.mrf.mxu3 }
 0x5db   : > { %v3666_v19 = vadd.f32 %v3426_v21, %v8648_v6 }
 0x5dd   : > { %v3782_v45 = vadd.f32 %v8956_v17, %v3666_v19 }
 0x5df   : > { %v3894_v46 = vmax.f32 %v3782_v45, 0.0  ;;  %3468 = vmatmul.bf16.gmra.mxu3 %v7228_v7 }
 0x5e1   : > { %v9062_v25 = vmax.f32 %v3890_v43, %v3894_v46 }
 0x5e2   : > { %v3429_v20 = vpop.f32.mrf.mxu3 }
 0x5e3   : > { %v3667_v22 = vadd.f32 %v3429_v20, %v8652_v14 }
 0x5e5   : > { %v3783_v54 = vadd.f32 %v8956_v17, %v3667_v22 }
 0x5e7   : > { %v3895_v55 = vmax.f32 %v3783_v54, 0.0 }
 0x5e9   : > { %v9066_v18 = vmax.f32 %v3891_v15, %v3895_v55 }
 0x5ea   : > { %v3431_v13 = vpop.f32.mrf.mxu3 }
 0x5eb   : > { %v3668_v63 = vadd.f32 %v3431_v13, %v8656_v34 }
 0x5ed   : > { %v3784_v6 = vadd.f32 %v8956_v17, %v3668_v63 }
 0x5ef   : > { %v3896_v21 = vmax.f32 %v3784_v6, 0.0  ;;  %3473 = vmatmul.bf16.gmra.mxu3 %v7229_v30 }
 0x5f1   : > { %v9070_v19 = vmax.f32 %v3892_v2, %v3896_v21  ;;  %v7880_v2 = vpack.i.bf16 %v9000_v36, %v8996_v31 }
 0x5f2   : > { %v3434_v43 = vpop.f32.mrf.mxu3 }
 0x5f3   : > { %v3669_v45 = vadd.f32 %v3434_v43, %v8660_v41  ;;  %v7865_v14 = vpack.i.bf16 %v9070_v19, %v9066_v18  ;;  %v7230_v41 = vld [vmem:[#allocation2 + $0x8] sm:$0xff] }
 0x5f5   : > { %v3785_v7 = vadd.f32 %v8956_v17, %v3669_v45  ;;  %7866 = vrot.lane.b32.xlu2 %v7865_v14, %s8330_s22 }
 0x5f7   : > { %v3897_v15 = vmax.f32 %v3785_v7, 0.0 }
 0x5f9   : > { %v9077_v20 = vmax.f32 %v3893_v28, %v3897_v15 }
 0x5fa   : > { %v3436_v34 = vpop.f32.mrf.mxu3 }
 0x5fb   : > { %v3670_v22 = vadd.f32 %v3436_v34, %v8664_v59  ;;  %v7895_v59 = vpack.i.bf16 %v9046_v9, %v9042_v3  ;;  %v7910_v34 = vpack.i.bf16 %v8976_v53, %v8971_v42 }
 0x5fd   : > { %v3786_v54 = vadd.f32 %v8956_v17, %v3670_v22  ;;  %7881 = vrot.lane.b32.xlu2 %v7880_v2, %s8330_s22  ;;  %v7231_v2 = vld [vmem:[#allocation2 + $0x170] sm:$0xff] }
 0x5ff   : > { %v3898_v13 = vmax.f32 %v3786_v54, 0.0  ;;  %3478 = vmatmul.bf16.gmra.mxu3 %v7230_v41 }
 0x601   : > { %v9084_v63 = vmax.f32 %v3894_v46, %v3898_v13 }
 0x602   : > { %v3439_v6 = vpop.f32.mrf.mxu3 }
 0x603   : > { %v3671_v30 = vadd.f32 %v3439_v6, %v8668_v4  ;;  %v7855_v28 = vpack.i.bf16 %v9084_v63, %v9077_v20  ;;  %v7875_v4 = vpack.i.bf16 %v9062_v25, %v9058_v0  ;;  %v7890_v6 = vpack.i.bf16 %v8992_v1, %v8988_v51 }
 0x605   : > { %v3787_v43 = vadd.f32 %v8956_v17, %v3671_v30  ;;  %7856 = vrot.lane.b32.xlu1 %v7855_v28, %s8330_s22  ;;  %7896 = vrot.lane.b32.xlu2 %v7895_v59, %s8330_s22  ;;  %v7862_v30 = vpop.permute.xlu2 %7861 }
 0x607   : > { %v3899_v45 = vmax.f32 %v3787_v43, 0.0 }
 0x609   : > { %v9094_v14 = vmax.f32 %v3895_v55, %v3899_v45 }
 0x60a   : > { %v3441_v46 = vpop.f32.mrf.mxu3 }
 0x60b   : > { %v3672_v7 = vadd.f32 %v3441_v46, %v8672_v26  ;;  %v7864_v46 = vunpack.i.h.bf16 %v7862_v30 }
 0x60d   : > { %v3788_v22 = vadd.f32 %v8956_v17, %v3672_v7  ;;  %7876 = vrot.lane.b32.xlu1 %v7875_v4, %s8330_s22  ;;  %7911 = vrot.lane.b32.xlu2 %v7910_v34, %s8330_s22  ;;  %v7863_v7 = vunpack.i.l.bf16 %v7862_v30  ;;  %v4316_v30 = vmax.f32 %v9016_v61, %v7864_v46 }
 0x60f   : > { %v3900_v54 = vmax.f32 %v3788_v22, 0.0  ;;  %3483 = vmatmul.bf16.gmra.mxu3 %v7231_v2 }
 0x611   : > { %v9104_v55 = vmax.f32 %v3896_v21, %v3900_v54 }
 0x612   : > { %v3444_v41 = vpop.f32.mrf.mxu3 }
 0x613   : > { %v3673_v26 = vadd.f32 %v3444_v41, %v8676_v37 }
 0x615   : > { %v3789_v28 = vadd.f32 %v8956_v17, %v3673_v26  ;;  %7891 = vrot.lane.b32.xlu1 %v7890_v6, %s8330_s22  ;;  %v7905_v26 = vpack.i.bf16 %v9038_v32, %v9034_v49  ;;  %v4315_v6 = vmax.f32 %v9012_v39, %v7863_v7 }
 0x617   : > { %v3901_v59 = vmax.f32 %v3789_v28, 0.0  ;;  %v7852_v43 = vpop.permute.xlu1 %7851 }
 0x618   : > { %v7854_v4 = vunpack.i.h.bf16 %v7852_v43  ;;  %v7853_v34 = vunpack.i.l.bf16 %v7852_v43 }
 0x619   : > { %v9111_v22 = vmax.f32 %v3897_v15, %v3901_v59  ;;  %v7232_v15 = vld [vmem:[#allocation2 + $0xc0] sm:$0xff] }
 0x61a   : > { %v3446_v21 = vpop.f32.mrf.mxu3  ;;  %v4317_v2 = vmax.f32 %v9023_v24, %v7853_v34  ;;  %v4318_v37 = vmax.f32 %v9027_v29, %v7854_v4  ;;  %v9125_v29 = vpack.c.bf16 %v4316_v30, %v4315_v6 }
 0x61b   : > { %v3674_v41 = vadd.f32 %v3446_v21, %v8680_v58 }
 0x61c   : > { %v9118_v52 = vpack.c.bf16 %v4318_v37, %v4317_v2  ;;  %10451 = vst [vmem:[#allocation95_spill] sm:$0xff] %v9125_v29 }
 0x61d   : > { %v3790_v28 = vadd.f32 %v8956_v17, %v3674_v41  ;;  %7906 = vrot.lane.b32.xlu1 %v7905_v26, %s8330_s22 }
 0x61e   : > { %10450 = vst [vmem:[#allocation94_spill] sm:$0xff] %v9118_v52  ;;  %4773 = vmatpush.bf16.msrb.mxu1 %v9118_v52 }
 0x61f   : > { %v3902_v24 = vmax.f32 %v3790_v28, 0.0  ;;  %3488 = vmatmul.bf16.gmra.mxu3 %v7232_v15 }
 0x621   : > { %v9127_v58 = vmax.f32 %v3898_v13, %v3902_v24  ;;  %v7845_v13 = vpack.i.bf16 %v9104_v55, %v9094_v14 }
 0x622   : > { %v3449_v43 = vpop.f32.mrf.mxu3  ;;  %4774 = vmatpush.bf16.msrb.mxu1 %v9125_v29 }
 0x623   : > { %v3675_v39 = vadd.f32 %v3449_v43, %v8684_v8  ;;  %v7840_v61 = vpack.i.bf16 %v9127_v58, %v9111_v22  ;;  %v7233_v8 = vld [vmem:[#allocation2 + $0xa0] sm:$0xff] }
 0x625   : > { %v3791_v46 = vadd.f32 %v8956_v17, %v3675_v39  ;;  %7841 = vrot.lane.b32.xlu0 %v7840_v61, %s8330_s22 }
 0x627   : > { %v3903_v7 = vmax.f32 %v3791_v46, 0.0 }
 0x629   : > { %v9135_v4 = vmax.f32 %v3899_v45, %v3903_v7  ;;  %v7870_v45 = vpack.i.bf16 %v9008_v40, %v9004_v16 }
 0x62a   : > { %v3451_v34 = vpop.f32.mrf.mxu3 }
 0x62b   : > { %10452 = vst [vmem:[#allocation96_spill] sm:$0xff] %v9135_v4  ;;  %v3676_v21 = vadd.f32 %v3451_v34, %v8690_v33 }
 0x62d   : > { %v3792_v2 = vadd.f32 %v8956_v17, %v3676_v21  ;;  %7846 = vrot.lane.b32.xlu0 %v7845_v13, %s8330_s22 }
 0x62f   : > { %v3904_v37 = vmax.f32 %v3792_v2, 0.0  ;;  %3493 = vmatmul.bf16.gmra.mxu3 %v7233_v8 }
 0x631   : > { %v9142_v41 = vmax.f32 %v3900_v54, %v3904_v37  ;;  %v7885_v54 = vpack.i.bf16 %v9054_v38, %v9050_v50 }
 0x632   : > { %v3454_v26 = vpop.f32.mrf.mxu3 }
 0x633   : > { %10453 = vst [vmem:[#allocation97_spill] sm:$0xff] %v9142_v41  ;;  %v3677_v6 = vadd.f32 %v3454_v26, %v8694_v44  ;;  %v7234_v44 = vld [vmem:[#allocation2 + $0x148] sm:$0xff] }
 0x634   : > { %v10463_v41 = vld [vmem:[#allocation25_spill] sm:$0xff] }
 0x635   : > { %v3793_v33 = vadd.f32 %v8956_v17, %v3677_v6  ;;  %7871 = vrot.lane.b32.xlu0 %v7870_v45, %s8330_s22  ;;  %v7235_v45 = vld [vmem:[#allocation2 + $0x1d0] sm:$0xff] }
 0x637   : > { %v3905_v30 = vmax.f32 %v3793_v33, 0.0 }
 0x639   : > { %v9149_v28 = vmax.f32 %v3901_v59, %v3905_v30  ;;  %v7900_v59 = vpack.i.bf16 %v8984_v23, %v8980_v5 }
 0x63a   : > { %v3456_v15 = vpop.f32.mrf.mxu3 }
 0x63b   : > { %10454 = vst [vmem:[#allocation98_spill] sm:$0xff] %v9149_v28  ;;  %v3678_v43 = vadd.f32 %v3456_v15, %v8698_v10 }
 0x63d   : > { %v3794_v39 = vadd.f32 %v8956_v17, %v3678_v43  ;;  %7886 = vrot.lane.b32.xlu0 %v7885_v54, %s8330_s22 }
 0x63f   : > { %v3906_v61 = vmax.f32 %v3794_v39, 0.0  ;;  %3498 = vmatmul.bf16.gmra.mxu3 %v7234_v44 }
 0x641   : > { %v9156_v46 = vmax.f32 %v3902_v24, %v3906_v61 }
 0x642   : > { %v3459_v34 = vpop.f32.mrf.mxu3 }
 0x643   : > { %v3679_v21 = vadd.f32 %v3459_v34, %v8702_v11  ;;  %v7920_v10 = vpack.i.bf16 %v9156_v46, %v9149_v28  ;;  %v7915_v11 = vpack.i.bf16 %v8966_v35, %v8961_v56 }
 0x645   : > { %v3795_v13 = vadd.f32 %v8956_v17, %v3679_v21  ;;  %7901 = vrot.lane.b32.xlu0 %v7900_v59, %s8330_s22  ;;  %7921 = vrot.lane.b32.xlu2 %v7920_v10, %s8330_s22  ;;  %v10455_v21 = vld [vmem:[#allocation17_spill] sm:$0xff] }
 0x647   : > { %v3907_v2 = vmax.f32 %v3795_v13, 0.0 }
 0x649   : > { %v9166_v8 = vmax.f32 %v3903_v7, %v3907_v2 }
 0x64a   : > { %v3461_v24 = vpop.f32.mrf.mxu3 }
 0x64b   : > { %v3680_v26 = vadd.f32 %v3461_v24, %v8706_v48 }
 0x64d   : > { %v3796_v6 = vadd.f32 %v8956_v17, %v3680_v26  ;;  %7916 = vrot.lane.b32.xlu0 %v7915_v11, %s8330_s22  ;;  %v10456_v26 = vld [vmem:[#allocation18_spill] sm:$0xff] }
 0x64f   : > { %v3908_v33 = vmax.f32 %v3796_v6, 0.0  ;;  %3503 = vmatmul.bf16.gmra.mxu3 %v7235_v45 }
 0x651   : > { %v9173_v15 = vmax.f32 %v3904_v37, %v3908_v33  ;;  %v7236_v37 = vld [vmem:[#allocation2 + $0x100] sm:$0xff] }
 0x652   : > { %v3464_v43 = vpop.f32.mrf.mxu3 }
 0x653   : > { %v3681_v54 = vadd.f32 %v3464_v43, %v8710_v62  ;;  %v7925_v7 = vpack.i.bf16 %v9173_v15, %v9166_v8 }
 0x655   : > { %v3797_v48 = vadd.f32 %v8956_v17, %v3681_v54  ;;  %7926 = vrot.lane.b32.xlu1 %v7925_v7, %s8330_s22  ;;  %v10457_v7 = vld [vmem:[#allocation19_spill] sm:$0xff] }
 0x657   : > { %v3909_v39 = vmax.f32 %v3797_v48, 0.0 }
 0x659   : > { %v9180_v44 = vmax.f32 %v3905_v30, %v3909_v39 }
 0x65a   : > { %v3466_v34 = vpop.f32.mrf.mxu3 }
 0x65b   : > { %v3682_v59 = vadd.f32 %v3466_v34, %v10455_v21 }
 0x65d   : > { %v3798_v10 = vadd.f32 %v8956_v17, %v3682_v59 }
 0x65f   : > { %v3910_v13 = vmax.f32 %v3798_v10, 0.0  ;;  %3508 = vmatmul.bf16.gmra.mxu3 %v7236_v37  ;;  %v10458_v37 = vld [vmem:[#allocation20_spill] sm:$0xff] }
 0x661   : > { %v9184_v24 = vmax.f32 %v3906_v61, %v3910_v13  ;;  %v7237_v61 = vld [vmem:[#allocation2 + $0xf8] sm:$0xff] }
 0x662   : > { %v3469_v62 = vpop.f32.mrf.mxu3 }
 0x663   : > { %v3683_v11 = vadd.f32 %v3469_v62, %v10456_v26  ;;  %v7930_v6 = vpack.i.bf16 %v9184_v24, %v9180_v44 }
 0x665   : > { %v3799_v45 = vadd.f32 %v8956_v17, %v3683_v11  ;;  %7931 = vrot.lane.b32.xlu0 %v7930_v6, %s8330_s22 }
 0x667   : > { %v3911_v30 = vmax.f32 %v3799_v45, 0.0 }
 0x669   : > { %v9191_v43 = vmax.f32 %v3907_v2, %v3911_v30 }
 0x66a   : > { %v3471_v54 = vpop.f32.mrf.mxu3 }
 0x66b   : > { %v3684_v48 = vadd.f32 %v3471_v54, %v10457_v7  ;;  %v10459_v54 = vld [vmem:[#allocation21_spill] sm:$0xff] }
 0x66d   : > { %v3800_v34 = vadd.f32 %v8956_v17, %v3684_v48 }
 0x66f   : > { %v3912_v21 = vmax.f32 %v3800_v34, 0.0  ;;  %3513 = vmatmul.bf16.gmra.mxu3 %v7237_v61 }
 0x671   : > { %v9195_v59 = vmax.f32 %v3908_v33, %v3912_v21  ;;  %v7238_v33 = vld [vmem:[#allocation2 + $0x40] sm:$0xff] }
 0x672   : > { %v3474_v10 = vpop.f32.mrf.mxu3 }
 0x673   : > { %v3685_v62 = vadd.f32 %v3474_v10, %v10458_v37  ;;  %v7935_v26 = vpack.i.bf16 %v9195_v59, %v9191_v43  ;;  %v10460_v37 = vld [vmem:[#allocation22_spill] sm:$0xff] }
 0x675   : > { %v3801_v11 = vadd.f32 %v8956_v17, %v3685_v62  ;;  %7936 = vrot.lane.b32.xlu2 %v7935_v26, %s8330_s22 }
 0x677   : > { %v3913_v2 = vmax.f32 %v3801_v11, 0.0 }
 0x679   : > { %v9202_v6 = vmax.f32 %v3909_v39, %v3913_v2 }
 0x67a   : > { %v3476_v45 = vpop.f32.mrf.mxu3 }
 0x67b   : > { %v3686_v7 = vadd.f32 %v3476_v45, %v10459_v54 }
 0x67d   : > { %v3802_v48 = vadd.f32 %v8956_v17, %v3686_v7 }
 0x67f   : > { %v3914_v34 = vmax.f32 %v3802_v48, 0.0  ;;  %3518 = vmatmul.bf16.gmra.mxu3 %v7238_v33  ;;  %v7239_v48 = vld [vmem:[#allocation2 + $0xa8] sm:$0xff] }
 0x681   : > { %v9206_v61 = vmax.f32 %v3910_v13, %v3914_v34  ;;  %v10461_v13 = vld [vmem:[#allocation23_spill] sm:$0xff] }
 0x682   : > { %v3479_v10 = vpop.f32.mrf.mxu3 }
 0x683   : > { %v3687_v29 = vadd.f32 %v3479_v10, %v10460_v37  ;;  %v7940_v62 = vpack.i.bf16 %v9206_v61, %v9202_v6  ;;  %v7857_v37 = vpop.permute.xlu1 %7856 }
 0x684   : > { %v7859_v57 = vunpack.i.h.bf16 %v7857_v37 }
 0x685   : > { %v9212_v26 = vadd.f32 %v8956_v17, %v3687_v29  ;;  %7941 = vrot.lane.b32.xlu1 %v7940_v62, %s8330_s22  ;;  %v10462_v62 = vld [vmem:[#allocation24_spill] sm:$0xff] }
 0x687   : > { %v10309_v39 = vmax.f32 %v9212_v26, 0.0 }
 0x689   : > { %v9218_v11 = vmax.f32 %v3911_v30, %v10309_v39 }
 0x68a   : > { %v3481_v45 = vpop.f32.mrf.mxu3 }
 0x68b   : > { %v3688_v54 = vadd.f32 %v3481_v45, %v10461_v13  ;;  %v7867_v13 = vpop.permute.xlu2 %7866 }
 0x68c   : > { %v7869_v60 = vunpack.i.h.bf16 %v7867_v13 }
 0x68d   : > { %v9222_v7 = vadd.f32 %v8956_v17, %v3688_v54 }
 0x68f   : > { %v10310_v33 = vmax.f32 %v9222_v7, 0.0  ;;  %3523 = vmatmul.bf16.gmra.mxu3 %v7239_v48 }
 0x691   : > { %v9227_v29 = vmax.f32 %v3912_v21, %v10310_v33 }
 0x692   : > { %v3484_v10 = vpop.f32.mrf.mxu3 }
 0x693   : > { %v3689_v52 = vadd.f32 %v3484_v10, %v10462_v62  ;;  %v7945_v30 = vpack.i.bf16 %v9227_v29, %v9218_v11 }
 0x695   : > { %v9233_v45 = vadd.f32 %v8956_v17, %v3689_v52  ;;  %7946 = vrot.lane.b32.xlu2 %v7945_v30, %s8330_s22  ;;  %v7877_v30 = vpop.permute.xlu1 %7876 }
 0x697   : > { %v10313_v54 = vmax.f32 %v9233_v45, 0.0  ;;  %v7842_v48 = vpop.permute.xlu0 %7841 }
 0x698   : > { %v7844_v39 = vunpack.i.h.bf16 %v7842_v48  ;;  %v7843_v12 = vunpack.i.l.bf16 %v7842_v48 }
 0x699   : > { %v9239_v21 = vmax.f32 %v3913_v2, %v10313_v54  ;;  %v7882_v54 = vpop.permute.xlu2 %7881 }
 0x69a   : > { %v3486_v33 = vpop.f32.mrf.mxu3  ;;  %v4333_v10 = vmax.f32 %v9111_v22, %v7843_v12  ;;  %v4334_v62 = vmax.f32 %v9127_v58, %v7844_v39  ;;  %v7858_v12 = vunpack.i.l.bf16 %v7857_v37 }
 0x69b   : > { %v3690_v52 = vadd.f32 %v3486_v33, %v10463_v41 }
 0x69c   : > { %v9244_v4 = vpack.c.bf16 %v4334_v62, %v4333_v10  ;;  %v7868_v62 = vunpack.i.l.bf16 %v7867_v13  ;;  %v4329_v37 = vmax.f32 %v9077_v20, %v7858_v12 }
 0x69d   : > { %v9247_v47 = vadd.f32 %v8956_v17, %v3690_v52  ;;  %v10465_v52 = vld [vmem:[#allocation26_spill] sm:$0xff] }
 0x69e   : > { %10464 = vst [vmem:[#allocation17_spill] sm:$0xff] %v9244_v4  ;;  %4816 = vmatpush.bf16.msrb.mxu2 %v9244_v4 }
 0x69f   : > { %v10317_v48 = vmax.f32 %v9247_v47, 0.0  ;;  %3528 = vmatmul.bf16.gmra.mxu3 %v7240_v27  ;;  %v7847_v2 = vpop.permute.xlu0 %7846 }
 0x6a0   : > { %v7849_v22 = vunpack.i.h.bf16 %v7847_v2  ;;  %v7848_v58 = vunpack.i.l.bf16 %v7847_v2  ;;  %v4330_v2 = vmax.f32 %v9084_v63, %v7859_v57  ;;  %v4328_v63 = vmax.f32 %v9070_v19, %v7869_v60 }
 0x6a1   : > { %v9253_v41 = vmax.f32 %v3914_v34, %v10317_v48 }
 0x6a2   : > { %v3489_v39 = vpop.f32.mrf.mxu3  ;;  %v4331_v33 = vmax.f32 %v9094_v14, %v7848_v58  ;;  %v4332_v10 = vmax.f32 %v9104_v55, %v7849_v22  ;;  %v7884_v14 = vunpack.i.h.bf16 %v7882_v54  ;;  %v7883_v55 = vunpack.i.l.bf16 %v7882_v54 }
 0x6a3   : > { %v3691_v4 = vadd.f32 %v3489_v39, %v10465_v52  ;;  %v7950_v27 = vpack.i.bf16 %v9253_v41, %v9239_v21  ;;  %v7879_v22 = vunpack.i.h.bf16 %v7877_v30  ;;  %v7878_v58 = vunpack.i.l.bf16 %v7877_v30  ;;  %v7892_v39 = vpop.permute.xlu1 %7891  ;;  %v7897_v52 = vpop.permute.xlu2 %7896 }
 0x6a4   : > { %v9260_v28 = vpack.c.bf16 %v4332_v10, %v4331_v33  ;;  %v4327_v10 = vmax.f32 %v9066_v18, %v7868_v62  ;;  %v9271_v57 = vpack.c.bf16 %v4330_v2, %v4329_v37  ;;  %v4311_v62 = vmax.f32 %v8996_v31, %v7883_v55  ;;  %v10469_v2 = vld [vmem:[#allocation27_spill] sm:$0xff] }
 0x6a5   : > { %v9265_v34 = vadd.f32 %v8956_v17, %v3691_v4  ;;  %7951 = vrot.lane.b32.xlu1 %v7950_v27, %s8330_s22  ;;  %v10468_v4 = vmax.f32 %v9212_v26, 0.0  ;;  %v4312_v37 = vmax.f32 %v9000_v36, %v7884_v14  ;;  %v4325_v19 = vmax.f32 %v9058_v0, %v7878_v58 }
 0x6a6   : > { %10466 = vst [vmem:[#allocation18_spill] sm:$0xff] %v9260_v28  ;;  %4817 = vmatpush.bf16.msrb.mxu2 %v9260_v28  ;;  %v4326_v26 = vmax.f32 %v9062_v25, %v7879_v22  ;;  %v9290_v48 = vpack.c.bf16 %v4328_v63, %v4327_v10  ;;  %v7899_v36 = vunpack.i.h.bf16 %v7897_v52  ;;  %v7898_v0 = vunpack.i.l.bf16 %v7897_v52 }
 0x6a7   : > { %v10316_v13 = vmax.f32 %v9265_v34, 0.0  ;;  %v7872_v33 = vpop.permute.xlu0 %7871  ;;  %10467 = vst [vmem:[#allocation19_spill] sm:$0xff] %v9271_v57  ;;  %v9297_v31 = vpack.c.bf16 %v4312_v37, %v4311_v62 }
 0x6a8   : > { %v7874_v20 = vunpack.i.h.bf16 %v7872_v33  ;;  %v7873_v12 = vunpack.i.l.bf16 %v7872_v33  ;;  %v7894_v33 = vunpack.i.h.bf16 %v7892_v39  ;;  %10471 = vst [vmem:[#allocation21_spill] sm:$0xff] %v9290_v48  ;;  %v9300_v55 = vpack.c.bf16 %v4326_v26, %v4325_v19 }
 0x6a9   : > { %v9278_v54 = vmax.f32 %v10468_v4, %v10316_v13  ;;  %v7893_v4 = vunpack.i.l.bf16 %v7892_v39  ;;  %10472 = vst [vmem:[#allocation22_spill] sm:$0xff] %v9297_v31  ;;  %v4322_v62 = vmax.f32 %v9046_v9, %v7899_v36 }
 0x6aa   : > { %v3491_v30 = vpop.f32.mrf.mxu3  ;;  %4818 = vmatpush.bf16.msrb.mxu2 %v9271_v57  ;;  %v4313_v27 = vmax.f32 %v9004_v16, %v7873_v12  ;;  %v4314_v18 = vmax.f32 %v9008_v40, %v7874_v20  ;;  %v7241_v40 = vld [vmem:[#allocation2 + $0x1a0] sm:$0xff]  ;;  %10473 = vst [vmem:[#allocation23_spill] sm:$0xff] %v9300_v55  ;;  %v4310_v10 = vmax.f32 %v8992_v1, %v7894_v33  ;;  %v10474_v12 = vmax.f32 %v9222_v7, 0.0 }
 0x6ab   : > { %v3692_v60 = vadd.f32 %v3491_v30, %v10469_v2  ;;  %v4309_v39 = vmax.f32 %v8988_v51, %v7893_v4  ;;  %v7907_v20 = vpop.permute.xlu1 %7906  ;;  %v4321_v1 = vmax.f32 %v9042_v3, %v7898_v0  ;;  %v7912_v37 = vpop.permute.xlu2 %7911 }
 0x6ac   : > { %v9288_v13 = vpack.c.bf16 %v4314_v18, %v4313_v27  ;;  %v10475_v18 = vld [vmem:[#allocation28_spill] sm:$0xff]  ;;  %v7909_v2 = vunpack.i.h.bf16 %v7907_v20  ;;  %v7908_v7 = vunpack.i.l.bf16 %v7907_v20  ;;  %v10480_v20 = vld [vmem:[#allocation29_spill] sm:$0xff] }
 0x6ad   : > { %v9293_v16 = vadd.f32 %v8956_v17, %v3692_v60  ;;  %v9317_v60 = vpack.c.bf16 %v4310_v10, %v4309_v39  ;;  %v9324_v3 = vpack.c.bf16 %v4322_v62, %v4321_v1  ;;  %v10484_v62 = vmax.f32 %v9247_v47, 0.0 }
 0x6ae   : > { %10470 = vst [vmem:[#allocation20_spill] sm:$0xff] %v9288_v13  ;;  %4775 = vmatpush.bf16.msrb.mxu1 %v9288_v13  ;;  %4819 = vmatpush.bf16.msrb.mxu2 %v9290_v48  ;;  %v4319_v36 = vmax.f32 %v9034_v49, %v7908_v7  ;;  %v4320_v0 = vmax.f32 %v9038_v32, %v7909_v2  ;;  %v10485_v7 = vld [vmem:[#allocation30_spill] sm:$0xff]  ;;  %v10487_v47 = vmax.f32 %v9265_v34, 0.0 }
 0x6af   : > { %v3920_v25 = vmax.f32 %v9293_v16, 0.0  ;;  %3533 = vmatmul.bf16.gmra.mxu3 %v7241_v40  ;;  %v7887_v14 = vpop.permute.xlu0 %7886  ;;  %10476 = vst [vmem:[#allocation24_spill] sm:$0xff] %v9317_v60  ;;  %v7259_v48 = vld [vmem:[#allocation2 + $0x30] sm:$0xff] }
 0x6b0   : > { %v7889_v22 = vunpack.i.h.bf16 %v7887_v14  ;;  %v7888_v58 = vunpack.i.l.bf16 %v7887_v14  ;;  %10478 = vst [vmem:[#allocation26_spill] sm:$0xff] %v9324_v3  ;;  %v10479_v14 = vmax.f32 %v9233_v45, 0.0 }
 0x6b1   : > { %v9308_v63 = vmax.f32 %v10474_v12, %v3920_v25 }
 0x6b2   : > { %v3494_v52 = vpop.f32.mrf.mxu3  ;;  %4776 = vmatpush.bf16.msrb.mxu1 %v9297_v31  ;;  %4820 = vmatpush.bf16.msrb.mxu2 %v9300_v55  ;;  %v4323_v30 = vmax.f32 %v9050_v50, %v7888_v58  ;;  %v4324_v27 = vmax.f32 %v9054_v38, %v7889_v22  ;;  %v7914_v50 = vunpack.i.h.bf16 %v7912_v37  ;;  %v7913_v38 = vunpack.i.l.bf16 %v7912_v37  ;;  %v10529_v55 = vld [vmem:[#allocation55_spill] sm:$0xff]  ;;  %v9744_v31 = vpop.f32.mrf.mxu1 }
 0x6b3   : > { %v3693_v51 = vadd.f32 %v3494_v52, %v10475_v18 }
 0x6b4   : > { %v9319_v19 = vpack.c.bf16 %v4324_v27, %v4323_v30  ;;  %v9338_v30 = vpack.c.bf16 %v4320_v0, %v4319_v36  ;;  %v4305_v49 = vmax.f32 %v8971_v42, %v7913_v38  ;;  %v4306_v32 = vmax.f32 %v8976_v53, %v7914_v50  ;;  %v7242_v27 = vld [vmem:[#allocation2 + $0xb8] sm:$0xff] }
 0x6b5   : > { %v3809_v26 = vadd.f32 %v8956_v17, %v3693_v51  ;;  %v10488_v36 = vld [vmem:[#allocation31_spill] sm:$0xff] }
 0x6b6   : > { %10477 = vst [vmem:[#allocation25_spill] sm:$0xff] %v9319_v19  ;;  %4777 = vmatpush.bf16.msrb.mxu1 %v9317_v60  ;;  %4821 = vmatpush.bf16.msrb.mxu2 %v9319_v19  ;;  %v9345_v1 = vpack.c.bf16 %v4306_v32, %v4305_v49 }
 0x6b7   : > { %v3921_v33 = vmax.f32 %v3809_v26, 0.0  ;;  %v7902_v4 = vpop.permute.xlu0 %7901  ;;  %10482 = vst [vmem:[#allocation28_spill] sm:$0xff] %v9338_v30 }
 0x6b8   : > { %v7904_v9 = vunpack.i.h.bf16 %v7902_v4  ;;  %v7903_v40 = vunpack.i.l.bf16 %v7902_v4  ;;  %10483 = vst [vmem:[#allocation29_spill] sm:$0xff] %v9345_v1 }
 0x6b9   : > { %v9330_v22 = vmax.f32 %v10479_v14, %v3921_v33  ;;  %v7243_v14 = vld [vmem:[#allocation2] sm:$0xff] }
 0x6ba   : > { %v3496_v58 = vpop.f32.mrf.mxu3  ;;  %4822 = vmatpush.bf16.msrb.mxu2 %v9324_v3  ;;  %v4307_v39 = vmax.f32 %v8980_v5, %v7903_v40  ;;  %v4308_v10 = vmax.f32 %v8984_v23, %v7904_v9 }
 0x6bb   : > { %v3694_v12 = vadd.f32 %v3496_v58, %v10480_v20 }
 0x6bc   : > { %v9336_v52 = vpack.c.bf16 %v4308_v10, %v4307_v39  ;;  %v10489_v10 = vld [vmem:[#allocation32_spill] sm:$0xff] }
 0x6bd   : > { %v3810_v45 = vadd.f32 %v8956_v17, %v3694_v12 }
 0x6be   : > { %10481 = vst [vmem:[#allocation27_spill] sm:$0xff] %v9336_v52  ;;  %4778 = vmatpush.bf16.msrb.mxu1 %v9336_v52  ;;  %4823 = vmatpush.bf16.msrb.mxu2 %v9338_v30 }
 0x6bf   : > { %v3922_v5 = vmax.f32 %v3810_v45, 0.0  ;;  %3538 = vmatmul.bf16.gmra.mxu3 %v7242_v27  ;;  %v7917_v23 = vpop.permute.xlu0 %7916  ;;  %v10490_v45 = vld [vmem:[#allocation33_spill] sm:$0xff] }
 0x6c0   : > { %v7919_v18 = vunpack.i.h.bf16 %v7917_v23  ;;  %v7918_v51 = vunpack.i.l.bf16 %v7917_v23 }
 0x6c1   : > { %v9349_v37 = vmax.f32 %v10484_v62, %v3922_v5 }
 0x6c2   : > { %v3499_v42 = vpop.f32.mrf.mxu3  ;;  %4779 = vmatpush.bf16.msrb.mxu1 %v9345_v1  ;;  %v4303_v53 = vmax.f32 %v8961_v56, %v7918_v51  ;;  %v4304_v2 = vmax.f32 %v8966_v35, %v7919_v18  ;;  %v7244_v18 = vld [vmem:[#allocation2 + $0x38] sm:$0xff] }
 0x6c3   : > { %v3695_v26 = vadd.f32 %v3499_v42, %v10485_v7 }
 0x6c4   : > { %v9355_v50 = vpack.c.bf16 %v4304_v2, %v4303_v53 }
 0x6c5   : > { %v3811_v38 = vadd.f32 %v8956_v17, %v3695_v26  ;;  %v10492_v26 = vld [vmem:[#allocation35_spill] sm:$0xff] }
 0x6c6   : > { %10486 = vst [vmem:[#allocation30_spill] sm:$0xff] %v9355_v50  ;;  %4780 = vmatpush.bf16.msrb.mxu1 %v9355_v50 }
 0x6c7   : > { %v3923_v4 = vmax.f32 %v3811_v38, 0.0 }
 0x6c9   : > { %v9361_v9 = vmax.f32 %v10487_v47, %v3923_v4  ;;  %v9382_v47 = vld [vmem:[#allocation8] ss:$0 sm:$0xff] }
 0x6ca   : > { %v3501_v40 = vpop.f32.mrf.mxu3 }
 0x6cb   : > { %v3696_v0 = vadd.f32 %v3501_v40, %v10488_v36  ;;  %v7245_v36 = vld [vmem:[#allocation2 + $0x20] sm:$0xff] }
 0x6cd   : > { %v3812_v56 = vadd.f32 %v8956_v17, %v3696_v0 }
 0x6cf   : > { %v3924_v35 = vmax.f32 %v3812_v56, 0.0  ;;  %3543 = vmatmul.bf16.gmra.mxu3 %v7243_v14  ;;  %v10493_v14 = vld [vmem:[#allocation36_spill] sm:$0xff] }
 0x6d1   : > { %v9367_v58 = vmax.f32 %v3920_v25, %v3924_v35  ;;  %v10491_v25 = vld [vmem:[#allocation34_spill] sm:$0xff] }
 0x6d2   : > { %v3504_v39 = vpop.f32.mrf.mxu3 }
 0x6d3   : > { %v3697_v20 = vadd.f32 %v3504_v39, %v10489_v10 }
 0x6d5   : > { %v3813_v12 = vadd.f32 %v8956_v17, %v3697_v20 }
 0x6d7   : > { %v3925_v34 = vmax.f32 %v3813_v12, 0.0 }
 0x6d9   : > { %v9371_v49 = vmax.f32 %v3921_v33, %v3925_v34 }
 0x6da   : > { %v3506_v32 = vpop.f32.mrf.mxu3 }
 0x6db   : > { %v3698_v27 = vadd.f32 %v3506_v32, %v10490_v45  ;;  %v10494_v32 = vld [vmem:[#allocation37_spill] sm:$0xff] }
 0x6dd   : > { %v3814_v23 = vadd.f32 %v8956_v17, %v3698_v27 }
 0x6df   : > { %v3926_v51 = vmax.f32 %v3814_v23, 0.0  ;;  %3548 = vmatmul.bf16.gmra.mxu3 %v7244_v18 }
 0x6e1   : > { %v9375_v62 = vmax.f32 %v3922_v5, %v3926_v51 }
 0x6e2   : > { %v3509_v16 = vpop.f32.mrf.mxu3 }
 0x6e3   : > { %v3699_v42 = vadd.f32 %v3509_v16, %v10491_v25  ;;  %v10495_v25 = vld [vmem:[#allocation38_spill] sm:$0xff] }
 0x6e5   : > { %v3815_v53 = vadd.f32 %v8956_v17, %v3699_v42 }
 0x6e7   : > { %v3927_v2 = vmax.f32 %v3815_v53, 0.0 }
 0x6e9   : > { %v9379_v7 = vmax.f32 %v3923_v4, %v3927_v2 }
 0x6ea   : > { %v3511_v33 = vpop.f32.mrf.mxu3 }
 0x6eb   : > { %v3700_v38 = vadd.f32 %v3511_v33, %v10492_v26  ;;  %v9401_v33 = vpop.permute.xlu2 %7921  ;;  %v9407_v26 = vpop.permute.xlu1 %7926 }
 0x6ed   : > { %v3816_v40 = vadd.f32 %v9382_v47, %v3700_v38 }
 0x6ef   : > { %v3928_v0 = vmax.f32 %v3816_v40, 0.0  ;;  %3553 = vmatmul.bf16.gmra.mxu3 %v7245_v36  ;;  %v10496_v36 = vld [vmem:[#allocation39_spill] sm:$0xff] }
 0x6f1   : > { %v9385_v5 = vmax.f32 %v3924_v35, %v3928_v0  ;;  %v7246_v35 = vld [vmem:[#allocation2 + $0x10] sm:$0xff] }
 0x6f2   : > { %v3514_v56 = vpop.f32.mrf.mxu3 }
 0x6f3   : > { %v3701_v39 = vadd.f32 %v3514_v56, %v10493_v14  ;;  %v7955_v17 = vpack.i.bf16 %v9385_v5, %v9379_v7  ;;  %v7937_v14 = vpop.permute.xlu2 %7936 }
 0x6f5   : > { %v3817_v4 = vadd.f32 %v9382_v47, %v3701_v39  ;;  %7956 = vrot.lane.b32.xlu2 %v7955_v17, %s8330_s22  ;;  %v7247_v17 = vld [vmem:[#allocation2 + $0x58] sm:$0xff] }
 0x6f7   : > { %v3929_v10 = vmax.f32 %v3817_v4, 0.0  ;;  %v7942_v4 = vpop.permute.xlu1 %7941 }
 0x6f8   : > { %v7944_v3 = vunpack.i.h.bf16 %v7942_v4  ;;  %v7943_v19 = vunpack.i.l.bf16 %v7942_v4  ;;  %v7932_v4 = vpop.permute.xlu0 %7931 }
 0x6f9   : > { %v9392_v20 = vmax.f32 %v3925_v34, %v3929_v10 }
 0x6fa   : > { %v3516_v12 = vpop.f32.mrf.mxu3 }
 0x6fb   : > { %v3702_v45 = vadd.f32 %v3516_v12, %v10494_v32 }
 0x6fd   : > { %v3818_v27 = vadd.f32 %v9382_v47, %v3702_v45 }
 0x6ff   : > { %v3930_v23 = vmax.f32 %v3818_v27, 0.0  ;;  %3558 = vmatmul.bf16.gmra.mxu3 %v7246_v35  ;;  %v10497_v27 = vld [vmem:[#allocation40_spill] sm:$0xff] }
 0x701   : > { %v9396_v18 = vmax.f32 %v3926_v51, %v3930_v23 }
 0x702   : > { %v3519_v16 = vpop.f32.mrf.mxu3 }
 0x703   : > { %v3703_v42 = vadd.f32 %v3519_v16, %v10495_v25  ;;  %v7960_v53 = vpack.i.bf16 %v9396_v18, %v9392_v20  ;;  %v7947_v16 = vpop.permute.xlu2 %7946 }
 0x705   : > { %v9404_v34 = vadd.f32 %v9382_v47, %v3703_v42  ;;  %7961 = vrot.lane.b32.xlu1 %v7960_v53, %s8330_s22  ;;  %v7949_v42 = vunpack.i.h.bf16 %v7947_v16 }
 0x707   : > { %v10319_v38 = vmax.f32 %v9404_v34, 0.0 }
 0x709   : > { %v9412_v51 = vmax.f32 %v3927_v2, %v10319_v38  ;;  %v10498_v38 = vld [vmem:[#allocation41_spill] sm:$0xff] }
 0x70a   : > { %v3521_v40 = vpop.f32.mrf.mxu3 }
 0x70b   : > { %v3704_v56 = vadd.f32 %v3521_v40, %v10496_v36  ;;  %v7948_v36 = vunpack.i.l.bf16 %v7947_v16 }
 0x70d   : > { %v9416_v39 = vadd.f32 %v9382_v47, %v3704_v56  ;;  %v4347_v30 = vmax.f32 %v9218_v11, %v7948_v36 }
 0x70f   : > { %v10318_v12 = vmax.f32 %v9416_v39, 0.0  ;;  %3563 = vmatmul.bf16.gmra.mxu3 %v7247_v17 }
 0x711   : > { %v9421_v32 = vmax.f32 %v3928_v0, %v10318_v12 }
 0x712   : > { %v3524_v45 = vpop.f32.mrf.mxu3 }
 0x713   : > { %v3705_v2 = vadd.f32 %v3524_v45, %v10497_v27  ;;  %v7965_v35 = vpack.i.bf16 %v9421_v32, %v9412_v51 }
 0x715   : > { %v9427_v25 = vadd.f32 %v9382_v47, %v3705_v2  ;;  %7966 = vrot.lane.b32.xlu0 %v7965_v35, %s8330_s22  ;;  %v4348_v2 = vmax.f32 %v9227_v29, %v7949_v42  ;;  %v4346_v29 = vmax.f32 %v9206_v61, %v7944_v3  ;;  %v7934_v3 = vunpack.i.h.bf16 %v7932_v4 }
 0x717   : > { %v3933_v53 = vmax.f32 %v9427_v25, 0.0  ;;  %v7952_v40 = vpop.permute.xlu1 %7951  ;;  %v9449_v11 = vpack.c.bf16 %v4348_v2, %v4347_v30  ;;  %v4342_v2 = vmax.f32 %v9184_v24, %v7934_v3  ;;  %v7923_v24 = vunpack.i.l.bf16 %v9401_v33 }
 0x718   : > { %v7954_v56 = vunpack.i.h.bf16 %v7952_v40  ;;  %v7953_v0 = vunpack.i.l.bf16 %v7952_v40 }
 0x719   : > { %v9433_v17 = vmax.f32 %v3929_v10, %v3933_v53  ;;  %v7248_v10 = vld [vmem:[#allocation2 + $0x88] sm:$0xff]  ;;  %10500 = vst [vmem:[#allocation32_spill] sm:$0xff] %v9449_v11 }
 0x71a   : > { %v4350_v45 = vmax.f32 %v9253_v41, %v7954_v56  ;;  %v4349_v27 = vmax.f32 %v9239_v21, %v7953_v0  ;;  %v3526_v12 = vpop.f32.mrf.mxu3  ;;  %v7939_v41 = vunpack.i.h.bf16 %v7937_v14  ;;  %v7938_v56 = vunpack.i.l.bf16 %v7937_v14  ;;  %v10501_v0 = vld [vmem:[#allocation42_spill] sm:$0xff] }
 0x71b   : > { %v3706_v35 = vadd.f32 %v3526_v12, %v10498_v38  ;;  %v4345_v38 = vmax.f32 %v9202_v6, %v7943_v19  ;;  %v7933_v6 = vunpack.i.l.bf16 %v7932_v4 }
 0x71c   : > { %v9440_v16 = vpack.c.bf16 %v4350_v45, %v4349_v27  ;;  %v4344_v36 = vmax.f32 %v9195_v59, %v7939_v41  ;;  %v4343_v61 = vmax.f32 %v9191_v43, %v7938_v56  ;;  %v7929_v59 = vunpack.i.h.bf16 %v9407_v26 }
 0x71d   : > { %v9443_v40 = vadd.f32 %v9382_v47, %v3706_v35  ;;  %v9459_v19 = vpack.c.bf16 %v4346_v29, %v4345_v38  ;;  %v7928_v27 = vunpack.i.l.bf16 %v9407_v26  ;;  %v4341_v35 = vmax.f32 %v9180_v44, %v7933_v6  ;;  %v10506_v38 = vld [vmem:[#allocation43_spill] sm:$0xff]  ;;  %v10512_v6 = vld [vmem:[#allocation44_spill] sm:$0xff] }
 0x71e   : > { %10499 = vst [vmem:[#allocation31_spill] sm:$0xff] %v9440_v16  ;;  %4859 = vmatpush.bf16.msrb.mxu3 %v9440_v16  ;;  %v9468_v43 = vpack.c.bf16 %v4344_v36, %v4343_v61  ;;  %v7924_v29 = vunpack.i.h.bf16 %v9401_v33  ;;  %v4340_v44 = vmax.f32 %v9173_v15, %v7929_v59  ;;  %v7249_v36 = vld [vmem:[#allocation2 + $0xd0] sm:$0xff]  ;;  %v10510_v15 = vmax.f32 %v9416_v39, 0.0 }
 0x71f   : > { %v3934_v21 = vmax.f32 %v9443_v40, 0.0  ;;  %3568 = vmatmul.bf16.gmra.mxu3 %v7248_v10  ;;  %10502 = vst [vmem:[#allocation33_spill] sm:$0xff] %v9459_v19  ;;  %v7128_v40 = vld [vmem:[%s8450_s21 + $0x1d0] sm:$0xff]  ;;  %v10504_v10 = vmax.f32 %v9404_v34, 0.0  ;;  %v4339_v4 = vmax.f32 %v9166_v8, %v7928_v27 }
 0x720   : > { %10503 = vst [vmem:[#allocation34_spill] sm:$0xff] %v9468_v43  ;;  %6164 = vmatmul.msk.bf16.gmra.mxu0 %vm816_vm0, %v7128_v40  ;;  %v10515_v40 = vld [vmem:[#allocation45_spill] sm:$0xff] }
 0x721   : > { %v9451_v12 = vmax.f32 %v3930_v23, %v3934_v21  ;;  %v9488_v3 = vpack.c.bf16 %v4340_v44, %v4339_v4  ;;  %v10517_v44 = vld [vmem:[#allocation46_spill] sm:$0xff] }
 0x722   : > { %v3529_v42 = vpop.f32.mrf.mxu3  ;;  %4860 = vmatpush.bf16.msrb.mxu3 %v9449_v11 }
 0x723   : > { %v3707_v45 = vadd.f32 %v3529_v42, %v10501_v0  ;;  %v7970_v14 = vpack.i.bf16 %v9451_v12, %v9433_v17  ;;  %v9482_v42 = vpack.c.bf16 %v4342_v2, %v4341_v35  ;;  %10509 = vst [vmem:[#allocation37_spill] sm:$0xff] %v9488_v3  ;;  %v7129_v2 = vld [vmem:[%s8450_s21 + $0x1d8] sm:$0xff] }
 0x725   : > { %v3823_v30 = vadd.f32 %v9382_v47, %v3707_v45  ;;  %7971 = vrot.lane.b32.xlu2 %v7970_v14, %s8330_s22  ;;  %10507 = vst [vmem:[#allocation36_spill] sm:$0xff] %v9482_v42  ;;  %v4338_v45 = vmax.f32 %v9156_v46, %v7924_v29  ;;  %v10508_v14 = vld [vmem:[#allocation98_spill] sm:$0xff]  ;;  %v7250_v29 = vld [vmem:[#allocation2 + $0x68] sm:$0xff] }
 0x726   : > { %4861 = vmatpush.bf16.msrb.mxu3 %v9459_v19  ;;  %v4337_v61 = vmax.f32 %v10508_v14, %v7923_v24 }
 0x727   : > { %v3935_v23 = vmax.f32 %v3823_v30, 0.0 }
 0x728   : > { %v9496_v59 = vpack.c.bf16 %v4338_v45, %v4337_v61  ;;  %v10519_v45 = vld [vmem:[#allocation47_spill] sm:$0xff] }
 0x729   : > { %v9473_v41 = vmax.f32 %v10504_v10, %v3935_v23 }
 0x72a   : > { %v3531_v56 = vpop.f32.mrf.mxu3  ;;  %4862 = vmatpush.bf16.msrb.mxu3 %v9468_v43  ;;  %10513 = vst [vmem:[#allocation39_spill] sm:$0xff] %v9496_v59 }
 0x72b   : > { %10505 = vst [vmem:[#allocation35_spill] sm:$0xff] %v9473_v41  ;;  %v3708_v26 = vadd.f32 %v3531_v56, %v10506_v38 }
 0x72d   : > { %v3824_v34 = vadd.f32 %v9382_v47, %v3708_v26 }
 0x72e   : > { %4863 = vmatpush.bf16.msrb.mxu3 %v9482_v42  ;;  %v10545_v42 = vld [vmem:[#allocation60_spill] sm:$0xff] }
 0x72f   : > { %v3936_v0 = vmax.f32 %v3824_v34, 0.0  ;;  %3573 = vmatmul.bf16.gmra.mxu3 %v7249_v36 }
 0x730   : > { %6165 = vmatmul.msk.bf16.gmra.mxu0 %vm816_vm0, %v7129_v2 }
 0x731   : > { %v9492_v33 = vmax.f32 %v10510_v15, %v3936_v0  ;;  %v7251_v15 = vld [vmem:[#allocation2 + $0xc8] sm:$0xff] }
 0x732   : > { %v3534_v8 = vpop.f32.mrf.mxu3  ;;  %4864 = vmatpush.bf16.msrb.mxu3 %v9488_v3 }
 0x733   : > { %10511 = vst [vmem:[#allocation38_spill] sm:$0xff] %v9492_v33  ;;  %v3709_v30 = vadd.f32 %v3534_v8, %v10512_v6 }
 0x735   : > { %v3825_v27 = vadd.f32 %v9382_v47, %v3709_v30  ;;  %v10521_v30 = vld [vmem:[#allocation48_spill] sm:$0xff] }
 0x736   : > { %4865 = vmatpush.bf16.msrb.mxu3 %v9496_v59 }
 0x737   : > { %v3937_v46 = vmax.f32 %v3825_v27, 0.0 }
 0x739   : > { %v9503_v35 = vmax.f32 %v3933_v53, %v3937_v46 }
 0x73a   : > { %v3536_v39 = vpop.f32.mrf.mxu3 }
 0x73b   : > { %10514 = vst [vmem:[#allocation40_spill] sm:$0xff] %v9503_v35  ;;  %v3710_v10 = vadd.f32 %v3536_v39, %v10515_v40 }
 0x73d   : > { %v3826_v56 = vadd.f32 %v9382_v47, %v3710_v10  ;;  %v10522_v10 = vld [vmem:[#allocation49_spill] sm:$0xff] }
 0x73f   : > { %v3938_v38 = vmax.f32 %v3826_v56, 0.0  ;;  %3578 = vmatmul.bf16.gmra.mxu3 %v7250_v29 }
 0x741   : > { %v9508_v26 = vmax.f32 %v3934_v21, %v3938_v38 }
 0x742   : > { %v3539_v24 = vpop.f32.mrf.mxu3 }
 0x743   : > { %10516 = vst [vmem:[#allocation41_spill] sm:$0xff] %v9508_v26  ;;  %v3711_v4 = vadd.f32 %v3539_v24, %v10517_v44  ;;  %v7252_v24 = vld [vmem:[#allocation2 + $0x198] sm:$0xff] }
 0x745   : > { %v3827_v34 = vadd.f32 %v9382_v47, %v3711_v4 }
 0x747   : > { %v3939_v25 = vmax.f32 %v3827_v34, 0.0  ;;  %v10523_v34 = vld [vmem:[#allocation50_spill] sm:$0xff] }
 0x749   : > { %v9512_v53 = vmax.f32 %v3935_v23, %v3939_v25 }
 0x74a   : > { %v3541_v36 = vpop.f32.mrf.mxu3 }
 0x74b   : > { %10518 = vst [vmem:[#allocation42_spill] sm:$0xff] %v9512_v53  ;;  %v3712_v14 = vadd.f32 %v3541_v36, %v10519_v45 }
 0x74d   : > { %v3828_v61 = vadd.f32 %v9382_v47, %v3712_v14 }
 0x74f   : > { %v3940_v8 = vmax.f32 %v3828_v61, 0.0  ;;  %3583 = vmatmul.bf16.gmra.mxu3 %v7251_v15  ;;  %v10524_v15 = vld [vmem:[#allocation51_spill] sm:$0xff] }
 0x751   : > { %v9516_v6 = vmax.f32 %v3936_v0, %v3940_v8 }
 0x752   : > { %v3544_v21 = vpop.f32.mrf.mxu3 }
 0x753   : > { %10520 = vst [vmem:[#allocation43_spill] sm:$0xff] %v9516_v6  ;;  %v3713_v27 = vadd.f32 %v3544_v21, %v10521_v30 }
 0x755   : > { %v3829_v2 = vadd.f32 %v9382_v47, %v3713_v27  ;;  %v7253_v27 = vld [vmem:[#allocation2 + $0xe8] sm:$0xff] }
 0x757   : > { %v3941_v39 = vmax.f32 %v3829_v2, 0.0 }
 0x759   : > { %v9520_v40 = vmax.f32 %v3937_v46, %v3941_v39 }
 0x75a   : > { %v3546_v23 = vpop.f32.mrf.mxu3 }
 0x75b   : > { %v3714_v56 = vadd.f32 %v3546_v23, %v10522_v10  ;;  %v10525_v10 = vld [vmem:[#allocation52_spill] sm:$0xff] }
 0x75d   : > { %v3830_v29 = vadd.f32 %v9382_v47, %v3714_v56 }
 0x75f   : > { %v3942_v44 = vmax.f32 %v3830_v29, 0.0  ;;  %3588 = vmatmul.bf16.gmra.mxu3 %v7252_v24 }
 0x761   : > { %v9524_v4 = vmax.f32 %v3938_v38, %v3942_v44 }
 0x762   : > { %v3549_v0 = vpop.f32.mrf.mxu3 }
 0x763   : > { %v3715_v36 = vadd.f32 %v3549_v0, %v10523_v34 }
 0x765   : > { %v3831_v45 = vadd.f32 %v9382_v47, %v3715_v36 }
 0x767   : > { %v3943_v14 = vmax.f32 %v3831_v45, 0.0  ;;  %v10526_v45 = vld [vmem:[#allocation53_spill] sm:$0xff] }
 0x769   : > { %v9528_v61 = vmax.f32 %v3939_v25, %v3943_v14  ;;  %v7957_v25 = vpop.permute.xlu2 %7956 }
 0x76a   : > { %v3551_v46 = vpop.f32.mrf.mxu3  ;;  %v7958_v3 = vunpack.i.l.bf16 %v7957_v25 }
 0x76b   : > { %v3716_v21 = vadd.f32 %v3551_v46, %v10524_v15  ;;  %v7254_v15 = vld [vmem:[#allocation2 + $0x178] sm:$0xff] }
 0x76d   : > { %v3832_v30 = vadd.f32 %v9382_v47, %v3716_v21 }
 0x76f   : > { %v3944_v2 = vmax.f32 %v3832_v30, 0.0  ;;  %3593 = vmatmul.bf16.gmra.mxu3 %v7253_v27 }
 0x771   : > { %v9532_v23 = vmax.f32 %v3940_v8, %v3944_v2 }
 0x772   : > { %v3554_v38 = vpop.f32.mrf.mxu3 }
 0x773   : > { %v3717_v56 = vadd.f32 %v3554_v38, %v10525_v10  ;;  %v7975_v29 = vpack.i.bf16 %v9532_v23, %v9528_v61 }
 0x775   : > { %v3833_v24 = vadd.f32 %v9382_v47, %v3717_v56  ;;  %7976 = vrot.lane.b32.xlu1 %v7975_v29, %s8330_s22 }
 0x777   : > { %v3945_v0 = vmax.f32 %v3833_v24, 0.0 }
 0x779   : > { %v9539_v34 = vmax.f32 %v3941_v39, %v3945_v0  ;;  %v10527_v39 = vld [vmem:[#allocation54_spill] sm:$0xff] }
 0x77a   : > { %v3556_v36 = vpop.f32.mrf.mxu3 }
 0x77b   : > { %v3718_v46 = vadd.f32 %v3556_v36, %v10526_v45 }
 0x77d   : > { %v3834_v8 = vadd.f32 %v9382_v47, %v3718_v46  ;;  %v7962_v46 = vpop.permute.xlu1 %7961 }
 0x77f   : > { %v3946_v21 = vmax.f32 %v3834_v8, 0.0  ;;  %3598 = vmatmul.bf16.gmra.mxu3 %v7254_v15  ;;  %v7972_v30 = vpop.permute.xlu2 %7971 }
 0x780   : > { %v7974_v27 = vunpack.i.h.bf16 %v7972_v30  ;;  %v7973_v38 = vunpack.i.l.bf16 %v7972_v30  ;;  %v7964_v30 = vunpack.i.h.bf16 %v7962_v46 }
 0x781   : > { %v9543_v10 = vmax.f32 %v3942_v44, %v3946_v21 }
 0x782   : > { %v3559_v56 = vpop.f32.mrf.mxu3  ;;  %v4365_v29 = vmax.f32 %v9433_v17, %v7973_v38  ;;  %v4366_v24 = vmax.f32 %v9451_v12, %v7974_v27  ;;  %v7963_v17 = vunpack.i.l.bf16 %v7962_v46 }
 0x783   : > { %v3719_v59 = vadd.f32 %v3559_v56, %v10527_v39  ;;  %v7980_v36 = vpack.i.bf16 %v9543_v10, %v9539_v34 }
 0x784   : > { %v9550_v45 = vpack.c.bf16 %v4366_v24, %v4365_v29  ;;  %v7959_v24 = vunpack.i.h.bf16 %v7957_v25 }
 0x785   : > { %v3835_v8 = vadd.f32 %v9382_v47, %v3719_v59  ;;  %7981 = vrot.lane.b32.xlu0 %v7980_v36, %s8330_s22 }
 0x786   : > { %10528 = vst [vmem:[#allocation98_spill] sm:$0xff] %v9550_v45  ;;  %4902 = vmatpush.bf16.msrb.mxu0 %v9550_v45  ;;  %v4362_v45 = vmax.f32 %v9396_v18, %v7964_v30 }
 0x787   : > { %v3947_v44 = vmax.f32 %v3835_v8, 0.0  ;;  %v7967_v15 = vpop.permute.xlu0 %7966  ;;  %v4361_v8 = vmax.f32 %v9392_v20, %v7963_v17  ;;  %v10532_v20 = vld [vmem:[#allocation57_spill] sm:$0xff] }
 0x788   : > { %v7969_v38 = vunpack.i.h.bf16 %v7967_v15  ;;  %v7968_v12 = vunpack.i.l.bf16 %v7967_v15  ;;  %v7255_v15 = vld [vmem:[#allocation2 + $0x70] sm:$0xff] }
 0x789   : > { %v9555_v27 = vmax.f32 %v3943_v14, %v3947_v44 }
 0x78a   : > { %v3561_v56 = vpop.f32.mrf.mxu3  ;;  %v4363_v39 = vmax.f32 %v9412_v51, %v7968_v12  ;;  %v4364_v29 = vmax.f32 %v9421_v32, %v7969_v38  ;;  %v9566_v51 = vpack.c.bf16 %v4362_v45, %v4361_v8  ;;  %v4359_v32 = vmax.f32 %v9379_v7, %v7958_v3  ;;  %v10535_v8 = vld [vmem:[#allocation61_spill] sm:$0xff] }
 0x78b   : > { %v3720_v59 = vadd.f32 %v3561_v56, %v10529_v55  ;;  %v4360_v55 = vmax.f32 %v9385_v5, %v7959_v24 }
 0x78c   : > { %v9560_v36 = vpack.c.bf16 %v4364_v29, %v4363_v39  ;;  %10531 = vst [vmem:[#allocation45_spill] sm:$0xff] %v9566_v51  ;;  %v7256_v39 = vld [vmem:[#allocation2 + $0x1c8] sm:$0xff] }
 0x78d   : > { %v3836_v46 = vadd.f32 %v9382_v47, %v3720_v59  ;;  %v9576_v17 = vpack.c.bf16 %v4360_v55, %v4359_v32 }
 0x78e   : > { %10530 = vst [vmem:[#allocation44_spill] sm:$0xff] %v9560_v36  ;;  %4903 = vmatpush.bf16.msrb.mxu0 %v9560_v36 }
 0x78f   : > { %v3948_v14 = vmax.f32 %v3836_v46, 0.0  ;;  %3603 = vmatmul.bf16.gmra.mxu3 %v7255_v15  ;;  %10533 = vst [vmem:[#allocation46_spill] sm:$0xff] %v9576_v17 }
 0x791   : > { %v9570_v25 = vmax.f32 %v3944_v2, %v3948_v14  ;;  %v10534_v2 = vld [vmem:[#allocation59_spill] sm:$0xff] }
 0x792   : > { %v3564_v38 = vpop.f32.mrf.mxu3  ;;  %4904 = vmatpush.bf16.msrb.mxu0 %v9566_v51 }
 0x793   : > { %v3721_v18 = vadd.f32 %v3564_v38, %v10532_v20  ;;  %v7985_v30 = vpack.i.bf16 %v9570_v25, %v9555_v27  ;;  %v10536_v38 = vld [vmem:[#allocation63_spill] sm:$0xff]  ;;  %v10537_v20 = vld [vmem:[#allocation56_spill] sm:$0xff] }
 0x795   : > { %v9579_v12 = vadd.f32 %v9382_v47, %v3721_v18  ;;  %7986 = vrot.lane.b32.xlu2 %v7985_v30, %s8330_s22  ;;  %v2770_v18 = vadd.f32 %v10537_v20, %v10536_v38 }
 0x796   : > { %4905 = vmatpush.bf16.msrb.mxu0 %v9576_v17 }
 0x797   : > { %v10327_v7 = vmax.f32 %v9579_v12, 0.0 }
 0x799   : > { %v9586_v5 = vmax.f32 %v3945_v0, %v10327_v7 }
 0x79a   : > { %v3566_v3 = vpop.f32.mrf.mxu3 }
 0x79b   : > { %v3722_v45 = vadd.f32 %v3566_v3, %v10534_v2  ;;  %v8114_v2 = vld [vmem:[#allocation5] ss:$0 sm:$0xff] }
 0x79d   : > { %v9590_v56 = vadd.f32 %v9382_v47, %v3722_v45  ;;  %v1296_v55 = vpop.f32.mrf.mxu0 }
 0x79e   : > { %v1297_v45 = vadd.f32 %v8114_v2, %v1296_v55 }
 0x79f   : > { %v10329_v29 = vmax.f32 %v9590_v56, 0.0  ;;  %3608 = vmatmul.bf16.gmra.mxu3 %v7256_v39 }
 0x7a1   : > { %v9595_v24 = vmax.f32 %v3946_v21, %v10329_v29 }
 0x7a2   : > { %v3569_v59 = vpop.f32.mrf.mxu3 }
 0x7a3   : > { %v3723_v46 = vadd.f32 %v3569_v59, %v10535_v8  ;;  %v7990_v0 = vpack.i.bf16 %v9595_v24, %v9586_v5  ;;  %v7257_v59 = vld [vmem:[#allocation2 + $0x90] sm:$0xff] }
 0x7a5   : > { %v9601_v15 = vadd.f32 %v9382_v47, %v3723_v46  ;;  %7991 = vrot.lane.b32.xlu1 %v7990_v0, %s8330_s22  ;;  %v1298_v46 = vpop.f32.mrf.mxu0  ;;  %v1422_v0 = vmax.f32 %v1297_v45, 0.0 }
 0x7a6   : > { %v1299_v7 = vadd.f32 %v8114_v2, %v1298_v46 }
 0x7a7   : > { %v10328_v32 = vmax.f32 %v9601_v15, 0.0 }
 0x7a8   : > { %v1423_v20 = vmax.f32 %v1299_v7, 0.0  ;;  %v10541_v7 = vld [vmem:[#allocation67_spill] sm:$0xff] }
 0x7a9   : > { %v9609_v21 = vmax.f32 %v3947_v44, %v10328_v32 }
 0x7aa   : > { %v3571_v30 = vpop.f32.mrf.mxu3  ;;  %v7647_v32 = vpack.c.bf16 %v1423_v20, %v1422_v0  ;;  %v10543_v20 = vld [vmem:[#allocation58_spill] sm:$0xff] }
 0x7ab   : > { %10538 = vst [vmem:[#allocation47_spill] sm:$0xff] %v9609_v21  ;;  %v3724_v3 = vadd.f32 %v3571_v30, %v2770_v18 }
 0x7ac   : > { %7741 = vst [vmem:[#allocation2 + $0x78] sm:$0xff] %v7647_v32   ;;  %v10542_v32 = vld [vmem:[#allocation64_spill] sm:$0xff] }
 0x7ad   : > { %v9612_v39 = vadd.f32 %v9382_v47, %v3724_v3  ;;  %v1301_v18 = vpop.f32.mrf.mxu0  ;;  %v7258_v3 = vld [vmem:[#allocation2 + $0x160] sm:$0xff]  ;;  %v2773_v50 = vadd.f32 %v10543_v20, %v10542_v32 }
 0x7ae   : > { %v1302_v30 = vadd.f32 %v8114_v2, %v1301_v18  ;;  %v10544_v18 = vld [vmem:[#allocation66_spill] sm:$0xff] }
 0x7af   : > { %v10334_v8 = vmax.f32 %v9612_v39, 0.0  ;;  %3613 = vmatmul.bf16.gmra.mxu3 %v7257_v59 }
 0x7b0   : > { %v1424_v17 = vmax.f32 %v1302_v30, 0.0 }
 0x7b1   : > { %v9617_v38 = vmax.f32 %v3948_v14, %v10334_v8  ;;  %v10540_v8 = vld [vmem:[#allocation72_spill] sm:$0xff] }
 0x7b2   : > { %v3574_v44 = vpop.f32.mrf.mxu3  ;;  %v2783_v0 = vadd.f32 %v10541_v7, %v10540_v8 }
 0x7b3   : > { %10539 = vst [vmem:[#allocation48_spill] sm:$0xff] %v9617_v38  ;;  %v3725_v30 = vadd.f32 %v3574_v44, %v2773_v50  ;;  %v7260_v7 = vld [vmem:[#allocation2 + $0x78] sm:$0xff] }
 0x7b5   : > { %v1303_v29 = vpop.f32.mrf.mxu0 }
 0x7b6   : > { %v1304_v51 = vadd.f32 %v8114_v2, %v1303_v29  ;;  %v10546_v2 = vld [vmem:[#allocation73_spill] sm:$0xff] }
 0x7b8   : > { %v1425_v36 = vmax.f32 %v1304_v51, 0.0  ;;  %v10547_v51 = vld [vmem:[#allocation69_spill] sm:$0xff] }
 0x7ba   : > { %v3576_v55 = vpop.f32.mrf.mxu3  ;;  %v7652_v45 = vpack.c.bf16 %v1425_v36, %v1424_v17  ;;  %v2785_v36 = vadd.f32 %v10547_v51, %v10546_v2  ;;  %v10552_v51 = vld [vmem:[#allocation70_spill] sm:$0xff] }
 0x7bc   : > { %7742 = vst [vmem:[#allocation2 + $0x1c0] sm:$0xff] %v7652_v45  }
 0x7bf   : > { %3618 = vmatmul.bf16.gmra.mxu3 %v7258_v3  ;;  %v2775_v3 = vadd.f32 %v10545_v42, %v10544_v18 }
 0x7c1   : > { %v3726_v29 = vadd.f32 %v3576_v55, %v2775_v3 }
 0x7c2   : > { %v3579_v59 = vpop.f32.mrf.mxu3 }
 0x7c3   : > { %v3842_v1 = vadd.f32 %v9382_v47, %v3726_v29  ;;  %v10551_v29 = vld [vmem:[#allocation62_spill] sm:$0xff] }
 0x7c5   : > { %v3954_v42 = vmax.f32 %v3842_v1, 0.0 }
 0x7ca   : > { %v3581_v46 = vpop.f32.mrf.mxu3 }
 0x7cf   : > { %3623 = vmatmul.bf16.gmra.mxu3 %v7259_v48  ;;  %v3841_v48 = vadd.f32 %v9382_v47, %v3725_v30  ;;  %v10550_v30 = vld [vmem:[#allocation68_spill] sm:$0xff] }
 0x7d0   : > { %v2778_v2 = vadd.f32 %v10551_v29, %v10550_v30  ;;  %v7261_v30 = vld [vmem:[#allocation2 + $0x1c0] sm:$0xff] }
 0x7d1   : > { %v3953_v20 = vmax.f32 %v3841_v48, 0.0 }
 0x7d2   : > { %v3584_v14 = vpop.f32.mrf.mxu3 }
 0x7d3   : > { %v3729_v57 = vadd.f32 %v3584_v14, %v2783_v0  ;;  %v10549_v0 = vld [vmem:[#allocation71_spill] sm:$0xff] }
 0x7d5   : > { %v3845_v17 = vadd.f32 %v9382_v47, %v3729_v57  ;;  %v10548_v57 = vld [vmem:[#allocation75_spill] sm:$0xff] }
 0x7d6   : > { %v2788_v18 = vadd.f32 %v10549_v0, %v10548_v57 }
 0x7d7   : > { %v3957_v43 = vmax.f32 %v3845_v17, 0.0 }
 0x7d9   : > { %v9631_v50 = vmax.f32 %v3953_v20, %v3957_v43 }
 0x7da   : > { %v3586_v45 = vpop.f32.mrf.mxu3 }
 0x7db   : > { %v3730_v8 = vadd.f32 %v3586_v45, %v2785_v36  ;;  %v10553_v36 = vld [vmem:[#allocation65_spill] sm:$0xff]  ;;  %v3727_v45 = vadd.f32 %v3579_v59, %v2778_v2 }
 0x7dc   : > { %v2780_v17 = vadd.f32 %v10553_v36, %v10552_v51  ;;  %v10556_v36 = vld [vmem:[#allocation79_spill] sm:$0xff] }
 0x7dd   : > { %v3846_v32 = vadd.f32 %v9382_v47, %v3730_v8  ;;  %v10554_v8 = vld [vmem:[#allocation77_spill] sm:$0xff]  ;;  %v3843_v0 = vadd.f32 %v9382_v47, %v3727_v45 }
 0x7de   : > { %v3728_v48 = vadd.f32 %v3581_v46, %v2780_v17  ;;  %v10557_v17 = vld [vmem:[#allocation76_spill] sm:$0xff] }
 0x7df   : > { %v3958_v14 = vmax.f32 %v3846_v32, 0.0  ;;  %3628 = vmatmul.bf16.gmra.mxu3 %v7260_v7  ;;  %v10555_v7 = vld [vmem:[#allocation74_spill] sm:$0xff] }
 0x7e0   : > { %v2790_v32 = vadd.f32 %v10555_v7, %v10554_v8  ;;  %v3844_v52 = vadd.f32 %v9382_v47, %v3728_v48 }
 0x7e1   : > { %v9633_v44 = vmax.f32 %v3954_v42, %v3958_v14 }
 0x7e2   : > { %v3589_v55 = vpop.f32.mrf.mxu3 }
 0x7e3   : > { %v7995_v3 = vpack.i.bf16 %v9633_v44, %v9631_v50  ;;  %v3731_v1 = vadd.f32 %v3589_v55, %v2788_v18  ;;  %v3955_v55 = vmax.f32 %v3843_v0, 0.0  ;;  %v3956_v18 = vmax.f32 %v3844_v52, 0.0 }
 0x7e5   : > { %7996 = vrot.lane.b32.xlu0 %v7995_v3, %s8330_s22  ;;  %v3847_v28 = vadd.f32 %v9382_v47, %v3731_v1  ;;  %v2793_v1 = vadd.f32 %v10557_v17, %v10556_v36  ;;  %v10562_v17 = vmax.f32 %v9579_v12, 0.0 }
 0x7e7   : > { %v3959_v29 = vmax.f32 %v3847_v28, 0.0  ;;  %v10558_v28 = vld [vmem:[#allocation81_spill] sm:$0xff] }
 0x7e9   : > { %v9650_v59 = vmax.f32 %v3955_v55, %v3959_v29 }
 0x7ea   : > { %v3591_v57 = vpop.f32.mrf.mxu3 }
 0x7eb   : > { %v3732_v19 = vadd.f32 %v3591_v57, %v2790_v32  ;;  %v8030_v57 = vpack.i.bf16 %v9524_v4, %v9520_v40 }
 0x7ed   : > { %v3848_v51 = vadd.f32 %v9382_v47, %v3732_v19  ;;  %v10559_v19 = vld [vmem:[#allocation78_spill] sm:$0xff] }
 0x7ee   : > { %v2795_v8 = vadd.f32 %v10559_v19, %v10558_v28  ;;  %v10564_v19 = vld [vmem:[#allocation82_spill] sm:$0xff] }
 0x7ef   : > { %v3960_v3 = vmax.f32 %v3848_v51, 0.0  ;;  %3633 = vmatmul.bf16.gmra.mxu3 %v7261_v30 }
 0x7f1   : > { %v9652_v46 = vmax.f32 %v3956_v18, %v3960_v3 }
 0x7f2   : > { %v3594_v2 = vpop.f32.mrf.mxu3 }
 0x7f3   : > { %v8000_v45 = vpack.i.bf16 %v9652_v46, %v9650_v59  ;;  %v3733_v48 = vadd.f32 %v3594_v2, %v2793_v1  ;;  %v10560_v2 = vmax.f32 %v9590_v56, 0.0  ;;  %v9678_v1 = vmax.f32 %v10562_v17, %v3953_v20 }
 0x7f5   : > { %8001 = vrot.lane.b32.xlu2 %v8000_v45, %s8330_s22  ;;  %v9662_v52 = vadd.f32 %v9382_v47, %v3733_v48  ;;  %v9674_v36 = vmax.f32 %v10560_v2, %v3954_v42  ;;  %10563 = vst [vmem:[#allocation50_spill] sm:$0xff] %v9678_v1  ;;  %v10570_v2 = vmax.f32 %v9601_v15, 0.0  ;;  %v7977_v15 = vpop.permute.xlu1 %7976 }
 0x7f7   : > { %v10346_v0 = vmax.f32 %v9662_v52, 0.0  ;;  %10561 = vst [vmem:[#allocation49_spill] sm:$0xff] %v9674_v36  ;;  %v8045_v12 = vpack.i.bf16 %v9674_v36, %v9678_v1  ;;  %v9704_v17 = vmax.f32 %v10570_v2, %v3955_v55  ;;  %v8040_v2 = vpack.i.bf16 %v9367_v58, %v9361_v9  ;;  %v7982_v60 = vpop.permute.xlu0 %7981 }
 0x7f9   : > { %v9682_v45 = vmax.f32 %v3957_v43, %v10346_v0  ;;  %v10566_v43 = vmax.f32 %v9612_v39, 0.0  ;;  %10571 = vst [vmem:[#allocation52_spill] sm:$0xff] %v9704_v17  ;;  %v8060_v39 = vpack.i.bf16 %v9617_v38, %v9609_v21 }
 0x7fa   : > { %v3596_v7 = vpop.f32.mrf.mxu3 }
 0x7fb   : > { %v3734_v32 = vadd.f32 %v3596_v7, %v2795_v8  ;;  %v10565_v8 = vld [vmem:[#allocation80_spill] sm:$0xff]  ;;  %v9698_v42 = vmax.f32 %v10566_v43, %v3956_v18 }
 0x7fc   : > { %v2798_v7 = vadd.f32 %v10565_v8, %v10564_v19 }
 0x7fd   : > { %v9668_v30 = vadd.f32 %v9382_v47, %v3734_v32  ;;  %8031 = vrot.lane.b32.xlu2 %v8030_v57, %s8330_s22  ;;  %10567 = vst [vmem:[#allocation51_spill] sm:$0xff] %v9698_v42  ;;  %v10569_v32 = vld [vmem:[#allocation83_spill] sm:$0xff] }
 0x7ff   : > { %v10345_v51 = vmax.f32 %v9668_v30, 0.0 }
 0x801   : > { %v9686_v48 = vmax.f32 %v3958_v14, %v10345_v51  ;;  %v10568_v14 = vld [vmem:[#allocation84_spill] sm:$0xff]  ;;  %v10575_v51 = vld [vmem:[#allocation87_spill] sm:$0xff] }
 0x802   : > { %v3599_v28 = vpop.f32.mrf.mxu3  ;;  %v2800_v57 = vadd.f32 %v10569_v32, %v10568_v14  ;;  %v10572_v14 = vld [vmem:[#allocation86_spill] sm:$0xff]  ;;  %v10573_v32 = vld [vmem:[#allocation85_spill] sm:$0xff] }
 0x803   : > { %v8005_v56 = vpack.i.bf16 %v9686_v48, %v9682_v45  ;;  %v3735_v20 = vadd.f32 %v3599_v28, %v2798_v7  ;;  %v8025_v7 = vpack.i.bf16 %v9698_v42, %v9704_v17 }
 0x805   : > { %8006 = vrot.lane.b32.xlu1 %v8005_v56, %s8330_s22  ;;  %8046 = vrot.lane.b32.xlu2 %v8045_v12, %s8330_s22  ;;  %v9707_v19 = vadd.f32 %v9382_v47, %v3735_v20 }
 0x807   : > { %v10344_v18 = vmax.f32 %v9707_v19, 0.0 }
 0x809   : > { %v9722_v12 = vmax.f32 %v3959_v29, %v10344_v18  ;;  %v10574_v18 = vld [vmem:[#allocation88_spill] sm:$0xff] }
 0x80a   : > { %v3601_v8 = vpop.f32.mrf.mxu3  ;;  %v2805_v0 = vadd.f32 %v10575_v51, %v10574_v18  ;;  %v7984_v18 = vunpack.i.h.bf16 %v7982_v60 }
 0x80b   : > { %v3736_v28 = vadd.f32 %v3601_v8, %v2800_v57  ;;  %v2803_v57 = vadd.f32 %v10573_v32, %v10572_v14  ;;  %v8075_v8 = vpack.i.bf16 %v9492_v33, %v9473_v41  ;;  %v7287_v33 = vld [vmem:[#allocation10 + $0x88] sm:$0xf0] }
 0x80d   : > { %v9715_v56 = vadd.f32 %v9382_v47, %v3736_v28  ;;  %8026 = vrot.lane.b32.xlu1 %v8025_v7, %s8330_s22  ;;  %8061 = vrot.lane.b32.xlu2 %v8060_v39, %s8330_s22  ;;  %v7987_v7 = vpop.permute.xlu2 %7986 }
 0x80e   : > { %v7988_v14 = vunpack.i.l.bf16 %v7987_v7 }
 0x80f   : > { %v10343_v55 = vmax.f32 %v9715_v56, 0.0 }
 0x810   : > { %v4379_v51 = vmax.f32 %v9555_v27, %v7988_v14 }
 0x811   : > { %v9726_v20 = vmax.f32 %v3960_v3, %v10343_v55  ;;  %v7989_v3 = vunpack.i.h.bf16 %v7987_v7  ;;  %v8055_v7 = vpack.i.bf16 %v9349_v37, %v9330_v22 }
 0x812   : > { %v3604_v43 = vpop.f32.mrf.mxu3 }
 0x813   : > { %v8010_v28 = vpack.i.bf16 %v9726_v20, %v9722_v12  ;;  %v3737_v29 = vadd.f32 %v3604_v43, %v2803_v57 }
 0x815   : > { %8041 = vrot.lane.b32.xlu1 %v8040_v2, %s8330_s22  ;;  %8076 = vrot.lane.b32.xlu2 %v8075_v8, %s8330_s22  ;;  %v9742_v11 = vadd.f32 %v9382_v47, %v3737_v29  ;;  %v4380_v8 = vmax.f32 %v9570_v25, %v7989_v3  ;;  %v7983_v29 = vunpack.i.l.bf16 %v7982_v60  ;;  %v7979_v25 = vunpack.i.h.bf16 %v7977_v15 }
 0x816   : > { %8011 = vrot.lane.b32.xlu0 %v8010_v28, %s8330_s22  ;;  %v10578_v3 = vmax.f32 %v9662_v52, 0.0  ;;  %v2463_v52 = vpop.f32.mrf.mxu1 }
 0x817   : > { %v7992_v39 = vpop.permute.xlu1 %7991  ;;  %v10353_v41 = vmax.f32 %v9742_v11, 0.0  ;;  %v4377_v27 = vmax.f32 %v9539_v34, %v7983_v29  ;;  %v9765_v60 = vpack.c.bf16 %v4380_v8, %v4379_v51  ;;  %v8070_v34 = vpack.i.bf16 %v9308_v63, %v9278_v54  ;;  %v7270_v51 = vld [vmem:[#allocation10 + $0x4] sm:$0xf] }
 0x818   : > { %v7994_v32 = vunpack.i.h.bf16 %v7992_v39  ;;  %v7993_v55 = vunpack.i.l.bf16 %v7992_v39  ;;  %v9751_v39 = vpop.f32.mrf.mxu2  ;;  %v4376_v8 = vmax.f32 %v9532_v23, %v7979_v25 }
 0x819   : > { %10577 = vst [vmem:[#allocation54_spill] sm:$0xff] %v9765_v60  ;;  %v9771_v14 = vmax.f32 %v10578_v3, %v10353_v41 }
 0x81a   : > { %v4382_v43 = vmax.f32 %v9595_v24, %v7994_v32  ;;  %v4381_v57 = vmax.f32 %v9586_v5, %v7993_v55  ;;  %v3606_v2 = vpop.f32.mrf.mxu3  ;;  %v4378_v55 = vmax.f32 %v9543_v10, %v7984_v18  ;;  %v10579_v32 = vmax.f32 %v9668_v30, 0.0  ;;  %v10580_v10 = vld [vmem:[#allocation89_spill] sm:$0xff]  ;;  %v6722_v18 = vld [vmem:[#allocation10 + $0x1c] sm:$0xf0] }
 0x81b   : > { %v3738_v28 = vadd.f32 %v3606_v2, %v2805_v0  ;;  %v7978_v0 = vunpack.i.l.bf16 %v7977_v15  ;;  %v6725_v3 = vor.u32 %v7270_v51, %v6722_v18  ;;  %v7277_v51 = vld [vmem:[#allocation10 + $0x3c] sm:$0xf]  ;;  %v6750_v18 = vld [vmem:[#allocation10 + $0x54] sm:$0xf0] }
 0x81c   : > { %v9754_v16 = vpack.c.bf16 %v4382_v43, %v4381_v57 }
 0x81d   : > { %v9758_v24 = vadd.f32 %v9382_v47, %v3738_v28  ;;  %8056 = vrot.lane.b32.xlu1 %v8055_v7, %s8330_s22  ;;  %v4375_v28 = vmax.f32 %v9528_v61, %v7978_v0  ;;  %v9787_v7 = vpack.c.bf16 %v4378_v55, %v4377_v27  ;;  %4824 = vmatmul.bf16.vlgmr.msrb.gmra.mxu2 %v6725_v3  ;;  %v10583_v61 = vmax.f32 %v9707_v19, 0.0  ;;  %v6720_v27 = vld [vmem:[#allocation10] sm:$0xf]  ;;  %v10585_v19 = vld [vmem:[#allocation97_spill] sm:$0xff] }
 0x81e   : > { %10576 = vst [vmem:[#allocation53_spill] sm:$0xff] %v9754_v16  ;;  %4945 = vmatpush.bf16.msra.mxu1 %v9754_v16  ;;  %v8020_v55 = vpack.i.bf16 %v9375_v62, %v9371_v49  ;;  %v6753_v3 = vor.u32 %v7277_v51, %v6750_v18  ;;  %v8065_v51 = vpack.i.bf16 %v9508_v26, %v9503_v35  ;;  %v6776_v16 = vld [vmem:[#allocation10 + $0x70] sm:$0xf] }
 0x81f   : > { %v10354_v5 = vmax.f32 %v9758_v24, 0.0  ;;  %10581 = vst [vmem:[#allocation55_spill] sm:$0xff] %v9787_v7  ;;  %v9796_v23 = vpack.c.bf16 %v4376_v8, %v4375_v28  ;;  %v10584_v8 = vld [vmem:[#allocation96_spill] sm:$0xff] }
 0x820   : > { %v2812_v29 = vpop.f32.mrf.mxu2  ;;  %v8035_v28 = vpack.i.bf16 %v10585_v19, %v10584_v8 }
 0x821   : > { %v9777_v43 = vmax.f32 %v10579_v32, %v10354_v5  ;;  %10582 = vst [vmem:[#allocation57_spill] sm:$0xff] %v9796_v23  ;;  %v2813_v38 = vadd.f32 %v2812_v29, %v2463_v52 }
 0x822   : > { %v3609_v57 = vpop.f32.mrf.mxu3  ;;  %4946 = vmatpush.bf16.msra.mxu1 %v9765_v60 }
 0x823   : > { %v3739_v15 = vadd.f32 %v3609_v57, %v10580_v10  ;;  %v8015_v2 = vpack.i.bf16 %v9777_v43, %v9771_v14  ;;  %v7273_v57 = vld [vmem:[#allocation10 + $0x18] sm:$0xf0] }
 0x824   : > { %v6721_v10 = vor.u32 %v7273_v57, %v6720_v27  ;;  %v6748_v57 = vld [vmem:[#allocation10 + $0x38] sm:$0xf] }
 0x825   : > { %v9790_v30 = vadd.f32 %v9382_v47, %v3739_v15  ;;  %8071 = vrot.lane.b32.xlu1 %v8070_v34, %s8330_s22  ;;  %8016 = vrot.lane.b32.xlu0 %v8015_v2, %s8330_s22  ;;  %v2465_v15 = vpop.f32.mrf.mxu1 }
 0x826   : > { %4947 = vmatpush.bf16.msra.mxu1 %v9787_v7 }
 0x827   : > { %v10352_v32 = vmax.f32 %v9790_v30, 0.0  ;;  %4781 = vmatmul.bf16.vlgmr.msrb.gmra.mxu1 %v6721_v10  ;;  %v7280_v10 = vld [vmem:[#allocation10 + $0x50] sm:$0xf0] }
 0x828   : > { %v2814_v34 = vpop.f32.mrf.mxu2  ;;  %v6749_v41 = vor.u32 %v7280_v10, %v6748_v57  ;;  %v6777_v10 = vor.u32 %v7287_v33, %v6776_v16  ;;  %v2810_v16 = vadd.f32 %v9751_v39, %v9744_v31 }
 0x829   : > { %v9802_v25 = vmax.f32 %v10583_v61, %v10352_v32  ;;  %v2815_v35 = vadd.f32 %v2814_v34, %v2465_v15  ;;  %v7294_v15 = vld [vmem:[#allocation10 + $0xc0] sm:$0xf0] }
 0x82a   : > { %v9804_v0 = vpop.f32.mrf.mxu3  ;;  %4948 = vmatpush.bf16.msra.mxu1 %v9796_v23  ;;  %v6778_v23 = vld [vmem:[#allocation10 + $0x8c] sm:$0xf0] }
 0x82d   : > { %8021 = vrot.lane.b32.xlu0 %v8020_v55, %s8330_s22  ;;  %v9813_v61 = vpop.f32.mrf.mxu1  ;;  %4829 = vmatmul.bf16.gmra.mxu2 %v6753_v3  ;;  %v8050_v55 = vpack.i.bf16 %v9516_v6, %v9512_v53  ;;  %v7284_v3 = vld [vmem:[#allocation10 + $0x74] sm:$0xf]  ;;  %v7291_v53 = vld [vmem:[#allocation10 + $0xac] sm:$0xf] }
 0x82e   : > { %v6781_v7 = vor.u32 %v7284_v3, %v6778_v23 }
 0x830   : > { %v9815_v32 = vpop.f32.mrf.mxu2 }
 0x832   : > { %v3614_v2 = vpop.f32.mrf.mxu3 }
 0x833   : > { %v3741_v23 = vadd.f32 %v3614_v2, %v2813_v38 }
 0x835   : > { %8036 = vrot.lane.b32.xlu0 %v8035_v28, %s8330_s22  ;;  %v2470_v5 = vpop.f32.mrf.mxu1 }
 0x837   : > { %4786 = vmatmul.bf16.gmra.mxu1 %v6749_v41 }
 0x838   : > { %v2819_v18 = vpop.f32.mrf.mxu2 }
 0x83a   : > { %v3616_v27 = vpop.f32.mrf.mxu3 }
 0x83d   : > { %8051 = vrot.lane.b32.xlu0 %v8050_v55, %s8330_s22  ;;  %4834 = vmatmul.bf16.gmra.mxu2 %v6781_v7  ;;  %v2473_v57 = vpop.f32.mrf.mxu1  ;;  %v3742_v7 = vadd.f32 %v3616_v27, %v2815_v35  ;;  %v3857_v35 = vadd.f32 %v9382_v47, %v3741_v23  ;;  %v7298_v23 = vld [vmem:[#allocation10 + $0xe4] sm:$0xf] }
 0x83f   : > { %v3858_v38 = vadd.f32 %v9382_v47, %v3742_v7  ;;  %v6834_v7 = vld [vmem:[#allocation10 + $0xfc] sm:$0xf0] }
 0x840   : > { %v2822_v55 = vpop.f32.mrf.mxu2 }
 0x841   : > { %v2823_v21 = vadd.f32 %v2822_v55, %v2473_v57  ;;  %v10586_v55 = vld [vmem:[#allocation90_spill] sm:$0xff] }
 0x842   : > { %v9820_v28 = vpop.f32.mrf.mxu3 }
 0x845   : > { %8066 = vrot.lane.b32.xlu0 %v8065_v51, %s8330_s22  ;;  %v6806_v51 = vld [vmem:[#allocation10 + $0xc4] sm:$0xf0]  ;;  %v2475_v6 = vpop.f32.mrf.mxu1 }
 0x846   : > { %v6809_v1 = vor.u32 %v7291_v53, %v6806_v51  ;;  %v3740_v53 = vadd.f32 %v9804_v0, %v2810_v16 }
 0x847   : > { %4791 = vmatmul.bf16.gmra.mxu1 %v6777_v10  ;;  %v2820_v10 = vadd.f32 %v2819_v18, %v2470_v5 }
 0x848   : > { %v2824_v36 = vpop.f32.mrf.mxu2 }
 0x849   : > { %v2825_v33 = vadd.f32 %v2824_v36, %v2475_v6  ;;  %v3970_v36 = vmax.f32 %v3858_v38, 0.0 }
 0x84a   : > { %v3621_v60 = vpop.f32.mrf.mxu3 }
 0x84d   : > { %4839 = vmatmul.bf16.gmra.mxu2 %v6809_v1  ;;  %v6804_v1 = vld [vmem:[#allocation10 + $0xa8] sm:$0xf] }
 0x84e   : > { %v6805_v31 = vor.u32 %v7294_v15, %v6804_v1 }
 0x84f   : > { %v9825_v41 = vpop.permute.xlu2 %8001 }
 0x852   : > { %v3624_v13 = vpop.f32.mrf.mxu3 }
 0x853   : > { %v3745_v26 = vadd.f32 %v3624_v13, %v2823_v21 }
 0x855   : > { %v9830_v57 = vadd.f32 %v9382_v47, %v3745_v26 }
 0x857   : > { %v8032_v3 = vpop.permute.xlu2 %8031  ;;  %v3973_v26 = vmax.f32 %v9830_v57, 0.0  ;;  %4796 = vmatmul.bf16.gmra.mxu1 %v6805_v31  ;;  %v10593_v57 = vmax.f32 %v9790_v30, 0.0 }
 0x858   : > { %v8034_v17 = vunpack.i.h.bf16 %v8032_v3  ;;  %v8033_v42 = vunpack.i.l.bf16 %v8032_v3  ;;  %v6837_v3 = vor.u32 %v7298_v23, %v6834_v7  ;;  %v7305_v23 = vld [vmem:[#allocation10 + $0x11c] sm:$0xf]  ;;  %v6862_v7 = vld [vmem:[#allocation10 + $0x134] sm:$0xf0] }
 0x85a   : > { %v4374_v13 = vmax.f32 %v9524_v4, %v8034_v17  ;;  %v4373_v21 = vmax.f32 %v9520_v40, %v8033_v42  ;;  %v3626_v52 = vpop.f32.mrf.mxu3  ;;  %v9845_v40 = vadd.f32 %v9382_v47, %v3740_v53  ;;  %v3969_v4 = vmax.f32 %v3857_v35, 0.0  ;;  %v10588_v53 = vld [vmem:[#allocation91_spill] sm:$0xff] }
 0x85b   : > { %v3746_v29 = vadd.f32 %v3626_v52, %v2825_v33  ;;  %v3744_v33 = vadd.f32 %v3621_v60, %v2820_v10  ;;  %v8115_v52 = vld [vmem:[#allocation8] ss:$0 sm:$0xff] }
 0x85c   : > { %v9837_v34 = vpack.c.bf16 %v4374_v13, %v4373_v21  ;;  %v9850_v17 = vmax.f32 %v3969_v4, %v3973_v26  ;;  %v3968_v2 = vmax.f32 %v9845_v40, 0.0  ;;  %v10587_v13 = vmax.f32 %v9715_v56, 0.0 }
 0x85d   : > { %v9841_v6 = vadd.f32 %v9382_v47, %v3746_v29  ;;  %v2818_v47 = vadd.f32 %v9815_v32, %v9813_v61  ;;  %4844 = vmatmul.bf16.gmra.mxu2 %v6837_v3  ;;  %v3860_v18 = vadd.f32 %v8115_v52, %v3744_v33  ;;  %v6832_v29 = vld [vmem:[#allocation10 + $0xe0] sm:$0xf]  ;;  %v6865_v3 = vor.u32 %v7305_v23, %v6862_v7 }
 0x85e   : > { %4949 = vmatpush.bf16.msra.mxu1 %v9837_v34  ;;  %v9866_v21 = vmax.f32 %v10587_v13, %v3968_v2  ;;  %v10591_v13 = vmax.f32 %v9742_v11, 0.0 }
 0x85f   : > { %v3974_v42 = vmax.f32 %v9841_v6, 0.0  ;;  %v3743_v16 = vadd.f32 %v9820_v28, %v2818_v47  ;;  %v7301_v28 = vld [vmem:[#allocation10 + $0xf8] sm:$0xf0]  ;;  %v3972_v31 = vmax.f32 %v3860_v18, 0.0 }
 0x860   : > { %v8105_v38 = vpack.i.bf16 %v9866_v21, %v9802_v25  ;;  %v6833_v60 = vor.u32 %v7301_v28, %v6832_v29  ;;  %v10592_v18 = vld [vmem:[#allocation93_spill] sm:$0xff]  ;;  %v7308_v29 = vld [vmem:[#allocation10 + $0x130] sm:$0xf0] }
 0x861   : > { %v9852_v39 = vmax.f32 %v3970_v36, %v3974_v42  ;;  %v3859_v61 = vadd.f32 %v8115_v52, %v3743_v16  ;;  %v10590_v16 = vmax.f32 %v9758_v24, 0.0 }
 0x862   : > { %v3629_v0 = vpop.f32.mrf.mxu3 }
 0x863   : > { %v8090_v27 = vpack.i.bf16 %v9852_v39, %v9850_v17  ;;  %v3747_v51 = vadd.f32 %v3629_v0, %v10586_v55  ;;  %v3971_v56 = vmax.f32 %v3859_v61, 0.0  ;;  %v10589_v55 = vld [vmem:[#allocation92_spill] sm:$0xff]  ;;  %v9882_v33 = vmax.f32 %v10590_v16, %v3970_v36 }
 0x865   : > { %8091 = vrot.lane.b32.xlu2 %v8090_v27, %s8330_s22  ;;  %v3863_v32 = vadd.f32 %v8115_v52, %v3747_v51 }
 0x867   : > { %v3975_v1 = vmax.f32 %v3863_v32, 0.0  ;;  %4801 = vmatmul.bf16.gmra.mxu1 %v6833_v60  ;;  %v9886_v32 = vmax.f32 %v10591_v13, %v3969_v4 }
 0x869   : > { %v9872_v0 = vmax.f32 %v3971_v56, %v3975_v1 }
 0x86a   : > { %v3631_v5 = vpop.f32.mrf.mxu3 }
 0x86b   : > { %v3748_v35 = vadd.f32 %v3631_v5, %v10588_v53 }
 0x86d   : > { %v3864_v15 = vadd.f32 %v8115_v52, %v3748_v35  ;;  %8106 = vrot.lane.b32.xlu2 %v8105_v38, %s8330_s22  ;;  %4849 = vmatmul.bf16.gmra.mxu2 %v6865_v3  ;;  %v8100_v35 = vpack.i.bf16 %v9882_v33, %v9886_v32  ;;  %v6860_v38 = vld [vmem:[#allocation10 + $0x118] sm:$0xf] }
 0x86e   : > { %v6861_v28 = vor.u32 %v7308_v29, %v6860_v38 }
 0x86f   : > { %v3976_v6 = vmax.f32 %v3864_v15, 0.0 }
 0x871   : > { %v9874_v27 = vmax.f32 %v3972_v31, %v3976_v6  ;;  %v4513_v6 = vld [vmem:[#allocation10 + $0x150] sm:$0xff] }
 0x872   : > { %v3634_v47 = vpop.f32.mrf.mxu3 }
 0x873   : > { %v8085_v10 = vpack.i.bf16 %v9874_v27, %v9872_v0  ;;  %v3749_v51 = vadd.f32 %v3634_v47, %v10589_v55  ;;  %v4654_v47 = vunpack.c.h.b16 %v4513_v6  ;;  %v9901_v55 = vpop.permute.xlu0 %7996 }
 0x875   : > { %8086 = vrot.lane.b32.xlu1 %v8085_v10, %s8330_s22  ;;  %v3865_v5 = vadd.f32 %v8115_v52, %v3749_v51  ;;  %v4703_v10 = vpack.c.b16 %v4654_v47, %v4654_v47  ;;  %v9907_v51 = vmax.f32 %v3968_v2, %v3972_v31 }
 0x877   : > { %v3977_v60 = vmax.f32 %v3865_v5, 0.0  ;;  %v8007_v1 = vpop.permute.xlu1 %8006  ;;  %4806 = vmatmul.bf16.gmra.mxu1 %v6861_v28  ;;  %v8004_v28 = vunpack.i.h.bf16 %v9825_v41 }
 0x879   : > { %v9894_v11 = vmax.f32 %v3973_v26, %v3977_v60  ;;  %v9911_v26 = vmax.f32 %v10593_v57, %v3971_v56  ;;  %v8009_v56 = vunpack.i.h.bf16 %v8007_v1  ;;  %v8003_v60 = vunpack.i.l.bf16 %v9825_v41 }
 0x87a   : > { %v3636_v61 = vpop.f32.mrf.mxu3 }
 0x87b   : > { %v3750_v53 = vadd.f32 %v3636_v61, %v10592_v18  ;;  %v8095_v23 = vpack.i.bf16 %v9907_v51, %v9911_v26 }
 0x87d   : > { %v3866_v24 = vadd.f32 %v8115_v52, %v3750_v53  ;;  %8101 = vrot.lane.b32.xlu1 %v8100_v35, %s8330_s22  ;;  %4854 = vmatmul.bf16.gmra.mxu2 %v4703_v10  ;;  %v8008_v53 = vunpack.i.l.bf16 %v8007_v1  ;;  %v4391_v10 = vmax.f32 %v9650_v59, %v8003_v60  ;;  %v7998_v59 = vunpack.i.l.bf16 %v9901_v55 }
 0x87f   : > { %v3978_v36 = vmax.f32 %v3866_v24, 0.0  ;;  %v9903_v52 = vpop.permute.xlu1 %8026  ;;  %v4394_v24 = vmax.f32 %v9686_v48, %v8009_v56  ;;  %v4393_v1 = vmax.f32 %v9682_v45, %v8008_v53 }
 0x880   : > { %v8028_v56 = vunpack.i.l.bf16 %v9903_v52 }
 0x881   : > { %v9896_v4 = vmax.f32 %v3974_v42, %v3978_v36  ;;  %v4653_v42 = vunpack.c.l.b16 %v4513_v6 }
 0x883   : > { %v8080_v15 = vpack.i.bf16 %v9896_v4, %v9894_v11  ;;  %v4702_v7 = vpack.c.b16 %v4653_v42, %v4653_v42 }
 0x885   : > { %8081 = vrot.lane.b32.xlu0 %v8080_v15, %s8330_s22  ;;  %v8047_v15 = vpop.permute.xlu2 %8046 }
 0x887   : > { %4811 = vmatmul.bf16.gmra.mxu1 %v4702_v7  ;;  %v8042_v16 = vpop.permute.xlu1 %8041 }
 0x888   : > { %v8012_v3 = vpop.permute.xlu0 %8011  ;;  %v8043_v36 = vunpack.i.l.bf16 %v8042_v16 }
 0x889   : > { %v8014_v5 = vunpack.i.h.bf16 %v8012_v3  ;;  %v8013_v40 = vunpack.i.l.bf16 %v8012_v3  ;;  %v9938_v3 = vpack.c.bf16 %v4394_v24, %v4393_v1 }
 0x88b   : > { %v4396_v35 = vmax.f32 %v9726_v20, %v8014_v5  ;;  %v4395_v38 = vmax.f32 %v9722_v12, %v8013_v40  ;;  %v4392_v12 = vmax.f32 %v9652_v46, %v8004_v28  ;;  %v7999_v46 = vunpack.i.h.bf16 %v9901_v55 }
 0x88c   : > { %v8048_v28 = vunpack.i.l.bf16 %v8047_v15 }
 0x88d   : > { %8096 = vrot.lane.b32.xlu0 %v8095_v23, %s8330_s22  ;;  %v9927_v47 = vpack.c.bf16 %v4396_v35, %v4395_v38  ;;  %v4355_v23 = vmax.f32 %v9361_v9, %v8043_v36  ;;  %v4390_v55 = vmax.f32 %v9633_v44, %v7999_v46  ;;  %v8049_v38 = vunpack.i.h.bf16 %v8047_v15  ;;  %v10595_v36 = vld [vmem:[#allocation52_spill] sm:$0xff]  ;;  %v7271_v15 = vld [vmem:[#allocation10 + $0xc] sm:$0xf] }
 0x88f   : > { %v8057_v18 = vpop.permute.xlu1 %8056 }
 0x890   : > { %v8059_v57 = vunpack.i.h.bf16 %v8057_v18  ;;  %v8058_v42 = vunpack.i.l.bf16 %v8057_v18  ;;  %v8062_v18 = vpop.permute.xlu2 %8061 }
 0x892   : > { %v4353_v9 = vmax.f32 %v9330_v22, %v8058_v42  ;;  %v6728_v22 = vld [vmem:[#allocation10 + $0x8] sm:$0xf] }
 0x897   : > { %v8017_v13 = vpop.permute.xlu0 %8016 }
 0x898   : > { %v8019_v2 = vunpack.i.h.bf16 %v8017_v13  ;;  %v8018_v31 = vunpack.i.l.bf16 %v8017_v13  ;;  %v9946_v13 = vpack.c.bf16 %v4392_v12, %v4391_v10  ;;  %v10596_v12 = vld [vmem:[#allocation49_spill] sm:$0xff] }
 0x899   : > { %v4386_v10 = vmax.f32 %v10596_v12, %v8049_v38  ;;  %v7272_v38 = vld [vmem:[#allocation10 + $0x14] sm:$0xf]  ;;  %v7281_v12 = vld [vmem:[#allocation10 + $0x58] sm:$0xf0] }
 0x89a   : > { %v4398_v61 = vmax.f32 %v9777_v43, %v8019_v2  ;;  %v4397_v30 = vmax.f32 %v9771_v14, %v8018_v31  ;;  %v8044_v43 = vunpack.i.h.bf16 %v8042_v16  ;;  %v8072_v16 = vpop.permute.xlu1 %8071 }
 0x89b   : > { %v8074_v5 = vunpack.i.h.bf16 %v8072_v16  ;;  %v8073_v40 = vunpack.i.l.bf16 %v8072_v16  ;;  %v10598_v16 = vld [vmem:[#allocation43_spill] sm:$0xff] }
 0x89c   : > { %v9920_v29 = vpack.c.bf16 %v4398_v61, %v4397_v30  ;;  %v4356_v45 = vmax.f32 %v9367_v58, %v8044_v43  ;;  %v4354_v58 = vmax.f32 %v9349_v37, %v8059_v57  ;;  %v4389_v61 = vmax.f32 %v9631_v50, %v7998_v59  ;;  %v7274_v37 = vld [vmem:[#allocation10 + $0x20] sm:$0xf0]  ;;  %v10594_v43 = vld [vmem:[#allocation51_spill] sm:$0xff] }
 0x89d   : > { %v8029_v30 = vunpack.i.h.bf16 %v9903_v52  ;;  %v4351_v52 = vmax.f32 %v9278_v54, %v8073_v40 }
 0x89e   : > { %4988 = vmatpush.bf16.msra.mxu2 %v9920_v29  ;;  %v9960_v24 = vpack.c.bf16 %v4354_v58, %v4353_v9  ;;  %v9966_v1 = vpack.c.bf16 %v4390_v55, %v4389_v61  ;;  %v10599_v9 = vld [vmem:[#allocation42_spill] sm:$0xff]  ;;  %v10601_v61 = vld [vmem:[#allocation48_spill] sm:$0xff] }
 0x89f   : > { %v8022_v14 = vpop.permute.xlu0 %8021 }
 0x8a0   : > { %v8024_v6 = vunpack.i.h.bf16 %v8022_v14  ;;  %v8023_v20 = vunpack.i.l.bf16 %v8022_v14  ;;  %v4825_v60 = vpop.f32.mrf.mxu2  ;;  %v4387_v14 = vmax.f32 %v10595_v36, %v8028_v56  ;;  %v10602_v56 = vld [vmem:[#allocation47_spill] sm:$0xff] }
 0x8a2   : > { %4989 = vmatpush.bf16.msra.mxu2 %v9927_v47  ;;  %v4357_v41 = vmax.f32 %v9371_v49, %v8023_v20  ;;  %v4358_v48 = vmax.f32 %v9375_v62, %v8024_v6  ;;  %v9944_v62 = vpack.c.bf16 %v4356_v45, %v4355_v23  ;;  %v6729_v6 = vor.u32 %v7274_v37, %v6728_v22  ;;  %v6730_v20 = vld [vmem:[#allocation10 + $0x24] sm:$0xf0] }
 0x8a3   : > { %v8064_v23 = vunpack.i.h.bf16 %v8062_v18  ;;  %v8063_v45 = vunpack.i.l.bf16 %v8062_v18  ;;  %v6733_v59 = vor.u32 %v7271_v15, %v6730_v20  ;;  %v10603_v37 = vld [vmem:[#allocation95_spill] sm:$0xff]  ;;  %v6756_v20 = vld [vmem:[#allocation10 + $0x40] sm:$0xf] }
 0x8a4   : > { %v9936_v7 = vpack.c.bf16 %v4358_v48, %v4357_v41  ;;  %v4782_v44 = vpop.f32.mrf.mxu1  ;;  %v10597_v41 = vld [vmem:[#allocation50_spill] sm:$0xff] }
 0x8a5   : > { %v9988_v55 = vadd.f32 %v4825_v60, %v4782_v44  ;;  %v4383_v18 = vmax.f32 %v10602_v56, %v8063_v45  ;;  %v10609_v45 = vld [vmem:[#allocation31_spill] sm:$0xff] }
 0x8a6   : > { %4906 = vmatpush.bf16.msrb.mxu0 %v9936_v7  ;;  %4990 = vmatpush.bf16.msra.mxu2 %v9938_v3 }
 0x8a7   : > { %v8037_v49 = vpop.permute.xlu0 %8036 }
 0x8a8   : > { %v8039_v2 = vunpack.i.h.bf16 %v8037_v49  ;;  %v8038_v31 = vunpack.i.l.bf16 %v8037_v49 }
 0x8aa   : > { %v4336_v53 = vmax.f32 %v10585_v19, %v8039_v2  ;;  %v4335_v35 = vmax.f32 %v10584_v8, %v8038_v31  ;;  %4907 = vmatpush.bf16.msrb.mxu0 %v9944_v62  ;;  %4991 = vmatpush.bf16.msra.mxu2 %v9946_v13  ;;  %v4352_v19 = vmax.f32 %v9308_v63, %v8074_v5  ;;  %v10600_v5 = vld [vmem:[#allocation94_spill] sm:$0xff]  ;;  %v9984_v2 = vpop.f32.mrf.mxu2 }
 0x8ab   : > { %v4388_v8 = vmax.f32 %v10594_v43, %v8029_v30  ;;  %v4385_v63 = vmax.f32 %v10597_v41, %v8048_v28  ;;  %v4384_v30 = vmax.f32 %v10601_v61, %v8064_v23  ;;  %v6738_v28 = vld [vmem:[#allocation10 + $0x2c] sm:$0xf0]  ;;  %v10610_v61 = vld [vmem:[#allocation22_spill] sm:$0xff] }
 0x8ac   : > { %v9958_v50 = vpack.c.bf16 %v4336_v53, %v4335_v35  ;;  %v9973_v42 = vpack.c.bf16 %v4352_v19, %v4351_v52  ;;  %v9982_v40 = vpop.f32.mrf.mxu1  ;;  %v8077_v53 = vpop.permute.xlu2 %8076  ;;  %v6741_v15 = vor.u32 %v7272_v38, %v6738_v28 }
 0x8ad   : > { %v9975_v46 = vpack.c.bf16 %v4388_v8, %v4387_v14  ;;  %v9992_v35 = vpack.c.bf16 %v4386_v10, %v4385_v63  ;;  %v8079_v52 = vunpack.i.h.bf16 %v8077_v53  ;;  %v8078_v44 = vunpack.i.l.bf16 %v8077_v53  ;;  %v10604_v8 = vld [vmem:[#allocation41_spill] sm:$0xff]  ;;  %v10605_v14 = vld [vmem:[#allocation40_spill] sm:$0xff]  ;;  %v10607_v63 = vld [vmem:[#allocation38_spill] sm:$0xff] }
 0x8ae   : > { %4866 = vmatpush.bf16.msrb.mxu3 %v9958_v50  ;;  %4908 = vmatpush.bf16.msrb.mxu0 %v9960_v24  ;;  %v9997_v43 = vpack.c.bf16 %v4384_v30, %v4383_v18  ;;  %v10606_v10 = vld [vmem:[#allocation20_spill] sm:$0xff] }
 0x8af   : > { %4992 = vmatpush.bf16.msra.mxu2 %v9966_v1  ;;  %v8052_v54 = vpop.permute.xlu0 %8051  ;;  %v10611_v30 = vld [vmem:[#allocation32_spill] sm:$0xff] }
 0x8b0   : > { %v8054_v48 = vunpack.i.h.bf16 %v8052_v54  ;;  %v8053_v57 = vunpack.i.l.bf16 %v8052_v54 }
 0x8b1   : > { %4867 = vmatmul.bf16.vlgmr.msrb.gmra.mxu3 %v6729_v6 }
 0x8b2   : > { %v4372_v49 = vmax.f32 %v10598_v16, %v8054_v48  ;;  %v4371_v58 = vmax.f32 %v10599_v9, %v8053_v57  ;;  %4909 = vmatpush.bf16.msrb.mxu0 %v9973_v42  ;;  %v4830_v41 = vpop.f32.mrf.mxu2  ;;  %v4368_v48 = vmax.f32 %v10607_v63, %v8079_v52  ;;  %v10608_v57 = vld [vmem:[#allocation35_spill] sm:$0xff]  ;;  %v6736_v16 = vld [vmem:[#allocation10 + $0x10] sm:$0xf]  ;;  %v10614_v52 = vld [vmem:[#allocation33_spill] sm:$0xff] }
 0x8b3   : > { %4993 = vmatpush.bf16.msra.mxu2 %v9975_v46  ;;  %v4367_v23 = vmax.f32 %v10608_v57, %v8078_v44  ;;  %v7275_v9 = vld [vmem:[#allocation10 + $0x28] sm:$0xf0] }
 0x8b4   : > { %v9986_v31 = vpack.c.bf16 %v4372_v49, %v4371_v58  ;;  %v4787_v54 = vpop.f32.mrf.mxu1  ;;  %v6757_v49 = vor.u32 %v7281_v12, %v6756_v20  ;;  %v7278_v58 = vld [vmem:[#allocation10 + $0x44] sm:$0xf]  ;;  %v6737_v18 = vor.u32 %v7275_v9, %v6736_v16  ;;  %v7288_v20 = vld [vmem:[#allocation10 + $0x90] sm:$0xf0]  ;;  %v10618_v12 = vld [vmem:[#allocation29_spill] sm:$0xff] }
 0x8b5   : > { %4910 = vmatmul.bf16.vlgmr.msrb.gmra.mxu0 %v6733_v59  ;;  %v10011_v56 = vpack.c.bf16 %v4368_v48, %v4367_v23  ;;  %v10021_v44 = vadd.f32 %v4830_v41, %v4787_v54  ;;  %v10620_v41 = vld [vmem:[#allocation36_spill] sm:$0xff]  ;;  %v6764_v48 = vld [vmem:[#allocation10 + $0x48] sm:$0xf]  ;;  %v7282_v23 = vld [vmem:[#allocation10 + $0x60] sm:$0xf0] }
 0x8b6   : > { %5381 = vmatpush.bf16.msra.mxu0 %v10600_v5  ;;  %4950 = vmatpush.bf16.msra.mxu1 %v9986_v31  ;;  %v6758_v5 = vld [vmem:[#allocation10 + $0x5c] sm:$0xf0]  ;;  %v6786_v16 = vld [vmem:[#allocation10 + $0x94] sm:$0xf0] }
 0x8b7   : > { %4994 = vmatpush.bf16.msra.mxu2 %v9992_v35  ;;  %v8067_v22 = vpop.permute.xlu0 %8066  ;;  %v6761_v53 = vor.u32 %v7278_v58, %v6758_v5  ;;  %v10622_v9 = vld [vmem:[#allocation21_spill] sm:$0xff] }
 0x8b8   : > { %v8069_v60 = vunpack.i.h.bf16 %v8067_v22  ;;  %v8068_v19 = vunpack.i.l.bf16 %v8067_v22  ;;  %v10612_v22 = vld [vmem:[#allocation24_spill] sm:$0xff]  ;;  %v10623_v58 = vld [vmem:[#allocation37_spill] sm:$0xff] }
 0x8b9   : > { %v10624_v5 = vld [vmem:[#allocation53_spill] sm:$0xff] }
 0x8ba   : > { %5382 = vmatpush.bf16.msra.mxu0 %v10603_v37  ;;  %v4370_v36 = vmax.f32 %v10604_v8, %v8069_v60  ;;  %v4369_v6 = vmax.f32 %v10605_v14, %v8068_v19  ;;  %v10613_v37 = vld [vmem:[#allocation17_spill] sm:$0xff]  ;;  %v10018_v28 = vpop.f32.mrf.mxu2  ;;  %v10615_v60 = vld [vmem:[#allocation27_spill] sm:$0xff]  ;;  %v10616_v19 = vld [vmem:[#allocation18_spill] sm:$0xff] }
 0x8bb   : > { %4995 = vmatpush.bf16.msra.mxu2 %v9997_v43  ;;  %v7279_v8 = vld [vmem:[#allocation10 + $0x4c] sm:$0xf]  ;;  %v10617_v14 = vld [vmem:[#allocation34_spill] sm:$0xff] }
 0x8bc   : > { %v10006_v59 = vpack.c.bf16 %v4370_v36, %v4369_v6  ;;  %v10016_v38 = vpop.f32.mrf.mxu1  ;;  %v6766_v36 = vld [vmem:[#allocation10 + $0x64] sm:$0xf0] }
 0x8bd   : > { %v6769_v6 = vor.u32 %v7279_v8, %v6766_v36  ;;  %v7286_v8 = vld [vmem:[#allocation10 + $0x84] sm:$0xf]  ;;  %v6794_v36 = vld [vmem:[#allocation10 + $0x9c] sm:$0xf0] }
 0x8be   : > { %5383 = vmatpush.bf16.msra.mxu0 %v10606_v10  ;;  %4951 = vmatpush.bf16.msra.mxu1 %v10006_v59  ;;  %v10619_v10 = vld [vmem:[#allocation19_spill] sm:$0xff] }
 0x8bf   : > { %5467 = vmatpush.bf16.msrb.mxu2 %v10609_v45  ;;  %v7285_v45 = vld [vmem:[#allocation10 + $0x7c] sm:$0xf] }
 0x8c0   : > { %4996 = vmatmul.bf16.vlgmr.msra.gmra.mxu2 %v6741_v15  ;;  %v6784_v15 = vld [vmem:[#allocation10 + $0x78] sm:$0xf] }
 0x8c1   : > { %4872 = vmatmul.bf16.gmra.mxu3 %v6757_v49  ;;  %v6785_v57 = vor.u32 %v7288_v20, %v6784_v15  ;;  %v10621_v49 = vld [vmem:[#allocation30_spill] sm:$0xff]  ;;  %v6812_v15 = vld [vmem:[#allocation10 + $0xb0] sm:$0xf]  ;;  %v7295_v20 = vld [vmem:[#allocation10 + $0xc8] sm:$0xf0] }
 0x8c2   : > { %5384 = vmatpush.bf16.msra.mxu0 %v10610_v61  ;;  %4952 = vmatpush.bf16.msra.mxu1 %v10011_v56  ;;  %v4835_v54 = vpop.f32.mrf.mxu2  ;;  %v6765_v61 = vor.u32 %v7282_v23, %v6764_v48  ;;  %v6813_v48 = vor.u32 %v7295_v20, %v6812_v15  ;;  %v7292_v23 = vld [vmem:[#allocation10 + $0xb4] sm:$0xf]  ;;  %v8092_v20 = vpop.permute.xlu2 %8091 }
 0x8c3   : > { %5468 = vmatpush.bf16.msrb.mxu2 %v10611_v30  ;;  %v6789_v30 = vor.u32 %v7285_v45, %v6786_v16  ;;  %v6814_v45 = vld [vmem:[#allocation10 + $0xcc] sm:$0xf0] }
 0x8c4   : > { %v4792_v63 = vpop.f32.mrf.mxu1  ;;  %v10632_v16 = vld [vmem:[#allocation28_spill] sm:$0xff] }
 0x8c5   : > { %4953 = vmatmul.bf16.vlgmr.msra.gmra.mxu1 %v6737_v18  ;;  %4915 = vmatmul.bf16.gmra.mxu0 %v6761_v53  ;;  %v10625_v18 = vld [vmem:[#allocation23_spill] sm:$0xff] }
 0x8c6   : > { %5385 = vmatpush.bf16.msra.mxu0 %v10612_v22  ;;  %5424 = vmatpush.bf16.msrb.mxu1 %v10613_v37  ;;  %v10626_v37 = vld [vmem:[#allocation39_spill] sm:$0xff] }
 0x8c7   : > { %5469 = vmatpush.bf16.msrb.mxu2 %v10614_v52  ;;  %v10627_v52 = vld [vmem:[#allocation54_spill] sm:$0xff] }
 0x8ca   : > { %5386 = vmatpush.bf16.msra.mxu0 %v10615_v60  ;;  %5425 = vmatpush.bf16.msrb.mxu1 %v10616_v19  ;;  %v10036_v22 = vpop.f32.mrf.mxu2  ;;  %v10040_v60 = vadd.f32 %v4835_v54, %v4792_v63  ;;  %v10628_v19 = vld [vmem:[#allocation25_spill] sm:$0xff]  ;;  %v6792_v54 = vld [vmem:[#allocation10 + $0x80] sm:$0xf] }
 0x8cb   : > { %5470 = vmatpush.bf16.msrb.mxu2 %v10617_v14  ;;  %v10629_v14 = vld [vmem:[#allocation55_spill] sm:$0xff] }
 0x8cc   : > { %v10034_v53 = vpop.f32.mrf.mxu1 }
 0x8ce   : > { %5387 = vmatpush.bf16.msra.mxu0 %v10618_v12  ;;  %5426 = vmatpush.bf16.msrb.mxu1 %v10619_v10  ;;  %v10630_v12 = vld [vmem:[#allocation26_spill] sm:$0xff]  ;;  %v10631_v10 = vld [vmem:[#allocation57_spill] sm:$0xff] }
 0x8cf   : > { %5471 = vmatpush.bf16.msrb.mxu2 %v10620_v41 }
 0x8d0   : > { %5001 = vmatmul.bf16.gmra.mxu2 %v6769_v6  ;;  %v6797_v6 = vor.u32 %v7286_v8, %v6794_v36  ;;  %v7299_v8 = vld [vmem:[#allocation10 + $0xec] sm:$0xf]  ;;  %v6842_v36 = vld [vmem:[#allocation10 + $0x104] sm:$0xf0] }
 0x8d1   : > { %4877 = vmatmul.bf16.gmra.mxu3 %v6785_v57  ;;  %v7289_v57 = vld [vmem:[#allocation10 + $0x98] sm:$0xf0] }
 0x8d2   : > { %5388 = vmatpush.bf16.msra.mxu0 %v10621_v49  ;;  %5427 = vmatpush.bf16.msrb.mxu1 %v10622_v9  ;;  %v4840_v63 = vpop.f32.mrf.mxu2  ;;  %v6817_v49 = vor.u32 %v7292_v23, %v6814_v45  ;;  %v7309_v23 = vld [vmem:[#allocation10 + $0x138] sm:$0xf0]  ;;  %v8094_v45 = vunpack.i.h.bf16 %v8092_v20 }
 0x8d3   : > { %5472 = vmatpush.bf16.msrb.mxu2 %v10623_v58 }
 0x8d4   : > { %v4797_v41 = vpop.f32.mrf.mxu1 }
 0x8d5   : > { %4958 = vmatmul.bf16.gmra.mxu1 %v6765_v61  ;;  %4920 = vmatmul.bf16.gmra.mxu0 %v6789_v30  ;;  %v7293_v61 = vld [vmem:[#allocation10 + $0xbc] sm:$0xf]  ;;  %v6822_v30 = vld [vmem:[#allocation10 + $0xd4] sm:$0xf0] }
 0x8d6   : > { %5553 = vmatpush.bf16.msrb.mxu0 %v10624_v5  ;;  %5428 = vmatpush.bf16.msrb.mxu1 %v10625_v18  ;;  %v10056_v5 = vadd.f32 %v4840_v63, %v4797_v41  ;;  %v7302_v18 = vld [vmem:[#allocation10 + $0x100] sm:$0xf0]  ;;  %v7300_v63 = vld [vmem:[#allocation10 + $0xf4] sm:$0xf] }
 0x8d7   : > { %5473 = vmatpush.bf16.msrb.mxu2 %v10626_v37  ;;  %v6820_v37 = vld [vmem:[#allocation10 + $0xb8] sm:$0xf] }
 0x8da   : > { %5554 = vmatpush.bf16.msrb.mxu0 %v10627_v52  ;;  %5429 = vmatpush.bf16.msrb.mxu1 %v10628_v19  ;;  %v10054_v58 = vpop.f32.mrf.mxu2  ;;  %v7296_v19 = vld [vmem:[#allocation10 + $0xd0] sm:$0xf0] }
 0x8db   : > { %5474 = vmatpush.bf16.msrb.mxu2 %v9958_v50  ;;  %v6793_v50 = vor.u32 %v7289_v57, %v6792_v54  ;;  %v6850_v54 = vld [vmem:[#allocation10 + $0x10c] sm:$0xf0]  ;;  %v6868_v57 = vld [vmem:[#allocation10 + $0x120] sm:$0xf] }
 0x8dc   : > { %v10052_v9 = vpop.f32.mrf.mxu1 }
 0x8de   : > { %5555 = vmatpush.bf16.msrb.mxu0 %v10629_v14  ;;  %5430 = vmatpush.bf16.msrb.mxu1 %v10630_v12 }
 0x8e0   : > { %5006 = vmatmul.bf16.gmra.mxu2 %v6797_v6 }
 0x8e1   : > { %4882 = vmatmul.bf16.gmra.mxu3 %v6813_v48 }
 0x8e2   : > { %5556 = vmatpush.bf16.msrb.mxu0 %v10631_v10  ;;  %5431 = vmatpush.bf16.msrb.mxu1 %v10632_v16  ;;  %v8093_v16 = vunpack.i.l.bf16 %v8092_v20 }
 0x8e5   : > { %4963 = vmatmul.bf16.gmra.mxu1 %v6793_v50  ;;  %4925 = vmatmul.bf16.gmra.mxu0 %v6817_v49  ;;  %v6853_v50 = vor.u32 %v7300_v63, %v6850_v54 }
 0x8e6   : > { %5557 = vmatpush.bf16.msrb.mxu0 %v9837_v34  ;;  %5596 = vmatpush.bf16.msra.mxu1 %v9920_v29  ;;  %v6825_v34 = vor.u32 %v7293_v61, %v6822_v30  ;;  %v6840_v29 = vld [vmem:[#allocation10 + $0xe8] sm:$0xf] }
 0x8e7   : > { %v6841_v52 = vor.u32 %v7302_v18, %v6840_v29  ;;  %v6848_v29 = vld [vmem:[#allocation10 + $0xf0] sm:$0xf]  ;;  %v6869_v18 = vor.u32 %v7309_v23, %v6868_v57 }
 0x8ea   : > { %5558 = vmatpush.bf16.msrb.mxu0 %v9986_v31  ;;  %5597 = vmatpush.bf16.msra.mxu1 %v9927_v47  ;;  %v4802_v47 = vpop.f32.mrf.mxu1  ;;  %v4845_v31 = vpop.f32.mrf.mxu2 }
 0x8eb   : > { %v10068_v6 = vadd.f32 %v4845_v31, %v4802_v47  ;;  %v6870_v47 = vld [vmem:[#allocation10 + $0x13c] sm:$0xf0]  ;;  %v4406_v31 = vmax.f32 %v9852_v39, %v8094_v45 }
 0x8ee   : > { %5559 = vmatpush.bf16.msrb.mxu0 %v10006_v59  ;;  %5598 = vmatpush.bf16.msra.mxu1 %v9938_v3  ;;  %v6821_v59 = vor.u32 %v7296_v19, %v6820_v37  ;;  %v6845_v3 = vor.u32 %v7299_v8, %v6842_v36  ;;  %v4405_v37 = vmax.f32 %v9850_v17, %v8093_v16 }
 0x8f0   : > { %5011 = vmatmul.bf16.gmra.mxu2 %v6825_v34 }
 0x8f1   : > { %4887 = vmatmul.bf16.gmra.mxu3 %v6841_v52 }
 0x8f2   : > { %5560 = vmatpush.bf16.msrb.mxu0 %v10011_v56  ;;  %5599 = vmatpush.bf16.msra.mxu1 %v9946_v13  ;;  %v10064_v14 = vpop.f32.mrf.mxu1  ;;  %v10066_v56 = vpop.f32.mrf.mxu2 }
 0x8f3   : > { %v8087_v13 = vpop.permute.xlu1 %8086 }
 0x8f4   : > { %v8089_v12 = vunpack.i.h.bf16 %v8087_v13  ;;  %v8088_v10 = vunpack.i.l.bf16 %v8087_v13 }
 0x8f5   : > { %4968 = vmatmul.bf16.gmra.mxu1 %v6821_v59  ;;  %4930 = vmatmul.bf16.gmra.mxu0 %v6845_v3  ;;  %v8107_v59 = vpop.permute.xlu2 %8106  ;;  %v4462_v3 = vpack.c.bf16 %v4406_v31, %v4405_v37  ;;  %v10634_v31 = vld [vmem:[#allocation44_spill] sm:$0xff] }
 0x8f6   : > { %5600 = vmatpush.bf16.msra.mxu1 %v9966_v1  ;;  %v4408_v49 = vmax.f32 %v9874_v27, %v8089_v12  ;;  %v4407_v61 = vmax.f32 %v9872_v0, %v8088_v10  ;;  %v8108_v63 = vunpack.i.l.bf16 %v8107_v59 }
 0x8f7   : > { %v8082_v15 = vpop.permute.xlu0 %8081 }
 0x8f8   : > { %v8084_v41 = vunpack.i.h.bf16 %v8082_v15  ;;  %v8083_v1 = vunpack.i.l.bf16 %v8082_v15  ;;  %v4463_v19 = vpack.c.bf16 %v4408_v49, %v4407_v61  ;;  %v4399_v16 = vmax.f32 %v9802_v25, %v8108_v63  ;;  %v4515_v25 = vld [vmem:[#allocation10 + $0x160] sm:$0xff] }
 0x8f9   : > { %v4658_v37 = vunpack.c.h.b16 %v4515_v25 }
 0x8fa   : > { %5601 = vmatpush.bf16.msra.mxu1 %v9975_v46  ;;  %v4410_v46 = vmax.f32 %v9896_v4, %v8084_v41  ;;  %v4409_v48 = vmax.f32 %v9894_v11, %v8083_v1  ;;  %v4807_v34 = vpop.f32.mrf.mxu1  ;;  %v7303_v4 = vld [vmem:[#allocation10 + $0x108] sm:$0xf0]  ;;  %v7306_v11 = vld [vmem:[#allocation10 + $0x124] sm:$0xf]  ;;  %v4514_v41 = vld [vmem:[#allocation10 + $0x158] sm:$0xff]  ;;  %v8109_v1 = vunpack.i.h.bf16 %v8107_v59 }
 0x8fb   : > { %v8102_v8 = vpop.permute.xlu1 %8101  ;;  %v6873_v36 = vor.u32 %v7306_v11, %v6870_v47  ;;  %v4655_v57 = vunpack.c.l.b16 %v4514_v41  ;;  %v7315_v59 = vld [vmem:[#allocation11 + $0x18] sm:$0xf0] }
 0x8fc   : > { %v4464_v30 = vpack.c.bf16 %v4410_v46, %v4409_v48  ;;  %v8104_v13 = vunpack.i.h.bf16 %v8102_v8  ;;  %v8103_v15 = vunpack.i.l.bf16 %v8102_v8  ;;  %v7307_v48 = vld [vmem:[#allocation10 + $0x12c] sm:$0xf]  ;;  %v4400_v45 = vmax.f32 %v9866_v21, %v8109_v1  ;;  %v10633_v21 = vld [vmem:[#allocation98_spill] sm:$0xff] }
 0x8fd   : > { %v4657_v8 = vunpack.c.l.b16 %v4515_v25  ;;  %v7283_v1 = vld [vmem:[#allocation10 + $0x68] sm:$0xf0]  ;;  %v7329_v25 = vld [vmem:[#allocation11 + $0x88] sm:$0xf0] }
 0x8fe   : > { %5602 = vmatpush.bf16.msra.mxu1 %v9992_v35  ;;  %v4850_v35 = vpop.f32.mrf.mxu2  ;;  %5033 = vmatpush.bf16.msra.mxu3 %v4464_v30  ;;  %v4402_v54 = vmax.f32 %v9882_v33, %v8104_v13  ;;  %v4401_v46 = vmax.f32 %v9886_v32, %v8103_v15  ;;  %v6876_v33 = vld [vmem:[#allocation10 + $0x128] sm:$0xf]  ;;  %v7310_v32 = vld [vmem:[#allocation10 + $0x140] sm:$0xf0] }
 0x8ff   : > { %5641 = vmatpush.bf16.msra.mxu2 %v4464_v30  ;;  %v8097_v52 = vpop.permute.xlu0 %8096  ;;  %v10084_v10 = vadd.f32 %v4850_v35, %v4807_v34  ;;  %v4704_v30 = vpack.c.b16 %v4655_v57, %v4655_v57  ;;  %v4656_v34 = vunpack.c.h.b16 %v4514_v41  ;;  %v4706_v13 = vpack.c.b16 %v4657_v8, %v4657_v8  ;;  %v6772_v41 = vld [vmem:[#allocation10 + $0x50] sm:$0xf]  ;;  %v6959_v8 = vld [vmem:[#allocation11 + $0x78] sm:$0xf] }
 0x900   : > { %5016 = vmatmul.bf16.gmra.mxu2 %v6853_v50  ;;  %v8099_v27 = vunpack.i.h.bf16 %v8097_v52  ;;  %v8098_v0 = vunpack.i.l.bf16 %v8097_v52  ;;  %v4460_v50 = vpack.c.bf16 %v4402_v54, %v4401_v46  ;;  %v6744_v52 = vld [vmem:[#allocation10 + $0x18] sm:$0xf]  ;;  %v7312_v54 = vld [vmem:[#allocation11 + $0x4] sm:$0xf]  ;;  %v6773_v46 = vor.u32 %v7283_v1, %v6772_v41 }
 0x901   : > { %4892 = vmatmul.bf16.gmra.mxu3 %v6869_v18  ;;  %v6877_v18 = vor.u32 %v7310_v32, %v6876_v33  ;;  %v7319_v32 = vld [vmem:[#allocation11 + $0x3c] sm:$0xf] }
 0x902   : > { %5603 = vmatpush.bf16.msra.mxu1 %v9997_v43  ;;  %v6849_v43 = vor.u32 %v7303_v4, %v6848_v29  ;;  %5034 = vmatpush.bf16.msra.mxu3 %v4463_v19  ;;  %v4404_v20 = vmax.f32 %v9907_v51, %v8099_v27  ;;  %v4403_v39 = vmax.f32 %v9911_v26, %v8098_v0  ;;  %v10080_v17 = vpop.f32.mrf.mxu1  ;;  %v6878_v26 = vld [vmem:[#allocation10 + $0x144] sm:$0xf0]  ;;  %v7276_v27 = vld [vmem:[#allocation10 + $0x30] sm:$0xf0]  ;;  %v10635_v0 = vld [vmem:[#allocation45_spill] sm:$0xff] }
 0x903   : > { %5642 = vmatpush.bf16.msra.mxu2 %v4463_v19  ;;  %v6881_v23 = vor.u32 %v7307_v48, %v6878_v26  ;;  %v4459_v29 = vpack.c.bf16 %v4400_v45, %v4399_v16  ;;  %v4705_v4 = vpack.c.b16 %v4656_v34, %v4656_v34  ;;  %v4707_v19 = vpack.c.b16 %v4658_v37, %v4658_v37  ;;  %v6923_v48 = vld [vmem:[#allocation11 + $0x38] sm:$0xf]  ;;  %v7322_v26 = vld [vmem:[#allocation11 + $0x50] sm:$0xf0]  ;;  %v6931_v16 = vld [vmem:[#allocation11 + $0x40] sm:$0xf] }
 0x904   : > { %v4461_v51 = vpack.c.bf16 %v4404_v20, %v4403_v39  ;;  %v6903_v20 = vld [vmem:[#allocation11 + $0x8] sm:$0xf]  ;;  %v7316_v39 = vld [vmem:[#allocation11 + $0x20] sm:$0xf0]  ;;  %v6924_v57 = vor.u32 %v7322_v26, %v6923_v48 }
 0x905   : > { %4973 = vmatmul.bf16.gmra.mxu1 %v6849_v43  ;;  %4935 = vmatmul.bf16.gmra.mxu0 %v6873_v36  ;;  %v6745_v43 = vor.u32 %v7276_v27, %v6744_v52  ;;  %v6895_v36 = vld [vmem:[#allocation11] sm:$0xf]  ;;  %v6904_v63 = vor.u32 %v7316_v39, %v6903_v20  ;;  %v4833_v20 = vadd.f32 %v10018_v28, %v10016_v38  ;;  %v6979_v48 = vld [vmem:[#allocation11 + $0xa8] sm:$0xf]  ;;  %v7336_v26 = vld [vmem:[#allocation11 + $0xc0] sm:$0xf0] }
 0x906   : > { %v10082_v12 = vpop.f32.mrf.mxu2  ;;  %5035 = vmatpush.bf16.msra.mxu3 %v4462_v3  ;;  %v6896_v15 = vor.u32 %v7315_v59, %v6895_v36 }
 0x907   : > { %5643 = vmatpush.bf16.msra.mxu2 %v4462_v3  ;;  %v10636_v3 = vld [vmem:[#allocation46_spill] sm:$0xff] }
 0x90a   : > { %5036 = vmatpush.bf16.msra.mxu3 %v4461_v51  ;;  %v4812_v49 = vpop.f32.mrf.mxu1 }
 0x90b   : > { %5644 = vmatpush.bf16.msra.mxu2 %v4461_v51  ;;  %v6897_v51 = vld [vmem:[#allocation11 + $0x1c] sm:$0xf0] }
 0x90e   : > { %v4855_v61 = vpop.f32.mrf.mxu2  ;;  %5037 = vmatpush.bf16.msra.mxu3 %v4460_v50 }
 0x90f   : > { %5645 = vmatpush.bf16.msra.mxu2 %v4460_v50  ;;  %v10090_v35 = vadd.f32 %v4855_v61, %v4812_v49  ;;  %v7323_v50 = vld [vmem:[#allocation11 + $0x58] sm:$0xf0] }
 0x910   : > { %5021 = vmatmul.bf16.gmra.mxu2 %v6881_v23  ;;  %v6800_v61 = vld [vmem:[#allocation10 + $0x88] sm:$0xf]  ;;  %v6932_v34 = vor.u32 %v7323_v50, %v6931_v16 }
 0x911   : > { %4897 = vmatmul.bf16.gmra.mxu3 %v4704_v30  ;;  %v7290_v30 = vld [vmem:[#allocation10 + $0xa0] sm:$0xf0] }
 0x912   : > { %5038 = vmatpush.bf16.msra.mxu3 %v4459_v29  ;;  %v4814_v11 = vpop.f32.mrf.mxu1 }
 0x913   : > { %5646 = vmatpush.bf16.msra.mxu2 %v4459_v29 }
 0x915   : > { %4978 = vmatmul.bf16.gmra.mxu1 %v6877_v18  ;;  %4940 = vmatmul.bf16.gmra.mxu0 %v4705_v4  ;;  %v6801_v18 = vor.u32 %v7290_v30, %v6800_v61  ;;  %v6925_v4 = vld [vmem:[#allocation11 + $0x54] sm:$0xf0]  ;;  %v6987_v61 = vld [vmem:[#allocation11 + $0xb0] sm:$0xf]  ;;  %v7337_v30 = vld [vmem:[#allocation11 + $0xc8] sm:$0xf0] }
 0x916   : > { %5510 = vmatpush.bf16.msrb.mxu3 %v10633_v21  ;;  %v4857_v47 = vpop.f32.mrf.mxu2  ;;  %v6951_v21 = vld [vmem:[#allocation11 + $0x70] sm:$0xf] }
 0x917   : > { %v6928_v47 = vor.u32 %v7319_v32, %v6925_v4  ;;  %v6856_v32 = vld [vmem:[#allocation10 + $0xf8] sm:$0xf] }
 0x91a   : > { %5511 = vmatpush.bf16.msrb.mxu3 %v10634_v31  ;;  %v6952_v31 = vor.u32 %v7329_v25, %v6951_v21  ;;  %v6988_v21 = vor.u32 %v7337_v30, %v6987_v61 }
 0x91e   : > { %5512 = vmatpush.bf16.msrb.mxu3 %v10635_v0 }
 0x920   : > { %5026 = vmatmul.bf16.gmra.mxu2 %v4707_v19 }
 0x921   : > { %6886 = vmatmul.msk.bf16.vlgmr.msra.gmra.mxu3 %vm4751_vm1, %v6745_v43  ;;  %v7330_v43 = vld [vmem:[#allocation11 + $0x90] sm:$0xf0] }
 0x922   : > { %5513 = vmatpush.bf16.msrb.mxu3 %v10636_v3  ;;  %v6960_v41 = vor.u32 %v7330_v43, %v6959_v8 }
 0x925   : > { %4983 = vmatmul.bf16.gmra.mxu1 %v4706_v13  ;;  %5389 = vmatmul.bf16.vlgmr.msra.gmra.mxu0 %v6896_v15  ;;  %v6828_v13 = vld [vmem:[#allocation10 + $0xc0] sm:$0xf]  ;;  %v7297_v15 = vld [vmem:[#allocation10 + $0xd8] sm:$0xf0] }
 0x926   : > { %5514 = vmatpush.bf16.msrb.mxu3 %v9936_v7  ;;  %v6900_v7 = vor.u32 %v7312_v54, %v6897_v51  ;;  %v7326_v54 = vld [vmem:[#allocation11 + $0x74] sm:$0xf]  ;;  %v6953_v51 = vld [vmem:[#allocation11 + $0x8c] sm:$0xf0] }
 0x92a   : > { %5515 = vmatpush.bf16.msrb.mxu3 %v9944_v62 }
 0x92e   : > { %5516 = vmatpush.bf16.msrb.mxu3 %v9960_v24 }
 0x930   : > { %5475 = vmatmul.bf16.vlgmr.msrb.gmra.mxu2 %v6904_v63 }
 0x931   : > { %6887 = vmatmul.msk.bf16.gmra.mxu3 %vm4751_vm1, %v6773_v46 }
 0x932   : > { %5517 = vmatpush.bf16.msrb.mxu3 %v9973_v42  ;;  %v4911_v62 = vpop.f32.mrf.mxu0  ;;  %v4828_v42 = vadd.f32 %v9984_v2, %v9982_v40 }
 0x934   : > { %v4868_v23 = vpop.f32.mrf.mxu3 }
 0x935   : > { %5432 = vmatmul.bf16.vlgmr.msrb.gmra.mxu1 %v6900_v7  ;;  %v4869_v45 = vadd.f32 %v4868_v23, %v9988_v55  ;;  %5394 = vmatmul.bf16.gmra.mxu0 %v6924_v57  ;;  %v6980_v23 = vor.u32 %v7336_v26, %v6979_v48 }
 0x937   : > { %v4912_v24 = vadd.f32 %v4911_v62, %v4869_v45  ;;  %v6956_v62 = vor.u32 %v7326_v54, %v6953_v51  ;;  %v7311_v54 = vld [vmem:[#allocation10 + $0x148] sm:$0xf0] }
 0x93a   : > { %v4913_v49 = vpop.f32.mrf.mxu0 }
 0x93c   : > { %v4870_v33 = vpop.f32.mrf.mxu3 }
 0x93d   : > { %v4871_v29 = vadd.f32 %v4870_v33, %v4828_v42 }
 0x93f   : > { %v4914_v55 = vadd.f32 %v4913_v49, %v4871_v29  ;;  %v7304_v29 = vld [vmem:[#allocation10 + $0x110] sm:$0xf0] }
 0x940   : > { %5480 = vmatmul.bf16.gmra.mxu2 %v6932_v34 }
 0x941   : > { %6888 = vmatmul.msk.bf16.gmra.mxu3 %vm4751_vm1, %v6801_v18  ;;  %v4838_v18 = vadd.f32 %v10036_v22, %v10034_v53 }
 0x942   : > { %v4954_v37 = vpop.f32.mrf.mxu1  ;;  %v4916_v52 = vpop.f32.mrf.mxu0 }
 0x943   : > { %v4997_v11 = vpop.f32.mrf.mxu2  ;;  %v4955_v27 = vadd.f32 %v4954_v37, %v4912_v24  ;;  %v7007_v37 = vld [vmem:[#allocation11 + $0xe0] sm:$0xf] }
 0x944   : > { %v4873_v0 = vpop.f32.mrf.mxu3 }
 0x945   : > { %v10106_v40 = vadd.f32 %v4997_v11, %v4955_v27  ;;  %5437 = vmatmul.bf16.gmra.mxu1 %v6928_v47  ;;  %v4874_v2 = vadd.f32 %v4873_v0, %v10021_v44  ;;  %5399 = vmatmul.bf16.gmra.mxu0 %v6952_v31  ;;  %v6829_v44 = vor.u32 %v7297_v15, %v6828_v13  ;;  %v7333_v11 = vld [vmem:[#allocation11 + $0xac] sm:$0xf]  ;;  %v6981_v31 = vld [vmem:[#allocation11 + $0xc4] sm:$0xf0]  ;;  %v7344_v15 = vld [vmem:[#allocation11 + $0x100] sm:$0xf0] }
 0x946   : > { %v7015_v13 = vld [vmem:[#allocation11 + $0xe8] sm:$0xf] }
 0x947   : > { %v4917_v19 = vadd.f32 %v4916_v52, %v4874_v2  ;;  %v7343_v52 = vld [vmem:[#allocation11 + $0xf8] sm:$0xf0]  ;;  %v6984_v2 = vor.u32 %v7333_v11, %v6981_v31  ;;  %v7016_v51 = vor.u32 %v7344_v15, %v7015_v13  ;;  %v5122_v11 = vld [vmem:[#allocation11 + $0x150] sm:$0xff] }
 0x948   : > { %v10138_v13 = vld [vmem:[#allocation11 + $0x158] sm:$0xff] }
 0x94a   : > { %v4956_v59 = vpop.f32.mrf.mxu1  ;;  %v4918_v3 = vpop.f32.mrf.mxu0 }
 0x94b   : > { %v4999_v36 = vpop.f32.mrf.mxu2  ;;  %v4957_v39 = vadd.f32 %v4956_v59, %v4914_v55 }
 0x94c   : > { %v4875_v1 = vpop.f32.mrf.mxu3 }
 0x94d   : > { %v10111_v63 = vadd.f32 %v4999_v36, %v4957_v39  ;;  %v4876_v46 = vadd.f32 %v4875_v1, %v4833_v20  ;;  %v6884_v1 = vld [vmem:[#allocation10 + $0x130] sm:$0xf] }
 0x94f   : > { %v4919_v7 = vadd.f32 %v4918_v3, %v4876_v46  ;;  %v4843_v46 = vadd.f32 %v10054_v58, %v10052_v9 }
 0x950   : > { %5485 = vmatmul.bf16.gmra.mxu2 %v6960_v41 }
 0x951   : > { %6889 = vmatmul.msk.bf16.gmra.mxu3 %vm4751_vm1, %v6829_v44 }
 0x952   : > { %v4959_v45 = vpop.f32.mrf.mxu1  ;;  %v4921_v38 = vpop.f32.mrf.mxu0 }
 0x953   : > { %v5002_v57 = vpop.f32.mrf.mxu2  ;;  %v4960_v28 = vadd.f32 %v4959_v45, %v4917_v19  ;;  %v7008_v19 = vor.u32 %v7343_v52, %v7007_v37  ;;  %v7350_v45 = vld [vmem:[#allocation11 + $0x130] sm:$0xf0] }
 0x954   : > { %v4878_v24 = vpop.f32.mrf.mxu3 }
 0x955   : > { %v10114_v16 = vadd.f32 %v5002_v57, %v4960_v28  ;;  %5442 = vmatmul.bf16.gmra.mxu1 %v6956_v62  ;;  %v4879_v50 = vadd.f32 %v4878_v24, %v10040_v60  ;;  %5404 = vmatmul.bf16.gmra.mxu0 %v6980_v23  ;;  %v6857_v60 = vor.u32 %v7304_v29, %v6856_v32  ;;  %v7009_v62 = vld [vmem:[#allocation11 + $0xfc] sm:$0xf0]  ;;  %v7035_v23 = vld [vmem:[#allocation11 + $0x118] sm:$0xf]  ;;  %v7351_v29 = vld [vmem:[#allocation11 + $0x138] sm:$0xf0] }
 0x956   : > { %v7043_v32 = vld [vmem:[#allocation11 + $0x120] sm:$0xf] }
 0x957   : > { %v4922_v49 = vadd.f32 %v4921_v38, %v4879_v50  ;;  %v7036_v50 = vor.u32 %v7350_v45, %v7035_v23  ;;  %v7044_v31 = vor.u32 %v7351_v29, %v7043_v32  ;;  %v5263_v23 = vunpack.c.h.b16 %v5122_v11  ;;  %v6919_v32 = vld [vmem:[#allocation11 + $0x18] sm:$0xf]  ;;  %v7318_v29 = vld [vmem:[#allocation11 + $0x30] sm:$0xf0] }
 0x95a   : > { %v4961_v34 = vpop.f32.mrf.mxu1  ;;  %v4923_v33 = vpop.f32.mrf.mxu0 }
 0x95b   : > { %v5004_v42 = vpop.f32.mrf.mxu2  ;;  %v4962_v4 = vadd.f32 %v4961_v34, %v4919_v7  ;;  %v7340_v7 = vld [vmem:[#allocation11 + $0xe4] sm:$0xf]  ;;  %v4516_v34 = vld [vmem:[#allocation10 + $0x168] sm:$0xf] }
 0x95c   : > { %v4880_v25 = vpop.f32.mrf.mxu3  ;;  %v7012_v24 = vor.u32 %v7340_v7, %v7009_v62 }
 0x95d   : > { %v10119_v55 = vadd.f32 %v5004_v42, %v4962_v4  ;;  %v4881_v47 = vadd.f32 %v4880_v25, %v4838_v18  ;;  %v4659_v4 = vunpack.c.l.b16 %v4516_v34 }
 0x95f   : > { %v4924_v27 = vadd.f32 %v4923_v33, %v4881_v47  ;;  %v4848_v47 = vadd.f32 %v10066_v56, %v10064_v14 }
 0x960   : > { %5490 = vmatmul.bf16.gmra.mxu2 %v6988_v21 }
 0x961   : > { %6890 = vmatmul.msk.bf16.gmra.mxu3 %vm4751_vm1, %v6857_v60 }
 0x962   : > { %v4964_v8 = vpop.f32.mrf.mxu1  ;;  %v4926_v53 = vpop.f32.mrf.mxu0 }
 0x963   : > { %v5007_v0 = vpop.f32.mrf.mxu2  ;;  %v4965_v22 = vadd.f32 %v4964_v8, %v4922_v49 }
 0x964   : > { %v4883_v43 = vpop.f32.mrf.mxu3 }
 0x965   : > { %v10122_v36 = vadd.f32 %v5007_v0, %v4965_v22  ;;  %5447 = vmatmul.bf16.gmra.mxu1 %v6984_v2  ;;  %v4884_v59 = vadd.f32 %v4883_v43, %v10056_v5  ;;  %5409 = vmatmul.bf16.gmra.mxu0 %v7008_v19  ;;  %v6885_v5 = vor.u32 %v7311_v54, %v6884_v1  ;;  %v5262_v0 = vunpack.c.l.b16 %v5122_v11  ;;  %v7347_v2 = vld [vmem:[#allocation11 + $0x11c] sm:$0xf]  ;;  %v7037_v19 = vld [vmem:[#allocation11 + $0x134] sm:$0xf0] }
 0x967   : > { %v4927_v3 = vadd.f32 %v4926_v53, %v4884_v59  ;;  %v7040_v53 = vor.u32 %v7347_v2, %v7037_v19  ;;  %v5311_v22 = vpack.c.b16 %v5262_v0, %v5262_v0  ;;  %v6913_v0 = vld [vmem:[#allocation11 + $0x2c] sm:$0xf0]  ;;  %v6939_v2 = vld [vmem:[#allocation11 + $0x48] sm:$0xf]  ;;  %v7324_v19 = vld [vmem:[#allocation11 + $0x60] sm:$0xf0] }
 0x96a   : > { %v4966_v39 = vpop.f32.mrf.mxu1  ;;  %v4928_v41 = vpop.f32.mrf.mxu0 }
 0x96b   : > { %v5009_v20 = vpop.f32.mrf.mxu2  ;;  %v4967_v44 = vadd.f32 %v4966_v39, %v4924_v27 }
 0x96c   : > { %v4885_v48 = vpop.f32.mrf.mxu3 }
 0x96d   : > { %v10127_v26 = vadd.f32 %v5009_v20, %v4967_v44  ;;  %v4886_v57 = vadd.f32 %v4885_v48, %v4843_v46  ;;  %v7313_v46 = vld [vmem:[#allocation11 + $0xc] sm:$0xf]  ;;  %v6905_v44 = vld [vmem:[#allocation11 + $0x24] sm:$0xf0] }
 0x96f   : > { %v4929_v38 = vadd.f32 %v4928_v41, %v4886_v57  ;;  %v5264_v41 = vunpack.c.l.b16 %v10138_v13 }
 0x970   : > { %5495 = vmatmul.bf16.gmra.mxu2 %v7016_v51  ;;  %v4853_v51 = vadd.f32 %v10082_v12, %v10080_v17 }
 0x971   : > { %6891 = vmatmul.msk.bf16.gmra.mxu3 %vm4751_vm1, %v6885_v5  ;;  %v5313_v7 = vpack.c.b16 %v5264_v41, %v5264_v41 }
 0x972   : > { %v4969_v49 = vpop.f32.mrf.mxu1  ;;  %v4931_v9 = vpop.f32.mrf.mxu0 }
 0x973   : > { %v5012_v28 = vpop.f32.mrf.mxu2  ;;  %v4970_v58 = vadd.f32 %v4969_v49, %v4927_v3 }
 0x974   : > { %v4888_v61 = vpop.f32.mrf.mxu3 }
 0x975   : > { %v10130_v30 = vadd.f32 %v5012_v28, %v4970_v58  ;;  %5452 = vmatmul.bf16.gmra.mxu1 %v7012_v24  ;;  %v4889_v42 = vadd.f32 %v4888_v61, %v10068_v6  ;;  %5414 = vmatmul.bf16.gmra.mxu0 %v7036_v50  ;;  %v4708_v6 = vpack.c.b16 %v4659_v4, %v4659_v4  ;;  %v7317_v28 = vld [vmem:[#allocation11 + $0x28] sm:$0xf0] }
 0x976   : > { %v5312_v50 = vpack.c.b16 %v5263_v23, %v5263_v23  ;;  %v6941_v23 = vld [vmem:[#allocation11 + $0x64] sm:$0xf0] }
 0x977   : > { %v4932_v33 = vadd.f32 %v4931_v9, %v4889_v42 }
 0x97a   : > { %v4971_v21 = vpop.f32.mrf.mxu1  ;;  %v4933_v25 = vpop.f32.mrf.mxu0 }
 0x97b   : > { %v5014_v18 = vpop.f32.mrf.mxu2  ;;  %v4972_v60 = vadd.f32 %v4971_v21, %v4929_v38  ;;  %v6911_v38 = vld [vmem:[#allocation11 + $0x10] sm:$0xf]  ;;  %v7320_v21 = vld [vmem:[#allocation11 + $0x44] sm:$0xf] }
 0x97c   : > { %v4890_v37 = vpop.f32.mrf.mxu3  ;;  %v6912_v49 = vor.u32 %v7317_v28, %v6911_v38 }
 0x97d   : > { %v10135_v52 = vadd.f32 %v5014_v18, %v4972_v60  ;;  %v4891_v27 = vadd.f32 %v4890_v37, %v4848_v47  ;;  %v6920_v47 = vor.u32 %v7318_v29, %v6919_v32  ;;  %v6989_v32 = vld [vmem:[#allocation11 + $0xcc] sm:$0xf0] }
 0x97f   : > { %v4934_v8 = vadd.f32 %v4933_v25, %v4891_v27  ;;  %v6933_v25 = vld [vmem:[#allocation11 + $0x5c] sm:$0xf0]  ;;  %v7314_v27 = vld [vmem:[#allocation11 + $0x14] sm:$0xf] }
 0x980   : > { %5500 = vmatmul.bf16.gmra.mxu2 %v7044_v31 }
 0x981   : > { %6892 = vmatmul.msk.bf16.gmra.mxu3 %vm4751_vm1, %v4708_v6  ;;  %v6936_v6 = vor.u32 %v7320_v21, %v6933_v25 }
 0x982   : > { %v4974_v43 = vpop.f32.mrf.mxu1  ;;  %v4936_v14 = vpop.f32.mrf.mxu0 }
 0x983   : > { %v5017_v59 = vpop.f32.mrf.mxu2  ;;  %v4975_v3 = vadd.f32 %v4974_v43, %v4932_v33 }
 0x984   : > { %v4893_v56 = vpop.f32.mrf.mxu3 }
 0x985   : > { %v10140_v15 = vadd.f32 %v5017_v59, %v4975_v3  ;;  %5457 = vmatmul.bf16.gmra.mxu1 %v7040_v53  ;;  %v4894_v20 = vadd.f32 %v4893_v56, %v10084_v10  ;;  %5419 = vmatmul.bf16.gmra.mxu0 %v5311_v22  ;;  %v6908_v10 = vor.u32 %v7313_v46, %v6905_v44  ;;  %v6961_v46 = vld [vmem:[#allocation11 + $0x94] sm:$0xf0] }
 0x987   : > { %v4937_v39 = vadd.f32 %v4936_v14, %v4894_v20  ;;  %v6947_v20 = vld [vmem:[#allocation11 + $0x50] sm:$0xf] }
 0x98a   : > { %v4976_v1 = vpop.f32.mrf.mxu1  ;;  %v4938_v57 = vpop.f32.mrf.mxu0 }
 0x98b   : > { %v5019_v54 = vpop.f32.mrf.mxu2  ;;  %v4977_v48 = vadd.f32 %v4976_v1, %v4934_v8  ;;  %v6940_v8 = vor.u32 %v7324_v19, %v6939_v2 }
 0x98c   : > { %v4895_v5 = vpop.f32.mrf.mxu3 }
 0x98d   : > { %v10146_v62 = vadd.f32 %v5019_v54, %v4977_v48  ;;  %v4896_v45 = vadd.f32 %v4895_v5, %v4853_v51  ;;  %v7327_v54 = vld [vmem:[#allocation11 + $0x7c] sm:$0xf] }
 0x98e   : > { %v6964_v5 = vor.u32 %v7327_v54, %v6961_v46 }
 0x98f   : > { %v4939_v24 = vadd.f32 %v4938_v57, %v4896_v45  ;;  %v6967_v45 = vld [vmem:[#allocation11 + $0x80] sm:$0xf] }
 0x990   : > { %5505 = vmatmul.bf16.gmra.mxu2 %v5313_v7  ;;  %v7321_v7 = vld [vmem:[#allocation11 + $0x4c] sm:$0xf] }
 0x991   : > { %5518 = vmatmul.bf16.vlgmr.msrb.gmra.mxu3 %v6908_v10  ;;  %v7331_v10 = vld [vmem:[#allocation11 + $0x98] sm:$0xf0] }
 0x992   : > { %v4979_v9 = vpop.f32.mrf.mxu1  ;;  %v4941_v17 = vpop.f32.mrf.mxu0  ;;  %v6968_v38 = vor.u32 %v7331_v10, %v6967_v45  ;;  %v7345_v45 = vld [vmem:[#allocation11 + $0x108] sm:$0xf0] }
 0x993   : > { %v5022_v58 = vpop.f32.mrf.mxu2  ;;  %v4980_v61 = vadd.f32 %v4979_v9, %v4937_v39  ;;  %v7325_v39 = vld [vmem:[#allocation11 + $0x68] sm:$0xf0] }
 0x994   : > { %v4898_v12 = vpop.f32.mrf.mxu3  ;;  %v6948_v44 = vor.u32 %v7325_v39, %v6947_v20  ;;  %v7341_v39 = vld [vmem:[#allocation11 + $0xec] sm:$0xf] }
 0x995   : > { %v10148_v42 = vadd.f32 %v5022_v58, %v4980_v61  ;;  %5462 = vmatmul.bf16.gmra.mxu1 %v5312_v50  ;;  %v4899_v34 = vadd.f32 %v4898_v12, %v10090_v35  ;;  %5561 = vmatmul.bf16.vlgmr.msrb.gmra.mxu0 %v6912_v49  ;;  %v6916_v35 = vor.u32 %v7314_v27, %v6913_v0  ;;  %v6975_v61 = vld [vmem:[#allocation11 + $0x88] sm:$0xf]  ;;  %v7338_v27 = vld [vmem:[#allocation11 + $0xd0] sm:$0xf0] }
 0x997   : > { %v4942_v33 = vadd.f32 %v4941_v17, %v4899_v34  ;;  %v7332_v17 = vld [vmem:[#allocation11 + $0xa0] sm:$0xf0] }
 0x99a   : > { %v4981_v18 = vpop.f32.mrf.mxu1  ;;  %v4943_v60 = vpop.f32.mrf.mxu0 }
 0x99b   : > { %v5024_v4 = vpop.f32.mrf.mxu2  ;;  %v4982_v11 = vadd.f32 %v4981_v18, %v4939_v24  ;;  %v6976_v18 = vor.u32 %v7332_v17, %v6975_v61  ;;  %v7031_v61 = vld [vmem:[#allocation11 + $0xf8] sm:$0xf]  ;;  %v7346_v17 = vld [vmem:[#allocation11 + $0x110] sm:$0xf0] }
 0x99c   : > { %v4900_v31 = vpop.f32.mrf.mxu3 }
 0x99d   : > { %v10151_v37 = vadd.f32 %v5024_v4, %v4982_v11  ;;  %v7328_v11 = vld [vmem:[#allocation11 + $0x84] sm:$0xf]  ;;  %v6995_v31 = vld [vmem:[#allocation11 + $0xb8] sm:$0xf] }
 0x99e   : > { %v6996_v0 = vor.u32 %v7338_v27, %v6995_v31  ;;  %v7051_v27 = vld [vmem:[#allocation11 + $0x128] sm:$0xf] }
 0x9a0   : > { %7061 = vmatmul.msk.bf16.vlgmr.msra.gmra.mxu2 %vm4751_vm1, %v6920_v47 }
 0x9a1   : > { %5523 = vmatmul.bf16.gmra.mxu3 %v6936_v6 }
 0x9a2   : > { %v4984_v53 = vpop.f32.mrf.mxu1  ;;  %v5390_v59 = vpop.f32.mrf.mxu0 }
 0x9a3   : > { %v5027_v22 = vpop.f32.mrf.mxu2  ;;  %v4985_v43 = vadd.f32 %v4984_v53, %v4942_v33  ;;  %v7334_v33 = vld [vmem:[#allocation11 + $0xb4] sm:$0xf] }
 0x9a4   : > { %v5040_v3 = vpop.f32.mrf.mxu3  ;;  %v6992_v60 = vor.u32 %v7334_v33, %v6989_v32  ;;  %v7348_v33 = vld [vmem:[#allocation11 + $0x124] sm:$0xf]  ;;  %v7045_v32 = vld [vmem:[#allocation11 + $0x13c] sm:$0xf0] }
 0x9a5   : > { %v10154_v14 = vadd.f32 %v5027_v22, %v4985_v43  ;;  %5604 = vmatmul.bf16.vlgmr.msra.gmra.mxu1 %v6916_v35  ;;  %v10157_v56 = vadd.f32 %v5040_v3, %v10106_v40  ;;  %5566 = vmatmul.bf16.gmra.mxu0 %v6940_v8  ;;  %v6944_v40 = vor.u32 %v7321_v7, %v6941_v23  ;;  %v7003_v43 = vld [vmem:[#allocation11 + $0xc0] sm:$0xf]  ;;  %v7023_v23 = vld [vmem:[#allocation11 + $0xf0] sm:$0xf] }
 0x9a6   : > { %v7048_v31 = vor.u32 %v7348_v33, %v7045_v32 }
 0x9aa   : > { %v4986_v41 = vpop.f32.mrf.mxu1  ;;  %v5392_v51 = vpop.f32.mrf.mxu0 }
 0x9ab   : > { %v5029_v1 = vpop.f32.mrf.mxu2  ;;  %v7017_v41 = vld [vmem:[#allocation11 + $0x104] sm:$0xf0] }
 0x9ac   : > { %v5042_v48 = vpop.f32.mrf.mxu3 }
 0x9ad   : > { %v10160_v57 = vadd.f32 %v5042_v48, %v10111_v63  ;;  %v7335_v48 = vld [vmem:[#allocation11 + $0xbc] sm:$0xf] }
 0x9b0   : > { %7062 = vmatmul.msk.bf16.gmra.mxu2 %vm4751_vm1, %v6948_v44 }
 0x9b1   : > { %5528 = vmatmul.bf16.gmra.mxu3 %v6964_v5  ;;  %v7020_v5 = vor.u32 %v7341_v39, %v7017_v41  ;;  %v5265_v39 = vunpack.c.h.b16 %v10138_v13 }
 0x9b2   : > { %v5433_v28 = vpop.f32.mrf.mxu1  ;;  %v5395_v49 = vpop.f32.mrf.mxu0 }
 0x9b3   : > { %v5476_v24 = vpop.f32.mrf.mxu2  ;;  %v5434_v50 = vadd.f32 %v5433_v28, %v5390_v59  ;;  %v7339_v59 = vld [vmem:[#allocation11 + $0xd8] sm:$0xf0] }
 0x9b4   : > { %v5045_v9 = vpop.f32.mrf.mxu3  ;;  %v7004_v54 = vor.u32 %v7339_v59, %v7003_v43 }
 0x9b5   : > { %v10163_v58 = vadd.f32 %v5476_v24, %v5434_v50  ;;  %5609 = vmatmul.bf16.gmra.mxu1 %v6944_v40  ;;  %v10166_v63 = vadd.f32 %v5045_v9, %v10114_v16  ;;  %5571 = vmatmul.bf16.gmra.mxu0 %v6968_v38  ;;  %v6969_v16 = vld [vmem:[#allocation11 + $0x9c] sm:$0xf0]  ;;  %v7024_v40 = vor.u32 %v7345_v45, %v7023_v23 }
 0x9b6   : > { %v6972_v6 = vor.u32 %v7328_v11, %v6969_v16  ;;  %v5314_v45 = vpack.c.b16 %v5265_v39, %v5265_v39 }
 0x9ba   : > { %v5435_v12 = vpop.f32.mrf.mxu1  ;;  %v5397_v4 = vpop.f32.mrf.mxu0 }
 0x9bb   : > { %v5478_v34 = vpop.f32.mrf.mxu2  ;;  %v5436_v29 = vadd.f32 %v5435_v12, %v5392_v51 }
 0x9bc   : > { %v5047_v21 = vpop.f32.mrf.mxu3 }
 0x9bd   : > { %v10168_v25 = vadd.f32 %v5478_v34, %v5436_v29  ;;  %v10171_v47 = vadd.f32 %v5047_v21, %v10119_v55 }
 0x9c0   : > { %7063 = vmatmul.msk.bf16.gmra.mxu2 %vm4751_vm1, %v6976_v18  ;;  %v7032_v18 = vor.u32 %v7346_v17, %v7031_v61  ;;  %v5125_v17 = vld [vmem:[#allocation11 + $0x168] sm:$0xf] }
 0x9c1   : > { %5533 = vmatmul.bf16.gmra.mxu3 %v6992_v60  ;;  %v7342_v60 = vld [vmem:[#allocation11 + $0xf4] sm:$0xf] }
 0x9c2   : > { %v5438_v2 = vpop.f32.mrf.mxu1  ;;  %v5400_v8 = vpop.f32.mrf.mxu0 }
 0x9c3   : > { %v5481_v19 = vpop.f32.mrf.mxu2  ;;  %v5439_v35 = vadd.f32 %v5438_v2, %v5395_v49 }
 0x9c4   : > { %v5050_v53 = vpop.f32.mrf.mxu3 }
 0x9c5   : > { %v10174_v22 = vadd.f32 %v5481_v19, %v5439_v35  ;;  %5614 = vmatmul.bf16.gmra.mxu1 %v6972_v6  ;;  %v10177_v55 = vadd.f32 %v5050_v53, %v10122_v36  ;;  %5576 = vmatmul.bf16.gmra.mxu0 %v6996_v0  ;;  %v6997_v36 = vld [vmem:[#allocation11 + $0xd4] sm:$0xf0]  ;;  %v7352_v6 = vld [vmem:[#allocation11 + $0x140] sm:$0xf0] }
 0x9c6   : > { %v7000_v10 = vor.u32 %v7335_v48, %v6997_v36  ;;  %v7052_v2 = vor.u32 %v7352_v6, %v7051_v27 }
 0x9ca   : > { %v5440_v3 = vpop.f32.mrf.mxu1  ;;  %v5402_v46 = vpop.f32.mrf.mxu0 }
 0x9cb   : > { %v5483_v20 = vpop.f32.mrf.mxu2  ;;  %v5441_v1 = vadd.f32 %v5440_v3, %v5397_v4  ;;  %v7059_v3 = vld [vmem:[#allocation11 + $0x130] sm:$0xf] }
 0x9cc   : > { %v5052_v44 = vpop.f32.mrf.mxu3 }
 0x9cd   : > { %v10179_v51 = vadd.f32 %v5483_v20, %v5441_v1  ;;  %v10182_v7 = vadd.f32 %v5052_v44, %v10127_v26  ;;  %v7353_v20 = vld [vmem:[#allocation11 + $0x148] sm:$0xf0] }
 0x9ce   : > { %v7060_v44 = vor.u32 %v7353_v20, %v7059_v3 }
 0x9d0   : > { %7064 = vmatmul.msk.bf16.gmra.mxu2 %vm4751_vm1, %v7004_v54  ;;  %v5124_v54 = vld [vmem:[#allocation11 + $0x160] sm:$0xff] }
 0x9d1   : > { %5538 = vmatmul.bf16.gmra.mxu3 %v7020_v5 }
 0x9d2   : > { %v5443_v38 = vpop.f32.mrf.mxu1  ;;  %v5405_v50 = vpop.f32.mrf.mxu0 }
 0x9d3   : > { %v5486_v28 = vpop.f32.mrf.mxu2  ;;  %v5444_v24 = vadd.f32 %v5443_v38, %v5400_v8 }
 0x9d4   : > { %v5055_v49 = vpop.f32.mrf.mxu3 }
 0x9d5   : > { %v10185_v9 = vadd.f32 %v5486_v28, %v5444_v24  ;;  %5619 = vmatmul.bf16.gmra.mxu1 %v7000_v10  ;;  %v10188_v26 = vadd.f32 %v5055_v49, %v10130_v30  ;;  %5581 = vmatmul.bf16.gmra.mxu0 %v7024_v40  ;;  %v7025_v30 = vld [vmem:[#allocation11 + $0x10c] sm:$0xf0]  ;;  %v7349_v10 = vld [vmem:[#allocation11 + $0x12c] sm:$0xf]  ;;  %v7053_v40 = vld [vmem:[#allocation11 + $0x144] sm:$0xf0] }
 0x9d6   : > { %v7028_v0 = vor.u32 %v7342_v60, %v7025_v30  ;;  %v7056_v38 = vor.u32 %v7349_v10, %v7053_v40  ;;  %v5267_v30 = vunpack.c.h.b16 %v5124_v54  ;;  %v5682_v10 = vlaneseq }
 0x9d8   : > { %v5316_v27 = vpack.c.b16 %v5267_v30, %v5267_v30 }
 0x9da   : > { %v5445_v12 = vpop.f32.mrf.mxu1  ;;  %v5407_v4 = vpop.f32.mrf.mxu0 }
 0x9db   : > { %v5488_v34 = vpop.f32.mrf.mxu2  ;;  %v5446_v29 = vadd.f32 %v5445_v12, %v5402_v46 }
 0x9dc   : > { %v5057_v21 = vpop.f32.mrf.mxu3 }
 0x9dd   : > { %v10190_v11 = vadd.f32 %v5488_v34, %v5446_v29  ;;  %v10193_v16 = vadd.f32 %v5057_v21, %v10135_v52  ;;  %v5268_v34 = vunpack.c.l.b16 %v5125_v17 }
 0x9e0   : > { %7065 = vmatmul.msk.bf16.gmra.mxu2 %vm4751_vm1, %v7032_v18 }
 0x9e1   : > { %5543 = vmatmul.bf16.gmra.mxu3 %v7048_v31 }
 0x9e2   : > { %v5448_v19 = vpop.f32.mrf.mxu1  ;;  %v5410_v53 = vpop.f32.mrf.mxu0 }
 0x9e3   : > { %v5491_v35 = vpop.f32.mrf.mxu2  ;;  %v5449_v8 = vadd.f32 %v5448_v19, %v5405_v50 }
 0x9e4   : > { %v5060_v43 = vpop.f32.mrf.mxu3 }
 0x9e5   : > { %v10196_v59 = vadd.f32 %v5491_v35, %v5449_v8  ;;  %5624 = vmatmul.bf16.gmra.mxu1 %v7028_v0  ;;  %v10199_v52 = vadd.f32 %v5060_v43, %v10140_v15  ;;  %5586 = vmatmul.bf16.gmra.mxu0 %v7052_v2  ;;  %v5266_v15 = vunpack.c.l.b16 %v5124_v54 }
 0x9e7   : > { %v5315_v13 = vpack.c.b16 %v5266_v15, %v5266_v15 }
 0x9ea   : > { %v5450_v41 = vpop.f32.mrf.mxu1  ;;  %v5412_v48 = vpop.f32.mrf.mxu0 }
 0x9eb   : > { %v5493_v1 = vpop.f32.mrf.mxu2  ;;  %v5451_v46 = vadd.f32 %v5450_v41, %v5407_v4  ;;  %v5317_v4 = vpack.c.b16 %v5268_v34, %v5268_v34 }
 0x9ec   : > { %v5062_v5 = vpop.f32.mrf.mxu3 }
 0x9ed   : > { %v10202_v36 = vadd.f32 %v5493_v1, %v5451_v46  ;;  %v10205_v23 = vadd.f32 %v5062_v5, %v10146_v62 }
 0x9f0   : > { %7066 = vmatmul.msk.bf16.gmra.mxu2 %vm4751_vm1, %v7060_v44 }
 0x9f1   : > { %5548 = vmatmul.bf16.gmra.mxu3 %v5314_v45 }
 0x9f2   : > { %v5453_v28 = vpop.f32.mrf.mxu1  ;;  %v5415_v49 = vpop.f32.mrf.mxu0 }
 0x9f3   : > { %v5496_v24 = vpop.f32.mrf.mxu2  ;;  %v5454_v50 = vadd.f32 %v5453_v28, %v5410_v53 }
 0x9f4   : > { %v5065_v61 = vpop.f32.mrf.mxu3 }
 0x9f5   : > { %v10208_v12 = vadd.f32 %v5496_v24, %v5454_v50  ;;  %5629 = vmatmul.bf16.gmra.mxu1 %v7056_v38  ;;  %v10211_v62 = vadd.f32 %v5065_v61, %v10148_v42  ;;  %5591 = vmatmul.bf16.gmra.mxu0 %v5315_v13  ;;  %v10229_v38 = vand.u32 127, %v5682_v10 }
 0x9f7   : > { %vm5684_vm2 = vcmp.lt.s32.totalorder %v10229_v38, 64 }
 0x9fa   : > { %v5455_v33 = vpop.f32.mrf.mxu1  ;;  %v5417_v18 = vpop.f32.mrf.mxu0 }
 0x9fb   : > { %v5498_v32 = vpop.f32.mrf.mxu2  ;;  %v5456_v29 = vadd.f32 %v5455_v33, %v5412_v48 }
 0x9fc   : > { %v5067_v21 = vpop.f32.mrf.mxu3 }
 0x9fd   : > { %v10213_v60 = vadd.f32 %v5498_v32, %v5456_v29  ;;  %v10216_v31 = vadd.f32 %v5067_v21, %v10151_v37 }
 0xa00   : > { %7067 = vmatmul.msk.bf16.gmra.mxu2 %vm4751_vm1, %v5317_v4 }
 0xa02   : > { %v5458_v6 = vpop.f32.mrf.mxu1  ;;  %v5420_v2 = vpop.f32.mrf.mxu0 }
 0xa03   : > { %v5501_v42 = vpop.f32.mrf.mxu2  ;;  %v5459_v0 = vadd.f32 %v5458_v6, %v5415_v49 }
 0xa04   : > { %v5070_v19 = vpop.f32.mrf.mxu3 }
 0xa05   : > { %v10219_v35 = vadd.f32 %v5501_v42, %v5459_v0  ;;  %5634 = vmatmul.bf16.gmra.mxu1 %v5316_v27  ;;  %v10222_v8 = vadd.f32 %v5070_v19, %v10154_v14 }
 0xa0a   : > { %v5460_v53 = vpop.f32.mrf.mxu1  ;;  %v5422_v37 = vpop.f32.mrf.mxu0 }
 0xa0b   : > { %v5503_v43 = vpop.f32.mrf.mxu2  ;;  %v5461_v3 = vadd.f32 %v5460_v53, %v5417_v18 }
 0xa0c   : > { %v5072_v20 = vpop.f32.mrf.mxu3 }
 0xa0d   : > { %v10224_v39 = vadd.f32 %v5503_v43, %v5461_v3 }
 0xa12   : > { %v5463_v41 = vpop.f32.mrf.mxu1  ;;  %v5562_v46 = vpop.f32.mrf.mxu0 }
 0xa13   : > { %v5506_v1 = vpop.f32.mrf.mxu2  ;;  %v5464_v54 = vadd.f32 %v5463_v41, %v5420_v2 }
 0xa14   : > { %v5519_v44 = vpop.f32.mrf.mxu3 }
 0xa15   : > { %v10226_v48 = vadd.f32 %v5506_v1, %v5464_v54  ;;  %v5520_v40 = vadd.f32 %v5519_v44, %v10163_v58 }
 0xa17   : > { %v5563_v13 = vadd.f32 %v5562_v46, %v5520_v40 }
 0xa1a   : > { %v5465_v5 = vpop.f32.mrf.mxu1  ;;  %v5564_v15 = vpop.f32.mrf.mxu0 }
 0xa1b   : > { %v5508_v45 = vpop.f32.mrf.mxu2 }
 0xa1c   : > { %v5521_v14 = vpop.f32.mrf.mxu3 }
 0xa1d   : > { %v5522_v34 = vadd.f32 %v5521_v14, %v10168_v25 }
 0xa1f   : > { %v5565_v32 = vadd.f32 %v5564_v15, %v5522_v34 }
 0xa22   : > { %v5605_v28 = vpop.f32.mrf.mxu1  ;;  %v5567_v49 = vpop.f32.mrf.mxu0 }
 0xa23   : > { %v5648_v24 = vpop.f32.mrf.mxu2  ;;  %v5606_v50 = vadd.f32 %v5605_v28, %v5563_v13 }
 0xa24   : > { %v5524_v61 = vpop.f32.mrf.mxu3 }
 0xa25   : > { %v5649_v17 = vadd.f32 %v5648_v24, %v5606_v50  ;;  %v5525_v27 = vadd.f32 %v5524_v61, %v10174_v22 }
 0xa27   : > { %v5685_v33 = vsel %vm5684_vm2, %v10157_v56, %v5649_v17  ;;  %v5568_v6 = vadd.f32 %v5567_v49, %v5525_v27 }
 0xa2a   : > { %v5607_v58 = vpop.f32.mrf.mxu1  ;;  %v5569_v4 = vpop.f32.mrf.mxu0 }
 0xa2b   : > { %v5650_v29 = vpop.f32.mrf.mxu2  ;;  %v5608_v18 = vadd.f32 %v5607_v58, %v5565_v32 }
 0xa2c   : > { %v5526_v21 = vpop.f32.mrf.mxu3 }
 0xa2d   : > { %v5651_v30 = vadd.f32 %v5650_v29, %v5608_v18  ;;  %v5527_v43 = vadd.f32 %v5526_v21, %v10179_v51 }
 0xa2f   : > { %v5686_v56 = vsel %vm5684_vm2, %v10160_v57, %v5651_v30  ;;  %v5570_v37 = vadd.f32 %v5569_v4, %v5527_v43 }
 0xa30   : > { %v7657_v25 = vpack.c.bf16 %v5686_v56, %v5685_v33 }
 0xa32   : > { %7658 = vst [vmem:[%s10241_s30] sm:$0xff] %v7657_v25   ;;  %v5610_v42 = vpop.f32.mrf.mxu1  ;;  %v5572_v19 = vpop.f32.mrf.mxu0 }
 0xa33   : > { %v5653_v0 = vpop.f32.mrf.mxu2  ;;  %v5611_v2 = vadd.f32 %v5610_v42, %v5568_v6 }
 0xa34   : > { %v5529_v53 = vpop.f32.mrf.mxu3 }
 0xa35   : > { %v5654_v22 = vadd.f32 %v5653_v0, %v5611_v2  ;;  %v5530_v44 = vadd.f32 %v5529_v53, %v10185_v9 }
 0xa37   : > { %v5687_v3 = vsel %vm5684_vm2, %v10166_v63, %v5654_v22  ;;  %v5573_v15 = vadd.f32 %v5572_v19, %v5530_v44 }
 0xa3a   : > { %v5612_v20 = vpop.f32.mrf.mxu1  ;;  %v5574_v1 = vpop.f32.mrf.mxu0 }
 0xa3b   : > { %v5655_v41 = vpop.f32.mrf.mxu2  ;;  %v5613_v57 = vadd.f32 %v5612_v20, %v5570_v37 }
 0xa3c   : > { %v5531_v54 = vpop.f32.mrf.mxu3 }
 0xa3d   : > { %v5656_v46 = vadd.f32 %v5655_v41, %v5613_v57  ;;  %v5532_v28 = vadd.f32 %v5531_v54, %v10190_v11 }
 0xa3f   : > { %v5688_v5 = vsel %vm5684_vm2, %v10171_v47, %v5656_v46  ;;  %v5575_v24 = vadd.f32 %v5574_v1, %v5532_v28 }
 0xa40   : > { %v7662_v45 = vpack.c.bf16 %v5688_v5, %v5687_v3 }
 0xa42   : > { %7743 = vst [vmem:[%s10241_s30 + $0x8] sm:$0xff] %v7662_v45   ;;  %v5615_v51 = vpop.f32.mrf.mxu1  ;;  %v5577_v63 = vpop.f32.mrf.mxu0 }
 0xa43   : > { %v5658_v10 = vpop.f32.mrf.mxu2  ;;  %v5616_v14 = vadd.f32 %v5615_v51, %v5573_v15 }
 0xa44   : > { %v5534_v40 = vpop.f32.mrf.mxu3 }
 0xa45   : > { %v5659_v13 = vadd.f32 %v5658_v10, %v5616_v14  ;;  %v5535_v33 = vadd.f32 %v5534_v40, %v10196_v59 }
 0xa47   : > { %v5689_v9 = vsel %vm5684_vm2, %v10177_v55, %v5659_v13  ;;  %v5578_v29 = vadd.f32 %v5577_v63, %v5535_v33 }
 0xa4a   : > { %v5617_v50 = vpop.f32.mrf.mxu1  ;;  %v5579_v61 = vpop.f32.mrf.mxu0 }
 0xa4b   : > { %v5660_v49 = vpop.f32.mrf.mxu2  ;;  %v5618_v47 = vadd.f32 %v5617_v50, %v5575_v24 }
 0xa4c   : > { %v5536_v17 = vpop.f32.mrf.mxu3 }
 0xa4d   : > { %v5661_v34 = vadd.f32 %v5660_v49, %v5618_v47  ;;  %v5537_v27 = vadd.f32 %v5536_v17, %v10202_v36 }
 0xa4f   : > { %v5690_v32 = vsel %vm5684_vm2, %v10182_v7, %v5661_v34  ;;  %v5580_v56 = vadd.f32 %v5579_v61, %v5537_v27 }
 0xa50   : > { %v7667_v58 = vpack.c.bf16 %v5690_v32, %v5689_v9 }
 0xa52   : > { %7744 = vst [vmem:[%s10241_s30 + $0x10] sm:$0xff] %v7667_v58   ;;  %v5620_v11 = vpop.f32.mrf.mxu1  ;;  %v5582_v55 = vpop.f32.mrf.mxu0 }
 0xa53   : > { %v5663_v18 = vpop.f32.mrf.mxu2  ;;  %v5621_v4 = vadd.f32 %v5620_v11, %v5578_v29 }
 0xa54   : > { %v5539_v21 = vpop.f32.mrf.mxu3 }
 0xa55   : > { %v5664_v30 = vadd.f32 %v5663_v18, %v5621_v4  ;;  %v5540_v19 = vadd.f32 %v5539_v21, %v10208_v12 }
 0xa57   : > { %v5691_v59 = vsel %vm5684_vm2, %v10188_v26, %v5664_v30  ;;  %v5583_v43 = vadd.f32 %v5582_v55, %v5540_v19 }
 0xa5a   : > { %v5622_v25 = vpop.f32.mrf.mxu1  ;;  %v5584_v42 = vpop.f32.mrf.mxu0 }
 0xa5b   : > { %v5665_v6 = vpop.f32.mrf.mxu2  ;;  %v5623_v7 = vadd.f32 %v5622_v25, %v5580_v56 }
 0xa5c   : > { %v5541_v0 = vpop.f32.mrf.mxu3 }
 0xa5d   : > { %v5666_v2 = vadd.f32 %v5665_v6, %v5623_v7  ;;  %v5542_v57 = vadd.f32 %v5541_v0, %v10213_v60 }
 0xa5f   : > { %v5692_v53 = vsel %vm5684_vm2, %v10193_v16, %v5666_v2  ;;  %v5585_v1 = vadd.f32 %v5584_v42, %v5542_v57 }
 0xa60   : > { %v7672_v22 = vpack.c.bf16 %v5692_v53, %v5691_v59 }
 0xa62   : > { %7745 = vst [vmem:[%s10241_s30 + $0x18] sm:$0xff] %v7672_v22   ;;  %v5625_v36 = vpop.f32.mrf.mxu1  ;;  %v5587_v26 = vpop.f32.mrf.mxu0 }
 0xa63   : > { %v5668_v3 = vpop.f32.mrf.mxu2  ;;  %v5626_v37 = vadd.f32 %v5625_v36, %v5583_v43 }
 0xa64   : > { %v5544_v20 = vpop.f32.mrf.mxu3 }
 0xa65   : > { %v5669_v41 = vadd.f32 %v5668_v3, %v5626_v37  ;;  %v5545_v15 = vadd.f32 %v5544_v20, %v10219_v35 }
 0xa67   : > { %v5693_v12 = vsel %vm5684_vm2, %v10199_v52, %v5669_v41  ;;  %v5588_v14 = vadd.f32 %v5587_v26, %v5545_v15 }
 0xa6a   : > { %v5627_v54 = vpop.f32.mrf.mxu1  ;;  %v5589_v44 = vpop.f32.mrf.mxu0 }
 0xa6b   : > { %v5670_v46 = vpop.f32.mrf.mxu2  ;;  %v5628_v16 = vadd.f32 %v5627_v54, %v5585_v1 }
 0xa6c   : > { %v5546_v5 = vpop.f32.mrf.mxu3 }
 0xa6d   : > { %v5671_v45 = vadd.f32 %v5670_v46, %v5628_v16  ;;  %v5547_v9 = vadd.f32 %v5546_v5, %v10224_v39 }
 0xa6f   : > { %v5694_v51 = vsel %vm5684_vm2, %v10205_v23, %v5671_v45  ;;  %v5590_v24 = vadd.f32 %v5589_v44, %v5547_v9 }
 0xa70   : > { %v7677_v10 = vpack.c.bf16 %v5694_v51, %v5693_v12 }
 0xa72   : > { %7746 = vst [vmem:[%s10241_s30 + $0x20] sm:$0xff] %v7677_v10   ;;  %v5630_v60 = vpop.f32.mrf.mxu1  ;;  %v5592_v52 = vpop.f32.mrf.mxu0 }
 0xa73   : > { %v5673_v63 = vpop.f32.mrf.mxu2  ;;  %v5631_v40 = vadd.f32 %v5630_v60, %v5588_v14 }
 0xa74   : > { %v5549_v13 = vpop.f32.mrf.mxu3 }
 0xa75   : > { %v5674_v28 = vadd.f32 %v5673_v63, %v5631_v40  ;;  %v5550_v34 = vadd.f32 %v5549_v13, %v10226_v48 }
 0xa77   : > { %v5695_v35 = vsel %vm5684_vm2, %v10211_v62, %v5674_v28  ;;  %v5593_v39 = vadd.f32 %v5592_v52, %v5550_v34 }
 0xa7a   : > { %v5632_v50 = vpop.f32.mrf.mxu1  ;;  %v5594_v47 = vpop.f32.mrf.mxu0 }
 0xa7b   : > { %v5675_v49 = vpop.f32.mrf.mxu2  ;;  %v5633_v23 = vadd.f32 %v5632_v50, %v5590_v24 }
 0xa7c   : > { %v5551_v61 = vpop.f32.mrf.mxu3 }
 0xa7d   : > { %v5676_v17 = vadd.f32 %v5675_v49, %v5633_v23 }
 0xa7f   : > { %v5696_v33 = vsel %vm5684_vm2, %v10216_v31, %v5676_v17 }
 0xa80   : > { %v7682_v32 = vpack.c.bf16 %v5696_v33, %v5695_v35 }
 0xa82   : > { %7747 = vst [vmem:[%s10241_s30 + $0x28] sm:$0xff] %v7682_v32   ;;  %v5635_v58 = vpop.f32.mrf.mxu1 }
 0xa83   : > { %v5678_v29 = vpop.f32.mrf.mxu2  ;;  %v5636_v62 = vadd.f32 %v5635_v58, %v5593_v39 }
 0xa85   : > { %v5679_v11 = vadd.f32 %v5678_v29, %v5636_v62 }
 0xa87   : > { %v5697_v18 = vsel %vm5684_vm2, %v10222_v8, %v5679_v11 }
 0xa88   : > { %v5710_v4 = vpack.c.bf16 %v5697_v18, %v5697_v18 }
 0xa8a   : > { %5723 = vst [vmem:[%s10241_s30 + $0x30] sm:$0xf] %v5710_v4  ;;  %v5637_v55 = vpop.f32.mrf.mxu1 }
 0xa8b   : > { %v5680_v21 = vpop.f32.mrf.mxu2 }
 0xa8c PF: > { %s21_s24 = sadd.s32 1, %s8318_s24  }
 0xa8d   : > { %p18_p7 = scmp.ge.s32.totalorder %s21_s24, 4  }
 0xa8f   :  { %20 = sbr.rel (!%p18_p7) target bundleno = 4 (0x4), region = 105 }
 0xa94   :  { %5745 = vsyncpa [#allocation4], 1 }
 0xa95   :  { %5747 = vsyncpa [#allocation4 + $0x1], 1 }
 0xa96   :  { %5748 = vsyncpa [#allocation6], 1 }
 0xa97   :  { %5749 = vsyncpa [#allocation9], 1 }
 0xa98   :  { %5750 = vsyncpa [#allocation12], 1 }

</bundles_post_ra>
